<compile_context>
chip_gen: v6e
topology: v6e:2x2x1
jax: 0.10.0
libtpu: 0.0.40
codegen_flags: <defaults>
</compile_context>

<pallas_src>
import functools

import jax
import jax.numpy as jnp
from jax.experimental import pallas as pl
from jax.experimental.pallas import tpu as pltpu

# -------------------- small, module-consistent configuration --------------------
CFG = dict(
    n_mels=16,      # reference default 80
    dim=32,         # reference default 192
    layers=2,       # reference default 4
    heads=4,
    max_seq_len=64,
    nb_features=384,   # Performer random-feature count (hardcoded in the module)
)
BATCH = 2
TIME = 16
LN_EPS = 1e-5
BN_EPS = 1e-5
KERNEL_EPS = 1e-3       # performer generalized-kernel epsilon


# ==================== Pallas kernels ====================

def _frontend_kernel(B, H, W, S,
                     patches_ref, w1_ref, b1_ref, dww_ref, dwb_ref,
                     pw2w_ref, pw2b_ref, projw_ref, projb_ref, ng_ref, nb_ref, pos_ref,
                     o_ref, h1p_sc):
    """Whole conv front-end + stem tail, fully fused.

    conv1(1x1)+dw1+pw1+BN1 (all linear in the single input channel) -> one dense 3x3 conv
    as an im2col matmul -> ReLU -> depthwise 3x3 (9-tap broadcast-MAC over a zero-padded
    VMEM scratch, halo handled in-kernel) -> pointwise conv2 (+BN2 folded) -> ReLU ->
    frequency mean -> proj Linear -> LayerNorm -> + positional embedding."""
    C = w1_ref.shape[1]                                     # dim // 2

    # collapsed 3x3 conv (1 -> d_half) on the MXU, then ReLU
    h1 = jnp.dot(patches_ref[...], w1_ref[...],
                 preferred_element_type=jnp.float32) + b1_ref[...]          # (B*H*W, C)
    h1 = jnp.maximum(h1, 0.0)

    # zero-padded scratch for depthwise2; valid data lives at sublane offset 8 (aligned)
    h1p_sc[...] = jnp.zeros_like(h1p_sc)
    h1p_sc[:, 1:H + 1, 8:8 + W, :] = h1.reshape(B, H, W, C)

    # depthwise conv2: 9-tap broadcast-MAC over shifted windows of the padded scratch
    acc = jnp.zeros((B, H, W, C), jnp.float32) + dwb_ref[...]
    for kh in range(3):
        for kw in range(3):
            acc = acc + h1p_sc[:, kh:kh + H, 7 + kw:7 + kw + W, :] * dww_ref[kh * 3 + kw]

    # pointwise conv2 (+BN2 folded) -> ReLU
    y = jnp.dot(acc.reshape(B * H * W, C).astype(jnp.bfloat16), pw2w_ref[...],
                preferred_element_type=jnp.float32) + pw2b_ref[...]         # (B*H*W, dim)
    y = jnp.maximum(y, 0.0)

    # frequency (mel) mean, sequence truncation, proj Linear, LayerNorm, + pos embedding
    z = jnp.mean(y.reshape(B, H, W, -1), axis=1)[:, :S, :]                  # (B, S, dim)
    p = jnp.dot(z.reshape(B * S, -1).astype(jnp.bfloat16), projw_ref[...],
                preferred_element_type=jnp.float32) + projb_ref[...]
    mu = jnp.mean(p, axis=-1, keepdims=True)
    var = jnp.mean(jnp.square(p - mu), axis=-1, keepdims=True)
    o_ref[...] = ((p - mu) * jax.lax.rsqrt(var + LN_EPS) * ng_ref[...] + nb_ref[...]
                  + pos_ref[...])


def _performer_stack_kernel(S,
                            seq_ref,
                            ln1g_ref, ln1b_ref, wqkv_ref, bqkv_ref, mask_ref, wo_ref,
                            bo_ref, ln2g_ref, ln2b_ref, w1_ref, b1_ref, w2_ref, b2_ref,
                            cw1_ref, cb1_ref, cg_ref, cbe_ref, cw2_ref, cb2_ref,
                            t_ref, vad_ref,
                            x1_sc, x2_sc):
    """One grid step = one reversible Performer layer; grid=(layers,) 'arbitrary'.
    Reversible streams (x1, x2) live in VMEM scratch across layers.  The last grid step
    also performs the reversible merge and the fused VAD head."""
    l = pl.program_id(0)

    @pl.when(l == 0)
    def _():                                   # reversible stream duplication: cat([x, x], -1)
        x1_sc[...] = seq_ref[...]
        x2_sc[...] = seq_ref[...]

    BS, dim = x2_sc.shape
    B = BS // S
    HM = mask_ref.shape[0]                     # heads * nb_features
    mask16 = mask_ref[...]                     # (HM, dim) bf16 block-diagonal head indicator

    # ---- f-branch: y1 = x1 + SelfAttention(LayerNorm(x2)) ----
    x2 = x2_sc[...]
    mu = jnp.mean(x2, axis=-1, keepdims=True)
    var = jnp.mean(jnp.square(x2 - mu), axis=-1, keepdims=True)
    a16 = ((x2 - mu) * jax.lax.rsqrt(var + LN_EPS) * ln1g_ref[...]
           + ln1b_ref[...]).astype(jnp.bfloat16)

    # packed q'/k'/v projection (q/k already folded with the scaled random-feature matrix):
    # one wide matmul, lane-split at HM and 2*HM (multiples of 128)
    qkv = jnp.dot(a16, wqkv_ref[...], preferred_element_type=jnp.float32) + bqkv_ref[...]
    qp = (jnp.maximum(qkv[:, :HM], 0.0) + KERNEL_EPS).reshape(B, S, HM)
    kp = (jnp.maximum(qkv[:, HM:2 * HM], 0.0) + KERNEL_EPS).reshape(B, S, HM)
    v = qkv[:, 2 * HM:].reshape(B, S, dim)

    # generalized-kernel (ReLU random feature) linear attention; batches never mix
    ksum = jnp.sum(kp, axis=1, keepdims=True)                                   # (B, 1, HM)
    denom = jnp.dot((qp * ksum).reshape(BS, HM).astype(jnp.bfloat16), mask16,
                    preferred_element_type=jnp.float32)                         # (BS, dim)
    ctx = jnp.einsum('bsh,bsd->bhd', kp.astype(jnp.bfloat16), v.astype(jnp.bfloat16),
                     preferred_element_type=jnp.float32)                        # (B, HM, dim)
    ctx16 = ctx.astype(jnp.bfloat16) * mask16              # keep per-head blocks only (bf16)
    o = jnp.einsum('bsh,bhd->bsd', qp.astype(jnp.bfloat16), ctx16,
                   preferred_element_type=jnp.float32)                          # (B, S, dim)
    attn = o.reshape(BS, dim) / denom          # exact reciprocal (denominator can be small)
    y1 = x1_sc[...] + jnp.dot(attn.astype(jnp.bfloat16), wo_ref[...],
                              preferred_element_type=jnp.float32) + bo_ref[...]

    # ---- g-branch: y2 = x2 + FeedForward(LayerNorm(y1)); ff_chunks along seq is a no-op ----
    mu2 = jnp.mean(y1, axis=-1, keepdims=True)
    var2 = jnp.mean(jnp.square(y1 - mu2), axis=-1, keepdims=True)
    af16 = ((y1 - mu2) * jax.lax.rsqrt(var2 + LN_EPS) * ln2g_ref[...]
            + ln2b_ref[...]).astype(jnp.bfloat16)
    h = jnp.dot(af16, w1_ref[...], preferred_element_type=jnp.float32) + b1_ref[...]
    hidden = w2_ref.shape[0]                                  # 4*dim (lane-aligned = 128)
    # performer_pytorch FeedForward GLU: act(first_chunk) * second_chunk
    # TODO(synk): torch nn.GELU is exact (erf); tanh approximation used (Mosaic-safe).
    gate = jax.nn.gelu(h[:, :hidden], approximate=True) * h[:, hidden:]
    y2 = x2 + jnp.dot(gate.astype(jnp.bfloat16), w2_ref[...],
                      preferred_element_type=jnp.float32) + b2_ref[...]

    x1_sc[...] = y1
    x2_sc[...] = y2

    # ---- last layer: reversible merge + fused VAD head (Linear->LN->ReLU->Linear) ----
    @pl.when(l == pl.num_programs(0) - 1)
    def _():
        # TODO(synk): performer_pytorch ReversibleSequence reduces the duplicated streams
        # with a mean over the stacked chunks; if the installed build uses .sum, scale by 2.
        t = 0.5 * (y1 + y2)
        t_ref[...] = t
        hh = jnp.dot(t.astype(jnp.bfloat16), cw1_ref[...],
                     preferred_element_type=jnp.float32) + cb1_ref[...]
        mu3 = jnp.mean(hh, axis=-1, keepdims=True)
        var3 = jnp.mean(jnp.square(hh - mu3), axis=-1, keepdims=True)
        hh = (hh - mu3) * jax.lax.rsqrt(var3 + LN_EPS) * cg_ref[...] + cbe_ref[...]
        hh = jnp.maximum(hh, 0.0)                 # Dropout(0.2) is an eval no-op
        vad_ref[...] = jnp.dot(hh.astype(jnp.bfloat16), cw2_ref[...],
                               preferred_element_type=jnp.float32) + cb2_ref[...]


def _fusion_boundary_kernel(x_ref, wf_ref, bf_ref, w1_ref, b1_ref, g_ref, be_ref,
                            w2_ref, b2_ref, o_ref):
    """Training path: fusion Linear(3*dim, dim) -> boundary head (Linear -> LN -> GELU -> Linear)."""
    fused = jnp.dot(x_ref[...].astype(jnp.bfloat16), wf_ref[...],
                    preferred_element_type=jnp.float32) + bf_ref[...]
    h = jnp.dot(fused.astype(jnp.bfloat16), w1_ref[...],
                preferred_element_type=jnp.float32) + b1_ref[...]
    mu = jnp.mean(h, axis=-1, keepdims=True)
    var = jnp.mean(jnp.square(h - mu), axis=-1, keepdims=True)
    h = (h - mu) * jax.lax.rsqrt(var + LN_EPS) * g_ref[...] + be_ref[...]
    h = jax.nn.gelu(h, approximate=True)
    o_ref[...] = jnp.dot(h.astype(jnp.bfloat16), w2_ref[...],
                         preferred_element_type=jnp.float32) + b2_ref[...]


# ==================== plain-JAX glue (training path only) ====================

def gru_direction(x, w_ih, w_hh, b_ih, b_hh):
    # TODO(synk): GRU recurrence is inherently sequential; kept as a plain-JAX lax.scan
    # (training-only path), with the input projection hoisted out of the scan.
    B, T, _ = x.shape
    Hdim = w_hh.shape[1]
    gi_all = jnp.einsum("btd,gd->btg", x, w_ih) + b_ih        # (B, T, 3H)
    h0 = jnp.zeros((B, Hdim), jnp.float32)

    def step(h, gi):
        gh = h @ w_hh.T + b_hh
        i_r, i_z, i_n = jnp.split(gi, 3, axis=-1)
        h_r, h_z, h_n = jnp.split(gh, 3, axis=-1)
        r = jax.nn.sigmoid(i_r + h_r)
        z = jax.nn.sigmoid(i_z + h_z)
        n = jnp.tanh(i_n + r * h_n)
        h_new = (1.0 - z) * n + z * h
        return h_new, h_new

    _, ys = jax.lax.scan(step, h0, jnp.swapaxes(gi_all, 0, 1))
    return jnp.swapaxes(ys, 0, 1)


# ==================== parameters (deterministic synthetic init) ====================

def init_params(key, cfg):
    dim, heads, layers = cfg["dim"], cfg["heads"], cfg["layers"]
    d_half, d_head, m = dim // 2, dim // heads, cfg["nb_features"]
    ks = iter(jax.random.split(key, 128))

    def xavier(shape, fan_in, fan_out):
        return jax.random.normal(next(ks), shape, jnp.float32) * jnp.sqrt(2.0 / (fan_in + fan_out))

    zeros = lambda *s: jnp.zeros(s, jnp.float32)
    ones = lambda *s: jnp.ones(s, jnp.float32)

    p = {
        # conv front-end
        "conv1_w": xavier((1, 4), 1, 4),                       # Conv2d(1,4,1,bias=False), stored (Cin,Cout)
        "ds1_dw_w": xavier((3, 3, 4), 9, 9), "ds1_dw_b": zeros(4),
        "ds1_pw_w": xavier((4, d_half), 4, d_half), "ds1_pw_b": zeros(d_half),
        "bn1_g": ones(d_half), "bn1_b": zeros(d_half), "bn1_m": zeros(d_half), "bn1_v": ones(d_half),
        "ds2_dw_w": xavier((3, 3, d_half), 9, 9), "ds2_dw_b": zeros(d_half),
        "ds2_pw_w": xavier((d_half, dim), d_half, dim), "ds2_pw_b": zeros(dim),
        "bn2_g": ones(dim), "bn2_b": zeros(dim), "bn2_m": zeros(dim), "bn2_v": ones(dim),
        # proj + norm + positional embedding
        "proj_w": xavier((dim, dim), dim, dim), "proj_b": zeros(dim),
        "norm_g": ones(dim), "norm_b": zeros(dim),
        "pos_emb": jax.random.normal(next(ks), (1, cfg["max_seq_len"], dim), jnp.float32) * 0.02,
        # fusion + heads
        "fusion_w": xavier((3 * dim, dim), 3 * dim, dim), "fusion_b": zeros(dim),
        "clf_w1": xavier((dim, d_half), dim, d_half), "clf_b1": zeros(d_half),
        "clf_ln_g": ones(d_half), "clf_ln_b": zeros(d_half),
        "clf_w2": xavier((d_half, 1), d_half, 1), "clf_b2": zeros(1),
        "bd_w1": xavier((dim, d_half), dim, d_half), "bd_b1": zeros(d_half),
        "bd_ln_g": ones(d_half), "bd_ln_b": zeros(d_half),
        "bd_w2": xavier((d_half, 1), d_half, 1), "bd_b2": zeros(1),
    }
    for dirn in ("fwd", "bwd"):
        p[f"gru_wi_{dirn}"] = xavier((3 * dim, dim), dim, dim)
        p[f"gru_wh_{dirn}"] = xavier((3 * dim, dim), dim, dim)
        p[f"gru_bi_{dirn}"] = zeros(3 * dim)
        p[f"gru_bh_{dirn}"] = zeros(3 * dim)

    layers_p = []
    for _ in range(layers):
        layers_p.append({
            "attn_ln_g": ones(dim), "attn_ln_b": zeros(dim),
            "wq": xavier((dim, dim), dim, dim), "bq": zeros(dim),
            "wk": xavier((dim, dim), dim, dim), "bk": zeros(dim),
            "wv": xavier((dim, dim), dim, dim), "bv": zeros(dim),
            "wo": xavier((dim, dim), dim, dim), "bo": zeros(dim),
            # TODO(synk): plain gaussian stand-in for performer's gaussian-orthogonal
            # random features (fixed; feature_redraw is a training-time mechanism).
            "proj_t": jax.random.normal(next(ks), (d_head, m), jnp.float32),
            "ff_ln_g": ones(dim), "ff_ln_b": zeros(dim),
            "ff_w1": xavier((dim, dim * 8), dim, dim * 8), "ff_b1": zeros(dim * 8),   # GLU: 2 * 4*dim
            "ff_w2": xavier((dim * 4, dim), dim * 4, dim), "ff_b2": zeros(dim),
        })
    p["performer_layers"] = layers_p
    return p


def prepare_params(params, cfg, batch, time_steps):
    """Fold BN into convs, collapse the pre-ReLU conv chain, fold q/k projections and the
    performer data_normalizer into one packed (dim, 2*heads*m+dim) feature matrix, stack
    per-layer weights for the grid-over-layers kernel, cast MXU weights to bf16 once, and
    precompute per-call constants (pos slab)."""
    dim, heads, m, L = cfg["dim"], cfg["heads"], cfg["nb_features"], cfg["layers"]
    d_head, d_half = dim // heads, dim // 2
    HM = heads * m
    B = batch
    S = min(time_steps, cfg["max_seq_len"])
    p = {}

    # --- conv front-end ---
    s1 = params["bn1_g"] * jax.lax.rsqrt(params["bn1_v"] + BN_EPS)
    t1 = params["bn1_b"] - params["bn1_m"] * s1
    # conv1(1x1, no bias) + depthwise1 + pointwise1 + BN1  ==  one dense 3x3 conv (1 -> d_half)
    w_eff1 = jnp.einsum("c,khc,cd->khd", params["conv1_w"][0],
                        params["ds1_dw_w"], params["ds1_pw_w"]) * s1
    p["fe1_w"] = w_eff1.reshape(9, d_half).astype(jnp.bfloat16)
    p["fe1_b"] = ((params["ds1_dw_b"] @ params["ds1_pw_w"] + params["ds1_pw_b"]) * s1
                  + t1).reshape(1, d_half)
    p["dw2_w"] = params["ds2_dw_w"].reshape(9, 1, 1, d_half)
    p["dw2_b"] = params["ds2_dw_b"].reshape(1, 1, 1, d_half)
    s2 = params["bn2_g"] * jax.lax.rsqrt(params["bn2_v"] + BN_EPS)
    t2 = params["bn2_b"] - params["bn2_m"] * s2
    p["pw2_w"] = (params["ds2_pw_w"] * s2[None, :]).astype(jnp.bfloat16)
    p["pw2_b"] = (params["ds2_pw_b"] * s2 + t2).reshape(1, dim)

    # --- proj + norm + positional slab (precomputed, lane-dense) ---
    p["proj_w"] = params["proj_w"].astype(jnp.bfloat16)
    p["proj_b"] = params["proj_b"].reshape(1, dim)
    p["norm_g"] = params["norm_g"].reshape(1, dim)
    p["norm_b"] = params["norm_b"].reshape(1, dim)
    p["pos"] = jnp.tile(params["pos_emb"][0, :S], (B, 1))          # (B*S, dim)

    # --- performer stack: packed q/k/v projection, stacked per-layer weights ---
    scale = float(d_head) ** -0.25          # data_normalizer of the generalized kernel
    p["head_mask"] = (jnp.arange(HM)[:, None] // m
                      == jnp.arange(dim)[None, :] // d_head).astype(jnp.bfloat16)
    wqkv, bqkv = [], []
    for lp in params["performer_layers"]:
        pbd = jax.scipy.linalg.block_diag(*([lp["proj_t"]] * heads)) * scale   # (dim, HM)
        wqkv.append(jnp.concatenate([lp["wq"] @ pbd, lp["wk"] @ pbd, lp["wv"]], axis=1))
        bqkv.append(jnp.concatenate([lp["bq"] @ pbd, lp["bk"] @ pbd, lp["bv"]]))
    stack = lambda fn: jnp.stack([fn(lp) for lp in params["performer_layers"]])
    p["wqkv"] = jnp.stack(wqkv).astype(jnp.bfloat16)               # (L, dim, 2*HM+dim)
    p["bqkv"] = jnp.stack(bqkv).reshape(L, 1, 2 * HM + dim)
    p["ln1_g"] = stack(lambda lp: lp["attn_ln_g"]).reshape(L, 1, dim)
    p["ln1_b"] = stack(lambda lp: lp["attn_ln_b"]).reshape(L, 1, dim)
    p["wo"] = stack(lambda lp: lp["wo"]).astype(jnp.bfloat16)
    p["bo"] = stack(lambda lp: lp["bo"]).reshape(L, 1, dim)
    p["ln2_g"] = stack(lambda lp: lp["ff_ln_g"]).reshape(L, 1, dim)
    p["ln2_b"] = stack(lambda lp: lp["ff_ln_b"]).reshape(L, 1, dim)
    p["ff_w1"] = stack(lambda lp: lp["ff_w1"]).astype(jnp.bfloat16)
    p["ff_b1"] = stack(lambda lp: lp["ff_b1"]).reshape(L, 1, 8 * dim)
    p["ff_w2"] = stack(lambda lp: lp["ff_w2"]).astype(jnp.bfloat16)
    p["ff_b2"] = stack(lambda lp: lp["ff_b2"]).reshape(L, 1, dim)

    # --- heads + fusion + GRU ---
    p["clf_w1"] = params["clf_w1"].astype(jnp.bfloat16)
    p["clf_b1"] = params["clf_b1"].reshape(1, d_half)
    p["clf_ln_g"] = params["clf_ln_g"].reshape(1, d_half)
    p["clf_ln_b"] = params["clf_ln_b"].reshape(1, d_half)
    p["clf_w2"] = params["clf_w2"].astype(jnp.bfloat16)
    p["clf_b2"] = params["clf_b2"].reshape(1, 1)
    p["bd_w1"] = params["bd_w1"].astype(jnp.bfloat16)
    p["bd_b1"] = params["bd_b1"].reshape(1, d_half)
    p["bd_ln_g"] = params["bd_ln_g"].reshape(1, d_half)
    p["bd_ln_b"] = params["bd_ln_b"].reshape(1, d_half)
    p["bd_w2"] = params["bd_w2"].astype(jnp.bfloat16)
    p["bd_b2"] = params["bd_b2"].reshape(1, 1)
    p["fusion_w"] = params["fusion_w"].astype(jnp.bfloat16)
    p["fusion_b"] = params["fusion_b"].reshape(1, dim)
    for dirn in ("fwd", "bwd"):
        for n in ("wi", "wh", "bi", "bh"):
            p[f"gru_{n}_{dirn}"] = params[f"gru_{n}_{dirn}"]
    return p


# ==================== forward pass ====================

def mel_performer_forward(prep, x, cfg=CFG, training=False):
    B, T, n_mels = x.shape
    dim = cfg["dim"]
    d_half = dim // 2
    H, W = n_mels, T                              # freq x time image
    S = min(T, cfg["max_seq_len"])
    L = cfg["layers"]
    HM = cfg["heads"] * cfg["nb_features"]

    # ---- im2col of the raw single-channel input (tiny XLA prep on a ~2 KiB tensor);
    #      everything downstream of it is a single fused Pallas kernel. ----
    img = jnp.transpose(x, (0, 2, 1)).astype(jnp.float32)           # (B, n_mels, T)
    imgp = jnp.pad(img, ((0, 0), (1, 1), (1, 1)))
    patches = jnp.stack([imgp[:, kh:kh + H, kw:kw + W]
                         for kh in range(3) for kw in range(3)], axis=-1)   # (B, H, W, 9)
    patches = patches.reshape(B * H * W, 9).astype(jnp.bfloat16)

    seq = pl.pallas_call(
        functools.partial(_frontend_kernel, B, H, W, S),
        out_shape=jax.ShapeDtypeStruct((B * S, dim), jnp.float32),
        scratch_shapes=[pltpu.VMEM((B, H + 2, W + 16, d_half), jnp.float32)],
    )(patches, prep["fe1_w"], prep["fe1_b"], prep["dw2_w"], prep["dw2_b"],
      prep["pw2_w"], prep["pw2_b"], prep["proj_w"], prep["proj_b"],
      prep["norm_g"], prep["norm_b"], prep["pos"])

    # ---- Performer stack + reversible merge + VAD head: ONE pallas_call, grid over layers ----
    def layer_spec(arr):
        nd = arr.ndim - 1
        return pl.BlockSpec((None,) + arr.shape[1:], lambda l, nd=nd: (l,) + (0,) * nd)

    def shared_spec(arr):
        nd = arr.ndim
        return pl.BlockSpec(arr.shape, lambda l, nd=nd: (0,) * nd)

    inputs = [
        (seq, "shared"),
        (prep["ln1_g"], "layer"), (prep["ln1_b"], "layer"),
        (prep["wqkv"], "layer"), (prep["bqkv"], "layer"),
        (prep["head_mask"], "shared"),
        (prep["wo"], "layer"), (prep["bo"], "layer"),
        (prep["ln2_g"], "layer"), (prep["ln2_b"], "layer"),
        (prep["ff_w1"], "layer"), (prep["ff_b1"], "layer"),
        (prep["ff_w2"], "layer"), (prep["ff_b2"], "layer"),
        (prep["clf_w1"], "shared"), (prep["clf_b1"], "shared"),
        (prep["clf_ln_g"], "shared"), (prep["clf_ln_b"], "shared"),
        (prep["clf_w2"], "shared"), (prep["clf_b2"], "shared"),
    ]
    in_specs = [layer_spec(a) if kind == "layer" else shared_spec(a) for a, kind in inputs]
    operands = [a for a, _ in inputs]

    t_flat, vad_col = pl.pallas_call(
        functools.partial(_performer_stack_kernel, S),
        grid=(L,),
        in_specs=in_specs,
        out_specs=[pl.BlockSpec((B * S, dim), lambda l: (0, 0)),
                   pl.BlockSpec((B * S, 1), lambda l: (0, 0))],
        out_shape=(jax.ShapeDtypeStruct((B * S, dim), jnp.float32),
                   jax.ShapeDtypeStruct((B * S, 1), jnp.float32)),
        scratch_shapes=[pltpu.VMEM((B * S, dim), jnp.float32),
                        pltpu.VMEM((B * S, dim), jnp.float32)],
        compiler_params=pltpu.CompilerParams(dimension_semantics=("arbitrary",)),
    )(*operands)

    vad = vad_col.reshape(B, S)
    if not training:
        return vad                           # eval mode: frame-level VAD logits (batch, seq_len)

    # ---- training-only: bidirectional GRU + fusion + boundary head ----
    t_out = t_flat.reshape(B, S, dim)
    gru_f = gru_direction(t_out, prep["gru_wi_fwd"], prep["gru_wh_fwd"],
                          prep["gru_bi_fwd"], prep["gru_bh_fwd"])
    gru_b = gru_direction(t_out[:, ::-1], prep["gru_wi_bwd"], prep["gru_wh_bwd"],
                          prep["gru_bi_bwd"], prep["gru_bh_bwd"])[:, ::-1]
    fused_in = jnp.concatenate([t_out, gru_f, gru_b], axis=-1).reshape(B * S, 3 * dim)
    boundary = pl.pallas_call(
        _fusion_boundary_kernel,
        out_shape=jax.ShapeDtypeStruct((B * S, 1), jnp.float32),
    )(fused_in, prep["fusion_w"], prep["fusion_b"], prep["bd_w1"], prep["bd_b1"],
      prep["bd_ln_g"], prep["bd_ln_b"], prep["bd_w2"], prep["bd_b2"]).reshape(B, S)
    return vad, boundary


# ==================== main ====================

if __name__ == "__main__":
    key = jax.random.PRNGKey(0)
    pkey, xkey = jax.random.split(key)
    params = init_params(pkey, CFG)
    prep = prepare_params(params, CFG, BATCH, TIME)
    x = jax.random.normal(xkey, (BATCH, TIME, CFG["n_mels"]), jnp.float32)

    fwd = jax.jit(mel_performer_forward)
    vad = jax.block_until_ready(fwd(prep, x))

    assert vad.shape == (BATCH, TIME), vad.shape
    assert bool(jnp.all(jnp.isfinite(vad)))
    print("KERNEL_OK")
</pallas_src>

<mosaic_0001>
module attributes {stable_mosaic.version = 11 : i64} {
  func.func @_frontend_kernel(%arg0: memref<512x9xbf16, #tpu.memory_space<vmem>>, %arg1: memref<9x16xbf16, #tpu.memory_space<vmem>>, %arg2: memref<1x16xf32, #tpu.memory_space<vmem>>, %arg3: memref<9x1x1x16xf32, #tpu.memory_space<vmem>>, %arg4: memref<1x1x1x16xf32, #tpu.memory_space<vmem>>, %arg5: memref<16x32xbf16, #tpu.memory_space<vmem>>, %arg6: memref<1x32xf32, #tpu.memory_space<vmem>>, %arg7: memref<32x32xbf16, #tpu.memory_space<vmem>>, %arg8: memref<1x32xf32, #tpu.memory_space<vmem>>, %arg9: memref<1x32xf32, #tpu.memory_space<vmem>>, %arg10: memref<1x32xf32, #tpu.memory_space<vmem>>, %arg11: memref<32x32xf32, #tpu.memory_space<vmem>>, %arg12: memref<32x32xf32, #tpu.memory_space<vmem>>, %arg13: memref<2x18x32x16xf32, #tpu.memory_space<vmem>>) attributes {dimension_semantics = [], scalar_prefetch = 0 : i64, scratch_operands = 1 : i64, tpu.core_type = #tpu.core_type<tc>} {
    %c0 = arith.constant 0 : index
    %c0_0 = arith.constant 0 : index
    %0 = vector.load %arg0[%c0, %c0_0] : memref<512x9xbf16, #tpu.memory_space<vmem>>, vector<512x9xbf16>
    %c0_1 = arith.constant 0 : index
    %c0_2 = arith.constant 0 : index
    %1 = vector.load %arg1[%c0_1, %c0_2] : memref<9x16xbf16, #tpu.memory_space<vmem>>, vector<9x16xbf16>
    %cst = arith.constant dense<0.000000e+00> : vector<512x16xf32>
    %2 = tpu.matmul %0, %1, %cst {dimension_numbers = #tpu.dot_dimension_numbers<[1], [0], [0], [1], [0, 0, 1, 1], [], []>} : vector<512x9xbf16>, vector<9x16xbf16>, vector<512x16xf32> -> vector<512x16xf32>
    %c0_3 = arith.constant 0 : index
    %c0_4 = arith.constant 0 : index
    %3 = vector.load %arg2[%c0_3, %c0_4] : memref<1x16xf32, #tpu.memory_space<vmem>>, vector<1x16xf32>
    %4 = vector.broadcast %3 : vector<1x16xf32> to vector<512x16xf32>
    %5 = arith.addf %2, %4 : vector<512x16xf32>
    %cst_5 = arith.constant 0.000000e+00 : f32
    %6 = vector.broadcast %cst_5 : f32 to vector<512x16xf32>
    %7 = arith.maximumf %5, %6 : vector<512x16xf32>
    %cst_6 = arith.constant 0.000000e+00 : f32
    %8 = vector.broadcast %cst_6 : f32 to vector<2x18x32x16xf32>
    %c0_7 = arith.constant 0 : index
    %c0_8 = arith.constant 0 : index
    %c0_9 = arith.constant 0 : index
    %c0_10 = arith.constant 0 : index
    %9 = vector.load %arg13[%c0_7, %c0_8, %c0_9, %c0_10] : memref<2x18x32x16xf32, #tpu.memory_space<vmem>>, vector<2x18x32x16xf32>
    tpu.vector_store %arg13[%c0_7, %c0_8, %c0_9, %c0_10], %8 {strides = array<i32>} : memref<2x18x32x16xf32, #tpu.memory_space<vmem>>, vector<2x18x32x16xf32>,
    %10 = vector.shape_cast %7 : vector<512x16xf32> to vector<2x16x16x16xf32>
    %c0_11 = arith.constant 0 : index
    %c1 = arith.constant 1 : index
    %c8 = arith.constant 8 : index
    %c0_12 = arith.constant 0 : index
    %11 = vector.load %arg13[%c0_11, %c1, %c8, %c0_12] : memref<2x18x32x16xf32, #tpu.memory_space<vmem>>, vector<2x16x16x16xf32>
    tpu.vector_store %arg13[%c0_11, %c1, %c8, %c0_12], %10 {strides = array<i32>} : memref<2x18x32x16xf32, #tpu.memory_space<vmem>>, vector<2x16x16x16xf32>,
    %cst_13 = arith.constant 0.000000e+00 : f32
    %12 = vector.broadcast %cst_13 : f32 to vector<2x16x16x16xf32>
    %c0_14 = arith.constant 0 : index
    %c0_15 = arith.constant 0 : index
    %c0_16 = arith.constant 0 : index
    %c0_17 = arith.constant 0 : index
    %13 = vector.load %arg4[%c0_14, %c0_15, %c0_16, %c0_17] : memref<1x1x1x16xf32, #tpu.memory_space<vmem>>, vector<1x1x1x16xf32>
    %14 = vector.broadcast %13 : vector<1x1x1x16xf32> to vector<2x16x16x16xf32>
    %15 = arith.addf %12, %14 : vector<2x16x16x16xf32>
    %c0_18 = arith.constant 0 : index
    %c0_19 = arith.constant 0 : index
    %c7 = arith.constant 7 : index
    %c0_20 = arith.constant 0 : index
    %16 = vector.load %arg13[%c0_18, %c0_19, %c7, %c0_20] : memref<2x18x32x16xf32, #tpu.memory_space<vmem>>, vector<2x16x16x16xf32>
    %c0_21 = arith.constant 0 : index
    %c0_22 = arith.constant 0 : index
    %c0_23 = arith.constant 0 : index
    %c0_24 = arith.constant 0 : index
    %17 = vector.load %arg3[%c0_21, %c0_22, %c0_23, %c0_24] : memref<9x1x1x16xf32, #tpu.memory_space<vmem>>, vector<1x1x1x16xf32>
    %18 = vector.shape_cast %17 : vector<1x1x1x16xf32> to vector<1x1x16xf32>
    %19 = vector.shape_cast %18 : vector<1x1x16xf32> to vector<1x1x1x16xf32>
    %20 = vector.broadcast %19 : vector<1x1x1x16xf32> to vector<2x16x16x16xf32>
    %21 = arith.mulf %16, %20 : vector<2x16x16x16xf32>
    %22 = arith.addf %15, %21 : vector<2x16x16x16xf32>
    %c0_25 = arith.constant 0 : index
    %c0_26 = arith.constant 0 : index
    %c8_27 = arith.constant 8 : index
    %c0_28 = arith.constant 0 : index
    %23 = vector.load %arg13[%c0_25, %c0_26, %c8_27, %c0_28] : memref<2x18x32x16xf32, #tpu.memory_space<vmem>>, vector<2x16x16x16xf32>
    %c1_29 = arith.constant 1 : index
    %c0_30 = arith.constant 0 : index
    %c0_31 = arith.constant 0 : index
    %c0_32 = arith.constant 0 : index
    %24 = vector.load %arg3[%c1_29, %c0_30, %c0_31, %c0_32] : memref<9x1x1x16xf32, #tpu.memory_space<vmem>>, vector<1x1x1x16xf32>
    %25 = vector.shape_cast %24 : vector<1x1x1x16xf32> to vector<1x1x16xf32>
    %26 = vector.shape_cast %25 : vector<1x1x16xf32> to vector<1x1x1x16xf32>
    %27 = vector.broadcast %26 : vector<1x1x1x16xf32> to vector<2x16x16x16xf32>
    %28 = arith.mulf %23, %27 : vector<2x16x16x16xf32>
    %29 = arith.addf %22, %28 : vector<2x16x16x16xf32>
    %c0_33 = arith.constant 0 : index
    %c0_34 = arith.constant 0 : index
    %c9 = arith.constant 9 : index
    %c0_35 = arith.constant 0 : index
    %30 = vector.load %arg13[%c0_33, %c0_34, %c9, %c0_35] : memref<2x18x32x16xf32, #tpu.memory_space<vmem>>, vector<2x16x16x16xf32>
    %c2 = arith.constant 2 : index
    %c0_36 = arith.constant 0 : index
    %c0_37 = arith.constant 0 : index
    %c0_38 = arith.constant 0 : index
    %31 = vector.load %arg3[%c2, %c0_36, %c0_37, %c0_38] : memref<9x1x1x16xf32, #tpu.memory_space<vmem>>, vector<1x1x1x16xf32>
    %32 = vector.shape_cast %31 : vector<1x1x1x16xf32> to vector<1x1x16xf32>
    %33 = vector.shape_cast %32 : vector<1x1x16xf32> to vector<1x1x1x16xf32>
    %34 = vector.broadcast %33 : vector<1x1x1x16xf32> to vector<2x16x16x16xf32>
    %35 = arith.mulf %30, %34 : vector<2x16x16x16xf32>
    %36 = arith.addf %29, %35 : vector<2x16x16x16xf32>
    %c0_39 = arith.constant 0 : index
    %c1_40 = arith.constant 1 : index
    %c7_41 = arith.constant 7 : index
    %c0_42 = arith.constant 0 : index
    %37 = vector.load %arg13[%c0_39, %c1_40, %c7_41, %c0_42] : memref<2x18x32x16xf32, #tpu.memory_space<vmem>>, vector<2x16x16x16xf32>
    %c3 = arith.constant 3 : index
    %c0_43 = arith.constant 0 : index
    %c0_44 = arith.constant 0 : index
    %c0_45 = arith.constant 0 : index
    %38 = vector.load %arg3[%c3, %c0_43, %c0_44, %c0_45] : memref<9x1x1x16xf32, #tpu.memory_space<vmem>>, vector<1x1x1x16xf32>
    %39 = vector.shape_cast %38 : vector<1x1x1x16xf32> to vector<1x1x16xf32>
    %40 = vector.shape_cast %39 : vector<1x1x16xf32> to vector<1x1x1x16xf32>
    %41 = vector.broadcast %40 : vector<1x1x1x16xf32> to vector<2x16x16x16xf32>
    %42 = arith.mulf %37, %41 : vector<2x16x16x16xf32>
    %43 = arith.addf %36, %42 : vector<2x16x16x16xf32>
    %c0_46 = arith.constant 0 : index
    %c1_47 = arith.constant 1 : index
    %c8_48 = arith.constant 8 : index
    %c0_49 = arith.constant 0 : index
    %44 = vector.load %arg13[%c0_46, %c1_47, %c8_48, %c0_49] : memref<2x18x32x16xf32, #tpu.memory_space<vmem>>, vector<2x16x16x16xf32>
    %c4 = arith.constant 4 : index
    %c0_50 = arith.constant 0 : index
    %c0_51 = arith.constant 0 : index
    %c0_52 = arith.constant 0 : index
    %45 = vector.load %arg3[%c4, %c0_50, %c0_51, %c0_52] : memref<9x1x1x16xf32, #tpu.memory_space<vmem>>, vector<1x1x1x16xf32>
    %46 = vector.shape_cast %45 : vector<1x1x1x16xf32> to vector<1x1x16xf32>
    %47 = vector.shape_cast %46 : vector<1x1x16xf32> to vector<1x1x1x16xf32>
    %48 = vector.broadcast %47 : vector<1x1x1x16xf32> to vector<2x16x16x16xf32>
    %49 = arith.mulf %44, %48 : vector<2x16x16x16xf32>
    %50 = arith.addf %43, %49 : vector<2x16x16x16xf32>
    %c0_53 = arith.constant 0 : index
    %c1_54 = arith.constant 1 : index
    %c9_55 = arith.constant 9 : index
    %c0_56 = arith.constant 0 : index
    %51 = vector.load %arg13[%c0_53, %c1_54, %c9_55, %c0_56] : memref<2x18x32x16xf32, #tpu.memory_space<vmem>>, vector<2x16x16x16xf32>
    %c5 = arith.constant 5 : index
    %c0_57 = arith.constant 0 : index
    %c0_58 = arith.constant 0 : index
    %c0_59 = arith.constant 0 : index
    %52 = vector.load %arg3[%c5, %c0_57, %c0_58, %c0_59] : memref<9x1x1x16xf32, #tpu.memory_space<vmem>>, vector<1x1x1x16xf32>
    %53 = vector.shape_cast %52 : vector<1x1x1x16xf32> to vector<1x1x16xf32>
    %54 = vector.shape_cast %53 : vector<1x1x16xf32> to vector<1x1x1x16xf32>
    %55 = vector.broadcast %54 : vector<1x1x1x16xf32> to vector<2x16x16x16xf32>
    %56 = arith.mulf %51, %55 : vector<2x16x16x16xf32>
    %57 = arith.addf %50, %56 : vector<2x16x16x16xf32>
    %c0_60 = arith.constant 0 : index
    %c2_61 = arith.constant 2 : index
    %c7_62 = arith.constant 7 : index
    %c0_63 = arith.constant 0 : index
    %58 = vector.load %arg13[%c0_60, %c2_61, %c7_62, %c0_63] : memref<2x18x32x16xf32, #tpu.memory_space<vmem>>, vector<2x16x16x16xf32>
    %c6 = arith.constant 6 : index
    %c0_64 = arith.constant 0 : index
    %c0_65 = arith.constant 0 : index
    %c0_66 = arith.constant 0 : index
    %59 = vector.load %arg3[%c6, %c0_64, %c0_65, %c0_66] : memref<9x1x1x16xf32, #tpu.memory_space<vmem>>, vector<1x1x1x16xf32>
    %60 = vector.shape_cast %59 : vector<1x1x1x16xf32> to vector<1x1x16xf32>
    %61 = vector.shape_cast %60 : vector<1x1x16xf32> to vector<1x1x1x16xf32>
    %62 = vector.broadcast %61 : vector<1x1x1x16xf32> to vector<2x16x16x16xf32>
    %63 = arith.mulf %58, %62 : vector<2x16x16x16xf32>
    %64 = arith.addf %57, %63 : vector<2x16x16x16xf32>
    %c0_67 = arith.constant 0 : index
    %c2_68 = arith.constant 2 : index
    %c8_69 = arith.constant 8 : index
    %c0_70 = arith.constant 0 : index
    %65 = vector.load %arg13[%c0_67, %c2_68, %c8_69, %c0_70] : memref<2x18x32x16xf32, #tpu.memory_space<vmem>>, vector<2x16x16x16xf32>
    %c7_71 = arith.constant 7 : index
    %c0_72 = arith.constant 0 : index
    %c0_73 = arith.constant 0 : index
    %c0_74 = arith.constant 0 : index
    %66 = vector.load %arg3[%c7_71, %c0_72, %c0_73, %c0_74] : memref<9x1x1x16xf32, #tpu.memory_space<vmem>>, vector<1x1x1x16xf32>
    %67 = vector.shape_cast %66 : vector<1x1x1x16xf32> to vector<1x1x16xf32>
    %68 = vector.shape_cast %67 : vector<1x1x16xf32> to vector<1x1x1x16xf32>
    %69 = vector.broadcast %68 : vector<1x1x1x16xf32> to vector<2x16x16x16xf32>
    %70 = arith.mulf %65, %69 : vector<2x16x16x16xf32>
    %71 = arith.addf %64, %70 : vector<2x16x16x16xf32>
    %c0_75 = arith.constant 0 : index
    %c2_76 = arith.constant 2 : index
    %c9_77 = arith.constant 9 : index
    %c0_78 = arith.constant 0 : index
    %72 = vector.load %arg13[%c0_75, %c2_76, %c9_77, %c0_78] : memref<2x18x32x16xf32, #tpu.memory_space<vmem>>, vector<2x16x16x16xf32>
    %c8_79 = arith.constant 8 : index
    %c0_80 = arith.constant 0 : index
    %c0_81 = arith.constant 0 : index
    %c0_82 = arith.constant 0 : index
    %73 = vector.load %arg3[%c8_79, %c0_80, %c0_81, %c0_82] : memref<9x1x1x16xf32, #tpu.memory_space<vmem>>, vector<1x1x1x16xf32>
    %74 = vector.shape_cast %73 : vector<1x1x1x16xf32> to vector<1x1x16xf32>
    %75 = vector.shape_cast %74 : vector<1x1x16xf32> to vector<1x1x1x16xf32>
    %76 = vector.broadcast %75 : vector<1x1x1x16xf32> to vector<2x16x16x16xf32>
    %77 = arith.mulf %72, %76 : vector<2x16x16x16xf32>
    %78 = arith.addf %71, %77 : vector<2x16x16x16xf32>
    %79 = vector.shape_cast %78 : vector<2x16x16x16xf32> to vector<512x16xf32>
    %80 = arith.truncf %79 : vector<512x16xf32> to vector<512x16xbf16>
    %c0_83 = arith.constant 0 : index
    %c0_84 = arith.constant 0 : index
    %81 = vector.load %arg5[%c0_83, %c0_84] : memref<16x32xbf16, #tpu.memory_space<vmem>>, vector<16x32xbf16>
    %cst_85 = arith.constant dense<0.000000e+00> : vector<512x32xf32>
    %82 = tpu.matmul %80, %81, %cst_85 {dimension_numbers = #tpu.dot_dimension_numbers<[1], [0], [0], [1], [0, 0, 1, 1], [], []>} : vector<512x16xbf16>, vector<16x32xbf16>, vector<512x32xf32> -> vector<512x32xf32>
    %c0_86 = arith.constant 0 : index
    %c0_87 = arith.constant 0 : index
    %83 = vector.load %arg6[%c0_86, %c0_87] : memref<1x32xf32, #tpu.memory_space<vmem>>, vector<1x32xf32>
    %84 = vector.broadcast %83 : vector<1x32xf32> to vector<512x32xf32>
    %85 = arith.addf %82, %84 : vector<512x32xf32>
    %cst_88 = arith.constant 0.000000e+00 : f32
    %86 = vector.broadcast %cst_88 : f32 to vector<512x32xf32>
    %87 = arith.maximumf %85, %86 : vector<512x32xf32>
    %88 = vector.shape_cast %87 : vector<512x32xf32> to vector<2x16x16x32xf32>
    %cst_89 = arith.constant dense<0.000000e+00> : vector<2x16x32xf32>
    %89 = vector.multi_reduction <add>, %88, %cst_89 [1] : vector<2x16x16x32xf32> to vector<2x16x32xf32>
    %cst_90 = arith.constant 1.600000e+01 : f32
    %90 = vector.broadcast %cst_90 : f32 to vector<2x16x32xf32>
    %91 = arith.divf %89, %90 : vector<2x16x32xf32>
    %92 = vector.shape_cast %91 : vector<2x16x32xf32> to vector<32x32xf32>
    %93 = arith.truncf %92 : vector<32x32xf32> to vector<32x32xbf16>
    %c0_91 = arith.constant 0 : index
    %c0_92 = arith.constant 0 : index
    %94 = vector.load %arg7[%c0_91, %c0_92] : memref<32x32xbf16, #tpu.memory_space<vmem>>, vector<32x32xbf16>
    %cst_93 = arith.constant dense<0.000000e+00> : vector<32x32xf32>
    %95 = tpu.matmul %93, %94, %cst_93 {dimension_numbers = #tpu.dot_dimension_numbers<[1], [0], [0], [1], [0, 0, 1, 1], [], []>} : vector<32x32xbf16>, vector<32x32xbf16>, vector<32x32xf32> -> vector<32x32xf32>
    %c0_94 = arith.constant 0 : index
    %c0_95 = arith.constant 0 : index
    %96 = vector.load %arg8[%c0_94, %c0_95] : memref<1x32xf32, #tpu.memory_space<vmem>>, vector<1x32xf32>
    %97 = vector.broadcast %96 : vector<1x32xf32> to vector<32x32xf32>
    %98 = arith.addf %95, %97 : vector<32x32xf32>
    %cst_96 = arith.constant dense<0.000000e+00> : vector<32xf32>
    %99 = vector.multi_reduction <add>, %98, %cst_96 [1] : vector<32x32xf32> to vector<32xf32>
    %100 = vector.shape_cast %99 : vector<32xf32> to vector<32x1xf32>
    %cst_97 = arith.constant 3.200000e+01 : f32
    %101 = vector.broadcast %cst_97 : f32 to vector<32x1xf32>
    %102 = arith.divf %100, %101 : vector<32x1xf32>
    %103 = vector.broadcast %102 : vector<32x1xf32> to vector<32x32xf32>
    %104 = arith.subf %98, %103 : vector<32x32xf32>
    %105 = arith.mulf %104, %104 : vector<32x32xf32>
    %cst_98 = arith.constant dense<0.000000e+00> : vector<32xf32>
    %106 = vector.multi_reduction <add>, %105, %cst_98 [1] : vector<32x32xf32> to vector<32xf32>
    %107 = vector.shape_cast %106 : vector<32xf32> to vector<32x1xf32>
    %cst_99 = arith.constant 3.200000e+01 : f32
    %108 = vector.broadcast %cst_99 : f32 to vector<32x1xf32>
    %109 = arith.divf %107, %108 : vector<32x1xf32>
    %110 = vector.broadcast %102 : vector<32x1xf32> to vector<32x32xf32>
    %111 = arith.subf %98, %110 : vector<32x32xf32>
    %cst_100 = arith.constant 9.99999974E-6 : f32
    %112 = vector.broadcast %cst_100 : f32 to vector<32x1xf32>
    %113 = arith.addf %109, %112 : vector<32x1xf32>
    %114 = math.rsqrt %113 : vector<32x1xf32>
    %115 = vector.broadcast %114 : vector<32x1xf32> to vector<32x32xf32>
    %116 = arith.mulf %111, %115 : vector<32x32xf32>
    %c0_101 = arith.constant 0 : index
    %c0_102 = arith.constant 0 : index
    %117 = vector.load %arg9[%c0_101, %c0_102] : memref<1x32xf32, #tpu.memory_space<vmem>>, vector<1x32xf32>
    %118 = vector.broadcast %117 : vector<1x32xf32> to vector<32x32xf32>
    %119 = arith.mulf %116, %118 : vector<32x32xf32>
    %c0_103 = arith.constant 0 : index
    %c0_104 = arith.constant 0 : index
    %120 = vector.load %arg10[%c0_103, %c0_104] : memref<1x32xf32, #tpu.memory_space<vmem>>, vector<1x32xf32>
    %121 = vector.broadcast %120 : vector<1x32xf32> to vector<32x32xf32>
    %122 = arith.addf %119, %121 : vector<32x32xf32>
    %c0_105 = arith.constant 0 : index
    %c0_106 = arith.constant 0 : index
    %123 = vector.load %arg11[%c0_105, %c0_106] : memref<32x32xf32, #tpu.memory_space<vmem>>, vector<32x32xf32>
    %124 = arith.addf %122, %123 : vector<32x32xf32>
    %c0_107 = arith.constant 0 : index
    %c0_108 = arith.constant 0 : index
    %125 = vector.load %arg12[%c0_107, %c0_108] : memref<32x32xf32, #tpu.memory_space<vmem>>, vector<32x32xf32>
    tpu.vector_store %arg12[%c0_107, %c0_108], %124 {strides = array<i32>} : memref<32x32xf32, #tpu.memory_space<vmem>>, vector<32x32xf32>,
    return
  }
}

module attributes {stable_mosaic.version = 11 : i64} {
  func.func @_performer_stack_kernel(%arg0: i32, %arg1: memref<32x32xf32, #tpu.memory_space<vmem>>, %arg2: memref<1x1x32xf32, #tpu.memory_space<vmem>>, %arg3: memref<1x1x32xf32, #tpu.memory_space<vmem>>, %arg4: memref<1x32x3104xbf16, #tpu.memory_space<vmem>>, %arg5: memref<1x1x3104xf32, #tpu.memory_space<vmem>>, %arg6: memref<1536x32xbf16, #tpu.memory_space<vmem>>, %arg7: memref<1x32x32xbf16, #tpu.memory_space<vmem>>, %arg8: memref<1x1x32xf32, #tpu.memory_space<vmem>>, %arg9: memref<1x1x32xf32, #tpu.memory_space<vmem>>, %arg10: memref<1x1x32xf32, #tpu.memory_space<vmem>>, %arg11: memref<1x32x256xbf16, #tpu.memory_space<vmem>>, %arg12: memref<1x1x256xf32, #tpu.memory_space<vmem>>, %arg13: memref<1x128x32xbf16, #tpu.memory_space<vmem>>, %arg14: memref<1x1x32xf32, #tpu.memory_space<vmem>>, %arg15: memref<32x16xbf16, #tpu.memory_space<vmem>>, %arg16: memref<1x16xf32, #tpu.memory_space<vmem>>, %arg17: memref<1x16xf32, #tpu.memory_space<vmem>>, %arg18: memref<1x16xf32, #tpu.memory_space<vmem>>, %arg19: memref<16x1xbf16, #tpu.memory_space<vmem>>, %arg20: memref<1x1xf32, #tpu.memory_space<vmem>>, %arg21: memref<32x32xf32, #tpu.memory_space<vmem>>, %arg22: memref<32x1xf32, #tpu.memory_space<vmem>>, %arg23: memref<32x32xf32, #tpu.memory_space<vmem>>, %arg24: memref<32x32xf32, #tpu.memory_space<vmem>>) attributes {dimension_semantics = [#tpu.dimension_semantics<arbitrary>], iteration_bounds = array<i64: 2>, scalar_prefetch = 0 : i64, scratch_operands = 2 : i64, tpu.core_type = #tpu.core_type<tc>, window_params = [{pipeline_mode = #tpu.pipeline_mode<synchronous>, transform_indices = @transform_0, window_bounds = array<i64: 32, 32>}, {transform_indices = @transform_1, window_bounds = array<i64: 1, 1, 32>}, {transform_indices = @transform_2, window_bounds = array<i64: 1, 1, 32>}, {transform_indices = @transform_3, window_bounds = array<i64: 1, 32, 3104>}, {transform_indices = @transform_4, window_bounds = array<i64: 1, 1, 3104>}, {pipeline_mode = #tpu.pipeline_mode<synchronous>, transform_indices = @transform_5, window_bounds = array<i64: 1536, 32>}, {transform_indices = @transform_6, window_bounds = array<i64: 1, 32, 32>}, {transform_indices = @transform_7, window_bounds = array<i64: 1, 1, 32>}, {transform_indices = @transform_8, window_bounds = array<i64: 1, 1, 32>}, {transform_indices = @transform_9, window_bounds = array<i64: 1, 1, 32>}, {transform_indices = @transform_10, window_bounds = array<i64: 1, 32, 256>}, {transform_indices = @transform_11, window_bounds = array<i64: 1, 1, 256>}, {transform_indices = @transform_12, window_bounds = array<i64: 1, 128, 32>}, {transform_indices = @transform_13, window_bounds = array<i64: 1, 1, 32>}, {pipeline_mode = #tpu.pipeline_mode<synchronous>, transform_indices = @transform_14, window_bounds = array<i64: 32, 16>}, {pipeline_mode = #tpu.pipeline_mode<synchronous>, transform_indices = @transform_15, window_bounds = array<i64: 1, 16>}, {pipeline_mode = #tpu.pipeline_mode<synchronous>, transform_indices = @transform_16, window_bounds = array<i64: 1, 16>}, {pipeline_mode = #tpu.pipeline_mode<synchronous>, transform_indices = @transform_17, window_bounds = array<i64: 1, 16>}, {pipeline_mode = #tpu.pipeline_mode<synchronous>, transform_indices = @transform_18, window_bounds = array<i64: 16, 1>}, {pipeline_mode = #tpu.pipeline_mode<synchronous>, transform_indices = @transform_19, window_bounds = array<i64: 1, 1>}, {pipeline_mode = #tpu.pipeline_mode<synchronous>, transform_indices = @transform_20, window_bounds = array<i64: 32, 32>}, {pipeline_mode = #tpu.pipeline_mode<synchronous>, transform_indices = @transform_21, window_bounds = array<i64: 32, 1>}]} {
    %c0_i32 = arith.constant 0 : i32
    %0 = arith.cmpi eq, %arg0, %c0_i32 : i32
    %1 = arith.extui %0 : i1 to i32
    %c0_i32_0 = arith.constant 0 : i32
    %2 = arith.cmpi ne, %1, %c0_i32_0 : i32
    scf.if %2 {
      %c0_72 = arith.constant 0 : index
      %c0_73 = arith.constant 0 : index
      %145 = vector.load %arg1[%c0_72, %c0_73] : memref<32x32xf32, #tpu.memory_space<vmem>>, vector<32x32xf32>
      %c0_74 = arith.constant 0 : index
      %c0_75 = arith.constant 0 : index
      %146 = vector.load %arg23[%c0_74, %c0_75] : memref<32x32xf32, #tpu.memory_space<vmem>>, vector<32x32xf32>
      tpu.vector_store %arg23[%c0_74, %c0_75], %145 {strides = array<i32>} : memref<32x32xf32, #tpu.memory_space<vmem>>, vector<32x32xf32>,
      %c0_76 = arith.constant 0 : index
      %c0_77 = arith.constant 0 : index
      %147 = vector.load %arg1[%c0_76, %c0_77] : memref<32x32xf32, #tpu.memory_space<vmem>>, vector<32x32xf32>
      %c0_78 = arith.constant 0 : index
      %c0_79 = arith.constant 0 : index
      %148 = vector.load %arg24[%c0_78, %c0_79] : memref<32x32xf32, #tpu.memory_space<vmem>>, vector<32x32xf32>
      tpu.vector_store %arg24[%c0_78, %c0_79], %147 {strides = array<i32>} : memref<32x32xf32, #tpu.memory_space<vmem>>, vector<32x32xf32>,
    } else {
    }
    %c0 = arith.constant 0 : index
    %c0_1 = arith.constant 0 : index
    %3 = vector.load %arg6[%c0, %c0_1] : memref<1536x32xbf16, #tpu.memory_space<vmem>>, vector<1536x32xbf16>
    %c0_2 = arith.constant 0 : index
    %c0_3 = arith.constant 0 : index
    %4 = vector.load %arg24[%c0_2, %c0_3] : memref<32x32xf32, #tpu.memory_space<vmem>>, vector<32x32xf32>
    %cst = arith.constant dense<0.000000e+00> : vector<32xf32>
    %5 = vector.multi_reduction <add>, %4, %cst [1] : vector<32x32xf32> to vector<32xf32>
    %6 = vector.shape_cast %5 : vector<32xf32> to vector<32x1xf32>
    %cst_4 = arith.constant 3.200000e+01 : f32
    %7 = vector.broadcast %cst_4 : f32 to vector<32x1xf32>
    %8 = arith.divf %6, %7 : vector<32x1xf32>
    %9 = vector.broadcast %8 : vector<32x1xf32> to vector<32x32xf32>
    %10 = arith.subf %4, %9 : vector<32x32xf32>
    %11 = arith.mulf %10, %10 : vector<32x32xf32>
    %cst_5 = arith.constant dense<0.000000e+00> : vector<32xf32>
    %12 = vector.multi_reduction <add>, %11, %cst_5 [1] : vector<32x32xf32> to vector<32xf32>
    %13 = vector.shape_cast %12 : vector<32xf32> to vector<32x1xf32>
    %cst_6 = arith.constant 3.200000e+01 : f32
    %14 = vector.broadcast %cst_6 : f32 to vector<32x1xf32>
    %15 = arith.divf %13, %14 : vector<32x1xf32>
    %16 = vector.broadcast %8 : vector<32x1xf32> to vector<32x32xf32>
    %17 = arith.subf %4, %16 : vector<32x32xf32>
    %cst_7 = arith.constant 9.99999974E-6 : f32
    %18 = vector.broadcast %cst_7 : f32 to vector<32x1xf32>
    %19 = arith.addf %15, %18 : vector<32x1xf32>
    %20 = math.rsqrt %19 : vector<32x1xf32>
    %21 = vector.broadcast %20 : vector<32x1xf32> to vector<32x32xf32>
    %22 = arith.mulf %17, %21 : vector<32x32xf32>
    %c0_8 = arith.constant 0 : index
    %c0_9 = arith.constant 0 : index
    %c0_10 = arith.constant 0 : index
    %23 = vector.load %arg2[%c0_8, %c0_9, %c0_10] : memref<1x1x32xf32, #tpu.memory_space<vmem>>, vector<1x1x32xf32>
    %24 = vector.shape_cast %23 : vector<1x1x32xf32> to vector<1x32xf32>
    %25 = vector.broadcast %24 : vector<1x32xf32> to vector<32x32xf32>
    %26 = arith.mulf %22, %25 : vector<32x32xf32>
    %c0_11 = arith.constant 0 : index
    %c0_12 = arith.constant 0 : index
    %c0_13 = arith.constant 0 : index
    %27 = vector.load %arg3[%c0_11, %c0_12, %c0_13] : memref<1x1x32xf32, #tpu.memory_space<vmem>>, vector<1x1x32xf32>
    %28 = vector.shape_cast %27 : vector<1x1x32xf32> to vector<1x32xf32>
    %29 = vector.broadcast %28 : vector<1x32xf32> to vector<32x32xf32>
    %30 = arith.addf %26, %29 : vector<32x32xf32>
    %31 = arith.truncf %30 : vector<32x32xf32> to vector<32x32xbf16>
    %c0_14 = arith.constant 0 : index
    %c0_15 = arith.constant 0 : index
    %c0_16 = arith.constant 0 : index
    %32 = vector.load %arg4[%c0_14, %c0_15, %c0_16] : memref<1x32x3104xbf16, #tpu.memory_space<vmem>>, vector<1x32x3104xbf16>
    %33 = vector.shape_cast %32 : vector<1x32x3104xbf16> to vector<32x3104xbf16>
    %cst_17 = arith.constant dense<0.000000e+00> : vector<32x3104xf32>
    %34 = tpu.matmul %31, %33, %cst_17 {dimension_numbers = #tpu.dot_dimension_numbers<[1], [0], [0], [1], [0, 0, 1, 1], [], []>} : vector<32x32xbf16>, vector<32x3104xbf16>, vector<32x3104xf32> -> vector<32x3104xf32>
    %c0_18 = arith.constant 0 : index
    %c0_19 = arith.constant 0 : index
    %c0_20 = arith.constant 0 : index
    %35 = vector.load %arg5[%c0_18, %c0_19, %c0_20] : memref<1x1x3104xf32, #tpu.memory_space<vmem>>, vector<1x1x3104xf32>
    %36 = vector.shape_cast %35 : vector<1x1x3104xf32> to vector<1x3104xf32>
    %37 = vector.broadcast %36 : vector<1x3104xf32> to vector<32x3104xf32>
    %38 = arith.addf %34, %37 : vector<32x3104xf32>
    %39 = vector.extract_strided_slice %38 {offsets = [0, 0], sizes = [32, 1536], strides = [1, 1]} : vector<32x3104xf32> to vector<32x1536xf32>
    %cst_21 = arith.constant 0.000000e+00 : f32
    %40 = vector.broadcast %cst_21 : f32 to vector<32x1536xf32>
    %41 = arith.maximumf %39, %40 : vector<32x1536xf32>
    %cst_22 = arith.constant 1.000000e-03 : f32
    %42 = vector.broadcast %cst_22 : f32 to vector<32x1536xf32>
    %43 = arith.addf %41, %42 : vector<32x1536xf32>
    %44 = vector.shape_cast %43 : vector<32x1536xf32> to vector<2x16x1536xf32>
    %45 = vector.extract_strided_slice %38 {offsets = [0, 1536], sizes = [32, 1536], strides = [1, 1]} : vector<32x3104xf32> to vector<32x1536xf32>
    %cst_23 = arith.constant 0.000000e+00 : f32
    %46 = vector.broadcast %cst_23 : f32 to vector<32x1536xf32>
    %47 = arith.maximumf %45, %46 : vector<32x1536xf32>
    %cst_24 = arith.constant 1.000000e-03 : f32
    %48 = vector.broadcast %cst_24 : f32 to vector<32x1536xf32>
    %49 = arith.addf %47, %48 : vector<32x1536xf32>
    %50 = vector.shape_cast %49 : vector<32x1536xf32> to vector<2x16x1536xf32>
    %51 = vector.extract_strided_slice %38 {offsets = [0, 3072], sizes = [32, 32], strides = [1, 1]} : vector<32x3104xf32> to vector<32x32xf32>
    %52 = vector.shape_cast %51 : vector<32x32xf32> to vector<2x16x32xf32>
    %cst_25 = arith.constant dense<0.000000e+00> : vector<2x1536xf32>
    %53 = vector.multi_reduction <add>, %50, %cst_25 [1] : vector<2x16x1536xf32> to vector<2x1536xf32>
    %54 = vector.shape_cast %53 : vector<2x1536xf32> to vector<2x1x1536xf32>
    %55 = vector.broadcast %54 : vector<2x1x1536xf32> to vector<2x16x1536xf32>
    %56 = arith.mulf %44, %55 : vector<2x16x1536xf32>
    %57 = vector.shape_cast %56 : vector<2x16x1536xf32> to vector<32x1536xf32>
    %58 = arith.truncf %57 : vector<32x1536xf32> to vector<32x1536xbf16>
    %cst_26 = arith.constant dense<0.000000e+00> : vector<32x32xf32>
    %59 = tpu.matmul %58, %3, %cst_26 {dimension_numbers = #tpu.dot_dimension_numbers<[1], [0], [0], [1], [0, 0, 1, 1], [], []>} : vector<32x1536xbf16>, vector<1536x32xbf16>, vector<32x32xf32> -> vector<32x32xf32>
    %60 = arith.truncf %50 : vector<2x16x1536xf32> to vector<2x16x1536xbf16>
    %61 = arith.truncf %52 : vector<2x16x32xf32> to vector<2x16x32xbf16>
    "tpu.trace_start"() <{level = 10 : i32, message = "bsh,bsd->bhd"}> : () -> ()
    %cst_27 = arith.constant dense<0.000000e+00> : vector<2x1536x32xf32>
    %62 = tpu.matmul %60, %61, %cst_27 {dimension_numbers = #tpu.dot_dimension_numbers<[1], [1], [2], [2], [0, 0, 0, 2, 1, 2], [0], [0]>} : vector<2x16x1536xbf16>, vector<2x16x32xbf16>, vector<2x1536x32xf32> -> vector<2x1536x32xf32>
    "tpu.trace_stop"() : () -> ()
    %63 = arith.truncf %62 : vector<2x1536x32xf32> to vector<2x1536x32xbf16>
    %64 = vector.shape_cast %3 : vector<1536x32xbf16> to vector<1x1536x32xbf16>
    %65 = vector.broadcast %64 : vector<1x1536x32xbf16> to vector<2x1536x32xbf16>
    %66 = arith.mulf %63, %65 : vector<2x1536x32xbf16>
    %67 = arith.truncf %44 : vector<2x16x1536xf32> to vector<2x16x1536xbf16>
    "tpu.trace_start"() <{level = 10 : i32, message = "bsh,bhd->bsd"}> : () -> ()
    %cst_28 = arith.constant dense<0.000000e+00> : vector<2x16x32xf32>
    %68 = tpu.matmul %67, %66, %cst_28 {dimension_numbers = #tpu.dot_dimension_numbers<[2], [1], [1], [2], [0, 0, 0, 1, 1, 2], [0], [0]>} : vector<2x16x1536xbf16>, vector<2x1536x32xbf16>, vector<2x16x32xf32> -> vector<2x16x32xf32>
    "tpu.trace_stop"() : () -> ()
    %69 = vector.shape_cast %68 : vector<2x16x32xf32> to vector<32x32xf32>
    %70 = arith.divf %69, %59 : vector<32x32xf32>
    %c0_29 = arith.constant 0 : index
    %c0_30 = arith.constant 0 : index
    %71 = vector.load %arg23[%c0_29, %c0_30] : memref<32x32xf32, #tpu.memory_space<vmem>>, vector<32x32xf32>
    %72 = arith.truncf %70 : vector<32x32xf32> to vector<32x32xbf16>
    %c0_31 = arith.constant 0 : index
    %c0_32 = arith.constant 0 : index
    %c0_33 = arith.constant 0 : index
    %73 = vector.load %arg7[%c0_31, %c0_32, %c0_33] : memref<1x32x32xbf16, #tpu.memory_space<vmem>>, vector<1x32x32xbf16>
    %74 = vector.shape_cast %73 : vector<1x32x32xbf16> to vector<32x32xbf16>
    %cst_34 = arith.constant dense<0.000000e+00> : vector<32x32xf32>
    %75 = tpu.matmul %72, %74, %cst_34 {dimension_numbers = #tpu.dot_dimension_numbers<[1], [0], [0], [1], [0, 0, 1, 1], [], []>} : vector<32x32xbf16>, vector<32x32xbf16>, vector<32x32xf32> -> vector<32x32xf32>
    %76 = arith.addf %71, %75 : vector<32x32xf32>
    %c0_35 = arith.constant 0 : index
    %c0_36 = arith.constant 0 : index
    %c0_37 = arith.constant 0 : index
    %77 = vector.load %arg8[%c0_35, %c0_36, %c0_37] : memref<1x1x32xf32, #tpu.memory_space<vmem>>, vector<1x1x32xf32>
    %78 = vector.shape_cast %77 : vector<1x1x32xf32> to vector<1x32xf32>
    %79 = vector.broadcast %78 : vector<1x32xf32> to vector<32x32xf32>
    %80 = arith.addf %76, %79 : vector<32x32xf32>
    %cst_38 = arith.constant dense<0.000000e+00> : vector<32xf32>
    %81 = vector.multi_reduction <add>, %80, %cst_38 [1] : vector<32x32xf32> to vector<32xf32>
    %82 = vector.shape_cast %81 : vector<32xf32> to vector<32x1xf32>
    %cst_39 = arith.constant 3.200000e+01 : f32
    %83 = vector.broadcast %cst_39 : f32 to vector<32x1xf32>
    %84 = arith.divf %82, %83 : vector<32x1xf32>
    %85 = vector.broadcast %84 : vector<32x1xf32> to vector<32x32xf32>
    %86 = arith.subf %80, %85 : vector<32x32xf32>
    %87 = arith.mulf %86, %86 : vector<32x32xf32>
    %cst_40 = arith.constant dense<0.000000e+00> : vector<32xf32>
    %88 = vector.multi_reduction <add>, %87, %cst_40 [1] : vector<32x32xf32> to vector<32xf32>
    %89 = vector.shape_cast %88 : vector<32xf32> to vector<32x1xf32>
    %cst_41 = arith.constant 3.200000e+01 : f32
    %90 = vector.broadcast %cst_41 : f32 to vector<32x1xf32>
    %91 = arith.divf %89, %90 : vector<32x1xf32>
    %92 = vector.broadcast %84 : vector<32x1xf32> to vector<32x32xf32>
    %93 = arith.subf %80, %92 : vector<32x32xf32>
    %cst_42 = arith.constant 9.99999974E-6 : f32
    %94 = vector.broadcast %cst_42 : f32 to vector<32x1xf32>
    %95 = arith.addf %91, %94 : vector<32x1xf32>
    %96 = math.rsqrt %95 : vector<32x1xf32>
    %97 = vector.broadcast %96 : vector<32x1xf32> to vector<32x32xf32>
    %98 = arith.mulf %93, %97 : vector<32x32xf32>
    %c0_43 = arith.constant 0 : index
    %c0_44 = arith.constant 0 : index
    %c0_45 = arith.constant 0 : index
    %99 = vector.load %arg9[%c0_43, %c0_44, %c0_45] : memref<1x1x32xf32, #tpu.memory_space<vmem>>, vector<1x1x32xf32>
    %100 = vector.shape_cast %99 : vector<1x1x32xf32> to vector<1x32xf32>
    %101 = vector.broadcast %100 : vector<1x32xf32> to vector<32x32xf32>
    %102 = arith.mulf %98, %101 : vector<32x32xf32>
    %c0_46 = arith.constant 0 : index
    %c0_47 = arith.constant 0 : index
    %c0_48 = arith.constant 0 : index
    %103 = vector.load %arg10[%c0_46, %c0_47, %c0_48] : memref<1x1x32xf32, #tpu.memory_space<vmem>>, vector<1x1x32xf32>
    %104 = vector.shape_cast %103 : vector<1x1x32xf32> to vector<1x32xf32>
    %105 = vector.broadcast %104 : vector<1x32xf32> to vector<32x32xf32>
    %106 = arith.addf %102, %105 : vector<32x32xf32>
    %107 = arith.truncf %106 : vector<32x32xf32> to vector<32x32xbf16>
    %c0_49 = arith.constant 0 : index
    %c0_50 = arith.constant 0 : index
    %c0_51 = arith.constant 0 : index
    %108 = vector.load %arg11[%c0_49, %c0_50, %c0_51] : memref<1x32x256xbf16, #tpu.memory_space<vmem>>, vector<1x32x256xbf16>
    %109 = vector.shape_cast %108 : vector<1x32x256xbf16> to vector<32x256xbf16>
    %cst_52 = arith.constant dense<0.000000e+00> : vector<32x256xf32>
    %110 = tpu.matmul %107, %109, %cst_52 {dimension_numbers = #tpu.dot_dimension_numbers<[1], [0], [0], [1], [0, 0, 1, 1], [], []>} : vector<32x32xbf16>, vector<32x256xbf16>, vector<32x256xf32> -> vector<32x256xf32>
    %c0_53 = arith.constant 0 : index
    %c0_54 = arith.constant 0 : index
    %c0_55 = arith.constant 0 : index
    %111 = vector.load %arg12[%c0_53, %c0_54, %c0_55] : memref<1x1x256xf32, #tpu.memory_space<vmem>>, vector<1x1x256xf32>
    %112 = vector.shape_cast %111 : vector<1x1x256xf32> to vector<1x256xf32>
    %113 = vector.broadcast %112 : vector<1x256xf32> to vector<32x256xf32>
    %114 = arith.addf %110, %113 : vector<32x256xf32>
    %115 = vector.extract_strided_slice %114 {offsets = [0, 0], sizes = [32, 128], strides = [1, 1]} : vector<32x256xf32> to vector<32x128xf32>
    %116 = arith.mulf %115, %115 : vector<32x128xf32>
    %117 = arith.mulf %115, %116 : vector<32x128xf32>
    %cst_56 = arith.constant 4.471500e-02 : f32
    %118 = vector.broadcast %cst_56 : f32 to vector<32x128xf32>
    %119 = arith.mulf %118, %117 : vector<32x128xf32>
    %120 = arith.addf %115, %119 : vector<32x128xf32>
    %cst_57 = arith.constant 0.797884583 : f32
    %121 = vector.broadcast %cst_57 : f32 to vector<32x128xf32>
    %122 = arith.mulf %121, %120 : vector<32x128xf32>
    %123 = math.tanh %122 : vector<32x128xf32>
    %cst_58 = arith.constant 1.000000e+00 : f32
    %124 = vector.broadcast %cst_58 : f32 to vector<32x128xf32>
    %125 = arith.addf %124, %123 : vector<32x128xf32>
    %cst_59 = arith.constant 5.000000e-01 : f32
    %126 = vector.broadcast %cst_59 : f32 to vector<32x128xf32>
    %127 = arith.mulf %126, %125 : vector<32x128xf32>
    %128 = arith.mulf %115, %127 : vector<32x128xf32>
    %129 = vector.extract_strided_slice %114 {offsets = [0, 128], sizes = [32, 128], strides = [1, 1]} : vector<32x256xf32> to vector<32x128xf32>
    %130 = arith.mulf %128, %129 : vector<32x128xf32>
    %131 = arith.truncf %130 : vector<32x128xf32> to vector<32x128xbf16>
    %c0_60 = arith.constant 0 : index
    %c0_61 = arith.constant 0 : index
    %c0_62 = arith.constant 0 : index
    %132 = vector.load %arg13[%c0_60, %c0_61, %c0_62] : memref<1x128x32xbf16, #tpu.memory_space<vmem>>, vector<1x128x32xbf16>
    %133 = vector.shape_cast %132 : vector<1x128x32xbf16> to vector<128x32xbf16>
    %cst_63 = arith.constant dense<0.000000e+00> : vector<32x32xf32>
    %134 = tpu.matmul %131, %133, %cst_63 {dimension_numbers = #tpu.dot_dimension_numbers<[1], [0], [0], [1], [0, 0, 1, 1], [], []>} : vector<32x128xbf16>, vector<128x32xbf16>, vector<32x32xf32> -> vector<32x32xf32>
    %135 = arith.addf %4, %134 : vector<32x32xf32>
    %c0_64 = arith.constant 0 : index
    %c0_65 = arith.constant 0 : index
    %c0_66 = arith.constant 0 : index
    %136 = vector.load %arg14[%c0_64, %c0_65, %c0_66] : memref<1x1x32xf32, #tpu.memory_space<vmem>>, vector<1x1x32xf32>
    %137 = vector.shape_cast %136 : vector<1x1x32xf32> to vector<1x32xf32>
    %138 = vector.broadcast %137 : vector<1x32xf32> to vector<32x32xf32>
    %139 = arith.addf %135, %138 : vector<32x32xf32>
    %c0_67 = arith.constant 0 : index
    %c0_68 = arith.constant 0 : index
    %140 = vector.load %arg23[%c0_67, %c0_68] : memref<32x32xf32, #tpu.memory_space<vmem>>, vector<32x32xf32>
    tpu.vector_store %arg23[%c0_67, %c0_68], %80 {strides = array<i32>} : memref<32x32xf32, #tpu.memory_space<vmem>>, vector<32x32xf32>,
    %c0_69 = arith.constant 0 : index
    %c0_70 = arith.constant 0 : index
    %141 = vector.load %arg24[%c0_69, %c0_70] : memref<32x32xf32, #tpu.memory_space<vmem>>, vector<32x32xf32>
    tpu.vector_store %arg24[%c0_69, %c0_70], %139 {strides = array<i32>} : memref<32x32xf32, #tpu.memory_space<vmem>>, vector<32x32xf32>,
    %c1_i32 = arith.constant 1 : i32
    %142 = arith.cmpi eq, %arg0, %c1_i32 : i32
    %143 = arith.extui %142 : i1 to i32
    %c0_i32_71 = arith.constant 0 : i32
    %144 = arith.cmpi ne, %143, %c0_i32_71 : i32
    scf.if %144 {
      %145 = arith.addf %80, %139 : vector<32x32xf32>
      %cst_72 = arith.constant 5.000000e-01 : f32
      %146 = vector.broadcast %cst_72 : f32 to vector<32x32xf32>
      %147 = arith.mulf %146, %145 : vector<32x32xf32>
      %c0_73 = arith.constant 0 : index
      %c0_74 = arith.constant 0 : index
      %148 = vector.load %arg21[%c0_73, %c0_74] : memref<32x32xf32, #tpu.memory_space<vmem>>, vector<32x32xf32>
      tpu.vector_store %arg21[%c0_73, %c0_74], %147 {strides = array<i32>} : memref<32x32xf32, #tpu.memory_space<vmem>>, vector<32x32xf32>,
      %149 = arith.truncf %147 : vector<32x32xf32> to vector<32x32xbf16>
      %c0_75 = arith.constant 0 : index
      %c0_76 = arith.constant 0 : index
      %150 = vector.load %arg15[%c0_75, %c0_76] : memref<32x16xbf16, #tpu.memory_space<vmem>>, vector<32x16xbf16>
      %cst_77 = arith.constant dense<0.000000e+00> : vector<32x16xf32>
      %151 = tpu.matmul %149, %150, %cst_77 {dimension_numbers = #tpu.dot_dimension_numbers<[1], [0], [0], [1], [0, 0, 1, 1], [], []>} : vector<32x32xbf16>, vector<32x16xbf16>, vector<32x16xf32> -> vector<32x16xf32>
      %c0_78 = arith.constant 0 : index
      %c0_79 = arith.constant 0 : index
      %152 = vector.load %arg16[%c0_78, %c0_79] : memref<1x16xf32, #tpu.memory_space<vmem>>, vector<1x16xf32>
      %153 = vector.broadcast %152 : vector<1x16xf32> to vector<32x16xf32>
      %154 = arith.addf %151, %153 : vector<32x16xf32>
      %cst_80 = arith.constant dense<0.000000e+00> : vector<32xf32>
      %155 = vector.multi_reduction <add>, %154, %cst_80 [1] : vector<32x16xf32> to vector<32xf32>
      %156 = vector.shape_cast %155 : vector<32xf32> to vector<32x1xf32>
      %cst_81 = arith.constant 1.600000e+01 : f32
      %157 = vector.broadcast %cst_81 : f32 to vector<32x1xf32>
      %158 = arith.divf %156, %157 : vector<32x1xf32>
      %159 = vector.broadcast %158 : vector<32x1xf32> to vector<32x16xf32>
      %160 = arith.subf %154, %159 : vector<32x16xf32>
      %161 = arith.mulf %160, %160 : vector<32x16xf32>
      %cst_82 = arith.constant dense<0.000000e+00> : vector<32xf32>
      %162 = vector.multi_reduction <add>, %161, %cst_82 [1] : vector<32x16xf32> to vector<32xf32>
      %163 = vector.shape_cast %162 : vector<32xf32> to vector<32x1xf32>
      %cst_83 = arith.constant 1.600000e+01 : f32
      %164 = vector.broadcast %cst_83 : f32 to vector<32x1xf32>
      %165 = arith.divf %163, %164 : vector<32x1xf32>
      %166 = vector.broadcast %158 : vector<32x1xf32> to vector<32x16xf32>
      %167 = arith.subf %154, %166 : vector<32x16xf32>
      %cst_84 = arith.constant 9.99999974E-6 : f32
      %168 = vector.broadcast %cst_84 : f32 to vector<32x1xf32>
      %169 = arith.addf %165, %168 : vector<32x1xf32>
      %170 = math.rsqrt %169 : vector<32x1xf32>
      %171 = vector.broadcast %170 : vector<32x1xf32> to vector<32x16xf32>
      %172 = arith.mulf %167, %171 : vector<32x16xf32>
      %c0_85 = arith.constant 0 : index
      %c0_86 = arith.constant 0 : index
      %173 = vector.load %arg17[%c0_85, %c0_86] : memref<1x16xf32, #tpu.memory_space<vmem>>, vector<1x16xf32>
      %174 = vector.broadcast %173 : vector<1x16xf32> to vector<32x16xf32>
      %175 = arith.mulf %172, %174 : vector<32x16xf32>
      %c0_87 = arith.constant 0 : index
      %c0_88 = arith.constant 0 : index
      %176 = vector.load %arg18[%c0_87, %c0_88] : memref<1x16xf32, #tpu.memory_space<vmem>>, vector<1x16xf32>
      %177 = vector.broadcast %176 : vector<1x16xf32> to vector<32x16xf32>
      %178 = arith.addf %175, %177 : vector<32x16xf32>
      %cst_89 = arith.constant 0.000000e+00 : f32
      %179 = vector.broadcast %cst_89 : f32 to vector<32x16xf32>
      %180 = arith.maximumf %178, %179 : vector<32x16xf32>
      %181 = arith.truncf %180 : vector<32x16xf32> to vector<32x16xbf16>
      %c0_90 = arith.constant 0 : index
      %c0_91 = arith.constant 0 : index
      %182 = vector.load %arg19[%c0_90, %c0_91] : memref<16x1xbf16, #tpu.memory_space<vmem>>, vector<16x1xbf16>
      %cst_92 = arith.constant dense<0.000000e+00> : vector<32x1xf32>
      %183 = tpu.matmul %181, %182, %cst_92 {dimension_numbers = #tpu.dot_dimension_numbers<[1], [0], [0], [1], [0, 0, 1, 1], [], []>} : vector<32x16xbf16>, vector<16x1xbf16>, vector<32x1xf32> -> vector<32x1xf32>
      %c0_93 = arith.constant 0 : index
      %c0_94 = arith.constant 0 : index
      %184 = vector.load %arg20[%c0_93, %c0_94] : memref<1x1xf32, #tpu.memory_space<vmem>>, vector<1x1xf32>
      %185 = vector.broadcast %184 : vector<1x1xf32> to vector<32x1xf32>
      %186 = arith.addf %183, %185 : vector<32x1xf32>
      %c0_95 = arith.constant 0 : index
      %c0_96 = arith.constant 0 : index
      %187 = vector.load %arg22[%c0_95, %c0_96] : memref<32x1xf32, #tpu.memory_space<vmem>>, vector<32x1xf32>
      tpu.vector_store %arg22[%c0_95, %c0_96], %186 {strides = array<i32>} : memref<32x1xf32, #tpu.memory_space<vmem>>, vector<32x1xf32>,
    } else {
    }
    return
  }
  func.func @transform_0(%arg0: i32) -> (i32, i32) {
    %c0_i32 = arith.constant 0 : i32
    %c0_i32_0 = arith.constant 0 : i32
    %c0_i32_1 = arith.constant 0 : i32
    return %c0_i32, %c0_i32_0 : i32, i32
  }
  func.func @transform_1(%arg0: i32) -> (i32, i32, i32) {
    %c0_i32 = arith.constant 0 : i32
    %c0_i32_0 = arith.constant 0 : i32
    %c0_i32_1 = arith.constant 0 : i32
    return %arg0, %c0_i32, %c0_i32_0 : i32, i32, i32
  }
  func.func @transform_2(%arg0: i32) -> (i32, i32, i32) {
    %c0_i32 = arith.constant 0 : i32
    %c0_i32_0 = arith.constant 0 : i32
    %c0_i32_1 = arith.constant 0 : i32
    return %arg0, %c0_i32, %c0_i32_0 : i32, i32, i32
  }
  func.func @transform_3(%arg0: i32) -> (i32, i32, i32) {
    %c0_i32 = arith.constant 0 : i32
    %c0_i32_0 = arith.constant 0 : i32
    %c0_i32_1 = arith.constant 0 : i32
    return %arg0, %c0_i32, %c0_i32_0 : i32, i32, i32
  }
  func.func @transform_4(%arg0: i32) -> (i32, i32, i32) {
    %c0_i32 = arith.constant 0 : i32
    %c0_i32_0 = arith.constant 0 : i32
    %c0_i32_1 = arith.constant 0 : i32
    return %arg0, %c0_i32, %c0_i32_0 : i32, i32, i32
  }
  func.func @transform_5(%arg0: i32) -> (i32, i32) {
    %c0_i32 = arith.constant 0 : i32
    %c0_i32_0 = arith.constant 0 : i32
    %c0_i32_1 = arith.constant 0 : i32
    return %c0_i32, %c0_i32_0 : i32, i32
  }
  func.func @transform_6(%arg0: i32) -> (i32, i32, i32) {
    %c0_i32 = arith.constant 0 : i32
    %c0_i32_0 = arith.constant 0 : i32
    %c0_i32_1 = arith.constant 0 : i32
    return %arg0, %c0_i32, %c0_i32_0 : i32, i32, i32
  }
  func.func @transform_7(%arg0: i32) -> (i32, i32, i32) {
    %c0_i32 = arith.constant 0 : i32
    %c0_i32_0 = arith.constant 0 : i32
    %c0_i32_1 = arith.constant 0 : i32
    return %arg0, %c0_i32, %c0_i32_0 : i32, i32, i32
  }
  func.func @transform_8(%arg0: i32) -> (i32, i32, i32) {
    %c0_i32 = arith.constant 0 : i32
    %c0_i32_0 = arith.constant 0 : i32
    %c0_i32_1 = arith.constant 0 : i32
    return %arg0, %c0_i32, %c0_i32_0 : i32, i32, i32
  }
  func.func @transform_9(%arg0: i32) -> (i32, i32, i32) {
    %c0_i32 = arith.constant 0 : i32
    %c0_i32_0 = arith.constant 0 : i32
    %c0_i32_1 = arith.constant 0 : i32
    return %arg0, %c0_i32, %c0_i32_0 : i32, i32, i32
  }
  func.func @transform_10(%arg0: i32) -> (i32, i32, i32) {
    %c0_i32 = arith.constant 0 : i32
    %c0_i32_0 = arith.constant 0 : i32
    %c0_i32_1 = arith.constant 0 : i32
    return %arg0, %c0_i32, %c0_i32_0 : i32, i32, i32
  }
  func.func @transform_11(%arg0: i32) -> (i32, i32, i32) {
    %c0_i32 = arith.constant 0 : i32
    %c0_i32_0 = arith.constant 0 : i32
    %c0_i32_1 = arith.constant 0 : i32
    return %arg0, %c0_i32, %c0_i32_0 : i32, i32, i32
  }
  func.func @transform_12(%arg0: i32) -> (i32, i32, i32) {
    %c0_i32 = arith.constant 0 : i32
    %c0_i32_0 = arith.constant 0 : i32
    %c0_i32_1 = arith.constant 0 : i32
    return %arg0, %c0_i32, %c0_i32_0 : i32, i32, i32
  }
  func.func @transform_13(%arg0: i32) -> (i32, i32, i32) {
    %c0_i32 = arith.constant 0 : i32
    %c0_i32_0 = arith.constant 0 : i32
    %c0_i32_1 = arith.constant 0 : i32
    return %arg0, %c0_i32, %c0_i32_0 : i32, i32, i32
  }
  func.func @transform_14(%arg0: i32) -> (i32, i32) {
    %c0_i32 = arith.constant 0 : i32
    %c0_i32_0 = arith.constant 0 : i32
    %c0_i32_1 = arith.constant 0 : i32
    return %c0_i32, %c0_i32_0 : i32, i32
  }
  func.func @transform_15(%arg0: i32) -> (i32, i32) {
    %c0_i32 = arith.constant 0 : i32
    %c0_i32_0 = arith.constant 0 : i32
    %c0_i32_1 = arith.constant 0 : i32
    return %c0_i32, %c0_i32_0 : i32, i32
  }
  func.func @transform_16(%arg0: i32) -> (i32, i32) {
    %c0_i32 = arith.constant 0 : i32
    %c0_i32_0 = arith.constant 0 : i32
    %c0_i32_1 = arith.constant 0 : i32
    return %c0_i32, %c0_i32_0 : i32, i32
  }
  func.func @transform_17(%arg0: i32) -> (i32, i32) {
    %c0_i32 = arith.constant 0 : i32
    %c0_i32_0 = arith.constant 0 : i32
    %c0_i32_1 = arith.constant 0 : i32
    return %c0_i32, %c0_i32_0 : i32, i32
  }
  func.func @transform_18(%arg0: i32) -> (i32, i32) {
    %c0_i32 = arith.constant 0 : i32
    %c0_i32_0 = arith.constant 0 : i32
    %c0_i32_1 = arith.constant 0 : i32
    return %c0_i32, %c0_i32_0 : i32, i32
  }
  func.func @transform_19(%arg0: i32) -> (i32, i32) {
    %c0_i32 = arith.constant 0 : i32
    %c0_i32_0 = arith.constant 0 : i32
    %c0_i32_1 = arith.constant 0 : i32
    return %c0_i32, %c0_i32_0 : i32, i32
  }
  func.func @transform_20(%arg0: i32) -> (i32, i32) {
    %c0_i32 = arith.constant 0 : i32
    %c0_i32_0 = arith.constant 0 : i32
    %c0_i32_1 = arith.constant 0 : i32
    return %c0_i32, %c0_i32_0 : i32, i32
  }
  func.func @transform_21(%arg0: i32) -> (i32, i32) {
    %c0_i32 = arith.constant 0 : i32
    %c0_i32_0 = arith.constant 0 : i32
    %c0_i32_1 = arith.constant 0 : i32
    return %c0_i32, %c0_i32_0 : i32, i32
  }
}

</mosaic_0001>

<bundles_post_ra>
// kernel: mel_performer_forward.2
= control target key start
LH: loop header
LB: loop body
LE: loop exit
PB: predicated region body
PF: predicated region fallthrough
CT: control target
= control target key end

     0   :  { %vm377_vm0 = vcmask 1043456   ;;  %vm378_vm1 = vcmask 1044480   ;;  %vm280_vm2 = vcmask 72704   ;;  %v3965_v1 = vmov 65535   ;;  %s6256_s1 = inlined_call_operand.vmem [shape: bf16[9,16], index: 1, kind: input, shape index: {}]   ;;  %s6257_s0 = inlined_call_operand.vmem [shape: bf16[512,9], index: 0, kind: input, shape index: {}]   ;;  %s6258_s5 = inlined_call_operand.vmem [shape: bf16[16,32], index: 5, kind: input, shape index: {}]   ;;  %s6259_s3 = inlined_call_operand.vmem [shape: f32[9,1,1,16], index: 3, kind: input, shape index: {}]   ;;  %s6260_s2 = inlined_call_operand.vmem [shape: f32[1,16], index: 2, kind: input, shape index: {}]   ;;  %s6261_s4 = inlined_call_operand.vmem [shape: f32[1,1,1,16], index: 4, kind: input, shape index: {}]   ;;  %s6262_s7 = inlined_call_operand.vmem [shape: bf16[32,32], index: 7, kind: input, shape index: {}]   ;;  %s6263_s6 = inlined_call_operand.vmem [shape: f32[1,32], index: 6, kind: input, shape index: {}]   ;;  %s6264_s8 = inlined_call_operand.vmem [shape: f32[1,32], index: 8, kind: input, shape index: {}]   ;;  %s6265_s9 = inlined_call_operand.vmem [shape: f32[1,32], index: 9, kind: input, shape index: {}]   ;;  %s6266_s10 = inlined_call_operand.vmem [shape: f32[1,32], index: 10, kind: input, shape index: {}]   ;;  %s6267_s11 = inlined_call_operand.vmem [shape: f32[32,32], index: 11, kind: input, shape index: {}]   ;;  %s6268_s12 = inlined_call_operand.vmem [shape: f32[32,32], index: 12, kind: output, shape index: {}]  }
   0x1   :  { %v3889_v0 = vld [vmem:[%s6256_s1] sm:$0x1f]   ;;  %v379_v2 = vsel %vm377_vm0, 4294967295, %v3965_v1  ;;  %v3891_v6 = vld [vmem:[%s6257_s0 + $0x8] sm:$0xff]   ;;  %v3892_v7 = vld [vmem:[%s6257_s0 + $0x10] sm:$0xff]   ;;  %vm737_vm3 = vcmask 130048  }
   0x2   :  { %v3890_v3 = vld [vmem:[%s6257_s0] sm:$0xff]   ;;  %v380_v4 = vsel %vm378_vm1, %v379_v2, 0  ;;  %v3893_v8 = vld [vmem:[%s6257_s0 + $0x18] sm:$0xff]   ;;  %v3895_v10 = vld [vmem:[%s6257_s0 + $0x28] sm:$0xff]   ;;  %v3966_v24 = vmov 0.0   ;;  %vm3251_vm4 = vcmask 261120  }
   0x3   :  { %v382_v5 = vand.u32 %v3889_v0, %v380_v4  ;;  %3749 = vmatprep.mubr.msk.bf16.mxu0 %vm280_vm2, %v3890_v3  ;;  %v3894_v9 = vld [vmem:[%s6257_s0 + $0x20] sm:$0xff]   ;;  %v3896_v11 = vld [vmem:[%s6257_s0 + $0x30] sm:$0xff]   ;;  %v3897_v12 = vld [vmem:[%s6257_s0 + $0x38] sm:$0xff]   ;;  %747 = vst.msk [vmem:[#allocation2 + $0x48] sm:$0xff] %vm737_vm3, %v3966_v24 }
   0x4   :  { %v3898_v13 = vld [vmem:[%s6257_s0 + $0x40] sm:$0xff]   ;;  %v3899_v14 = vld [vmem:[%s6257_s0 + $0x48] sm:$0xff]   ;;  %v3900_v15 = vld [vmem:[%s6257_s0 + $0x50] sm:$0xff]   ;;  %738 = vst.msk [vmem:[#allocation2] sm:$0xff] %vm737_vm3, %v3966_v24 }
   0x5   :  { %3747 = vmatprep.subr.bf16.mxu0 %v382_v5  ;;  %v3901_v16 = vld [vmem:[%s6257_s0 + $0x58] sm:$0xff]   ;;  %v3902_v17 = vld [vmem:[%s6257_s0 + $0x60] sm:$0xff]   ;;  %v3903_v18 = vld [vmem:[%s6257_s0 + $0x68] sm:$0xff]   ;;  %739 = vst.msk [vmem:[#allocation2 + $0x8] sm:$0xff] %vm737_vm3, %v3966_v24 }
   0x6   :  { %3748 = vmatpush3.bf16.msra.mxu0 %v382_v5  ;;  %v3904_v19 = vld [vmem:[%s6257_s0 + $0x70] sm:$0xff]   ;;  %v3905_v20 = vld [vmem:[%s6257_s0 + $0x78] sm:$0xff]   ;;  %v3906_v21 = vld [vmem:[%s6257_s0 + $0x80] sm:$0xff]   ;;  %740 = vst.msk [vmem:[#allocation2 + $0x10] sm:$0xff] %vm737_vm3, %v3966_v24 }
   0x7   :  { %v3907_v22 = vld [vmem:[%s6257_s0 + $0x88] sm:$0xff]   ;;  %v3908_v23 = vld [vmem:[%s6257_s0 + $0x90] sm:$0xff]   ;;  %741 = vst.msk [vmem:[#allocation2 + $0x18] sm:$0xff] %vm737_vm3, %v3966_v24  ;;  %742 = vst.msk [vmem:[#allocation2 + $0x20] sm:$0xff] %vm737_vm3, %v3966_v24 }
   0x8   :  { %743 = vst.msk [vmem:[#allocation2 + $0x28] sm:$0xff] %vm737_vm3, %v3966_v24  ;;  %744 = vst.msk [vmem:[#allocation2 + $0x30] sm:$0xff] %vm737_vm3, %v3966_v24  ;;  %v3909_v25 = vld [vmem:[%s6257_s0 + $0x98] sm:$0xff]   ;;  %v3910_v26 = vld [vmem:[%s6257_s0 + $0xa0] sm:$0xff]  }
   0x9   :  { %3750 = vmatmul.mubr.msk.bf16.vlgmr.msra.gmra.mxu0 %vm280_vm2, %v3891_v6  ;;  %745 = vst.msk [vmem:[#allocation2 + $0x38] sm:$0xff] %vm737_vm3, %v3966_v24  ;;  %746 = vst.msk [vmem:[#allocation2 + $0x40] sm:$0xff] %vm737_vm3, %v3966_v24  ;;  %v3911_v27 = vld [vmem:[%s6257_s0 + $0xa8] sm:$0xff]   ;;  %v3912_v28 = vld [vmem:[%s6257_s0 + $0xb0] sm:$0xff]  }
   0xa   :  { %3753 = vmatprep.mubr.msk.bf16.mxu0 %vm280_vm2, %v3892_v7  ;;  %748 = vst.msk [vmem:[#allocation2 + $0x50] sm:$0xff] %vm737_vm3, %v3966_v24  ;;  %749 = vst.msk [vmem:[#allocation2 + $0x58] sm:$0xff] %vm737_vm3, %v3966_v24  ;;  %v3913_v29 = vld [vmem:[%s6257_s0 + $0xb8] sm:$0xff]   ;;  %v3914_v30 = vld [vmem:[%s6257_s0 + $0xc0] sm:$0xff]  }
   0xb   :  { %750 = vst.msk [vmem:[#allocation2 + $0x60] sm:$0xff] %vm737_vm3, %v3966_v24  ;;  %751 = vst.msk [vmem:[#allocation2 + $0x68] sm:$0xff] %vm737_vm3, %v3966_v24  ;;  %v3915_v31 = vld [vmem:[%s6257_s0 + $0xc8] sm:$0xff]   ;;  %v3916_v32 = vld [vmem:[%s6257_s0 + $0xd0] sm:$0xff]  }
   0xc   :  { %752 = vst.msk [vmem:[#allocation2 + $0x70] sm:$0xff] %vm737_vm3, %v3966_v24  ;;  %753 = vst.msk [vmem:[#allocation2 + $0x78] sm:$0xff] %vm737_vm3, %v3966_v24  ;;  %v3917_v33 = vld [vmem:[%s6257_s0 + $0xd8] sm:$0xff]   ;;  %v3922_v34 = vld [vmem:[%s6258_s5] sm:$0xff]  }
   0xd   :  { %754 = vst.msk [vmem:[#allocation2 + $0x80] sm:$0xff] %vm737_vm3, %v3966_v24  ;;  %755 = vst.msk [vmem:[#allocation2 + $0x88] sm:$0xff] %vm737_vm3, %v3966_v24  ;;  %v3918_v35 = vld [vmem:[%s6257_s0 + $0xe0] sm:$0xff]   ;;  %3813 = vmatprep.subr.bf16.mxu1 %v3922_v34  ;;  %v3919_v36 = vld [vmem:[%s6257_s0 + $0xe8] sm:$0xff]  }
   0xe   :  { %756 = vst.msk [vmem:[#allocation2 + $0x90] sm:$0xff] %vm737_vm3, %v3966_v24  ;;  %757 = vst.msk [vmem:[#allocation2 + $0x98] sm:$0xff] %vm737_vm3, %v3966_v24  ;;  %3814 = vmatpush3.bf16.msra.mxu1 %v3922_v34  ;;  %v3920_v37 = vld [vmem:[%s6257_s0 + $0xf0] sm:$0xff]   ;;  %v3921_v38 = vld [vmem:[%s6257_s0 + $0xf8] sm:$0xff]  }
   0xf   :  { %758 = vst.msk [vmem:[#allocation2 + $0xa0] sm:$0xff] %vm737_vm3, %v3966_v24  ;;  %759 = vst.msk [vmem:[#allocation2 + $0xa8] sm:$0xff] %vm737_vm3, %v3966_v24  ;;  %v955_v39 = vld [vmem:[#allocation2 + $0x7] sm:$0xff]  ;;  %v4457_v40 = vld [vmem:[%s6259_s3] ss:$0 sm:$0xff] }
  0x10   :  { %760 = vst.msk [vmem:[#allocation2 + $0xb0] sm:$0xff] %vm737_vm3, %v3966_v24  ;;  %761 = vst.msk [vmem:[#allocation2 + $0xb8] sm:$0xff] %vm737_vm3, %v3966_v24  ;;  %v4462_v41 = vld [vmem:[%s6260_s2] ss:$0 sm:$0xff]  ;;  %v956_v42 = vld [vmem:[#allocation2 + $0xf] sm:$0xff]  ;;  %v1026_v44 = vmul.f32 %v4457_v40, %v955_v39 }
  0x11   :  { %3754 = vmatmul.mubr.msk.bf16.gmra.mxu0 %vm280_vm2, %v3893_v8  ;;  %762 = vst.msk [vmem:[#allocation2 + $0xc0] sm:$0xff] %vm737_vm3, %v3966_v24  ;;  %763 = vst.msk [vmem:[#allocation2 + $0xc8] sm:$0xff] %vm737_vm3, %v3966_v24  ;;  %v4469_v46 = vld [vmem:[%s6261_s4] ss:$0 sm:$0xff]  ;;  %v1027_v47 = vmul.f32 %v4457_v40, %v956_v42  ;;  %v1154_v48 = vld [vmem:[#allocation2 + $0x8] sm:$0xff] }
  0x12   :  { %3757 = vmatprep.mubr.msk.bf16.mxu0 %vm280_vm2, %v3894_v9  ;;  %764 = vst.msk [vmem:[#allocation2 + $0xd0] sm:$0xff] %vm737_vm3, %v3966_v24  ;;  %765 = vst.msk [vmem:[#allocation2 + $0xd8] sm:$0xff] %vm737_vm3, %v3966_v24  ;;  %v4475_v49 = vld [vmem:[%s6259_s3 + $0x1] ss:$0 sm:$0xff]  ;;  %v1155_v51 = vld [vmem:[#allocation2 + $0x10] sm:$0xff]  ;;  %v1090_v55 = vadd.f32 %v4469_v46, %v1026_v44 }
  0x13   :  { %766 = vst.msk [vmem:[#allocation2 + $0xe0] sm:$0xff] %vm737_vm3, %v3966_v24  ;;  %767 = vst.msk [vmem:[#allocation2 + $0xe8] sm:$0xff] %vm737_vm3, %v3966_v24  ;;  %v1226_v56 = vmul.f32 %v4475_v49, %v1154_v48  ;;  %v1091_v59 = vadd.f32 %v4469_v46, %v1027_v47  ;;  %v1227_v60 = vmul.f32 %v4475_v49, %v1155_v51  ;;  %v1354_v61 = vld [vmem:[#allocation2 + $0x9] sm:$0xff]  ;;  %v4487_v62 = vld [vmem:[%s6259_s3 + $0x2] ss:$0 sm:$0xff] }
  0x14   :  { %768 = vst.msk [vmem:[#allocation2 + $0xf0] sm:$0xff] %vm737_vm3, %v3966_v24  ;;  %769 = vst.msk [vmem:[#allocation2 + $0xf8] sm:$0xff] %vm737_vm3, %v3966_v24  ;;  %v1355_v0 = vld [vmem:[#allocation2 + $0x11] sm:$0xff]  ;;  %v1426_v5 = vmul.f32 %v4487_v62, %v1354_v61  ;;  %v4533_v34 = vld [vmem:[%s6259_s3 + $0x8] ss:$0 sm:$0xff] }
  0x15   :  { %770 = vst.msk [vmem:[#allocation2 + $0x100] sm:$0xff] %vm737_vm3, %v3966_v24  ;;  %771 = vst.msk [vmem:[#allocation2 + $0x108] sm:$0xff] %vm737_vm3, %v3966_v24  ;;  %v1290_v4 = vadd.f32 %v1226_v56, %v1090_v55  ;;  %v1291_v8 = vadd.f32 %v1227_v60, %v1091_v59  ;;  %v1427_v9 = vmul.f32 %v4487_v62, %v1355_v0 }
  0x16   :  { %772 = vst.msk [vmem:[#allocation2 + $0x110] sm:$0xff] %vm737_vm3, %v3966_v24  ;;  %773 = vst.msk [vmem:[#allocation2 + $0x118] sm:$0xff] %vm737_vm3, %v3966_v24 }
  0x17   :  { %774 = vst.msk [vmem:[#allocation2 + $0x120] sm:$0xff] %vm737_vm3, %v3966_v24  ;;  %775 = vst.msk [vmem:[#allocation2 + $0x128] sm:$0xff] %vm737_vm3, %v3966_v24 }
  0x18   :  { %776 = vst.msk [vmem:[#allocation2 + $0x130] sm:$0xff] %vm737_vm3, %v3966_v24  ;;  %777 = vst.msk [vmem:[#allocation2 + $0x138] sm:$0xff] %vm737_vm3, %v3966_v24 }
  0x19   :  { %3758 = vmatmul.mubr.msk.bf16.gmra.mxu0 %vm280_vm2, %v3895_v10  ;;  %778 = vst.msk [vmem:[#allocation2 + $0x140] sm:$0xff] %vm737_vm3, %v3966_v24  ;;  %779 = vst.msk [vmem:[#allocation2 + $0x148] sm:$0xff] %vm737_vm3, %v3966_v24 }
  0x1a   :  { %3761 = vmatprep.mubr.msk.bf16.mxu0 %vm280_vm2, %v3896_v11  ;;  %780 = vst.msk [vmem:[#allocation2 + $0x150] sm:$0xff] %vm737_vm3, %v3966_v24  ;;  %781 = vst.msk [vmem:[#allocation2 + $0x158] sm:$0xff] %vm737_vm3, %v3966_v24  ;;  %v4498_v11 = vld [vmem:[%s6259_s3 + $0x3] ss:$0 sm:$0xff] }
  0x1b   :  { %782 = vst.msk [vmem:[#allocation2 + $0x160] sm:$0xff] %vm737_vm3, %v3966_v24  ;;  %783 = vst.msk [vmem:[#allocation2 + $0x168] sm:$0xff] %vm737_vm3, %v3966_v24 }
  0x1c   :  { %784 = vst.msk [vmem:[#allocation2 + $0x170] sm:$0xff] %vm737_vm3, %v3966_v24  ;;  %785 = vst.msk [vmem:[#allocation2 + $0x178] sm:$0xff] %vm737_vm3, %v3966_v24 }
  0x1d   :  { %786 = vst.msk [vmem:[#allocation2 + $0x180] sm:$0xff] %vm737_vm3, %v3966_v24  ;;  %787 = vst.msk [vmem:[#allocation2 + $0x188] sm:$0xff] %vm737_vm3, %v3966_v24 }
  0x1e   :  { %788 = vst.msk [vmem:[#allocation2 + $0x190] sm:$0xff] %vm737_vm3, %v3966_v24  ;;  %789 = vst.msk [vmem:[#allocation2 + $0x198] sm:$0xff] %vm737_vm3, %v3966_v24 }
  0x1f   :  { %790 = vst.msk [vmem:[#allocation2 + $0x1a0] sm:$0xff] %vm737_vm3, %v3966_v24  ;;  %791 = vst.msk [vmem:[#allocation2 + $0x1a8] sm:$0xff] %vm737_vm3, %v3966_v24 }
  0x20   :  { %792 = vst.msk [vmem:[#allocation2 + $0x1b0] sm:$0xff] %vm737_vm3, %v3966_v24  ;;  %793 = vst.msk [vmem:[#allocation2 + $0x1b8] sm:$0xff] %vm737_vm3, %v3966_v24 }
  0x21   :  { %3762 = vmatmul.mubr.msk.bf16.gmra.mxu0 %vm280_vm2, %v3897_v12  ;;  %794 = vst.msk [vmem:[#allocation2 + $0x1c0] sm:$0xff] %vm737_vm3, %v3966_v24  ;;  %795 = vst.msk [vmem:[#allocation2 + $0x1c8] sm:$0xff] %vm737_vm3, %v3966_v24 }
  0x22   :  { %3765 = vmatprep.mubr.msk.bf16.mxu0 %vm280_vm2, %v3898_v13  ;;  %796 = vst.msk [vmem:[#allocation2 + $0x1d0] sm:$0xff] %vm737_vm3, %v3966_v24  ;;  %797 = vst.msk [vmem:[#allocation2 + $0x1d8] sm:$0xff] %vm737_vm3, %v3966_v24 }
  0x23   :  { %798 = vst.msk [vmem:[#allocation2 + $0x1e0] sm:$0xff] %vm737_vm3, %v3966_v24  ;;  %799 = vst.msk [vmem:[#allocation2 + $0x1e8] sm:$0xff] %vm737_vm3, %v3966_v24 }
  0x24   :  { %800 = vst.msk [vmem:[#allocation2 + $0x1f0] sm:$0xff] %vm737_vm3, %v3966_v24  ;;  %801 = vst.msk [vmem:[#allocation2 + $0x1f8] sm:$0xff] %vm737_vm3, %v3966_v24 }
  0x25   :  { %802 = vst.msk [vmem:[#allocation2 + $0x200] sm:$0xff] %vm737_vm3, %v3966_v24  ;;  %803 = vst.msk [vmem:[#allocation2 + $0x208] sm:$0xff] %vm737_vm3, %v3966_v24 }
  0x26   :  { %804 = vst.msk [vmem:[#allocation2 + $0x210] sm:$0xff] %vm737_vm3, %v3966_v24  ;;  %805 = vst.msk [vmem:[#allocation2 + $0x218] sm:$0xff] %vm737_vm3, %v3966_v24 }
  0x27   :  { %806 = vst.msk [vmem:[#allocation2 + $0x220] sm:$0xff] %vm737_vm3, %v3966_v24  ;;  %807 = vst.msk [vmem:[#allocation2 + $0x228] sm:$0xff] %vm737_vm3, %v3966_v24 }
  0x28   :  { %808 = vst.msk [vmem:[#allocation2 + $0x230] sm:$0xff] %vm737_vm3, %v3966_v24  ;;  %809 = vst.msk [vmem:[#allocation2 + $0x238] sm:$0xff] %vm737_vm3, %v3966_v24 }
  0x29   :  { %3766 = vmatmul.mubr.msk.bf16.gmra.mxu0 %vm280_vm2, %v3899_v14  ;;  %810 = vst.msk [vmem:[#allocation2 + $0x240] sm:$0xff] %vm737_vm3, %v3966_v24  ;;  %811 = vst.msk [vmem:[#allocation2 + $0x248] sm:$0xff] %vm737_vm3, %v3966_v24  ;;  %v4505_v14 = vld [vmem:[%s6259_s3 + $0x6] ss:$0 sm:$0xff] }
  0x2a   :  { %3769 = vmatprep.mubr.msk.bf16.mxu0 %vm280_vm2, %v3900_v15  ;;  %812 = vst.msk [vmem:[#allocation2 + $0x250] sm:$0xff] %vm737_vm3, %v3966_v24  ;;  %813 = vst.msk [vmem:[#allocation2 + $0x258] sm:$0xff] %vm737_vm3, %v3966_v24  ;;  %v4510_v15 = vld [vmem:[%s6259_s3 + $0x7] ss:$0 sm:$0xff] }
  0x2b   :  { %814 = vst.msk [vmem:[#allocation2 + $0x260] sm:$0xff] %vm737_vm3, %v3966_v24  ;;  %815 = vst.msk [vmem:[#allocation2 + $0x268] sm:$0xff] %vm737_vm3, %v3966_v24 }
  0x2c   :  { %816 = vst.msk [vmem:[#allocation2 + $0x270] sm:$0xff] %vm737_vm3, %v3966_v24  ;;  %817 = vst.msk [vmem:[#allocation2 + $0x278] sm:$0xff] %vm737_vm3, %v3966_v24 }
  0x2d   :  { %818 = vst.msk [vmem:[#allocation2 + $0x280] sm:$0xff] %vm737_vm3, %v3966_v24  ;;  %819 = vst.msk [vmem:[#allocation2 + $0x288] sm:$0xff] %vm737_vm3, %v3966_v24 }
  0x2e   :  { %820 = vst.msk [vmem:[#allocation2 + $0x290] sm:$0xff] %vm737_vm3, %v3966_v24  ;;  %821 = vst.msk [vmem:[#allocation2 + $0x298] sm:$0xff] %vm737_vm3, %v3966_v24 }
  0x2f   :  { %822 = vst.msk [vmem:[#allocation2 + $0x2a0] sm:$0xff] %vm737_vm3, %v3966_v24  ;;  %823 = vst.msk [vmem:[#allocation2 + $0x2a8] sm:$0xff] %vm737_vm3, %v3966_v24 }
  0x30   :  { %824 = vst.msk [vmem:[#allocation2 + $0x2b0] sm:$0xff] %vm737_vm3, %v3966_v24  ;;  %825 = vst.msk [vmem:[#allocation2 + $0x2b8] sm:$0xff] %vm737_vm3, %v3966_v24 }
  0x31   :  { %3770 = vmatmul.mubr.msk.bf16.gmra.mxu0 %vm280_vm2, %v3901_v16  ;;  %826 = vst.msk [vmem:[#allocation2 + $0x2c0] sm:$0xff] %vm737_vm3, %v3966_v24  ;;  %827 = vst.msk [vmem:[#allocation2 + $0x2c8] sm:$0xff] %vm737_vm3, %v3966_v24 }
  0x32   :  { %3773 = vmatprep.mubr.msk.bf16.mxu0 %vm280_vm2, %v3902_v17  ;;  %828 = vst.msk [vmem:[#allocation2 + $0x2d0] sm:$0xff] %vm737_vm3, %v3966_v24  ;;  %829 = vst.msk [vmem:[#allocation2 + $0x2d8] sm:$0xff] %vm737_vm3, %v3966_v24  ;;  %v4515_v17 = vld [vmem:[%s6259_s3 + $0x4] ss:$0 sm:$0xff] }
  0x33   :  { %830 = vst.msk [vmem:[#allocation2 + $0x2e0] sm:$0xff] %vm737_vm3, %v3966_v24  ;;  %831 = vst.msk [vmem:[#allocation2 + $0x2e8] sm:$0xff] %vm737_vm3, %v3966_v24 }
  0x34   :  { %832 = vst.msk [vmem:[#allocation2 + $0x2f0] sm:$0xff] %vm737_vm3, %v3966_v24  ;;  %833 = vst.msk [vmem:[#allocation2 + $0x2f8] sm:$0xff] %vm737_vm3, %v3966_v24 }
  0x35   :  { %834 = vst.msk [vmem:[#allocation2 + $0x300] sm:$0xff] %vm737_vm3, %v3966_v24  ;;  %835 = vst.msk [vmem:[#allocation2 + $0x308] sm:$0xff] %vm737_vm3, %v3966_v24 }
  0x36   :  { %836 = vst.msk [vmem:[#allocation2 + $0x310] sm:$0xff] %vm737_vm3, %v3966_v24  ;;  %837 = vst.msk [vmem:[#allocation2 + $0x318] sm:$0xff] %vm737_vm3, %v3966_v24 }
  0x37   :  { %838 = vst.msk [vmem:[#allocation2 + $0x320] sm:$0xff] %vm737_vm3, %v3966_v24  ;;  %839 = vst.msk [vmem:[#allocation2 + $0x328] sm:$0xff] %vm737_vm3, %v3966_v24 }
  0x38   :  { %840 = vst.msk [vmem:[#allocation2 + $0x330] sm:$0xff] %vm737_vm3, %v3966_v24  ;;  %841 = vst.msk [vmem:[#allocation2 + $0x338] sm:$0xff] %vm737_vm3, %v3966_v24 }
  0x39   :  { %3774 = vmatmul.mubr.msk.bf16.gmra.mxu0 %vm280_vm2, %v3903_v18  ;;  %842 = vst.msk [vmem:[#allocation2 + $0x340] sm:$0xff] %vm737_vm3, %v3966_v24  ;;  %843 = vst.msk [vmem:[#allocation2 + $0x348] sm:$0xff] %vm737_vm3, %v3966_v24 }
  0x3a   :  { %3777 = vmatprep.mubr.msk.bf16.mxu0 %vm280_vm2, %v3904_v19  ;;  %844 = vst.msk [vmem:[#allocation2 + $0x350] sm:$0xff] %vm737_vm3, %v3966_v24  ;;  %845 = vst.msk [vmem:[#allocation2 + $0x358] sm:$0xff] %vm737_vm3, %v3966_v24 }
  0x3b   :  { %846 = vst.msk [vmem:[#allocation2 + $0x360] sm:$0xff] %vm737_vm3, %v3966_v24  ;;  %847 = vst.msk [vmem:[#allocation2 + $0x368] sm:$0xff] %vm737_vm3, %v3966_v24 }
  0x3c   :  { %848 = vst.msk [vmem:[#allocation2 + $0x370] sm:$0xff] %vm737_vm3, %v3966_v24  ;;  %849 = vst.msk [vmem:[#allocation2 + $0x378] sm:$0xff] %vm737_vm3, %v3966_v24 }
  0x3d   :  { %850 = vst.msk [vmem:[#allocation2 + $0x380] sm:$0xff] %vm737_vm3, %v3966_v24  ;;  %851 = vst.msk [vmem:[#allocation2 + $0x388] sm:$0xff] %vm737_vm3, %v3966_v24 }
  0x3e   :  { %852 = vst.msk [vmem:[#allocation2 + $0x390] sm:$0xff] %vm737_vm3, %v3966_v24  ;;  %853 = vst.msk [vmem:[#allocation2 + $0x398] sm:$0xff] %vm737_vm3, %v3966_v24 }
  0x3f   :  { %854 = vst.msk [vmem:[#allocation2 + $0x3a0] sm:$0xff] %vm737_vm3, %v3966_v24  ;;  %855 = vst.msk [vmem:[#allocation2 + $0x3a8] sm:$0xff] %vm737_vm3, %v3966_v24 }
  0x40   :  { %856 = vst.msk [vmem:[#allocation2 + $0x3b0] sm:$0xff] %vm737_vm3, %v3966_v24  ;;  %857 = vst.msk [vmem:[#allocation2 + $0x3b8] sm:$0xff] %vm737_vm3, %v3966_v24 }
  0x41   :  { %3778 = vmatmul.mubr.msk.bf16.gmra.mxu0 %vm280_vm2, %v3905_v20  ;;  %858 = vst.msk [vmem:[#allocation2 + $0x3c0] sm:$0xff] %vm737_vm3, %v3966_v24  ;;  %859 = vst.msk [vmem:[#allocation2 + $0x3c8] sm:$0xff] %vm737_vm3, %v3966_v24 }
  0x42   :  { %3781 = vmatprep.mubr.msk.bf16.mxu0 %vm280_vm2, %v3906_v21  ;;  %860 = vst.msk [vmem:[#allocation2 + $0x3d0] sm:$0xff] %vm737_vm3, %v3966_v24  ;;  %861 = vst.msk [vmem:[#allocation2 + $0x3d8] sm:$0xff] %vm737_vm3, %v3966_v24 }
  0x43   :  { %862 = vst.msk [vmem:[#allocation2 + $0x3e0] sm:$0xff] %vm737_vm3, %v3966_v24  ;;  %863 = vst.msk [vmem:[#allocation2 + $0x3e8] sm:$0xff] %vm737_vm3, %v3966_v24 }
  0x44   :  { %864 = vst.msk [vmem:[#allocation2 + $0x3f0] sm:$0xff] %vm737_vm3, %v3966_v24  ;;  %865 = vst.msk [vmem:[#allocation2 + $0x3f8] sm:$0xff] %vm737_vm3, %v3966_v24 }
  0x45   :  { %866 = vst.msk [vmem:[#allocation2 + $0x400] sm:$0xff] %vm737_vm3, %v3966_v24  ;;  %867 = vst.msk [vmem:[#allocation2 + $0x408] sm:$0xff] %vm737_vm3, %v3966_v24 }
  0x46   :  { %868 = vst.msk [vmem:[#allocation2 + $0x410] sm:$0xff] %vm737_vm3, %v3966_v24  ;;  %869 = vst.msk [vmem:[#allocation2 + $0x418] sm:$0xff] %vm737_vm3, %v3966_v24 }
  0x47   :  { %870 = vst.msk [vmem:[#allocation2 + $0x420] sm:$0xff] %vm737_vm3, %v3966_v24  ;;  %871 = vst.msk [vmem:[#allocation2 + $0x428] sm:$0xff] %vm737_vm3, %v3966_v24 }
  0x48   :  { %872 = vst.msk [vmem:[#allocation2 + $0x430] sm:$0xff] %vm737_vm3, %v3966_v24  ;;  %873 = vst.msk [vmem:[#allocation2 + $0x438] sm:$0xff] %vm737_vm3, %v3966_v24 }
  0x49   :  { %3782 = vmatmul.mubr.msk.bf16.gmra.mxu0 %vm280_vm2, %v3907_v22  ;;  %874 = vst.msk [vmem:[#allocation2 + $0x440] sm:$0xff] %vm737_vm3, %v3966_v24  ;;  %875 = vst.msk [vmem:[#allocation2 + $0x448] sm:$0xff] %vm737_vm3, %v3966_v24  ;;  %v1490_v22 = vadd.f32 %v1426_v5, %v1290_v4 }
  0x4a   :  { %3785 = vmatprep.mubr.msk.bf16.mxu0 %vm280_vm2, %v3908_v23  ;;  %876 = vst.msk [vmem:[#allocation2 + $0x450] sm:$0xff] %vm737_vm3, %v3966_v24  ;;  %877 = vst.msk [vmem:[#allocation2 + $0x458] sm:$0xff] %vm737_vm3, %v3966_v24  ;;  %v1491_v23 = vadd.f32 %v1427_v9, %v1291_v8 }
  0x4b   :  { %878 = vst.msk [vmem:[#allocation2 + $0x460] sm:$0xff] %vm737_vm3, %v3966_v24  ;;  %879 = vst.msk [vmem:[#allocation2 + $0x468] sm:$0xff] %vm737_vm3, %v3966_v24 }
  0x4c   :  { %880 = vst.msk [vmem:[#allocation2 + $0x470] sm:$0xff] %vm737_vm3, %v3966_v24  ;;  %881 = vst.msk [vmem:[#allocation2 + $0x478] sm:$0xff] %vm737_vm3, %v3966_v24 }
  0x51   :  { %3786 = vmatmul.mubr.msk.bf16.gmra.mxu0 %vm280_vm2, %v3909_v25 }
  0x52   :  { %3789 = vmatprep.mubr.msk.bf16.mxu0 %vm280_vm2, %v3910_v26 }
  0x59   :  { %3790 = vmatmul.mubr.msk.bf16.gmra.mxu0 %vm280_vm2, %v3911_v27 }
  0x5a   :  { %3793 = vmatprep.mubr.msk.bf16.mxu0 %vm280_vm2, %v3912_v28 }
  0x61   :  { %3794 = vmatmul.mubr.msk.bf16.gmra.mxu0 %vm280_vm2, %v3913_v29 }
  0x62   :  { %3797 = vmatprep.mubr.msk.bf16.mxu0 %vm280_vm2, %v3914_v30 }
  0x69   :  { %3798 = vmatmul.mubr.msk.bf16.gmra.mxu0 %vm280_vm2, %v3915_v31 }
  0x6a   :  { %3801 = vmatprep.mubr.msk.bf16.mxu0 %vm280_vm2, %v3916_v32 }
  0x71   :  { %3802 = vmatmul.mubr.msk.bf16.gmra.mxu0 %vm280_vm2, %v3917_v33 }
  0x72   :  { %3805 = vmatprep.mubr.msk.bf16.mxu0 %vm280_vm2, %v3918_v35 }
  0x79   :  { %3806 = vmatmul.mubr.msk.bf16.gmra.mxu0 %vm280_vm2, %v3919_v36 }
  0x7a   :  { %3809 = vmatprep.mubr.msk.bf16.mxu0 %vm280_vm2, %v3920_v37 }
  0x81   :  { %3810 = vmatmul.mubr.msk.bf16.gmra.mxu0 %vm280_vm2, %v3921_v38 }
  0xc9   :  { %v3751_v43 = vpop.f32.mrf.mxu0 }
  0xca   :  { %v427_v45 = vadd.f32 %v3751_v43, %v4462_v41 }
  0xcb   :  { %v418_v50 = vpop.f32.mrf.mxu0 }
  0xcc   :  { %v675_v52 = vmax.f32 %v427_v45, 0.0  ;;  %v419_v53 = vadd.f32 %v4462_v41, %v418_v50 }
  0xcd   :  { %v3752_v54 = vpop.f32.mrf.mxu0 }
  0xce   :  { %885 = vst.msk [vmem:[#allocation2 + $0x48] sm:$0xff] %vm737_vm3, %v675_v52  ;;  %v673_v57 = vmax.f32 %v419_v53, 0.0  ;;  %v430_v58 = vadd.f32 %v3752_v54, %v4462_v41 }
  0xcf   :  { %v421_v63 = vpop.f32.mrf.mxu0 }
  0xd0   :  { %883 = vst.msk [vmem:[#allocation2 + $0x28] sm:$0xff] %vm737_vm3, %v673_v57  ;;  %v676_v1 = vmax.f32 %v430_v58, 0.0  ;;  %v422_v2 = vadd.f32 %v4462_v41, %v421_v63 }
  0xd1   :  { %v3755_v3 = vpop.f32.mrf.mxu0 }
  0xd2   :  { %886 = vst.msk [vmem:[#allocation2 + $0x50] sm:$0xff] %vm737_vm3, %v676_v1  ;;  %v674_v6 = vmax.f32 %v422_v2, 0.0  ;;  %v443_v7 = vadd.f32 %v3755_v3, %v4462_v41  ;;  %v4570_v1 = vld [vmem:[%s6259_s3 + $0x5] ss:$0 sm:$0xff] }
  0xd3   :  { %v434_v10 = vpop.f32.mrf.mxu0 }
  0xd4   :  { %884 = vst.msk [vmem:[#allocation2 + $0x30] sm:$0xff] %vm737_vm3, %v674_v6  ;;  %v679_v12 = vmax.f32 %v443_v7, 0.0  ;;  %v435_v13 = vadd.f32 %v4462_v41, %v434_v10 }
  0xd5   :  { %v3756_v16 = vpop.f32.mrf.mxu0  ;;  %v2155_v18 = vld [vmem:[#allocation2 + $0x47] sm:$0xff] }
  0xd6   :  { %v2355_v19 = vld [vmem:[#allocation2 + $0x48] sm:$0xff]  ;;  %889 = vst.msk [vmem:[#allocation2 + $0x88] sm:$0xff] %vm737_vm3, %v679_v12  ;;  %v677_v20 = vmax.f32 %v435_v13, 0.0  ;;  %v446_v21 = vadd.f32 %v3756_v16, %v4462_v41  ;;  %v2227_v27 = vmul.f32 %v4505_v14, %v2155_v18  ;;  %v4524_v29 = vmul.f32 %v4498_v11, %v2155_v18 }
  0xd7   :  { %v437_v24 = vpop.f32.mrf.mxu0  ;;  %v1554_v25 = vld [vmem:[#allocation2 + $0x27] sm:$0xff]  ;;  %v4521_v28 = vmul.f32 %v4510_v15, %v2355_v19  ;;  %v1030_v30 = vmul.f32 %v4457_v40, %v2155_v18  ;;  %v4536_v35 = vmul.f32 %v4515_v17, %v2355_v19  ;;  %v4548_v45 = vmul.f32 %v4475_v49, %v2355_v19 }
  0xd8   :  { %v1754_v26 = vld [vmem:[#allocation2 + $0x28] sm:$0xff]  ;;  %887 = vst.msk [vmem:[#allocation2 + $0x68] sm:$0xff] %vm737_vm3, %v677_v20  ;;  %v680_v31 = vmax.f32 %v446_v21, 0.0  ;;  %v438_v32 = vadd.f32 %v4462_v41, %v437_v24  ;;  %v1626_v33 = vmul.f32 %v4498_v11, %v1554_v25  ;;  %v1028_v43 = vmul.f32 %v4457_v40, %v1554_v25 }
  0xd9   :  { %v3759_v36 = vpop.f32.mrf.mxu0  ;;  %v1826_v37 = vmul.f32 %v4515_v17, %v1754_v26  ;;  %v4539_v38 = vld [vmem:[#allocation2 + $0x4f] sm:$0xff]  ;;  %v1228_v44 = vmul.f32 %v4475_v49, %v1754_v26  ;;  %v4555_v52 = vadd.f32 %v4469_v46, %v1030_v30 }
  0xda   :  { %v4541_v39 = vld [vmem:[#allocation2 + $0x50] sm:$0xff]  ;;  %890 = vst.msk [vmem:[#allocation2 + $0x90] sm:$0xff] %vm737_vm3, %v680_v31  ;;  %v678_v47 = vmax.f32 %v438_v32, 0.0  ;;  %v459_v48 = vadd.f32 %v3759_v36, %v4462_v41  ;;  %v1690_v50 = vadd.f32 %v1626_v33, %v1490_v22  ;;  %v2228_v57 = vmul.f32 %v4505_v14, %v4539_v38 }
  0xdb   :  { %v4543_v42 = vld [vmem:[#allocation2 + $0x49] sm:$0xff]  ;;  %v4552_v51 = vld [vmem:[#allocation2 + $0x51] sm:$0xff]  ;;  %v450_v53 = vpop.f32.mrf.mxu0  ;;  %v2428_v58 = vmul.f32 %v4510_v15, %v4541_v39  ;;  %v1092_v60 = vadd.f32 %v4469_v46, %v1028_v43 }
  0xdc   :  { %v1555_v54 = vld [vmem:[#allocation2 + $0x2f] sm:$0xff]  ;;  %v2627_v59 = vmul.f32 %v4533_v34, %v4543_v42  ;;  %888 = vst.msk [vmem:[#allocation2 + $0x70] sm:$0xff] %vm737_vm3, %v678_v47  ;;  %v683_v61 = vmax.f32 %v459_v48, 0.0  ;;  %v451_v63 = vadd.f32 %v4462_v41, %v450_v53  ;;  %v4574_v2 = vmul.f32 %v4533_v34, %v4552_v51 }
  0xdd   :  { %v1755_v55 = vld [vmem:[#allocation2 + $0x30] sm:$0xff]  ;;  %v1627_v0 = vmul.f32 %v4498_v11, %v1555_v54  ;;  %v3760_v3 = vpop.f32.mrf.mxu0  ;;  %v1890_v5 = vadd.f32 %v1826_v37, %v1690_v50  ;;  %v1029_v8 = vmul.f32 %v4457_v40, %v1555_v54  ;;  %v1292_v20 = vadd.f32 %v1228_v44, %v1092_v60 }
  0xde   :  { %v1954_v56 = vld [vmem:[#allocation2 + $0x29] sm:$0xff]  ;;  %v1827_v4 = vmul.f32 %v4515_v17, %v1755_v55  ;;  %v1955_v6 = vld [vmem:[#allocation2 + $0x31] sm:$0xff]  ;;  %893 = vst.msk [vmem:[#allocation2 + $0xc8] sm:$0xff] %vm737_vm3, %v683_v61  ;;  %v681_v9 = vmax.f32 %v451_v63, 0.0  ;;  %v462_v10 = vadd.f32 %v3760_v3, %v4462_v41  ;;  %v1229_v13 = vmul.f32 %v4475_v49, %v1755_v55 }
  0xdf   :  { %v2026_v7 = vmul.f32 %v4570_v1, %v1954_v56  ;;  %v1691_v12 = vadd.f32 %v1627_v0, %v1491_v23  ;;  %v453_v16 = vpop.f32.mrf.mxu0  ;;  %v1093_v19 = vadd.f32 %v4469_v46, %v1029_v8  ;;  %v1428_v21 = vmul.f32 %v4487_v62, %v1954_v56  ;;  %v4596_v54 = vld [vmem:[#allocation2 + $0x67] sm:$0xff] }
  0xe0   :  { %891 = vst.msk [vmem:[#allocation2 + $0xa8] sm:$0xff] %vm737_vm3, %v681_v9  ;;  %v684_v22 = vmax.f32 %v462_v10, 0.0  ;;  %v454_v24 = vadd.f32 %v4462_v41, %v453_v16  ;;  %v2027_v26 = vmul.f32 %v4570_v1, %v1955_v6  ;;  %v1429_v32 = vmul.f32 %v4487_v62, %v1955_v6 }
  0xe1   :  { %v2090_v18 = vadd.f32 %v2026_v7, %v1890_v5  ;;  %v1891_v25 = vadd.f32 %v1827_v4, %v1691_v12  ;;  %v3763_v30 = vpop.f32.mrf.mxu0  ;;  %v1293_v23 = vadd.f32 %v1229_v13, %v1093_v19  ;;  %v1492_v33 = vadd.f32 %v1428_v21, %v1292_v20 }
  0xe2   :  { %894 = vst.msk [vmem:[#allocation2 + $0xd0] sm:$0xff] %vm737_vm3, %v684_v22  ;;  %v682_v36 = vmax.f32 %v454_v24, 0.0  ;;  %v475_v37 = vadd.f32 %v3763_v30, %v4462_v41  ;;  %v1629_v44 = vmul.f32 %v4498_v11, %v4539_v38  ;;  %v2028_v61 = vmul.f32 %v4570_v1, %v4543_v42 }
  0xe3   :  { %v2291_v31 = vadd.f32 %v2227_v27, %v2090_v18  ;;  %v2091_v43 = vadd.f32 %v2027_v26, %v1891_v25  ;;  %v466_v47 = vpop.f32.mrf.mxu0  ;;  %v1493_v50 = vadd.f32 %v1429_v32, %v1293_v23  ;;  %v1692_v53 = vadd.f32 %v4524_v29, %v1492_v33  ;;  %v4602_v63 = vld [vmem:[#allocation2 + $0x6f] sm:$0xff] }
  0xe4   :  { %v1829_v27 = vmul.f32 %v4515_v17, %v4541_v39  ;;  %892 = vst.msk [vmem:[#allocation2 + $0xb0] sm:$0xff] %vm737_vm3, %v682_v36  ;;  %v687_v55 = vmax.f32 %v475_v37, 0.0  ;;  %v467_v56 = vadd.f32 %v4462_v41, %v466_v47  ;;  %v2029_v5 = vmul.f32 %v4570_v1, %v4552_v51  ;;  %v4609_v6 = vld [vmem:[#allocation2 + $0x70] sm:$0xff] }
  0xe5   :  { %v2491_v48 = vadd.f32 %v4521_v28, %v2291_v31  ;;  %v2292_v60 = vadd.f32 %v2228_v57, %v2091_v43  ;;  %v4604_v28 = vld [vmem:[#allocation2 + $0x68] sm:$0xff]  ;;  %v3764_v0 = vpop.f32.mrf.mxu0  ;;  %v1693_v3 = vadd.f32 %v1629_v44, %v1493_v50  ;;  %v1892_v4 = vadd.f32 %v4536_v35, %v1692_v53  ;;  %v4626_v25 = vld [vmem:[#allocation2 + $0x71] sm:$0xff] }
  0xe6   :  { %897 = vst.msk [vmem:[#allocation2 + $0x108] sm:$0xff] %vm737_vm3, %v687_v55  ;;  %v685_v57 = vmax.f32 %v467_v56, 0.0  ;;  %v478_v7 = vadd.f32 %v3764_v0, %v4462_v41  ;;  %v2229_v9 = vmul.f32 %v4505_v14, %v4596_v54  ;;  %v4615_v10 = vld [vmem:[#allocation2 + $0x69] sm:$0xff]  ;;  %v2230_v35 = vmul.f32 %v4505_v14, %v4602_v63 }
  0xe7   :  { %v2691_v29 = vadd.f32 %v2627_v59, %v2491_v48  ;;  %v2492_v8 = vadd.f32 %v2428_v58, %v2292_v60  ;;  %v469_v59 = vpop.f32.mrf.mxu0  ;;  %v1893_v12 = vadd.f32 %v1829_v27, %v1693_v3  ;;  %v2092_v13 = vadd.f32 %v2028_v61, %v1892_v4 }
  0xe8   :  { %v2429_v16 = vmul.f32 %v4510_v15, %v4604_v28  ;;  %895 = vst.msk [vmem:[#allocation2 + $0xe8] sm:$0xff] %vm737_vm3, %v685_v57  ;;  %v688_v18 = vmax.f32 %v478_v7, 0.0  ;;  %v470_v19 = vadd.f32 %v4462_v41, %v469_v59  ;;  %v2430_v20 = vmul.f32 %v4510_v15, %v4609_v6  ;;  %v4664_v59 = vld [vmem:[#allocation2 + $0x88] sm:$0xff] }
  0xe9   :  { %v2692_v58 = vadd.f32 %v4574_v2, %v2492_v8  ;;  %v3767_v21 = vpop.f32.mrf.mxu0  ;;  %v2093_v22 = vadd.f32 %v2029_v5, %v1893_v12  ;;  %v2293_v24 = vadd.f32 %v2229_v9, %v2092_v13  ;;  %v2629_v26 = vmul.f32 %v4533_v34, %v4615_v10  ;;  %v4662_v9 = vld [vmem:[#allocation2 + $0x8f] sm:$0xff] }
  0xea   :  { %v1031_v30 = vmul.f32 %v4457_v40, %v4539_v38  ;;  %898 = vst.msk [vmem:[#allocation2 + $0x110] sm:$0xff] %vm737_vm3, %v688_v18  ;;  %v686_v31 = vmax.f32 %v470_v19, 0.0  ;;  %v491_v23 = vadd.f32 %v3767_v21, %v4462_v41  ;;  %v1231_v32 = vmul.f32 %v4475_v49, %v4541_v39  ;;  %v4666_v12 = vld [vmem:[#allocation2 + $0x90] sm:$0xff] }
  0xeb   :  { %v2755_v2 = vpack.c.bf16 %v2692_v58, %v2691_v29  ;;  %v482_v33 = vpop.f32.mrf.mxu0  ;;  %v2294_v36 = vadd.f32 %v2230_v35, %v2093_v22  ;;  %v2493_v37 = vadd.f32 %v2429_v16, %v2293_v24  ;;  %v1294_v44 = vadd.f32 %v4548_v45, %v4555_v52  ;;  %v4672_v58 = vld [vmem:[#allocation2 + $0x89] sm:$0xff] }
  0xec   :  { %v1095_v43 = vadd.f32 %v4469_v46, %v1031_v30  ;;  %896 = vst.msk [vmem:[#allocation2 + $0xf0] sm:$0xff] %vm737_vm3, %v686_v31  ;;  %v691_v38 = vmax.f32 %v491_v23, 0.0  ;;  %v483_v47 = vadd.f32 %v4462_v41, %v482_v33  ;;  %v2630_v48 = vmul.f32 %v4533_v34, %v4626_v25 }
  0xed   :  { %3815 = vmatprep.mubr.msk.bf16.mxu1 %vm737_vm3, %v2755_v2  ;;  %v1430_v39 = vmul.f32 %v4487_v62, %v4543_v42  ;;  %v3768_v50 = vpop.f32.mrf.mxu0  ;;  %v2494_v53 = vadd.f32 %v2430_v20, %v2294_v36  ;;  %v1431_v55 = vmul.f32 %v4487_v62, %v4552_v51  ;;  %v1630_v45 = vmul.f32 %v4498_v11, %v4596_v54  ;;  %v4656_v51 = vld [vmem:[#allocation2 + $0x87] sm:$0xff] }
  0xee   :  { %v1295_v27 = vadd.f32 %v1231_v32, %v1095_v43  ;;  %901 = vst.msk [vmem:[#allocation2 + $0x148] sm:$0xff] %vm737_vm3, %v691_v38  ;;  %v689_v52 = vmax.f32 %v483_v47, 0.0  ;;  %v494_v56 = vadd.f32 %v3768_v50, %v4462_v41  ;;  %v1631_v61 = vmul.f32 %v4498_v11, %v4602_v63 }
  0xef   :  { %v1494_v60 = vadd.f32 %v1430_v39, %v1294_v44  ;;  %v485_v0 = vpop.f32.mrf.mxu0  ;;  %v2693_v42 = vadd.f32 %v2629_v26, %v2493_v37  ;;  %v2694_v29 = vadd.f32 %v2630_v48, %v2494_v53  ;;  %v1830_v4 = vmul.f32 %v4515_v17, %v4604_v28  ;;  %v4689_v44 = vld [vmem:[#allocation2 + $0x91] sm:$0xff] }
  0xf0   :  { %v1495_v3 = vadd.f32 %v1431_v55, %v1295_v27  ;;  %899 = vst.msk [vmem:[#allocation2 + $0x128] sm:$0xff] %vm737_vm3, %v689_v52  ;;  %v692_v5 = vmax.f32 %v494_v56, 0.0  ;;  %v486_v57 = vadd.f32 %v4462_v41, %v485_v0  ;;  %v2030_v8 = vmul.f32 %v4570_v1, %v4615_v10 }
  0xf1   :  { %v1694_v7 = vadd.f32 %v1630_v45, %v1494_v60  ;;  %v3771_v13 = vpop.f32.mrf.mxu0  ;;  %v2756_v35 = vpack.c.bf16 %v2694_v29, %v2693_v42  ;;  %v1831_v18 = vmul.f32 %v4515_v17, %v4609_v6  ;;  %v2031_v19 = vmul.f32 %v4570_v1, %v4626_v25 }
  0xf2   :  { %v1695_v16 = vadd.f32 %v1631_v61, %v1495_v3  ;;  %902 = vst.msk [vmem:[#allocation2 + $0x150] sm:$0xff] %vm737_vm3, %v692_v5  ;;  %v690_v20 = vmax.f32 %v486_v57, 0.0  ;;  %v507_v21 = vadd.f32 %v3771_v13, %v4462_v41  ;;  %v2231_v24 = vmul.f32 %v4505_v14, %v4656_v51 }
  0xf3   :  { %v1894_v22 = vadd.f32 %v1830_v4, %v1694_v7  ;;  %3816 = vmatmul.mubr.msk.bf16.vlgmr.msra.gmra.mxu1 %vm737_vm3, %v2756_v35  ;;  %v498_v26 = vpop.f32.mrf.mxu0  ;;  %v2232_v31 = vmul.f32 %v4505_v14, %v4662_v9  ;;  %v2431_v23 = vmul.f32 %v4510_v15, %v4664_v59  ;;  %v2432_v2 = vmul.f32 %v4510_v15, %v4666_v12 }
  0xf4   :  { %v1895_v30 = vadd.f32 %v1831_v18, %v1695_v16  ;;  %900 = vst.msk [vmem:[#allocation2 + $0x130] sm:$0xff] %vm737_vm3, %v690_v20  ;;  %v695_v32 = vmax.f32 %v507_v21, 0.0  ;;  %v499_v33 = vadd.f32 %v4462_v41, %v498_v26  ;;  %v2631_v37 = vmul.f32 %v4533_v34, %v4672_v58  ;;  %v4717_v18 = vld [vmem:[#allocation2 + $0xa7] sm:$0xff] }
  0xf5   :  { %v2094_v36 = vadd.f32 %v2030_v8, %v1894_v22  ;;  %v3772_v38 = vpop.f32.mrf.mxu0  ;;  %v1032_v47 = vmul.f32 %v4457_v40, %v4596_v54  ;;  %v1033_v48 = vmul.f32 %v4457_v40, %v4602_v63  ;;  %v1232_v39 = vmul.f32 %v4475_v49, %v4604_v28  ;;  %v4724_v22 = vld [vmem:[#allocation2 + $0xa8] sm:$0xff] }
  0xf6   :  { %v2095_v43 = vadd.f32 %v2031_v19, %v1895_v30  ;;  %905 = vst.msk [vmem:[#allocation2 + $0x188] sm:$0xff] %vm737_vm3, %v695_v32  ;;  %v693_v50 = vmax.f32 %v499_v33, 0.0  ;;  %v510_v27 = vadd.f32 %v3772_v38, %v4462_v41  ;;  %v1233_v55 = vmul.f32 %v4475_v49, %v4609_v6  ;;  %v4719_v19 = vld [vmem:[#allocation2 + $0xaf] sm:$0xff] }
  0xf7   :  { %v2295_v53 = vadd.f32 %v2231_v24, %v2094_v36  ;;  %v501_v52 = vpop.f32.mrf.mxu0  ;;  %v1096_v56 = vadd.f32 %v4469_v46, %v1032_v47  ;;  %v1097_v54 = vadd.f32 %v4469_v46, %v1033_v48  ;;  %v1432_v63 = vmul.f32 %v4487_v62, %v4615_v10 }
  0xf8   :  { %v2296_v45 = vadd.f32 %v2232_v31, %v2095_v43  ;;  %903 = vst.msk [vmem:[#allocation2 + $0x168] sm:$0xff] %vm737_vm3, %v693_v50  ;;  %v2632_v60 = vmul.f32 %v4533_v34, %v4689_v44  ;;  %v696_v61 = vmax.f32 %v510_v27, 0.0  ;;  %v502_v0 = vadd.f32 %v4462_v41, %v501_v52 }
  0xf9   :  { %v2495_v28 = vadd.f32 %v2431_v23, %v2295_v53  ;;  %v3775_v6 = vpop.f32.mrf.mxu0  ;;  %v1296_v29 = vadd.f32 %v1232_v39, %v1096_v56  ;;  %v1297_v3 = vadd.f32 %v1233_v55, %v1097_v54  ;;  %v1433_v4 = vmul.f32 %v4487_v62, %v4626_v25  ;;  %v4728_v23 = vld [vmem:[#allocation2 + $0xb0] sm:$0xff] }
  0xfa   :  { %v2496_v42 = vadd.f32 %v2432_v2, %v2296_v45  ;;  %906 = vst.msk [vmem:[#allocation2 + $0x190] sm:$0xff] %vm737_vm3, %v696_v61  ;;  %v694_v10 = vmax.f32 %v502_v0, 0.0  ;;  %v523_v57 = vadd.f32 %v3775_v6, %v4462_v41  ;;  %v1632_v7 = vmul.f32 %v4498_v11, %v4656_v51  ;;  %v4730_v2 = vld [vmem:[#allocation2 + $0xa9] sm:$0xff]  ;;  %v4747_v53 = vld [vmem:[#allocation2 + $0xb1] sm:$0xff] }
  0xfb   :  { %v2695_v5 = vadd.f32 %v2631_v37, %v2495_v28  ;;  %v1496_v13 = vadd.f32 %v1432_v63, %v1296_v29  ;;  %v1497_v35 = vadd.f32 %v1433_v4, %v1297_v3  ;;  %v1633_v16 = vmul.f32 %v4498_v11, %v4662_v9  ;;  %v514_v25 = vpop.f32.mrf.mxu0 }
  0xfc   :  { %v2696_v8 = vadd.f32 %v2632_v60, %v2496_v42  ;;  %904 = vst.msk [vmem:[#allocation2 + $0x170] sm:$0xff] %vm737_vm3, %v694_v10  ;;  %v699_v20 = vmax.f32 %v523_v57, 0.0  ;;  %v1832_v21 = vmul.f32 %v4515_v17, %v4664_v59  ;;  %v1833_v31 = vmul.f32 %v4515_v17, %v4666_v12 }
  0xfd   :  { %v1696_v26 = vadd.f32 %v1632_v7, %v1496_v13  ;;  %v1697_v30 = vadd.f32 %v1633_v16, %v1497_v35  ;;  %v2032_v32 = vmul.f32 %v4570_v1, %v4672_v58  ;;  %v2033_v33 = vmul.f32 %v4570_v1, %v4689_v44  ;;  %v3776_v43 = vpop.f32.mrf.mxu0 }
  0xfe   :  { %v2757_v24 = vpack.c.bf16 %v2696_v8, %v2695_v5  ;;  %909 = vst.msk [vmem:[#allocation2 + $0x1c8] sm:$0xff] %vm737_vm3, %v699_v20  ;;  %v2233_v36 = vmul.f32 %v4505_v14, %v4717_v18  ;;  %v2234_v37 = vmul.f32 %v4505_v14, %v4719_v19  ;;  %v2433_v48 = vmul.f32 %v4510_v15, %v4724_v22  ;;  %v4774_v5 = vld [vmem:[#allocation2 + $0xcf] sm:$0xff] }
  0xff   :  { %v1896_v38 = vadd.f32 %v1832_v21, %v1696_v26  ;;  %v1897_v47 = vadd.f32 %v1833_v31, %v1697_v30  ;;  %v515_v39 = vadd.f32 %v4462_v41, %v514_v25  ;;  %v2434_v50 = vmul.f32 %v4510_v15, %v4728_v23  ;;  %v4780_v8 = vld [vmem:[#allocation2 + $0xc8] sm:$0xff] }
 0x100   :  { %3819 = vmatprep.mubr.msk.bf16.mxu1 %vm737_vm3, %v2757_v24  ;;  %v2633_v27 = vmul.f32 %v4533_v34, %v4730_v2  ;;  %v1034_v55 = vmul.f32 %v4457_v40, %v4656_v51  ;;  %v1035_v45 = vmul.f32 %v4457_v40, %v4662_v9  ;;  %v1234_v63 = vmul.f32 %v4475_v49, %v4664_v59  ;;  %v517_v51 = vpop.f32.mrf.mxu0 }
 0x101   :  { %v2096_v52 = vadd.f32 %v2032_v32, %v1896_v38  ;;  %v2097_v56 = vadd.f32 %v2033_v33, %v1897_v47  ;;  %v697_v54 = vmax.f32 %v515_v39, 0.0  ;;  %v1235_v61 = vmul.f32 %v4475_v49, %v4666_v12 }
 0x102   :  { %v1098_v28 = vadd.f32 %v4469_v46, %v1034_v55  ;;  %v1099_v60 = vadd.f32 %v4469_v46, %v1035_v45  ;;  %v1434_v0 = vmul.f32 %v4487_v62, %v4672_v58  ;;  %v2634_v9 = vmul.f32 %v4533_v34, %v4747_v53  ;;  %v4772_v58 = vld [vmem:[#allocation2 + $0xc7] sm:$0xff]  ;;  %v3779_v20 = vpop.f32.mrf.mxu0 }
 0x103   :  { %v2297_v42 = vadd.f32 %v2233_v36, %v2096_v52  ;;  %v2298_v6 = vadd.f32 %v2234_v37, %v2097_v56  ;;  %907 = vst.msk [vmem:[#allocation2 + $0x1a8] sm:$0xff] %vm737_vm3, %v697_v54  ;;  %v1435_v59 = vmul.f32 %v4487_v62, %v4689_v44  ;;  %v1634_v4 = vmul.f32 %v4498_v11, %v4717_v18  ;;  %v4797_v55 = vld [vmem:[#allocation2 + $0xc9] sm:$0xff] }
 0x104   :  { %v1298_v29 = vadd.f32 %v1234_v63, %v1098_v28  ;;  %v1299_v3 = vadd.f32 %v1235_v61, %v1099_v60  ;;  %v1635_v12 = vmul.f32 %v4498_v11, %v4719_v19  ;;  %v1834_v7 = vmul.f32 %v4515_v17, %v4724_v22  ;;  %v2564_v60 = vld [vmem:[#allocation2 + $0xd1] sm:$0xff] }
 0x105   :  { %v2497_v10 = vadd.f32 %v2433_v48, %v2297_v42  ;;  %v2498_v57 = vadd.f32 %v2434_v50, %v2298_v6  ;;  %v1835_v44 = vmul.f32 %v4515_v17, %v4728_v23  ;;  %v2034_v16 = vmul.f32 %v4570_v1, %v4730_v2 }
 0x106   :  { %v1498_v13 = vadd.f32 %v1434_v0, %v1298_v29  ;;  %v1499_v35 = vadd.f32 %v1435_v59, %v1299_v3  ;;  %v2035_v25 = vmul.f32 %v4570_v1, %v4747_v53  ;;  %v2235_v26 = vmul.f32 %v4505_v14, %v4772_v58 }
 0x107   :  { %v2697_v21 = vadd.f32 %v2633_v27, %v2497_v10  ;;  %v2698_v24 = vadd.f32 %v2634_v9, %v2498_v57  ;;  %v2236_v30 = vmul.f32 %v4505_v14, %v4774_v5  ;;  %v2435_v33 = vmul.f32 %v4510_v15, %v4780_v8  ;;  %v2364_v27 = vld [vmem:[#allocation2 + $0xd0] sm:$0xff]  ;;  %v4823_v57 = vld [vmem:[#allocation2 + $0xe7] sm:$0xff] }
 0x108   :  { %v1698_v31 = vadd.f32 %v1634_v4, %v1498_v13  ;;  %v1699_v32 = vadd.f32 %v1635_v12, %v1499_v35  ;;  %v526_v36 = vadd.f32 %v3776_v43, %v4462_v41  ;;  %v518_v38 = vadd.f32 %v4462_v41, %v517_v51  ;;  %v4827_v35 = vld [vmem:[#allocation2 + $0xef] sm:$0xff] }
 0x109   :  { %v2758_v37 = vpack.c.bf16 %v2698_v24, %v2697_v21  ;;  %v539_v47 = vadd.f32 %v3779_v20, %v4462_v41  ;;  %v1036_v48 = vmul.f32 %v4457_v40, %v4717_v18  ;;  %v1037_v52 = vmul.f32 %v4457_v40, %v4719_v19 }
 0x10a   :  { %v1898_v39 = vadd.f32 %v1834_v7, %v1698_v31  ;;  %v1899_v50 = vadd.f32 %v1835_v44, %v1699_v32  ;;  %v700_v45 = vmax.f32 %v526_v36, 0.0  ;;  %v698_v43 = vmax.f32 %v518_v38, 0.0 }
 0x10b   :  { %3820 = vmatmul.mubr.msk.bf16.gmra.mxu1 %vm737_vm3, %v2758_v37  ;;  %v703_v56 = vmax.f32 %v539_v47, 0.0  ;;  %v1100_v54 = vadd.f32 %v4469_v46, %v1036_v48  ;;  %v1236_v63 = vmul.f32 %v4475_v49, %v4724_v22  ;;  %v1101_v61 = vadd.f32 %v4469_v46, %v1037_v52 }
 0x10c   :  { %v2098_v28 = vadd.f32 %v2034_v16, %v1898_v39  ;;  %v2099_v18 = vadd.f32 %v2035_v25, %v1899_v50  ;;  %910 = vst.msk [vmem:[#allocation2 + $0x1d0] sm:$0xff] %vm737_vm3, %v700_v45  ;;  %v1237_v0 = vmul.f32 %v4475_v49, %v4728_v23  ;;  %v2436_v19 = vmul.f32 %v4510_v15, %v2364_v27  ;;  %v530_v23 = vpop.f32.mrf.mxu0  ;;  %v4842_v39 = vld [vmem:[#allocation2 + $0xf0] sm:$0xff] }
 0x10d   :  { %v2635_v51 = vmul.f32 %v4533_v34, %v4797_v55  ;;  %908 = vst.msk [vmem:[#allocation2 + $0x1b0] sm:$0xff] %vm737_vm3, %v698_v43  ;;  %913 = vst.msk [vmem:[#allocation2 + $0x208] sm:$0xff] %vm737_vm3, %v703_v56  ;;  %v1300_v22 = vadd.f32 %v1236_v63, %v1100_v54  ;;  %v1436_v42 = vmul.f32 %v4487_v62, %v4730_v2 }
 0x10e   :  { %v2299_v6 = vadd.f32 %v2235_v26, %v2098_v28  ;;  %v2300_v9 = vadd.f32 %v2236_v30, %v2099_v18  ;;  %v1301_v59 = vadd.f32 %v1237_v0, %v1101_v61  ;;  %v1437_v29 = vmul.f32 %v4487_v62, %v4747_v53  ;;  %v4829_v53 = vld [vmem:[#allocation2 + $0xe8] sm:$0xff]  ;;  %v3780_v32 = vpop.f32.mrf.mxu0  ;;  %v4852_v18 = vld [vmem:[#allocation2 + $0xf1] sm:$0xff] }
 0x10f   :  { %v2636_v3 = vmul.f32 %v4533_v34, %v2564_v60  ;;  %v1500_v4 = vadd.f32 %v1436_v42, %v1300_v22  ;;  %v1636_v12 = vmul.f32 %v4498_v11, %v4772_v58  ;;  %v1637_v10 = vmul.f32 %v4498_v11, %v4774_v5  ;;  %v2565_v28 = vld [vmem:[#allocation2 + $0xe9] sm:$0xff] }
 0x110   :  { %v2499_v7 = vadd.f32 %v2435_v33, %v2299_v6  ;;  %v2500_v2 = vadd.f32 %v2436_v19, %v2300_v9  ;;  %v1501_v44 = vadd.f32 %v1437_v29, %v1301_v59  ;;  %v1836_v13 = vmul.f32 %v4515_v17, %v4780_v8  ;;  %v533_v0 = vpop.f32.mrf.mxu0  ;;  %v4866_v59 = vld [vmem:[#allocation2 + $0x107] sm:$0xff] }
 0x111   :  { %v1700_v16 = vadd.f32 %v1636_v12, %v1500_v4  ;;  %v1837_v25 = vmul.f32 %v4515_v17, %v2364_v27  ;;  %v2036_v20 = vmul.f32 %v4570_v1, %v4797_v55  ;;  %v2037_v21 = vmul.f32 %v4570_v1, %v2564_v60 }
 0x112   :  { %v2699_v24 = vadd.f32 %v2635_v51, %v2499_v7  ;;  %v2700_v26 = vadd.f32 %v2636_v3, %v2500_v2  ;;  %v1701_v30 = vadd.f32 %v1637_v10, %v1501_v44  ;;  %v2237_v31 = vmul.f32 %v4505_v14, %v4823_v57  ;;  %v4873_v3 = vld [vmem:[#allocation2 + $0x10f] sm:$0xff]  ;;  %v3783_v44 = vpop.f32.mrf.mxu0 }
 0x113   :  { %v1900_v33 = vadd.f32 %v1836_v13, %v1700_v16  ;;  %v2238_v36 = vmul.f32 %v4505_v14, %v4827_v35  ;;  %v2437_v37 = vmul.f32 %v4510_v15, %v4829_v53  ;;  %v531_v38 = vadd.f32 %v4462_v41, %v530_v23  ;;  %v4877_v2 = vld [vmem:[#allocation2 + $0x108] sm:$0xff] }
 0x114   :  { %v2759_v47 = vpack.c.bf16 %v2700_v26, %v2699_v24  ;;  %v1901_v48 = vadd.f32 %v1837_v25, %v1701_v30  ;;  %v1038_v50 = vmul.f32 %v4457_v40, %v4772_v58  ;;  %v1039_v45 = vmul.f32 %v4457_v40, %v4774_v5 }
 0x115   :  { %v2100_v52 = vadd.f32 %v2036_v20, %v1900_v33  ;;  %v701_v43 = vmax.f32 %v531_v38, 0.0  ;;  %v1238_v56 = vmul.f32 %v4475_v49, %v4780_v8  ;;  %v1239_v54 = vmul.f32 %v4475_v49, %v2364_v27 }
 0x116   :  { %3823 = vmatprep.mubr.msk.bf16.mxu1 %vm737_vm3, %v2759_v47  ;;  %v2101_v63 = vadd.f32 %v2037_v21, %v1901_v48  ;;  %v1102_v61 = vadd.f32 %v4469_v46, %v1038_v50  ;;  %v1103_v58 = vadd.f32 %v4469_v46, %v1039_v45  ;;  %v1438_v5 = vmul.f32 %v4487_v62, %v4797_v55  ;;  %v4891_v50 = vld [vmem:[#allocation2 + $0x110] sm:$0xff] }
 0x117   :  { %v2301_v19 = vadd.f32 %v2237_v31, %v2100_v52  ;;  %v2438_v8 = vmul.f32 %v4510_v15, %v4842_v39  ;;  %911 = vst.msk [vmem:[#allocation2 + $0x1e8] sm:$0xff] %vm737_vm3, %v701_v43  ;;  %v1439_v27 = vmul.f32 %v4487_v62, %v2564_v60  ;;  %v1638_v51 = vmul.f32 %v4498_v11, %v4823_v57  ;;  %v2567_v52 = vld [vmem:[#allocation2 + $0x109] sm:$0xff] }
 0x118   :  { %v2302_v22 = vadd.f32 %v2238_v36, %v2101_v63  ;;  %v1302_v42 = vadd.f32 %v1238_v56, %v1102_v61  ;;  %v1303_v6 = vadd.f32 %v1239_v54, %v1103_v58  ;;  %v1639_v9 = vmul.f32 %v4498_v11, %v4827_v35  ;;  %v4898_v58 = vld [vmem:[#allocation2 + $0x111] sm:$0xff] }
 0x119   :  { %v2501_v55 = vadd.f32 %v2437_v37, %v2301_v19  ;;  %v2637_v29 = vmul.f32 %v4533_v34, %v2565_v28  ;;  %v2638_v23 = vmul.f32 %v4533_v34, %v4852_v18  ;;  %v1838_v60 = vmul.f32 %v4515_v17, %v4829_v53 }
 0x11a   :  { %v2502_v4 = vadd.f32 %v2438_v8, %v2302_v22  ;;  %v1502_v12 = vadd.f32 %v1438_v5, %v1302_v42  ;;  %v1503_v10 = vadd.f32 %v1439_v27, %v1303_v6  ;;  %v1839_v7 = vmul.f32 %v4515_v17, %v4842_v39 }
 0x11b   :  { %v2701_v13 = vadd.f32 %v2637_v29, %v2501_v55  ;;  %v2038_v16 = vmul.f32 %v4570_v1, %v2565_v28  ;;  %v2039_v25 = vmul.f32 %v4570_v1, %v4852_v18  ;;  %v2239_v20 = vmul.f32 %v4505_v14, %v4866_v59  ;;  %v546_v29 = vpop.f32.mrf.mxu0 }
 0x11c   :  { %v2702_v21 = vadd.f32 %v2638_v23, %v2502_v4  ;;  %v1702_v24 = vadd.f32 %v1638_v51, %v1502_v12  ;;  %v1703_v26 = vadd.f32 %v1639_v9, %v1503_v10  ;;  %v2240_v30 = vmul.f32 %v4505_v14, %v4873_v3  ;;  %v4921_v4 = vld [vmem:[#allocation2 + $0x127] sm:$0xff]  ;;  %v4923_v12 = vld [vmem:[#allocation2 + $0x12f] sm:$0xff] }
 0x11d   :  { %v2439_v31 = vmul.f32 %v4510_v15, %v4877_v2  ;;  %v542_v33 = vadd.f32 %v3780_v32, %v4462_v41  ;;  %v534_v36 = vadd.f32 %v4462_v41, %v533_v0  ;;  %v555_v37 = vadd.f32 %v3783_v44, %v4462_v41  ;;  %v4925_v10 = vld [vmem:[#allocation2 + $0x128] sm:$0xff] }
 0x11e   :  { %v2760_v38 = vpack.c.bf16 %v2702_v21, %v2701_v13  ;;  %v1902_v47 = vadd.f32 %v1838_v60, %v1702_v24  ;;  %v1903_v48 = vadd.f32 %v1839_v7, %v1703_v26  ;;  %v1040_v45 = vmul.f32 %v4457_v40, %v4823_v57  ;;  %v4934_v24 = vld [vmem:[#allocation2 + $0x130] sm:$0xff] }
 0x11f   :  { %v704_v43 = vmax.f32 %v542_v33, 0.0  ;;  %v702_v56 = vmax.f32 %v534_v36, 0.0  ;;  %v707_v54 = vmax.f32 %v555_v37, 0.0  ;;  %v1041_v63 = vmul.f32 %v4457_v40, %v4827_v35  ;;  %v3784_v36 = vpop.f32.mrf.mxu0 }
 0x120   :  { %3824 = vmatmul.mubr.msk.bf16.gmra.mxu1 %vm737_vm3, %v2760_v38  ;;  %v2102_v32 = vadd.f32 %v2038_v16, %v1902_v47  ;;  %v2103_v61 = vadd.f32 %v2039_v25, %v1903_v48  ;;  %v1104_v5 = vadd.f32 %v4469_v46, %v1040_v45  ;;  %v1240_v0 = vmul.f32 %v4475_v49, %v4829_v53  ;;  %v4942_v47 = vld [vmem:[#allocation2 + $0x129] sm:$0xff] }
 0x121   :  { %v2440_v57 = vmul.f32 %v4510_v15, %v4891_v50  ;;  %914 = vst.msk [vmem:[#allocation2 + $0x210] sm:$0xff] %vm737_vm3, %v704_v43  ;;  %912 = vst.msk [vmem:[#allocation2 + $0x1f0] sm:$0xff] %vm737_vm3, %v702_v56  ;;  %v1105_v35 = vadd.f32 %v4469_v46, %v1041_v63  ;;  %v1241_v19 = vmul.f32 %v4475_v49, %v4842_v39 }
 0x122   :  { %917 = vst.msk [vmem:[#allocation2 + $0x288] sm:$0xff] %vm737_vm3, %v707_v54  ;;  %v1440_v8 = vmul.f32 %v4487_v62, %v2565_v28  ;;  %v2303_v27 = vadd.f32 %v2239_v20, %v2102_v32  ;;  %v2304_v51 = vadd.f32 %v2240_v30, %v2103_v61  ;;  %v2639_v53 = vmul.f32 %v4533_v34, %v2567_v52  ;;  %v4949_v54 = vld [vmem:[#allocation2 + $0x131] sm:$0xff] }
 0x123   :  { %v1304_v22 = vadd.f32 %v1240_v0, %v1104_v5  ;;  %v2640_v42 = vmul.f32 %v4533_v34, %v4898_v58  ;;  %v1305_v6 = vadd.f32 %v1241_v19, %v1105_v35  ;;  %v1441_v9 = vmul.f32 %v4487_v62, %v4852_v18 }
 0x124   :  { %v1640_v55 = vmul.f32 %v4498_v11, %v4866_v59  ;;  %v2503_v23 = vadd.f32 %v2439_v31, %v2303_v27  ;;  %v2504_v39 = vadd.f32 %v2440_v57, %v2304_v51  ;;  %v1641_v28 = vmul.f32 %v4498_v11, %v4873_v3 }
 0x125   :  { %v1504_v60 = vadd.f32 %v1440_v8, %v1304_v22  ;;  %v1505_v7 = vadd.f32 %v1441_v9, %v1305_v6  ;;  %v1840_v18 = vmul.f32 %v4515_v17, %v4877_v2  ;;  %v1841_v44 = vmul.f32 %v4515_v17, %v4891_v50  ;;  %v4976_v22 = vld [vmem:[#allocation2 + $0x148] sm:$0xff] }
 0x126   :  { %v2040_v13 = vmul.f32 %v4570_v1, %v2567_v52  ;;  %v2703_v16 = vadd.f32 %v2639_v53, %v2503_v23  ;;  %v2704_v25 = vadd.f32 %v2640_v42, %v2504_v39  ;;  %v2041_v21 = vmul.f32 %v4570_v1, %v4898_v58 }
 0x127   :  { %v1704_v20 = vadd.f32 %v1640_v55, %v1504_v60  ;;  %v1705_v26 = vadd.f32 %v1641_v28, %v1505_v7  ;;  %v2241_v30 = vmul.f32 %v4505_v14, %v4921_v4  ;;  %v2242_v31 = vmul.f32 %v4505_v14, %v4923_v12 }
 0x128   :  { %v2441_v33 = vmul.f32 %v4510_v15, %v4925_v10  ;;  %v2761_v37 = vpack.c.bf16 %v2704_v25, %v2703_v16  ;;  %v547_v48 = vadd.f32 %v4462_v41, %v546_v29  ;;  %v1042_v45 = vmul.f32 %v4457_v40, %v4866_v59 }
 0x129   :  { %v1904_v38 = vadd.f32 %v1840_v18, %v1704_v20  ;;  %v1905_v43 = vadd.f32 %v1841_v44, %v1705_v26  ;;  %v2442_v56 = vmul.f32 %v4510_v15, %v4934_v24  ;;  %v1043_v63 = vmul.f32 %v4457_v40, %v4873_v3  ;;  %v549_v3 = vpop.f32.mrf.mxu0 }
 0x12a   :  { %v1242_v32 = vmul.f32 %v4475_v49, %v4877_v2  ;;  %3827 = vmatprep.mubr.msk.bf16.mxu1 %vm737_vm3, %v2761_v37  ;;  %v705_v5 = vmax.f32 %v547_v48, 0.0  ;;  %v1106_v41 = vadd.f32 %v4469_v46, %v1042_v45  ;;  %v1442_v59 = vmul.f32 %v4487_v62, %v2567_v52 }
 0x12b   :  { %v2104_v61 = vadd.f32 %v2040_v13, %v1904_v38  ;;  %v2105_v0 = vadd.f32 %v2041_v21, %v1905_v43  ;;  %v2641_v57 = vmul.f32 %v4533_v34, %v4942_v47  ;;  %v1107_v35 = vadd.f32 %v4469_v46, %v1043_v63  ;;  %v4995_v13 = vld [vmem:[%s6260_s2] ss:$0 sm:$0xff]  ;;  %v5020_v63 = vld [vmem:[#allocation2 + $0x151] sm:$0xff] }
 0x12c   :  { %v1243_v40 = vmul.f32 %v4475_v49, %v4891_v50  ;;  %v2642_v2 = vmul.f32 %v4533_v34, %v4949_v54  ;;  %915 = vst.msk [vmem:[#allocation2 + $0x268] sm:$0xff] %vm737_vm3, %v705_v5  ;;  %v1306_v8 = vadd.f32 %v1242_v32, %v1106_v41  ;;  %v1642_v52 = vmul.f32 %v4498_v11, %v4921_v4  ;;  %v4972_v49 = vld [vmem:[#allocation2 + $0x147] sm:$0xff]  ;;  %v4974_v50 = vld [vmem:[#allocation2 + $0x14f] sm:$0xff]  ;;  %v5016_v43 = vld [vmem:[%s6261_s4] ss:$0 sm:$0xff] }
 0x12d   :  { %v2305_v19 = vadd.f32 %v2241_v30, %v2104_v61  ;;  %v2306_v27 = vadd.f32 %v2242_v31, %v2105_v0  ;;  %v1443_v53 = vmul.f32 %v4487_v62, %v4898_v58  ;;  %v1643_v46 = vmul.f32 %v4498_v11, %v4923_v12  ;;  %v3787_v58 = vpop.f32.mrf.mxu0  ;;  %v5007_v31 = vld [vmem:[#allocation2 + $0x150] sm:$0xff] }
 0x12e   :  { %v1307_v51 = vadd.f32 %v1243_v40, %v1107_v35  ;;  %v1506_v6 = vadd.f32 %v1442_v59, %v1306_v8  ;;  %v1842_v9 = vmul.f32 %v4515_v17, %v4925_v10  ;;  %v1843_v55 = vmul.f32 %v4515_v17, %v4934_v24  ;;  %v5036_v59 = vld [vmem:[%s6259_s3 + $0x7] ss:$0 sm:$0xff] }
 0x12f   :  { %v2505_v42 = vadd.f32 %v2441_v33, %v2305_v19  ;;  %v2506_v29 = vadd.f32 %v2442_v56, %v2306_v27  ;;  %v2042_v62 = vmul.f32 %v4570_v1, %v4942_v47  ;;  %v2043_v11 = vmul.f32 %v4570_v1, %v4949_v54  ;;  %v5009_v33 = vld [vmem:[#allocation2 + $0x149] sm:$0xff] }
 0x130   :  { %v1507_v23 = vadd.f32 %v1443_v53, %v1307_v51  ;;  %v1706_v39 = vadd.f32 %v1642_v52, %v1506_v6  ;;  %v2243_v60 = vmul.f32 %v4505_v14, %v4972_v49  ;;  %v2244_v28 = vmul.f32 %v4505_v14, %v4974_v50  ;;  %v5003_v14 = vld [vmem:[%s6259_s3] ss:$0 sm:$0xff]  ;;  %v5058_v52 = vld [vmem:[%s6259_s3 + $0x3] ss:$0 sm:$0xff]  ;;  %v5064_v51 = vld [vmem:[#allocation2 + $0x167] sm:$0xff]  ;;  %v562_v53 = vpop.f32.mrf.mxu0 }
 0x131   :  { %v2443_v7 = vmul.f32 %v4510_v15, %v4976_v22  ;;  %v2705_v17 = vadd.f32 %v2641_v57, %v2505_v42  ;;  %v2706_v18 = vadd.f32 %v2642_v2, %v2506_v29  ;;  %v558_v16 = vadd.f32 %v4995_v13, %v3784_v36 }
 0x132   :  { %v1707_v44 = vadd.f32 %v1643_v46, %v1507_v23  ;;  %v1906_v25 = vadd.f32 %v1842_v9, %v1706_v39  ;;  %v550_v20 = vadd.f32 %v4995_v13, %v549_v3  ;;  %v571_v21 = vadd.f32 %v4995_v13, %v3787_v58  ;;  %v5073_v9 = vld [vmem:[#allocation2 + $0x16f] sm:$0xff] }
 0x133   :  { %v1044_v15 = vmul.f32 %v5003_v14, %v4921_v4  ;;  %v2762_v26 = vpack.c.bf16 %v2706_v18, %v2705_v17  ;;  %v708_v36 = vmax.f32 %v558_v16, 0.0  ;;  %v1045_v37 = vmul.f32 %v5003_v14, %v4923_v12  ;;  %v5027_v12 = vld [vmem:[%s6259_s3 + $0x1] ss:$0 sm:$0xff]  ;;  %v3788_v16 = vpop.f32.mrf.mxu0 }
 0x134   :  { %v1907_v30 = vadd.f32 %v1843_v55, %v1707_v44  ;;  %v2106_v38 = vadd.f32 %v2042_v62, %v1906_v25  ;;  %v706_v48 = vmax.f32 %v550_v20, 0.0  ;;  %v711_v45 = vmax.f32 %v571_v21, 0.0  ;;  %v5075_v55 = vld [vmem:[#allocation2 + $0x168] sm:$0xff] }
 0x135   :  { %v1108_v4 = vadd.f32 %v5016_v43, %v1044_v15  ;;  %3828 = vmatmul.mubr.msk.bf16.gmra.mxu1 %vm737_vm3, %v2762_v26  ;;  %918 = vst.msk [vmem:[#allocation2 + $0x290] sm:$0xff] %vm737_vm3, %v708_v36  ;;  %v1109_v32 = vadd.f32 %v5016_v43, %v1045_v37  ;;  %v1244_v61 = vmul.f32 %v5027_v12, %v4925_v10  ;;  %v5047_v10 = vld [vmem:[%s6259_s3 + $0x2] ss:$0 sm:$0xff]  ;;  %v5097_v15 = vld [vmem:[#allocation2 + $0x170] sm:$0xff] }
 0x136   :  { %v2107_v56 = vadd.f32 %v2043_v11, %v1907_v30  ;;  %v1245_v5 = vmul.f32 %v5027_v12, %v4934_v24  ;;  %v2307_v41 = vadd.f32 %v2243_v60, %v2106_v38  ;;  %v2444_v0 = vmul.f32 %v5036_v59, %v5007_v31  ;;  %916 = vst.msk [vmem:[#allocation2 + $0x270] sm:$0xff] %vm737_vm3, %v706_v48 }
 0x137   :  { %v2643_v57 = vmul.f32 %v4533_v34, %v5009_v33  ;;  %921 = vst.msk [vmem:[#allocation2 + $0x2c8] sm:$0xff] %vm737_vm3, %v711_v45  ;;  %v1444_v24 = vmul.f32 %v5047_v10, %v4942_v47  ;;  %v1308_v40 = vadd.f32 %v1244_v61, %v1108_v4  ;;  %v1445_v19 = vmul.f32 %v5047_v10, %v4949_v54  ;;  %v2573_v45 = vld [vmem:[#allocation2 + $0x169] sm:$0xff]  ;;  %v5107_v4 = vld [vmem:[#allocation2 + $0x171] sm:$0xff] }
 0x138   :  { %v2308_v35 = vadd.f32 %v2244_v28, %v2107_v56  ;;  %v1309_v3 = vadd.f32 %v1245_v5, %v1109_v32  ;;  %v2507_v2 = vadd.f32 %v2443_v7, %v2307_v41  ;;  %v2644_v8 = vmul.f32 %v4533_v34, %v5020_v63  ;;  %v5069_v34 = vld [vmem:[%s6259_s3 + $0x4] ss:$0 sm:$0xff]  ;;  %v5086_v28 = vld [vmem:[%s6259_s3 + $0x6] ss:$0 sm:$0xff]  ;;  %v565_v5 = vpop.f32.mrf.mxu0 }
 0x139   :  { %v1644_v27 = vmul.f32 %v5058_v52, %v4972_v49  ;;  %v1645_v47 = vmul.f32 %v5058_v52, %v4974_v50  ;;  %v1508_v54 = vadd.f32 %v1444_v24, %v1308_v40  ;;  %v1844_v6 = vmul.f32 %v5069_v34, %v4976_v22 }
 0x13a   :  { %v2508_v46 = vadd.f32 %v2444_v0, %v2308_v35  ;;  %v1509_v42 = vadd.f32 %v1445_v19, %v1309_v3  ;;  %v2707_v29 = vadd.f32 %v2643_v57, %v2507_v2  ;;  %v1845_v23 = vmul.f32 %v5069_v34, %v5007_v31  ;;  %v5126_v35 = vld [vmem:[%s6259_s3 + $0x8] ss:$0 sm:$0xff]  ;;  %v5133_v2 = vld [vmem:[#allocation2 + $0x18f] sm:$0xff] }
 0x13b   :  { %v2044_v62 = vmul.f32 %v4570_v1, %v5009_v33  ;;  %v2045_v11 = vmul.f32 %v4570_v1, %v5020_v63  ;;  %v1708_v39 = vadd.f32 %v1644_v27, %v1508_v54  ;;  %v2245_v7 = vmul.f32 %v5086_v28, %v5064_v51 }
 0x13c   :  { %v2708_v58 = vadd.f32 %v2644_v8, %v2508_v46  ;;  %v1709_v60 = vadd.f32 %v1645_v47, %v1509_v42  ;;  %v2246_v17 = vmul.f32 %v5086_v28, %v5073_v9  ;;  %v2445_v18 = vmul.f32 %v5036_v59, %v5075_v55  ;;  %v5137_v46 = vld [vmem:[#allocation2 + $0x188] sm:$0xff]  ;;  %v5142_v42 = vld [vmem:[%s6259_s3 + $0x5] ss:$0 sm:$0xff] }
 0x13d   :  { %v563_v44 = vadd.f32 %v4995_v13, %v562_v53  ;;  %v1046_v1 = vmul.f32 %v5003_v14, %v4972_v49  ;;  %v1908_v20 = vadd.f32 %v1844_v6, %v1708_v39  ;;  %v1047_v26 = vmul.f32 %v5003_v14, %v4974_v50 }
 0x13e   :  { %v2763_v25 = vpack.c.bf16 %v2708_v58, %v2707_v29  ;;  %v1909_v21 = vadd.f32 %v1845_v23, %v1709_v60  ;;  %v1246_v37 = vmul.f32 %v5027_v12, %v4976_v22  ;;  %v1247_v38 = vmul.f32 %v5027_v12, %v5007_v31 }
 0x13f   :  { %v709_v30 = vmax.f32 %v563_v44, 0.0  ;;  %v1110_v36 = vadd.f32 %v5016_v43, %v1046_v1  ;;  %v2108_v49 = vadd.f32 %v2044_v62, %v1908_v20  ;;  %v1111_v56 = vadd.f32 %v5016_v43, %v1047_v26  ;;  %v3791_v62 = vpop.f32.mrf.mxu0 }
 0x140   :  { %3831 = vmatprep.mubr.msk.bf16.mxu1 %vm737_vm3, %v2763_v25  ;;  %v2109_v48 = vadd.f32 %v2045_v11, %v1909_v21  ;;  %v1446_v50 = vmul.f32 %v5047_v10, %v5009_v33  ;;  %v2446_v32 = vmul.f32 %v5036_v59, %v5097_v15  ;;  %v1447_v31 = vmul.f32 %v5047_v10, %v5020_v63  ;;  %v5121_v33 = vld [vmem:[#allocation2 + $0x187] sm:$0xff] }
 0x141   :  { %919 = vst.msk [vmem:[#allocation2 + $0x2a8] sm:$0xff] %vm737_vm3, %v709_v30  ;;  %v1310_v22 = vadd.f32 %v1246_v37, %v1110_v36  ;;  %v1646_v61 = vmul.f32 %v5058_v52, %v5064_v51  ;;  %v2309_v41 = vadd.f32 %v2245_v7, %v2108_v49  ;;  %v1311_v57 = vadd.f32 %v1247_v38, %v1111_v56  ;;  %v5158_v30 = vld [vmem:[#allocation2 + $0x190] sm:$0xff] }
 0x142   :  { %v2310_v0 = vadd.f32 %v2246_v17, %v2109_v48  ;;  %v1647_v24 = vmul.f32 %v5058_v52, %v5073_v9  ;;  %v2645_v40 = vmul.f32 %v5126_v35, %v2573_v45  ;;  %v2646_v63 = vmul.f32 %v5126_v35, %v5107_v4  ;;  %v2575_v36 = vld [vmem:[#allocation2 + $0x189] sm:$0xff]  ;;  %v5163_v48 = vld [vmem:[#allocation2 + $0x191] sm:$0xff] }
 0x143   :  { %v1510_v3 = vadd.f32 %v1446_v50, %v1310_v22  ;;  %v1846_v19 = vmul.f32 %v5069_v34, %v5075_v55  ;;  %v2509_v8 = vadd.f32 %v2445_v18, %v2309_v41  ;;  %v1511_v47 = vadd.f32 %v1447_v31, %v1311_v57 }
 0x144   :  { %v2510_v27 = vadd.f32 %v2446_v32, %v2310_v0  ;;  %v1847_v53 = vmul.f32 %v5069_v34, %v5097_v15  ;;  %v2046_v6 = vmul.f32 %v5142_v42, %v2573_v45  ;;  %v2047_v29 = vmul.f32 %v5142_v42, %v5107_v4 }
 0x145   :  { %v1710_v54 = vadd.f32 %v1646_v61, %v1510_v3  ;;  %v2247_v23 = vmul.f32 %v5086_v28, %v5121_v33  ;;  %v2709_v11 = vadd.f32 %v2645_v40, %v2509_v8  ;;  %v1711_v39 = vadd.f32 %v1647_v24, %v1511_v47  ;;  %v5186_v8 = vld [vmem:[#allocation2 + $0x1a7] sm:$0xff] }
 0x146   :  { %v2710_v58 = vadd.f32 %v2646_v63, %v2510_v27  ;;  %v2248_v60 = vmul.f32 %v5086_v28, %v5133_v2  ;;  %v2447_v17 = vmul.f32 %v5036_v59, %v5137_v46  ;;  %v574_v18 = vadd.f32 %v4995_v13, %v3788_v16  ;;  %v5188_v27 = vld [vmem:[#allocation2 + $0x1af] sm:$0xff] }
 0x147   :  { %v1910_v7 = vadd.f32 %v1846_v19, %v1710_v54  ;;  %v566_v44 = vadd.f32 %v4995_v13, %v565_v5  ;;  %v1911_v25 = vadd.f32 %v1847_v53, %v1711_v39  ;;  %v587_v20 = vadd.f32 %v4995_v13, %v3791_v62  ;;  %v5190_v47 = vld [vmem:[#allocation2 + $0x1a8] sm:$0xff] }
 0x148   :  { %v2764_v1 = vpack.c.bf16 %v2710_v58, %v2709_v11  ;;  %v1048_v21 = vmul.f32 %v5003_v14, %v5064_v51  ;;  %v712_v37 = vmax.f32 %v574_v18, 0.0  ;;  %v1049_v49 = vmul.f32 %v5003_v14, %v5073_v9  ;;  %v5199_v58 = vld [vmem:[#allocation2 + $0x1b0] sm:$0xff] }
 0x149   :  { %v2110_v26 = vadd.f32 %v2046_v6, %v1910_v7  ;;  %v710_v38 = vmax.f32 %v566_v44, 0.0  ;;  %v2111_v16 = vadd.f32 %v2047_v29, %v1911_v25  ;;  %v715_v56 = vmax.f32 %v587_v20, 0.0  ;;  %v5207_v25 = vld [vmem:[#allocation2 + $0x1a9] sm:$0xff] }
 0x14a   :  { %3832 = vmatmul.mubr.msk.bf16.gmra.mxu1 %vm737_vm3, %v2764_v1  ;;  %v1112_v50 = vadd.f32 %v5016_v43, %v1048_v21  ;;  %v1248_v51 = vmul.f32 %v5027_v12, %v5075_v55  ;;  %922 = vst.msk [vmem:[#allocation2 + $0x2d0] sm:$0xff] %vm737_vm3, %v712_v37  ;;  %v1113_v22 = vadd.f32 %v5016_v43, %v1049_v49 }
 0x14b   :  { %v2311_v32 = vadd.f32 %v2247_v23, %v2110_v26  ;;  %920 = vst.msk [vmem:[#allocation2 + $0x2b0] sm:$0xff] %vm737_vm3, %v710_v38  ;;  %v1249_v9 = vmul.f32 %v5027_v12, %v5097_v15  ;;  %v1448_v31 = vmul.f32 %v5047_v10, %v2573_v45  ;;  %v2312_v61 = vadd.f32 %v2248_v60, %v2111_v16  ;;  %v578_v15 = vpop.f32.mrf.mxu0  ;;  %v5214_v38 = vld [vmem:[#allocation2 + $0x1b1] sm:$0xff] }
 0x14c   :  { %v2448_v5 = vmul.f32 %v5036_v59, %v5158_v30  ;;  %v2647_v41 = vmul.f32 %v5126_v35, %v2575_v36  ;;  %925 = vst.msk [vmem:[#allocation2 + $0x308] sm:$0xff] %vm737_vm3, %v715_v56  ;;  %v1312_v55 = vadd.f32 %v1248_v51, %v1112_v50  ;;  %v2648_v57 = vmul.f32 %v5126_v35, %v5163_v48 }
 0x14d   :  { %v2511_v0 = vadd.f32 %v2447_v17, %v2311_v32  ;;  %v1313_v24 = vadd.f32 %v1249_v9, %v1113_v22  ;;  %v1449_v40 = vmul.f32 %v5047_v10, %v5107_v4  ;;  %v1648_v3 = vmul.f32 %v5058_v52, %v5121_v33  ;;  %v3792_v18 = vpop.f32.mrf.mxu0 }
 0x14e   :  { %v2512_v63 = vadd.f32 %v2448_v5, %v2312_v61  ;;  %v1512_v45 = vadd.f32 %v1448_v31, %v1312_v55  ;;  %v1649_v19 = vmul.f32 %v5058_v52, %v5133_v2  ;;  %v1848_v54 = vmul.f32 %v5069_v34, %v5137_v46 }
 0x14f   :  { %v1513_v53 = vadd.f32 %v1449_v40, %v1313_v24  ;;  %v1849_v4 = vmul.f32 %v5069_v34, %v5158_v30  ;;  %v2048_v6 = vmul.f32 %v5142_v42, %v2575_v36  ;;  %v2711_v29 = vadd.f32 %v2647_v41, %v2511_v0  ;;  %v581_v31 = vpop.f32.mrf.mxu0  ;;  %v5239_v24 = vld [vmem:[#allocation2 + $0x1cf] sm:$0xff] }
 0x150   :  { %v2712_v23 = vadd.f32 %v2648_v57, %v2512_v63  ;;  %v1712_v62 = vadd.f32 %v1648_v3, %v1512_v45  ;;  %v2049_v11 = vmul.f32 %v5142_v42, %v5163_v48  ;;  %v2249_v60 = vmul.f32 %v5086_v28, %v5186_v8  ;;  %v5241_v40 = vld [vmem:[#allocation2 + $0x1c8] sm:$0xff] }
 0x151   :  { %v1713_v39 = vadd.f32 %v1649_v19, %v1513_v53  ;;  %v2250_v7 = vmul.f32 %v5086_v28, %v5188_v27  ;;  %v2449_v17 = vmul.f32 %v5036_v59, %v5190_v47  ;;  %v579_v20 = vadd.f32 %v4995_v13, %v578_v15 }
 0x152   :  { %v2765_v44 = vpack.c.bf16 %v2712_v23, %v2711_v29  ;;  %v1912_v1 = vadd.f32 %v1848_v54, %v1712_v62  ;;  %v1050_v21 = vmul.f32 %v5003_v14, %v5121_v33  ;;  %v2450_v37 = vmul.f32 %v5036_v59, %v5199_v58 }
 0x153   :  { %v1913_v26 = vadd.f32 %v1849_v4, %v1713_v39  ;;  %v1051_v49 = vmul.f32 %v5003_v14, %v5133_v2  ;;  %v1250_v16 = vmul.f32 %v5027_v12, %v5137_v46  ;;  %v713_v50 = vmax.f32 %v579_v20, 0.0  ;;  %v3795_v4 = vpop.f32.mrf.mxu0 }
 0x154   :  { %3835 = vmatprep.mubr.msk.bf16.mxu1 %vm737_vm3, %v2765_v44  ;;  %v2112_v56 = vadd.f32 %v2048_v6, %v1912_v1  ;;  %v1114_v51 = vadd.f32 %v5016_v43, %v1050_v21  ;;  %v1450_v33 = vmul.f32 %v5047_v10, %v2575_v36  ;;  %v2649_v22 = vmul.f32 %v5126_v35, %v5207_v25 }
 0x155   :  { %v2113_v32 = vadd.f32 %v2049_v11, %v1913_v26  ;;  %v1115_v9 = vadd.f32 %v5016_v43, %v1051_v49  ;;  %v1251_v2 = vmul.f32 %v5027_v12, %v5158_v30  ;;  %v2650_v46 = vmul.f32 %v5126_v35, %v5214_v38  ;;  %923 = vst.msk [vmem:[#allocation2 + $0x2e8] sm:$0xff] %vm737_vm3, %v713_v50  ;;  %v5237_v30 = vld [vmem:[#allocation2 + $0x1c7] sm:$0xff] }
 0x156   :  { %v2313_v61 = vadd.f32 %v2249_v60, %v2112_v56  ;;  %v1314_v5 = vadd.f32 %v1250_v16, %v1114_v51  ;;  %v1650_v36 = vmul.f32 %v5058_v52, %v5186_v8  ;;  %v1451_v0 = vmul.f32 %v5047_v10, %v5163_v48  ;;  %v5262_v49 = vld [vmem:[#allocation2 + $0x1c9] sm:$0xff] }
 0x157   :  { %v2314_v41 = vadd.f32 %v2250_v7, %v2113_v32  ;;  %v1315_v55 = vadd.f32 %v1251_v2, %v1115_v9  ;;  %v1651_v57 = vmul.f32 %v5058_v52, %v5188_v27  ;;  %v1850_v45 = vmul.f32 %v5069_v34, %v5190_v47 }
 0x158   :  { %v2513_v15 = vadd.f32 %v2449_v17, %v2313_v61  ;;  %v1514_v63 = vadd.f32 %v1450_v33, %v1314_v5  ;;  %v1851_v3 = vmul.f32 %v5069_v34, %v5199_v58  ;;  %v2050_v48 = vmul.f32 %v5142_v42, %v5207_v25 }
 0x159   :  { %v2514_v19 = vadd.f32 %v2450_v37, %v2314_v41  ;;  %v1515_v53 = vadd.f32 %v1451_v0, %v1315_v55  ;;  %v2051_v54 = vmul.f32 %v5142_v42, %v5214_v38  ;;  %v2251_v29 = vmul.f32 %v5086_v28, %v5237_v30  ;;  %v2380_v37 = vld [vmem:[#allocation2 + $0x1d0] sm:$0xff] }
 0x15a   :  { %v1714_v6 = vadd.f32 %v1650_v36, %v1514_v63  ;;  %v2252_v23 = vmul.f32 %v5086_v28, %v5239_v24  ;;  %v2451_v62 = vmul.f32 %v5036_v59, %v5241_v40  ;;  %v2713_v11 = vadd.f32 %v2649_v22, %v2513_v15  ;;  %v2580_v22 = vld [vmem:[#allocation2 + $0x1d1] sm:$0xff]  ;;  %v5288_v15 = vld [vmem:[#allocation2 + $0x1e7] sm:$0xff]  ;;  %v594_v63 = vpop.f32.mrf.mxu0 }
 0x15b   :  { %v2714_v39 = vadd.f32 %v2650_v46, %v2514_v19  ;;  %v1715_v60 = vadd.f32 %v1651_v57, %v1515_v53  ;;  %v590_v7 = vadd.f32 %v4995_v13, %v3792_v18  ;;  %v582_v44 = vadd.f32 %v4995_v13, %v581_v31  ;;  %v5292_v53 = vld [vmem:[#allocation2 + $0x1ef] sm:$0xff] }
 0x15c   :  { %v1914_v17 = vadd.f32 %v1850_v45, %v1714_v6  ;;  %v603_v1 = vadd.f32 %v4995_v13, %v3795_v4  ;;  %v1052_v20 = vmul.f32 %v5003_v14, %v5186_v8  ;;  %v1053_v56 = vmul.f32 %v5003_v14, %v5188_v27 }
 0x15d   :  { %v2766_v21 = vpack.c.bf16 %v2714_v39, %v2713_v11  ;;  %v1915_v26 = vadd.f32 %v1851_v3, %v1715_v60  ;;  %v716_v16 = vmax.f32 %v590_v7, 0.0  ;;  %v714_v51 = vmax.f32 %v582_v44, 0.0  ;;  %v3796_v44 = vpop.f32.mrf.mxu0 }
 0x15e   :  { %v2114_v50 = vadd.f32 %v2050_v48, %v1914_v17  ;;  %v719_v18 = vmax.f32 %v603_v1, 0.0  ;;  %v1116_v33 = vadd.f32 %v5016_v43, %v1052_v20  ;;  %v1117_v8 = vadd.f32 %v5016_v43, %v1053_v56 }
 0x15f   :  { %3836 = vmatmul.mubr.msk.bf16.gmra.mxu1 %vm737_vm3, %v2766_v21  ;;  %v2115_v32 = vadd.f32 %v2051_v54, %v1915_v26  ;;  %926 = vst.msk [vmem:[#allocation2 + $0x310] sm:$0xff] %vm737_vm3, %v716_v16  ;;  %v1252_v9 = vmul.f32 %v5027_v12, %v5190_v47  ;;  %v1253_v2 = vmul.f32 %v5027_v12, %v5199_v58  ;;  %924 = vst.msk [vmem:[#allocation2 + $0x2f0] sm:$0xff] %vm737_vm3, %v714_v51  ;;  %v5309_v26 = vld [vmem:[#allocation2 + $0x1f0] sm:$0xff] }
 0x160   :  { %v2315_v27 = vadd.f32 %v2251_v29, %v2114_v50  ;;  %v2452_v31 = vmul.f32 %v5036_v59, %v2380_v37  ;;  %v2651_v61 = vmul.f32 %v5126_v35, %v5262_v49  ;;  %929 = vst.msk [vmem:[#allocation2 + $0x348] sm:$0xff] %vm737_vm3, %v719_v18  ;;  %v1452_v46 = vmul.f32 %v5047_v10, %v5207_v25 }
 0x161   :  { %v2316_v5 = vadd.f32 %v2252_v23, %v2115_v32  ;;  %v1316_v36 = vadd.f32 %v1252_v9, %v1116_v33  ;;  %v1317_v41 = vadd.f32 %v1253_v2, %v1117_v8  ;;  %v1453_v47 = vmul.f32 %v5047_v10, %v5214_v38  ;;  %v5294_v38 = vld [vmem:[#allocation2 + $0x1e8] sm:$0xff]  ;;  %v5318_v8 = vld [vmem:[#allocation2 + $0x1f1] sm:$0xff] }
 0x162   :  { %v2515_v58 = vadd.f32 %v2451_v62, %v2315_v27  ;;  %v2652_v55 = vmul.f32 %v5126_v35, %v2580_v22  ;;  %v1652_v0 = vmul.f32 %v5058_v52, %v5237_v30  ;;  %v1653_v57 = vmul.f32 %v5058_v52, %v5239_v24  ;;  %v2581_v32 = vld [vmem:[#allocation2 + $0x1e9] sm:$0xff] }
 0x163   :  { %v2516_v45 = vadd.f32 %v2452_v31, %v2316_v5  ;;  %v1516_v25 = vadd.f32 %v1452_v46, %v1316_v36  ;;  %v1517_v3 = vadd.f32 %v1453_v47, %v1317_v41  ;;  %v1852_v19 = vmul.f32 %v5069_v34, %v5241_v40  ;;  %v597_v31 = vpop.f32.mrf.mxu0  ;;  %v2183_v41 = vld [vmem:[#allocation2 + $0x207] sm:$0xff] }
 0x164   :  { %v2715_v48 = vadd.f32 %v2651_v61, %v2515_v58  ;;  %v1853_v54 = vmul.f32 %v5069_v34, %v2380_v37  ;;  %v2052_v4 = vmul.f32 %v5142_v42, %v5262_v49  ;;  %v2053_v6 = vmul.f32 %v5142_v42, %v2580_v22 }
 0x165   :  { %v2716_v29 = vadd.f32 %v2652_v55, %v2516_v45  ;;  %v1716_v23 = vadd.f32 %v1652_v0, %v1516_v25  ;;  %v1717_v62 = vadd.f32 %v1653_v57, %v1517_v3  ;;  %v2253_v11 = vmul.f32 %v5086_v28, %v5288_v15  ;;  %v2184_v55 = vld [vmem:[#allocation2 + $0x20f] sm:$0xff] }
 0x166   :  { %v2254_v39 = vmul.f32 %v5086_v28, %v5292_v53  ;;  %v2453_v60 = vmul.f32 %v5036_v59, %v5294_v38  ;;  %v595_v7 = vadd.f32 %v4995_v13, %v594_v63  ;;  %v1054_v17 = vmul.f32 %v5003_v14, %v5237_v30  ;;  %v2383_v25 = vld [vmem:[#allocation2 + $0x208] sm:$0xff] }
 0x167   :  { %v2767_v1 = vpack.c.bf16 %v2716_v29, %v2715_v48  ;;  %v1916_v20 = vadd.f32 %v1852_v19, %v1716_v23  ;;  %v1917_v21 = vadd.f32 %v1853_v54, %v1717_v62  ;;  %v1055_v16 = vmul.f32 %v5003_v14, %v5239_v24 }
 0x168   :  { %v717_v56 = vmax.f32 %v595_v7, 0.0  ;;  %v1118_v50 = vadd.f32 %v5016_v43, %v1054_v17  ;;  %v1254_v51 = vmul.f32 %v5027_v12, %v5241_v40  ;;  %v1255_v18 = vmul.f32 %v5027_v12, %v2380_v37 }
 0x169   :  { %3839 = vmatprep.mubr.msk.bf16.mxu1 %vm737_vm3, %v2767_v1  ;;  %v2116_v30 = vadd.f32 %v2052_v4, %v1916_v20  ;;  %v2117_v33 = vadd.f32 %v2053_v6, %v1917_v21  ;;  %v1119_v9 = vadd.f32 %v5016_v43, %v1055_v16  ;;  %v1454_v24 = vmul.f32 %v5047_v10, %v5262_v49  ;;  %v3799_v4 = vpop.f32.mrf.mxu0 }
 0x16a   :  { %v2454_v2 = vmul.f32 %v5036_v59, %v5309_v26  ;;  %927 = vst.msk [vmem:[#allocation2 + $0x328] sm:$0xff] %vm737_vm3, %v717_v56  ;;  %v1318_v40 = vadd.f32 %v1254_v51, %v1118_v50  ;;  %v1455_v37 = vmul.f32 %v5047_v10, %v2580_v22  ;;  %v1654_v27 = vmul.f32 %v5058_v52, %v5288_v15  ;;  %v2384_v56 = vld [vmem:[#allocation2 + $0x210] sm:$0xff] }
 0x16b   :  { %v2317_v61 = vadd.f32 %v2253_v11, %v2116_v30  ;;  %v2318_v46 = vadd.f32 %v2254_v39, %v2117_v33  ;;  %v1319_v5 = vadd.f32 %v1255_v18, %v1119_v9  ;;  %v1655_v36 = vmul.f32 %v5058_v52, %v5292_v53  ;;  %v2583_v50 = vld [vmem:[#allocation2 + $0x209] sm:$0xff]  ;;  %v2584_v33 = vld [vmem:[#allocation2 + $0x211] sm:$0xff] }
 0x16c   :  { %v2653_v49 = vmul.f32 %v5126_v35, %v2581_v32  ;;  %v2654_v47 = vmul.f32 %v5126_v35, %v5318_v8  ;;  %v1518_v58 = vadd.f32 %v1454_v24, %v1318_v40  ;;  %v1854_v22 = vmul.f32 %v5069_v34, %v5294_v38 }
 0x16d   :  { %v2517_v0 = vadd.f32 %v2453_v60, %v2317_v61  ;;  %v2518_v57 = vadd.f32 %v2454_v2, %v2318_v46  ;;  %v1519_v63 = vadd.f32 %v1455_v37, %v1319_v5  ;;  %v1855_v45 = vmul.f32 %v5069_v34, %v5309_v26 }
 0x16e   :  { %v1718_v3 = vadd.f32 %v1654_v27, %v1518_v58  ;;  %v2054_v19 = vmul.f32 %v5142_v42, %v2581_v32  ;;  %v2055_v48 = vmul.f32 %v5142_v42, %v5318_v8  ;;  %v2255_v54 = vmul.f32 %v5086_v28, %v2183_v41 }
 0x16f   :  { %v2717_v6 = vadd.f32 %v2653_v49, %v2517_v0  ;;  %v2718_v29 = vadd.f32 %v2654_v47, %v2518_v57  ;;  %v1719_v23 = vadd.f32 %v1655_v36, %v1519_v63  ;;  %v2256_v62 = vmul.f32 %v5086_v28, %v2184_v55  ;;  %v610_v47 = vpop.f32.mrf.mxu0  ;;  %v2185_v0 = vld [vmem:[#allocation2 + $0x227] sm:$0xff]  ;;  %v2186_v57 = vld [vmem:[#allocation2 + $0x22f] sm:$0xff] }
 0x170   :  { %v1918_v11 = vadd.f32 %v1854_v22, %v1718_v3  ;;  %v2455_v39 = vmul.f32 %v5036_v59, %v2383_v25  ;;  %v606_v60 = vadd.f32 %v4995_v13, %v3796_v44  ;;  %v598_v7 = vadd.f32 %v4995_v13, %v597_v31  ;;  %v2385_v63 = vld [vmem:[#allocation2 + $0x228] sm:$0xff] }
 0x171   :  { %v2768_v17 = vpack.c.bf16 %v2718_v29, %v2717_v6  ;;  %v1919_v1 = vadd.f32 %v1855_v45, %v1719_v23  ;;  %v619_v20 = vadd.f32 %v4995_v13, %v3799_v4  ;;  %v1056_v21 = vmul.f32 %v5003_v14, %v5288_v15  ;;  %v988_v23 = vld [vmem:[#allocation2 + $0x24f] sm:$0xff] }
 0x172   :  { %v2118_v16 = vadd.f32 %v2054_v19, %v1918_v11  ;;  %v720_v51 = vmax.f32 %v606_v60, 0.0  ;;  %v718_v18 = vmax.f32 %v598_v7, 0.0  ;;  %v1057_v30 = vmul.f32 %v5003_v14, %v5292_v53  ;;  %v1386_v60 = vld [vmem:[#allocation2 + $0x249] sm:$0xff]  ;;  %v3800_v7 = vpop.f32.mrf.mxu0 }
 0x173   :  { %3840 = vmatmul.mubr.msk.bf16.gmra.mxu1 %vm737_vm3, %v2768_v17  ;;  %v2119_v44 = vadd.f32 %v2055_v48, %v1919_v1  ;;  %v723_v9 = vmax.f32 %v619_v20, 0.0  ;;  %v1120_v24 = vadd.f32 %v5016_v43, %v1056_v21  ;;  %v1256_v2 = vmul.f32 %v5027_v12, %v5294_v38  ;;  %v2386_v20 = vld [vmem:[#allocation2 + $0x230] sm:$0xff] }
 0x174   :  { %v2319_v40 = vadd.f32 %v2255_v54, %v2118_v16  ;;  %930 = vst.msk [vmem:[#allocation2 + $0x350] sm:$0xff] %vm737_vm3, %v720_v51  ;;  %928 = vst.msk [vmem:[#allocation2 + $0x330] sm:$0xff] %vm737_vm3, %v718_v18  ;;  %v1121_v15 = vadd.f32 %v5016_v43, %v1057_v30  ;;  %v1257_v53 = vmul.f32 %v5027_v12, %v5309_v26  ;;  %v987_v54 = vld [vmem:[#allocation2 + $0x247] sm:$0xff] }
 0x175   :  { %v1456_v37 = vmul.f32 %v5047_v10, %v2581_v32  ;;  %v2320_v27 = vadd.f32 %v2256_v62, %v2119_v44  ;;  %v2456_v31 = vmul.f32 %v5036_v59, %v2384_v56  ;;  %v2655_v61 = vmul.f32 %v5126_v35, %v2583_v50  ;;  %933 = vst.msk [vmem:[#allocation2 + $0x388] sm:$0xff] %vm737_vm3, %v723_v9  ;;  %v1187_v62 = vld [vmem:[#allocation2 + $0x250] sm:$0xff] }
 0x176   :  { %v1320_v38 = vadd.f32 %v1256_v2, %v1120_v24  ;;  %v2519_v46 = vadd.f32 %v2455_v39, %v2319_v40  ;;  %v2656_v5 = vmul.f32 %v5126_v35, %v2584_v33  ;;  %v1321_v36 = vadd.f32 %v1257_v53, %v1121_v15  ;;  %v2585_v51 = vld [vmem:[#allocation2 + $0x229] sm:$0xff]  ;;  %v2586_v24 = vld [vmem:[#allocation2 + $0x231] sm:$0xff] }
 0x177   :  { %v1457_v49 = vmul.f32 %v5047_v10, %v5318_v8  ;;  %v2520_v58 = vadd.f32 %v2456_v31, %v2320_v27  ;;  %v1656_v32 = vmul.f32 %v5058_v52, %v2183_v41  ;;  %v1657_v22 = vmul.f32 %v5058_v52, %v2184_v55  ;;  %v1186_v41 = vld [vmem:[#allocation2 + $0x248] sm:$0xff] }
 0x178   :  { %v1520_v26 = vadd.f32 %v1456_v37, %v1320_v38  ;;  %v1856_v3 = vmul.f32 %v5069_v34, %v2383_v25  ;;  %v1857_v19 = vmul.f32 %v5069_v34, %v2384_v56  ;;  %v2056_v48 = vmul.f32 %v5142_v42, %v2583_v50  ;;  %v1387_v56 = vld [vmem:[#allocation2 + $0x251] sm:$0xff]  ;;  %v1786_v38 = vld [vmem:[#allocation2 + $0x268] sm:$0xff] }
 0x179   :  { %v1521_v45 = vadd.f32 %v1457_v49, %v1321_v36  ;;  %v2719_v4 = vadd.f32 %v2655_v61, %v2519_v46  ;;  %v2720_v8 = vadd.f32 %v2656_v5, %v2520_v58  ;;  %v2057_v29 = vmul.f32 %v5142_v42, %v2584_v33  ;;  %v1586_v33 = vld [vmem:[#allocation2 + $0x267] sm:$0xff]  ;;  %v1587_v53 = vld [vmem:[#allocation2 + $0x26f] sm:$0xff]  ;;  %v613_v5 = vpop.f32.mrf.mxu0 }
 0x17a   :  { %v1720_v6 = vadd.f32 %v1656_v32, %v1520_v26  ;;  %v2257_v11 = vmul.f32 %v5086_v28, %v2185_v0  ;;  %v2258_v39 = vmul.f32 %v5086_v28, %v2186_v57  ;;  %v2457_v25 = vmul.f32 %v5036_v59, %v2385_v63  ;;  %v1787_v46 = vld [vmem:[#allocation2 + $0x270] sm:$0xff] }
 0x17b   :  { %v1721_v55 = vadd.f32 %v1657_v22, %v1521_v45  ;;  %v2769_v17 = vpack.c.bf16 %v2720_v8, %v2719_v4  ;;  %v611_v21 = vadd.f32 %v4995_v13, %v610_v47  ;;  %v1058_v16 = vmul.f32 %v5003_v14, %v987_v54  ;;  %v1986_v26 = vld [vmem:[#allocation2 + $0x269] sm:$0xff]  ;;  %v1987_v32 = vld [vmem:[#allocation2 + $0x271] sm:$0xff] }
 0x17c   :  { %v1920_v1 = vadd.f32 %v1856_v3, %v1720_v6  ;;  %v1059_v18 = vmul.f32 %v5003_v14, %v988_v23  ;;  %v1258_v30 = vmul.f32 %v5027_v12, %v1186_v41  ;;  %v1259_v44 = vmul.f32 %v5027_v12, %v1187_v62  ;;  %v5392_v45 = vld [vmem:[#allocation2 + $0x287] sm:$0xff]  ;;  %v5394_v3 = vld [vmem:[#allocation2 + $0x28f] sm:$0xff]  ;;  %v3803_v62 = vpop.f32.mrf.mxu0 }
 0x17d   :  { %v1921_v50 = vadd.f32 %v1857_v19, %v1721_v55  ;;  %3843 = vmatprep.mubr.msk.bf16.mxu1 %vm737_vm3, %v2769_v17  ;;  %v721_v2 = vmax.f32 %v611_v21, 0.0  ;;  %v1122_v40 = vadd.f32 %v5016_v43, %v1058_v16  ;;  %v1458_v15 = vmul.f32 %v5047_v10, %v1386_v60  ;;  %v5396_v19 = vld [vmem:[#allocation2 + $0x288] sm:$0xff] }
 0x17e   :  { %v2120_v9 = vadd.f32 %v2056_v48, %v1920_v1  ;;  %v2458_v27 = vmul.f32 %v5036_v59, %v2386_v20  ;;  %v1123_v31 = vadd.f32 %v5016_v43, %v1059_v18  ;;  %v1459_v61 = vmul.f32 %v5047_v10, %v1387_v56 }
 0x17f   :  { %v2121_v37 = vadd.f32 %v2057_v29, %v1921_v50  ;;  %v2657_v49 = vmul.f32 %v5126_v35, %v2585_v51  ;;  %931 = vst.msk [vmem:[#allocation2 + $0x368] sm:$0xff] %vm737_vm3, %v721_v2  ;;  %v1322_v47 = vadd.f32 %v1258_v30, %v1122_v40  ;;  %v1658_v58 = vmul.f32 %v5058_v52, %v1586_v33  ;;  %v2388_v30 = vld [vmem:[#allocation2 + $0x290] sm:$0xff] }
 0x180   :  { %v2321_v36 = vadd.f32 %v2257_v11, %v2120_v9  ;;  %v2658_v0 = vmul.f32 %v5126_v35, %v2586_v24  ;;  %v1323_v57 = vadd.f32 %v1259_v44, %v1123_v31  ;;  %v1659_v63 = vmul.f32 %v5058_v52, %v1587_v53  ;;  %v5412_v44 = vld [vmem:[#allocation2 + $0x289] sm:$0xff] }
 0x181   :  { %v2322_v22 = vadd.f32 %v2258_v39, %v2121_v37  ;;  %v1522_v54 = vadd.f32 %v1458_v15, %v1322_v47  ;;  %v1858_v4 = vmul.f32 %v5069_v34, %v1786_v38  ;;  %v1859_v8 = vmul.f32 %v5069_v34, %v1787_v46 }
 0x182   :  { %v2521_v48 = vadd.f32 %v2457_v25, %v2321_v36  ;;  %v1523_v29 = vadd.f32 %v1459_v61, %v1323_v57  ;;  %v2058_v23 = vmul.f32 %v5142_v42, %v1986_v26  ;;  %v2059_v41 = vmul.f32 %v5142_v42, %v1987_v32 }
 0x183   :  { %v2522_v6 = vadd.f32 %v2458_v27, %v2322_v22  ;;  %v1722_v55 = vadd.f32 %v1658_v58, %v1522_v54  ;;  %v2259_v11 = vmul.f32 %v5086_v28, %v5392_v45  ;;  %v2260_v39 = vmul.f32 %v5086_v28, %v5394_v3  ;;  %v2588_v27 = vld [vmem:[#allocation2 + $0x291] sm:$0xff]  ;;  %v626_v54 = vpop.f32.mrf.mxu0 }
 0x184   :  { %v2459_v25 = vmul.f32 %v5036_v59, %v5396_v19  ;;  %v2721_v60 = vadd.f32 %v2657_v49, %v2521_v48  ;;  %v1723_v1 = vadd.f32 %v1659_v63, %v1523_v29  ;;  %v622_v20 = vadd.f32 %v4995_v13, %v3800_v7  ;;  %v5433_v48 = vld [vmem:[#allocation2 + $0x2a7] sm:$0xff]  ;;  %v5437_v29 = vld [vmem:[#allocation2 + $0x2af] sm:$0xff] }
 0x185   :  { %v2722_v17 = vadd.f32 %v2658_v0, %v2522_v6  ;;  %v1922_v21 = vadd.f32 %v1858_v4, %v1722_v55  ;;  %v614_v16 = vadd.f32 %v4995_v13, %v613_v5  ;;  %v635_v56 = vadd.f32 %v4995_v13, %v3803_v62 }
 0x186   :  { %v1060_v50 = vmul.f32 %v5003_v14, %v1586_v33  ;;  %v1923_v18 = vadd.f32 %v1859_v8, %v1723_v1  ;;  %v724_v9 = vmax.f32 %v622_v20, 0.0  ;;  %v1061_v24 = vmul.f32 %v5003_v14, %v1587_v53 }
 0x187   :  { %v2770_v51 = vpack.c.bf16 %v2722_v17, %v2721_v60  ;;  %v2122_v2 = vadd.f32 %v2058_v23, %v1922_v21  ;;  %v722_v40 = vmax.f32 %v614_v16, 0.0  ;;  %v727_v15 = vmax.f32 %v635_v56, 0.0  ;;  %v3804_v16 = vpop.f32.mrf.mxu0 }
 0x188   :  { %v1124_v7 = vadd.f32 %v5016_v43, %v1060_v50  ;;  %v2123_v37 = vadd.f32 %v2059_v41, %v1923_v18  ;;  %934 = vst.msk [vmem:[#allocation2 + $0x390] sm:$0xff] %vm737_vm3, %v724_v9  ;;  %v1125_v33 = vadd.f32 %v5016_v43, %v1061_v24  ;;  %v1260_v31 = vmul.f32 %v5027_v12, %v1786_v38  ;;  %v5454_v18 = vld [vmem:[#allocation2 + $0x2b0] sm:$0xff] }
 0x189   :  { %3844 = vmatmul.mubr.msk.bf16.gmra.mxu1 %vm737_vm3, %v2770_v51  ;;  %v1261_v61 = vmul.f32 %v5027_v12, %v1787_v46  ;;  %v2323_v5 = vadd.f32 %v2259_v11, %v2122_v2  ;;  %v2460_v53 = vmul.f32 %v5036_v59, %v2388_v30  ;;  %v2659_v36 = vmul.f32 %v5126_v35, %v5412_v44 }
 0x18a   :  { %932 = vst.msk [vmem:[#allocation2 + $0x370] sm:$0xff] %vm737_vm3, %v722_v40  ;;  %937 = vst.msk [vmem:[#allocation2 + $0x3c8] sm:$0xff] %vm737_vm3, %v727_v15  ;;  %v1460_v49 = vmul.f32 %v5047_v10, %v1986_v26  ;;  %v2324_v47 = vadd.f32 %v2260_v39, %v2123_v37  ;;  %v1324_v58 = vadd.f32 %v1260_v31, %v1124_v7  ;;  %v5463_v7 = vld [vmem:[#allocation2 + $0x2a9] sm:$0xff]  ;;  %v5465_v37 = vld [vmem:[#allocation2 + $0x2b1] sm:$0xff]  ;;  %v629_v31 = vpop.f32.mrf.mxu0 }
 0x18b   :  { %v1325_v22 = vadd.f32 %v1261_v61, %v1125_v33  ;;  %v1461_v0 = vmul.f32 %v5047_v10, %v1987_v32  ;;  %v2523_v38 = vadd.f32 %v2459_v25, %v2323_v5  ;;  %v2660_v46 = vmul.f32 %v5126_v35, %v2588_v27  ;;  %v5439_v32 = vld [vmem:[#allocation2 + $0x2a8] sm:$0xff] }
 0x18c   :  { %v1660_v57 = vmul.f32 %v5058_v52, %v5392_v45  ;;  %v1661_v63 = vmul.f32 %v5058_v52, %v5394_v3  ;;  %v2524_v4 = vadd.f32 %v2460_v53, %v2324_v47  ;;  %v1524_v8 = vadd.f32 %v1460_v49, %v1324_v58 }
 0x18d   :  { %v1525_v26 = vadd.f32 %v1461_v0, %v1325_v22  ;;  %v1860_v6 = vmul.f32 %v5069_v34, %v5396_v19  ;;  %v2723_v23 = vadd.f32 %v2659_v36, %v2523_v38  ;;  %v1861_v41 = vmul.f32 %v5069_v34, %v2388_v30  ;;  %v5478_v36 = vld [vmem:[#allocation2 + $0x2c7] sm:$0xff] }
 0x18e   :  { %v2060_v62 = vmul.f32 %v5142_v42, %v5412_v44  ;;  %v2061_v55 = vmul.f32 %v5142_v42, %v2588_v27  ;;  %v2724_v11 = vadd.f32 %v2660_v46, %v2524_v4  ;;  %v1724_v39 = vadd.f32 %v1660_v57, %v1524_v8  ;;  %v5490_v38 = vld [vmem:[#allocation2 + $0x2c8] sm:$0xff]  ;;  %v3807_v4 = vpop.f32.mrf.mxu0 }
 0x18f   :  { %v1725_v25 = vadd.f32 %v1661_v63, %v1525_v26  ;;  %v2261_v60 = vmul.f32 %v5086_v28, %v5433_v48  ;;  %v2262_v17 = vmul.f32 %v5086_v28, %v5437_v29  ;;  %v2461_v1 = vmul.f32 %v5036_v59, %v5439_v32 }
 0x190   :  { %v627_v20 = vadd.f32 %v4995_v13, %v626_v54  ;;  %v1062_v21 = vmul.f32 %v5003_v14, %v5392_v45  ;;  %v2771_v56 = vpack.c.bf16 %v2724_v11, %v2723_v23  ;;  %v1924_v50 = vadd.f32 %v1860_v6, %v1724_v39 }
 0x191   :  { %v1925_v51 = vadd.f32 %v1861_v41, %v1725_v25  ;;  %v1063_v9 = vmul.f32 %v5003_v14, %v5394_v3  ;;  %v1262_v40 = vmul.f32 %v5027_v12, %v5396_v19  ;;  %v1263_v13 = vmul.f32 %v5027_v12, %v2388_v30 }
 0x192   :  { %v725_v24 = vmax.f32 %v627_v20, 0.0  ;;  %v1126_v2 = vadd.f32 %v5016_v43, %v1062_v21  ;;  %3847 = vmatprep.mubr.msk.bf16.mxu1 %vm737_vm3, %v2771_v56  ;;  %v2124_v45 = vadd.f32 %v2060_v62, %v1924_v50  ;;  %v1462_v14 = vmul.f32 %v5047_v10, %v5412_v44  ;;  %v5505_v62 = vld [vmem:[%s6260_s2] ss:$0 sm:$0xff]  ;;  %v5519_v20 = vld [vmem:[#allocation2 + $0x2c9] sm:$0xff] }
 0x193   :  { %v2125_v15 = vadd.f32 %v2061_v55, %v1925_v51  ;;  %v1127_v33 = vadd.f32 %v5016_v43, %v1063_v9  ;;  %v2462_v3 = vmul.f32 %v5036_v59, %v5454_v18  ;;  %v1463_v12 = vmul.f32 %v5047_v10, %v2588_v27  ;;  %v5486_v27 = vld [vmem:[#allocation2 + $0x2cf] sm:$0xff] }
 0x194   :  { %935 = vst.msk [vmem:[#allocation2 + $0x3a8] sm:$0xff] %vm737_vm3, %v725_v24  ;;  %v1326_v19 = vadd.f32 %v1262_v40, %v1126_v2  ;;  %v1662_v30 = vmul.f32 %v5058_v52, %v5433_v48  ;;  %v2325_v61 = vadd.f32 %v2261_v60, %v2124_v45  ;;  %v1663_v43 = vmul.f32 %v5058_v52, %v5437_v29  ;;  %v5524_v51 = vld [vmem:[#allocation2 + $0x2d1] sm:$0xff]  ;;  %v5535_v2 = vld [vmem:[%s6259_s3 + $0x1] ss:$0 sm:$0xff] }
 0x195   :  { %v2326_v5 = vadd.f32 %v2262_v17, %v2125_v15  ;;  %v1327_v53 = vadd.f32 %v1263_v13, %v1127_v33  ;;  %v2661_v44 = vmul.f32 %v5126_v35, %v5463_v7  ;;  %v2662_v49 = vmul.f32 %v5126_v35, %v5465_v37  ;;  %v5547_v15 = vld [vmem:[%s6259_s3 + $0x2] ss:$0 sm:$0xff] }
 0x196   :  { %v1526_v47 = vadd.f32 %v1462_v14, %v1326_v19  ;;  %v1862_v10 = vmul.f32 %v5069_v34, %v5439_v32  ;;  %v2525_v58 = vadd.f32 %v2461_v1, %v2325_v61  ;;  %v1863_v52 = vmul.f32 %v5069_v34, %v5454_v18  ;;  %v5517_v1 = vld [vmem:[#allocation2 + $0x2d0] sm:$0xff]  ;;  %v642_v61 = vpop.f32.mrf.mxu0 }
 0x197   :  { %v2526_v22 = vadd.f32 %v2462_v3, %v2326_v5  ;;  %v1527_v0 = vadd.f32 %v1463_v12, %v1327_v53  ;;  %v2062_v57 = vmul.f32 %v5142_v42, %v5463_v7  ;;  %v2063_v63 = vmul.f32 %v5142_v42, %v5465_v37 }
 0x198   :  { %v1726_v46 = vadd.f32 %v1662_v30, %v1526_v47  ;;  %v2263_v54 = vmul.f32 %v5086_v28, %v5478_v36  ;;  %v2725_v8 = vadd.f32 %v2661_v44, %v2525_v58  ;;  %v2264_v23 = vmul.f32 %v5086_v28, %v5486_v27  ;;  %v5513_v28 = vld [vmem:[%s6259_s3] ss:$0 sm:$0xff]  ;;  %v5574_v47 = vld [vmem:[#allocation2 + $0x2e7] sm:$0xff]  ;;  %v5583_v58 = vld [vmem:[%s6259_s3 + $0x4] ss:$0 sm:$0xff] }
 0x199   :  { %v2726_v26 = vadd.f32 %v2662_v49, %v2526_v22  ;;  %v1727_v6 = vadd.f32 %v1663_v43, %v1527_v0  ;;  %v2463_v41 = vmul.f32 %v5036_v59, %v5490_v38  ;;  %v638_v55 = vadd.f32 %v5505_v62, %v3804_v16  ;;  %v5568_v43 = vld [vmem:[%s6259_s3 + $0x3] ss:$0 sm:$0xff] }
 0x19a   :  { %v1926_v34 = vadd.f32 %v1862_v10, %v1726_v46  ;;  %v630_v11 = vadd.f32 %v5505_v62, %v629_v31  ;;  %v651_v60 = vadd.f32 %v5505_v62, %v3807_v4  ;;  %v1064_v59 = vmul.f32 %v5513_v28, %v5433_v48  ;;  %v5529_v48 = vld [vmem:[%s6261_s4] ss:$0 sm:$0xff]  ;;  %v5578_v10 = vld [vmem:[#allocation2 + $0x2e8] sm:$0xff]  ;;  %v5593_v4 = vld [vmem:[#allocation2 + $0x2f0] sm:$0xff] }
 0x19b   :  { %v2772_v39 = vpack.c.bf16 %v2726_v26, %v2725_v8  ;;  %v1927_v25 = vadd.f32 %v1863_v52, %v1727_v6  ;;  %v728_v21 = vmax.f32 %v638_v55, 0.0  ;;  %v1065_v56 = vmul.f32 %v5513_v28, %v5437_v29  ;;  %v5598_v26 = vld [vmem:[%s6259_s3 + $0x6] ss:$0 sm:$0xff] }
 0x19c   :  { %v2126_v17 = vadd.f32 %v2062_v57, %v1926_v34  ;;  %v726_v16 = vmax.f32 %v630_v11, 0.0  ;;  %v731_v9 = vmax.f32 %v651_v60, 0.0  ;;  %v1128_v24 = vadd.f32 %v5529_v48, %v1064_v59  ;;  %v5606_v11 = vld [vmem:[#allocation2 + $0x2e9] sm:$0xff] }
 0x19d   :  { %3848 = vmatmul.mubr.msk.bf16.gmra.mxu1 %vm737_vm3, %v2772_v39  ;;  %v2127_v50 = vadd.f32 %v2063_v63, %v1927_v25  ;;  %v1264_v29 = vmul.f32 %v5535_v2, %v5439_v32  ;;  %938 = vst.msk [vmem:[#allocation2 + $0x3d0] sm:$0xff] %vm737_vm3, %v728_v21  ;;  %v1129_v13 = vadd.f32 %v5529_v48, %v1065_v56  ;;  %v5554_v32 = vld [vmem:[%s6259_s3 + $0x7] ss:$0 sm:$0xff] }
 0x19e   :  { %v2327_v40 = vadd.f32 %v2263_v54, %v2126_v17  ;;  %936 = vst.msk [vmem:[#allocation2 + $0x3b0] sm:$0xff] %vm737_vm3, %v726_v16  ;;  %v1265_v45 = vmul.f32 %v5535_v2, %v5454_v18  ;;  %v1464_v33 = vmul.f32 %v5547_v15, %v5463_v7  ;;  %v2464_v3 = vmul.f32 %v5554_v32, %v5517_v1  ;;  %v5613_v17 = vld [vmem:[#allocation2 + $0x2f1] sm:$0xff] }
 0x19f   :  { %v2328_v14 = vadd.f32 %v2264_v23, %v2127_v50  ;;  %v2663_v18 = vmul.f32 %v5126_v35, %v5519_v20  ;;  %941 = vst.msk [vmem:[#allocation2 + $0x408] sm:$0xff] %vm737_vm3, %v731_v9  ;;  %v1328_v19 = vadd.f32 %v1264_v29, %v1128_v24  ;;  %v2664_v30 = vmul.f32 %v5126_v35, %v5524_v51  ;;  %v5576_v35 = vld [vmem:[#allocation2 + $0x2ef] sm:$0xff]  ;;  %v5626_v29 = vld [vmem:[%s6259_s3 + $0x8] ss:$0 sm:$0xff] }
 0x1a0   :  { %v2527_v12 = vadd.f32 %v2463_v41, %v2327_v40  ;;  %v1329_v7 = vadd.f32 %v1265_v45, %v1129_v13  ;;  %v1465_v31 = vmul.f32 %v5547_v15, %v5465_v37  ;;  %v1664_v44 = vmul.f32 %v5568_v43, %v5478_v36  ;;  %v3808_v41 = vpop.f32.mrf.mxu0  ;;  %v5633_v13 = vld [vmem:[#allocation2 + $0x307] sm:$0xff] }
 0x1a1   :  { %v2528_v5 = vadd.f32 %v2464_v3, %v2328_v14  ;;  %v1528_v53 = vadd.f32 %v1464_v33, %v1328_v19  ;;  %v1665_v49 = vmul.f32 %v5568_v43, %v5486_v27  ;;  %v1864_v22 = vmul.f32 %v5583_v58, %v5490_v38 }
 0x1a2   :  { %v1529_v37 = vadd.f32 %v1465_v31, %v1329_v7  ;;  %v1865_v0 = vmul.f32 %v5583_v58, %v5517_v1  ;;  %v2064_v52 = vmul.f32 %v5142_v42, %v5519_v20  ;;  %v2727_v46 = vadd.f32 %v2663_v18, %v2527_v12  ;;  %v645_v45 = vpop.f32.mrf.mxu0  ;;  %v3923_v18 = vld [vmem:[%s6262_s7 + $0x8] sm:$0xff]  }
 0x1a3   :  { %v2728_v57 = vadd.f32 %v2664_v30, %v2528_v5  ;;  %v1728_v63 = vadd.f32 %v1664_v44, %v1528_v53  ;;  %v2065_v54 = vmul.f32 %v5142_v42, %v5524_v51  ;;  %v2265_v6 = vmul.f32 %v5598_v26, %v5574_v47  ;;  %v5647_v7 = vld [vmem:[#allocation2 + $0x30f] sm:$0xff]  ;;  %3879 = vmatprep.subr.bf16.mxu0 %v3923_v18 }
 0x1a4   :  { %v1729_v8 = vadd.f32 %v1665_v49, %v1529_v37  ;;  %v2266_v23 = vmul.f32 %v5598_v26, %v5576_v35  ;;  %v2465_v34 = vmul.f32 %v5554_v32, %v5578_v10  ;;  %v643_v39 = vadd.f32 %v5505_v62, %v642_v61  ;;  %v5649_v31 = vld [vmem:[#allocation2 + $0x308] sm:$0xff]  ;;  %3880 = vmatpush3.bf16.msra.mxu0 %v3923_v18 }
 0x1a5   :  { %v2773_v55 = vpack.c.bf16 %v2728_v57, %v2727_v46  ;;  %v1928_v42 = vadd.f32 %v1864_v22, %v1728_v63  ;;  %v1066_v25 = vmul.f32 %v5513_v28, %v5478_v36  ;;  %v2466_v59 = vmul.f32 %v5554_v32, %v5593_v4 }
 0x1a6   :  { %v1929_v60 = vadd.f32 %v1865_v0, %v1729_v8  ;;  %v1067_v21 = vmul.f32 %v5513_v28, %v5486_v27  ;;  %v1266_v16 = vmul.f32 %v5535_v2, %v5490_v38  ;;  %v729_v50 = vmax.f32 %v643_v39, 0.0 }
 0x1a7   :  { %3851 = vmatprep.mubr.msk.bf16.mxu1 %vm737_vm3, %v2773_v55  ;;  %v2128_v56 = vadd.f32 %v2064_v52, %v1928_v42  ;;  %v1130_v9 = vadd.f32 %v5529_v48, %v1066_v25  ;;  %v1466_v36 = vmul.f32 %v5547_v15, %v5519_v20  ;;  %v2665_v27 = vmul.f32 %v5626_v29, %v5606_v11  ;;  %v3811_v52 = vpop.f32.mrf.mxu0 }
 0x1a8   :  { %v2129_v24 = vadd.f32 %v2065_v54, %v1929_v60  ;;  %v1131_v38 = vadd.f32 %v5529_v48, %v1067_v21  ;;  %v1267_v40 = vmul.f32 %v5535_v2, %v5517_v1  ;;  %v2666_v20 = vmul.f32 %v5626_v29, %v5613_v17  ;;  %939 = vst.msk [vmem:[#allocation2 + $0x3e8] sm:$0xff] %vm737_vm3, %v729_v50  ;;  %v2396_v21 = vld [vmem:[#allocation2 + $0x310] sm:$0xff] }
 0x1a9   :  { %v2329_v33 = vadd.f32 %v2265_v6, %v2128_v56  ;;  %v1330_v14 = vadd.f32 %v1266_v16, %v1130_v9  ;;  %v1666_v3 = vmul.f32 %v5568_v43, %v5574_v47  ;;  %v1467_v1 = vmul.f32 %v5547_v15, %v5524_v51  ;;  %v5658_v51 = vld [vmem:[%s6259_s3 + $0x5] ss:$0 sm:$0xff]  ;;  %v5675_v16 = vld [vmem:[#allocation2 + $0x309] sm:$0xff] }
 0x1aa   :  { %v2330_v19 = vadd.f32 %v2266_v23, %v2129_v24  ;;  %v1331_v12 = vadd.f32 %v1267_v40, %v1131_v38  ;;  %v1667_v30 = vmul.f32 %v5568_v43, %v5576_v35  ;;  %v1866_v53 = vmul.f32 %v5583_v58, %v5578_v10  ;;  %v2596_v38 = vld [vmem:[#allocation2 + $0x311] sm:$0xff] }
 0x1ab   :  { %v2529_v61 = vadd.f32 %v2465_v34, %v2329_v33  ;;  %v1530_v5 = vadd.f32 %v1466_v36, %v1330_v14  ;;  %v1867_v44 = vmul.f32 %v5583_v58, %v5593_v4  ;;  %v2066_v22 = vmul.f32 %v5658_v51, %v5606_v11 }
 0x1ac   :  { %v2530_v49 = vadd.f32 %v2466_v59, %v2330_v19  ;;  %v1531_v37 = vadd.f32 %v1467_v1, %v1331_v12  ;;  %v2067_v0 = vmul.f32 %v5658_v51, %v5613_v17  ;;  %v2267_v57 = vmul.f32 %v5598_v26, %v5633_v13 }
 0x1ad   :  { %v1730_v46 = vadd.f32 %v1666_v3, %v1530_v5  ;;  %v2268_v63 = vmul.f32 %v5598_v26, %v5647_v7  ;;  %v2467_v54 = vmul.f32 %v5554_v32, %v5649_v31  ;;  %v2729_v8 = vadd.f32 %v2665_v27, %v2529_v61  ;;  %v5701_v61 = vld [vmem:[#allocation2 + $0x327] sm:$0xff] }
 0x1ae   :  { %v2730_v6 = vadd.f32 %v2666_v20, %v2530_v49  ;;  %v1731_v23 = vadd.f32 %v1667_v30, %v1531_v37  ;;  %v654_v34 = vadd.f32 %v5505_v62, %v3808_v41  ;;  %v646_v42 = vadd.f32 %v5505_v62, %v645_v45  ;;  %v5705_v49 = vld [vmem:[#allocation2 + $0x32f] sm:$0xff]  ;;  %v658_v37 = vpop.f32.mrf.mxu0 }
 0x1af   :  { %v1930_v55 = vadd.f32 %v1866_v53, %v1730_v46  ;;  %v667_v39 = vadd.f32 %v5505_v62, %v3811_v52  ;;  %v1068_v25 = vmul.f32 %v5513_v28, %v5574_v47  ;;  %v1069_v50 = vmul.f32 %v5513_v28, %v5576_v35 }
 0x1b0   :  { %v2774_v60 = vpack.c.bf16 %v2730_v6, %v2729_v8  ;;  %v1931_v59 = vadd.f32 %v1867_v44, %v1731_v23  ;;  %v732_v56 = vmax.f32 %v654_v34, 0.0  ;;  %v730_v36 = vmax.f32 %v646_v42, 0.0 }
 0x1b1   :  { %v2130_v9 = vadd.f32 %v2066_v22, %v1930_v55  ;;  %v735_v41 = vmax.f32 %v667_v39, 0.0  ;;  %v1132_v24 = vadd.f32 %v5529_v48, %v1068_v25  ;;  %v1133_v47 = vadd.f32 %v5529_v48, %v1069_v50 }
 0x1b2   :  { %3852 = vmatmul.mubr.msk.bf16.gmra.mxu1 %vm737_vm3, %v2774_v60  ;;  %v2131_v27 = vadd.f32 %v2067_v0, %v1931_v59  ;;  %942 = vst.msk [vmem:[#allocation2 + $0x410] sm:$0xff] %vm737_vm3, %v732_v56  ;;  %v1268_v40 = vmul.f32 %v5535_v2, %v5578_v10  ;;  %v1269_v45 = vmul.f32 %v5535_v2, %v5593_v4  ;;  %940 = vst.msk [vmem:[#allocation2 + $0x3f0] sm:$0xff] %vm737_vm3, %v730_v36  ;;  %v2398_v60 = vld [vmem:[#allocation2 + $0x330] sm:$0xff] }
 0x1b3   :  { %v2331_v35 = vadd.f32 %v2267_v57, %v2130_v9  ;;  %v2468_v33 = vmul.f32 %v5554_v32, %v2396_v21  ;;  %v2667_v20 = vmul.f32 %v5626_v29, %v5675_v16  ;;  %945 = vst.msk [vmem:[#allocation2 + $0x448] sm:$0xff] %vm737_vm3, %v735_v41  ;;  %v1468_v14 = vmul.f32 %v5547_v15, %v5606_v11 }
 0x1b4   :  { %v2332_v3 = vadd.f32 %v2268_v63, %v2131_v27  ;;  %v1332_v18 = vadd.f32 %v1268_v40, %v1132_v24  ;;  %v1333_v19 = vadd.f32 %v1269_v45, %v1133_v47  ;;  %v1469_v10 = vmul.f32 %v5547_v15, %v5613_v17  ;;  %v5707_v17 = vld [vmem:[#allocation2 + $0x328] sm:$0xff]  ;;  %v2598_v27 = vld [vmem:[#allocation2 + $0x331] sm:$0xff] }
 0x1b5   :  { %v2531_v4 = vadd.f32 %v2467_v54, %v2331_v35  ;;  %v2668_v12 = vmul.f32 %v5626_v29, %v2596_v38  ;;  %v1668_v1 = vmul.f32 %v5568_v43, %v5633_v13  ;;  %v1669_v30 = vmul.f32 %v5568_v43, %v5647_v7 }
 0x1b6   :  { %v2532_v5 = vadd.f32 %v2468_v33, %v2332_v3  ;;  %v1532_v53 = vadd.f32 %v1468_v14, %v1332_v18  ;;  %v1533_v11 = vadd.f32 %v1469_v10, %v1333_v19  ;;  %v1868_v44 = vmul.f32 %v5583_v58, %v5649_v31  ;;  %v5741_v10 = vld [vmem:[#allocation2 + $0x347] sm:$0xff] }
 0x1b7   :  { %v2731_v22 = vadd.f32 %v2667_v20, %v2531_v4  ;;  %v1869_v0 = vmul.f32 %v5583_v58, %v2396_v21  ;;  %v2068_v52 = vmul.f32 %v5658_v51, %v5675_v16  ;;  %v2069_v46 = vmul.f32 %v5658_v51, %v2596_v38 }
 0x1b8   :  { %v2732_v57 = vadd.f32 %v2668_v12, %v2532_v5  ;;  %v1732_v63 = vadd.f32 %v1668_v1, %v1532_v53  ;;  %v1733_v54 = vadd.f32 %v1669_v30, %v1533_v11  ;;  %v2269_v8 = vmul.f32 %v5598_v26, %v5701_v61  ;;  %v2200_v30 = vld [vmem:[#allocation2 + $0x34f] sm:$0xff] }
 0x1b9   :  { %v2270_v6 = vmul.f32 %v5598_v26, %v5705_v49  ;;  %v2469_v23 = vmul.f32 %v5554_v32, %v5707_v17  ;;  %v659_v34 = vadd.f32 %v5505_v62, %v658_v37  ;;  %v1070_v55 = vmul.f32 %v5513_v28, %v5633_v13  ;;  %v2597_v13 = vld [vmem:[#allocation2 + $0x329] sm:$0xff] }
 0x1ba   :  { %v2775_v42 = vpack.c.bf16 %v2732_v57, %v2731_v22  ;;  %v1932_v39 = vadd.f32 %v1868_v44, %v1732_v63  ;;  %v1933_v25 = vadd.f32 %v1869_v0, %v1733_v54  ;;  %v1071_v59 = vmul.f32 %v5513_v28, %v5647_v7  ;;  %v3812_v7 = vpop.f32.mrf.mxu0 }
 0x1bb   :  { %v733_v56 = vmax.f32 %v659_v34, 0.0  ;;  %v1134_v50 = vadd.f32 %v5529_v48, %v1070_v55  ;;  %v1270_v9 = vmul.f32 %v5535_v2, %v5649_v31  ;;  %v1271_v36 = vmul.f32 %v5535_v2, %v2396_v21  ;;  %v2399_v34 = vld [vmem:[#allocation2 + $0x348] sm:$0xff]  ;;  %v2400_v55 = vld [vmem:[#allocation2 + $0x350] sm:$0xff] }
 0x1bc   :  { %3855 = vmatprep.mubr.msk.bf16.mxu1 %vm737_vm3, %v2775_v42  ;;  %v2132_v41 = vadd.f32 %v2068_v52, %v1932_v39  ;;  %v2133_v24 = vadd.f32 %v2069_v46, %v1933_v25  ;;  %v1135_v47 = vadd.f32 %v5529_v48, %v1071_v59  ;;  %v1470_v40 = vmul.f32 %v5547_v15, %v5675_v16  ;;  %v661_v5 = vpop.f32.mrf.mxu0 }
 0x1bd   :  { %v2470_v45 = vmul.f32 %v5554_v32, %v2398_v60  ;;  %943 = vst.msk [vmem:[#allocation2 + $0x428] sm:$0xff] %vm737_vm3, %v733_v56  ;;  %v1334_v35 = vadd.f32 %v1270_v9, %v1134_v50  ;;  %v1471_v31 = vmul.f32 %v5547_v15, %v2596_v38  ;;  %v1670_v21 = vmul.f32 %v5568_v43, %v5701_v61 }
 0x1be   :  { %v2333_v33 = vadd.f32 %v2269_v8, %v2132_v41  ;;  %v2334_v20 = vadd.f32 %v2270_v6, %v2133_v24  ;;  %v1335_v14 = vadd.f32 %v1271_v36, %v1135_v47  ;;  %v1671_v3 = vmul.f32 %v5568_v43, %v5705_v49  ;;  %v2600_v36 = vld [vmem:[#allocation2 + $0x351] sm:$0xff] }
 0x1bf   :  { %v2669_v18 = vmul.f32 %v5626_v29, %v2597_v13  ;;  %v2670_v16 = vmul.f32 %v5626_v29, %v2598_v27  ;;  %v1534_v19 = vadd.f32 %v1470_v40, %v1334_v35  ;;  %v1870_v38 = vmul.f32 %v5583_v58, %v5707_v17 }
 0x1c0   :  { %v2533_v4 = vadd.f32 %v2469_v23, %v2333_v33  ;;  %v2534_v12 = vadd.f32 %v2470_v45, %v2334_v20  ;;  %v1535_v1 = vadd.f32 %v1471_v31, %v1335_v14  ;;  %v1871_v11 = vmul.f32 %v5583_v58, %v2398_v60 }
 0x1c1   :  { %v1734_v53 = vadd.f32 %v1670_v21, %v1534_v19  ;;  %v2070_v44 = vmul.f32 %v5658_v51, %v2597_v13  ;;  %v2071_v37 = vmul.f32 %v5658_v51, %v2598_v27  ;;  %v2271_v46 = vmul.f32 %v5598_v26, %v5741_v10  ;;  %v2201_v19 = vld [vmem:[#allocation2 + $0x367] sm:$0xff] }
 0x1c2   :  { %v2733_v22 = vadd.f32 %v2669_v18, %v2533_v4  ;;  %v2734_v0 = vadd.f32 %v2670_v16, %v2534_v12  ;;  %v1735_v52 = vadd.f32 %v1671_v3, %v1535_v1  ;;  %v2272_v63 = vmul.f32 %v5598_v26, %v2200_v30 }
 0x1c3   :  { %v1934_v57 = vadd.f32 %v1870_v38, %v1734_v53  ;;  %v670_v54 = vadd.f32 %v5505_v62, %v3812_v7  ;;  %v662_v8 = vadd.f32 %v5505_v62, %v661_v5  ;;  %v1072_v42 = vmul.f32 %v5513_v28, %v5701_v61  ;;  %v2599_v62 = vld [vmem:[#allocation2 + $0x349] sm:$0xff] }
 0x1c4   :  { %v2776_v6 = vpack.c.bf16 %v2734_v0, %v2733_v22  ;;  %v1935_v23 = vadd.f32 %v1871_v11, %v1735_v52  ;;  %v1073_v39 = vmul.f32 %v5513_v28, %v5705_v49  ;;  %v1272_v50 = vmul.f32 %v5535_v2, %v5707_v17  ;;  %v2202_v11 = vld [vmem:[#allocation2 + $0x36f] sm:$0xff] }
 0x1c5   :  { %v2134_v25 = vadd.f32 %v2070_v44, %v1934_v57  ;;  %v736_v59 = vmax.f32 %v670_v54, 0.0  ;;  %v734_v56 = vmax.f32 %v662_v8, 0.0  ;;  %v1136_v41 = vadd.f32 %v5529_v48, %v1072_v42  ;;  %v2402_v54 = vld [vmem:[#allocation2 + $0x370] sm:$0xff] }
 0x1c6   :  { %3856 = vmatmul.mubr.msk.bf16.gmra.mxu1 %vm737_vm3, %v2776_v6  ;;  %v2135_v9 = vadd.f32 %v2071_v37, %v1935_v23  ;;  %v1137_v24 = vadd.f32 %v5529_v48, %v1073_v39  ;;  %v1273_v61 = vmul.f32 %v5535_v2, %v2398_v60  ;;  %v2471_v49 = vmul.f32 %v5554_v32, %v2399_v34 }
 0x1c7   :  { %v2335_v47 = vadd.f32 %v2271_v46, %v2134_v25  ;;  %v2472_v40 = vmul.f32 %v5554_v32, %v2400_v55  ;;  %946 = vst.msk [vmem:[#allocation2 + $0x450] sm:$0xff] %vm737_vm3, %v736_v59  ;;  %944 = vst.msk [vmem:[#allocation2 + $0x430] sm:$0xff] %vm737_vm3, %v734_v56  ;;  %v1472_v17 = vmul.f32 %v5547_v15, %v2597_v13  ;;  %v2601_v25 = vld [vmem:[#allocation2 + $0x369] sm:$0xff]  ;;  %v2602_v59 = vld [vmem:[#allocation2 + $0x371] sm:$0xff] }
 0x1c8   :  { %v2336_v7 = vadd.f32 %v2272_v63, %v2135_v9  ;;  %v1336_v45 = vadd.f32 %v1272_v50, %v1136_v41  ;;  %v1337_v35 = vadd.f32 %v1273_v61, %v1137_v24  ;;  %v1473_v31 = vmul.f32 %v5547_v15, %v2598_v27  ;;  %v2401_v63 = vld [vmem:[#allocation2 + $0x368] sm:$0xff] }
 0x1c9   :  { %v2535_v21 = vadd.f32 %v2471_v49, %v2335_v47  ;;  %v2671_v33 = vmul.f32 %v5626_v29, %v2599_v62  ;;  %v2672_v60 = vmul.f32 %v5626_v29, %v2600_v36  ;;  %v1672_v20 = vmul.f32 %v5568_v43, %v5741_v10 }
 0x1ca   :  { %v2536_v14 = vadd.f32 %v2472_v40, %v2336_v7  ;;  %v1536_v3 = vadd.f32 %v1472_v17, %v1336_v45  ;;  %v1537_v18 = vadd.f32 %v1473_v31, %v1337_v35  ;;  %v1673_v16 = vmul.f32 %v5568_v43, %v2200_v30  ;;  %v5796_v7 = vld [vmem:[#allocation2 + $0x387] sm:$0xff] }
 0x1cb   :  { %v1872_v13 = vmul.f32 %v5583_v58, %v2399_v34  ;;  %v1873_v4 = vmul.f32 %v5583_v58, %v2400_v55  ;;  %v2072_v27 = vmul.f32 %v5658_v51, %v2599_v62  ;;  %v2735_v12 = vadd.f32 %v2671_v33, %v2535_v21  ;;  %v2204_v21 = vld [vmem:[#allocation2 + $0x38f] sm:$0xff] }
 0x1cc   :  { %v2736_v1 = vadd.f32 %v2672_v60, %v2536_v14  ;;  %v1736_v38 = vadd.f32 %v1672_v20, %v1536_v3  ;;  %v1737_v5 = vadd.f32 %v1673_v16, %v1537_v18  ;;  %v2073_v53 = vmul.f32 %v5658_v51, %v2600_v36  ;;  %v5802_v3 = vpop.f32.mrf.mxu1 }
 0x1cd   :  { %v2273_v44 = vmul.f32 %v5598_v26, %v2201_v19  ;;  %v1074_v37 = vmul.f32 %v5513_v28, %v5741_v10  ;;  %v1075_v22 = vmul.f32 %v5513_v28, %v2200_v30  ;;  %v1274_v57 = vmul.f32 %v5535_v2, %v2399_v34 }
 0x1ce   :  { %v2777_v0 = vpack.c.bf16 %v2736_v1, %v2735_v12  ;;  %v1936_v52 = vadd.f32 %v1872_v13, %v1736_v38  ;;  %v1937_v46 = vadd.f32 %v1873_v4, %v1737_v5  ;;  %v1275_v23 = vmul.f32 %v5535_v2, %v2400_v55  ;;  %v2403_v38 = vld [vmem:[#allocation2 + $0x388] sm:$0xff]  ;;  %v2404_v5 = vld [vmem:[#allocation2 + $0x390] sm:$0xff] }
 0x1cf   :  { %v1138_v8 = vadd.f32 %v5529_v48, %v1074_v37  ;;  %v1139_v6 = vadd.f32 %v5529_v48, %v1075_v22  ;;  %v1474_v42 = vmul.f32 %v5547_v15, %v2599_v62  ;;  %v2274_v30 = vmul.f32 %v5598_v26, %v2202_v11 }
 0x1d0   :  { %3859 = vmatprep.mubr.msk.bf16.mxu1 %vm737_vm3, %v2777_v0  ;;  %v2136_v10 = vadd.f32 %v2072_v27, %v1936_v52  ;;  %v2137_v39 = vadd.f32 %v2073_v53, %v1937_v46  ;;  %v1475_v34 = vmul.f32 %v5547_v15, %v2600_v36  ;;  %v1674_v9 = vmul.f32 %v5568_v43, %v2201_v19  ;;  %v2603_v53 = vld [vmem:[#allocation2 + $0x389] sm:$0xff] }
 0x1d1   :  { %v1338_v56 = vadd.f32 %v1274_v57, %v1138_v8  ;;  %v1339_v50 = vadd.f32 %v1275_v23, %v1139_v6  ;;  %v1675_v41 = vmul.f32 %v5568_v43, %v2202_v11  ;;  %v2473_v62 = vmul.f32 %v5554_v32, %v2401_v63  ;;  %v2604_v8 = vld [vmem:[#allocation2 + $0x391] sm:$0xff]  ;;  %v5814_v23 = vpop.f32.mrf.mxu1 }
 0x1d2   :  { %v2337_v24 = vadd.f32 %v2273_v44, %v2136_v10  ;;  %v2338_v55 = vadd.f32 %v2274_v30, %v2137_v39  ;;  %v2474_v61 = vmul.f32 %v5554_v32, %v2402_v54  ;;  %v2673_v47 = vmul.f32 %v5626_v29, %v2601_v25 }
 0x1d3   :  { %v2674_v49 = vmul.f32 %v5626_v29, %v2602_v59  ;;  %v1538_v40 = vadd.f32 %v1474_v42, %v1338_v56  ;;  %v1539_v17 = vadd.f32 %v1475_v34, %v1339_v50  ;;  %v1874_v35 = vmul.f32 %v5583_v58, %v2401_v63 }
 0x1d4   :  { %v2537_v36 = vadd.f32 %v2473_v62, %v2337_v24  ;;  %v2538_v45 = vadd.f32 %v2474_v61, %v2338_v55  ;;  %v1875_v31 = vmul.f32 %v5583_v58, %v2402_v54  ;;  %v2074_v20 = vmul.f32 %v5658_v51, %v2601_v25 }
 0x1d5   :  { %v1738_v33 = vadd.f32 %v1674_v9, %v1538_v40  ;;  %v1739_v60 = vadd.f32 %v1675_v41, %v1539_v17  ;;  %v2075_v14 = vmul.f32 %v5658_v51, %v2602_v59  ;;  %v2275_v13 = vmul.f32 %v5598_v26, %v5796_v7  ;;  %v5825_v41 = vld [vmem:[#allocation2 + $0x3a7] sm:$0xff] }
 0x1d6   :  { %v2737_v18 = vadd.f32 %v2673_v47, %v2537_v36  ;;  %v2738_v16 = vadd.f32 %v2674_v49, %v2538_v45  ;;  %v1076_v4 = vmul.f32 %v5513_v28, %v2201_v19  ;;  %v2276_v1 = vmul.f32 %v5598_v26, %v2204_v21  ;;  %v2206_v47 = vld [vmem:[#allocation2 + $0x3af] sm:$0xff]  ;;  %v5828_v49 = vpop.f32.mrf.mxu1 }
 0x1d7   :  { %v1938_v27 = vadd.f32 %v1874_v35, %v1738_v33  ;;  %v1939_v12 = vadd.f32 %v1875_v31, %v1739_v60  ;;  %v1077_v44 = vmul.f32 %v5513_v28, %v2202_v11  ;;  %v1276_v0 = vmul.f32 %v5535_v2, %v2401_v63 }
 0x1d8   :  { %v2778_v37 = vpack.c.bf16 %v2738_v16, %v2737_v18  ;;  %v1140_v22 = vadd.f32 %v5529_v48, %v1076_v4  ;;  %v1476_v52 = vmul.f32 %v5547_v15, %v2601_v25  ;;  %v1277_v6 = vmul.f32 %v5535_v2, %v2402_v54 }
 0x1d9   :  { %v2138_v46 = vadd.f32 %v2074_v20, %v1938_v27  ;;  %v2139_v57 = vadd.f32 %v2075_v14, %v1939_v12  ;;  %v1141_v19 = vadd.f32 %v5529_v48, %v1077_v44  ;;  %v2475_v11 = vmul.f32 %v5554_v32, %v2403_v38  ;;  %v2405_v14 = vld [vmem:[#allocation2 + $0x3a8] sm:$0xff] }
 0x1da   :  { %3860 = vmatmul.mubr.msk.bf16.gmra.mxu1 %vm737_vm3, %v2778_v37  ;;  %v2476_v42 = vmul.f32 %v5554_v32, %v2404_v5  ;;  %v2675_v10 = vmul.f32 %v5626_v29, %v2603_v53  ;;  %v1340_v63 = vadd.f32 %v1276_v0, %v1140_v22  ;;  %v1477_v34 = vmul.f32 %v5547_v15, %v2602_v59  ;;  %v2406_v37 = vld [vmem:[#allocation2 + $0x3b0] sm:$0xff] }
 0x1db   :  { %v2339_v39 = vadd.f32 %v2275_v13, %v2138_v46  ;;  %v2340_v30 = vadd.f32 %v2276_v1, %v2139_v57  ;;  %v1341_v25 = vadd.f32 %v1277_v6, %v1141_v19  ;;  %v2676_v56 = vmul.f32 %v5626_v29, %v2604_v8  ;;  %v5841_v1 = vpop.f32.mrf.mxu1  ;;  %v2605_v22 = vld [vmem:[#allocation2 + $0x3a9] sm:$0xff]  ;;  %v2606_v0 = vld [vmem:[#allocation2 + $0x3b1] sm:$0xff] }
 0x1dc   :  { %v1540_v50 = vadd.f32 %v1476_v52, %v1340_v63  ;;  %v1676_v54 = vmul.f32 %v5568_v43, %v5796_v7  ;;  %v1677_v9 = vmul.f32 %v5568_v43, %v2204_v21  ;;  %v1876_v61 = vmul.f32 %v5583_v58, %v2403_v38 }
 0x1dd   :  { %v2539_v24 = vadd.f32 %v2475_v11, %v2339_v39  ;;  %v2540_v55 = vadd.f32 %v2476_v42, %v2340_v30  ;;  %v1541_v62 = vadd.f32 %v1477_v34, %v1341_v25  ;;  %v1877_v59 = vmul.f32 %v5583_v58, %v2404_v5  ;;  %v5855_v30 = vld [vmem:[#allocation2 + $0x3c7] sm:$0xff]  ;;  %v5857_v25 = vld [vmem:[#allocation2 + $0x3cf] sm:$0xff] }
 0x1de   :  { %v1740_v40 = vadd.f32 %v1676_v54, %v1540_v50  ;;  %v2076_v17 = vmul.f32 %v5658_v51, %v2603_v53  ;;  %v2077_v36 = vmul.f32 %v5658_v51, %v2604_v8  ;;  %v2277_v33 = vmul.f32 %v5598_v26, %v5825_v41 }
 0x1df   :  { %v2739_v45 = vadd.f32 %v2675_v10, %v2539_v24  ;;  %v2740_v35 = vadd.f32 %v2676_v56, %v2540_v55  ;;  %v1741_v31 = vadd.f32 %v1677_v9, %v1541_v62  ;;  %v2278_v20 = vmul.f32 %v5598_v26, %v2206_v47 }
 0x1e0   :  { %v1940_v60 = vadd.f32 %v1876_v61, %v1740_v40  ;;  %v1078_v18 = vmul.f32 %v5513_v28, %v5796_v7  ;;  %v1079_v16 = vmul.f32 %v5513_v28, %v2204_v21  ;;  %v1278_v27 = vmul.f32 %v5535_v2, %v2403_v38 }
 0x1e1   :  { %v2779_v13 = vpack.c.bf16 %v2740_v35, %v2739_v45  ;;  %v1941_v4 = vadd.f32 %v1877_v59, %v1741_v31  ;;  %v1279_v12 = vmul.f32 %v5535_v2, %v2404_v5  ;;  %v1478_v7 = vmul.f32 %v5547_v15, %v2603_v53  ;;  %v2407_v35 = vld [vmem:[#allocation2 + $0x3c8] sm:$0xff]  ;;  %v2408_v31 = vld [vmem:[#allocation2 + $0x3d0] sm:$0xff] }
 0x1e2   :  { %v2140_v44 = vadd.f32 %v2076_v17, %v1940_v60  ;;  %v1142_v52 = vadd.f32 %v5529_v48, %v1078_v18  ;;  %v1143_v46 = vadd.f32 %v5529_v48, %v1079_v16  ;;  %v2477_v57 = vmul.f32 %v5554_v32, %v2405_v14 }
 0x1e3   :  { %3863 = vmatprep.mubr.msk.bf16.mxu1 %vm737_vm3, %v2779_v13  ;;  %v2141_v21 = vadd.f32 %v2077_v36, %v1941_v4  ;;  %v1479_v38 = vmul.f32 %v5547_v15, %v2604_v8  ;;  %v1678_v5 = vmul.f32 %v5568_v43, %v5825_v41  ;;  %v1679_v42 = vmul.f32 %v5568_v43, %v2206_v47  ;;  %v5859_v8 = vpop.f32.mrf.mxu1  ;;  %v2607_v13 = vld [vmem:[#allocation2 + $0x3c9] sm:$0xff] }
 0x1e4   :  { %v2341_v19 = vadd.f32 %v2277_v33, %v2140_v44  ;;  %v1342_v6 = vadd.f32 %v1278_v27, %v1142_v52  ;;  %v1343_v11 = vadd.f32 %v1279_v12, %v1143_v46  ;;  %v2478_v63 = vmul.f32 %v5554_v32, %v2406_v37  ;;  %v2608_v44 = vld [vmem:[#allocation2 + $0x3d1] sm:$0xff] }
 0x1e5   :  { %v2342_v10 = vadd.f32 %v2278_v20, %v2141_v21  ;;  %v2677_v53 = vmul.f32 %v5626_v29, %v2605_v22  ;;  %v2678_v39 = vmul.f32 %v5626_v29, %v2606_v0  ;;  %v1878_v54 = vmul.f32 %v5583_v58, %v2405_v14  ;;  %v5872_v20 = vpop.f32.mrf.mxu1 }
 0x1e6   :  { %v2541_v34 = vadd.f32 %v2477_v57, %v2341_v19  ;;  %v1542_v56 = vadd.f32 %v1478_v7, %v1342_v6  ;;  %v1543_v50 = vadd.f32 %v1479_v38, %v1343_v11  ;;  %v1879_v24 = vmul.f32 %v5583_v58, %v2406_v37 }
 0x1e7   :  { %v2542_v9 = vadd.f32 %v2478_v63, %v2342_v10  ;;  %v2078_v55 = vmul.f32 %v5658_v51, %v2605_v22  ;;  %v2079_v62 = vmul.f32 %v5658_v51, %v2606_v0  ;;  %v2279_v59 = vmul.f32 %v5598_v26, %v5855_v30  ;;  %v5884_v19 = vpop.f32.mrf.mxu1  ;;  %v5889_v10 = vld [vmem:[#allocation2 + $0x3e7] sm:$0xff] }
 0x1e8   :  { %v1742_v61 = vadd.f32 %v1678_v5, %v1542_v56  ;;  %v1743_v40 = vadd.f32 %v1679_v42, %v1543_v50  ;;  %v2280_v17 = vmul.f32 %v5598_v26, %v5857_v25  ;;  %v2741_v36 = vadd.f32 %v2677_v53, %v2541_v34 }
 0x1e9   :  { %v2742_v45 = vadd.f32 %v2678_v39, %v2542_v9  ;;  %v1080_v33 = vmul.f32 %v5513_v28, %v5825_v41  ;;  %v1081_v60 = vmul.f32 %v5513_v28, %v2206_v47  ;;  %v1280_v4 = vmul.f32 %v5535_v2, %v2405_v14 }
 0x1ea   :  { %v1942_v18 = vadd.f32 %v1878_v54, %v1742_v61  ;;  %v1943_v16 = vadd.f32 %v1879_v24, %v1743_v40  ;;  %v1281_v27 = vmul.f32 %v5535_v2, %v2406_v37  ;;  %v1480_v7 = vmul.f32 %v5547_v15, %v2605_v22  ;;  %v5899_v61 = vpop.f32.mrf.mxu1 }
 0x1eb   :  { %v2780_v12 = vpack.c.bf16 %v2742_v45, %v2741_v36  ;;  %v1144_v52 = vadd.f32 %v5529_v48, %v1080_v33  ;;  %v1145_v46 = vadd.f32 %v5529_v48, %v1081_v60  ;;  %v2479_v47 = vmul.f32 %v5554_v32, %v2407_v35 }
 0x1ec   :  { %v2142_v41 = vadd.f32 %v2078_v55, %v1942_v18  ;;  %v2143_v21 = vadd.f32 %v2079_v62, %v1943_v16  ;;  %v2480_v57 = vmul.f32 %v5554_v32, %v2408_v31  ;;  %v2679_v14 = vmul.f32 %v5626_v29, %v2607_v13 }
 0x1ed   :  { %3864 = vmatmul.mubr.msk.bf16.gmra.mxu1 %vm737_vm3, %v2780_v12  ;;  %v1344_v38 = vadd.f32 %v1280_v4, %v1144_v52  ;;  %v1345_v37 = vadd.f32 %v1281_v27, %v1145_v46  ;;  %v1481_v5 = vmul.f32 %v5547_v15, %v2606_v0  ;;  %v2680_v22 = vmul.f32 %v5626_v29, %v2608_v44  ;;  %v2409_v27 = vld [vmem:[#allocation2 + $0x3e8] sm:$0xff]  ;;  %v2410_v12 = vld [vmem:[#allocation2 + $0x3f0] sm:$0xff] }
 0x1ee   :  { %v2343_v6 = vadd.f32 %v2279_v59, %v2142_v41  ;;  %v2344_v11 = vadd.f32 %v2280_v17, %v2143_v21  ;;  %v1680_v42 = vmul.f32 %v5568_v43, %v5855_v30  ;;  %v1681_v39 = vmul.f32 %v5568_v43, %v5857_v25  ;;  %v2210_v17 = vld [vmem:[#allocation2 + $0x3ef] sm:$0xff] }
 0x1ef   :  { %v1544_v63 = vadd.f32 %v1480_v7, %v1344_v38  ;;  %v1545_v53 = vadd.f32 %v1481_v5, %v1345_v37  ;;  %v1880_v34 = vmul.f32 %v5583_v58, %v2407_v35  ;;  %v1881_v50 = vmul.f32 %v5583_v58, %v2408_v31 }
 0x1f0   :  { %v2543_v56 = vadd.f32 %v2479_v47, %v2343_v6  ;;  %v2544_v0 = vadd.f32 %v2480_v57, %v2344_v11  ;;  %v2080_v54 = vmul.f32 %v5658_v51, %v2607_v13  ;;  %v2081_v55 = vmul.f32 %v5658_v51, %v2608_v44  ;;  %v2610_v47 = vld [vmem:[#allocation2 + $0x3f1] sm:$0xff] }
 0x1f1   :  { %v1744_v9 = vadd.f32 %v1680_v42, %v1544_v63  ;;  %v1745_v24 = vadd.f32 %v1681_v39, %v1545_v53  ;;  %v2281_v62 = vmul.f32 %v5598_v26, %v5889_v10  ;;  %v1082_v36 = vmul.f32 %v5513_v28, %v5855_v30  ;;  %v5922_v53 = vld [vmem:[#allocation2 + $0x407] sm:$0xff] }
 0x1f2   :  { %v2743_v40 = vadd.f32 %v2679_v14, %v2543_v56  ;;  %v2744_v59 = vadd.f32 %v2680_v22, %v2544_v0  ;;  %v1083_v45 = vmul.f32 %v5513_v28, %v5857_v25  ;;  %v1282_v18 = vmul.f32 %v5535_v2, %v2407_v35  ;;  %v2609_v25 = vld [vmem:[#allocation2 + $0x3e9] sm:$0xff]  ;;  %v5912_v35 = vpop.f32.mrf.mxu1 }
 0x1f3   :  { %v1944_v33 = vadd.f32 %v1880_v34, %v1744_v9  ;;  %v1945_v60 = vadd.f32 %v1881_v50, %v1745_v24  ;;  %v1283_v16 = vmul.f32 %v5535_v2, %v2408_v31  ;;  %v1146_v52 = vadd.f32 %v5529_v48, %v1082_v36  ;;  %v5926_v50 = vld [vmem:[#allocation2 + $0x40f] sm:$0xff] }
 0x1f4   :  { %v2781_v4 = vpack.c.bf16 %v2744_v59, %v2743_v40  ;;  %v1147_v46 = vadd.f32 %v5529_v48, %v1083_v45  ;;  %v1482_v7 = vmul.f32 %v5547_v15, %v2607_v13  ;;  %v2282_v21 = vmul.f32 %v5598_v26, %v2210_v17  ;;  %v3924_v40 = vld [vmem:[%s6262_s7] sm:$0xff]  }
 0x1f5   :  { %v2144_v41 = vadd.f32 %v2080_v54, %v1944_v33  ;;  %v2145_v30 = vadd.f32 %v2081_v55, %v1945_v60  ;;  %v1483_v57 = vmul.f32 %v5547_v15, %v2608_v44  ;;  %v1346_v31 = vadd.f32 %v1282_v18, %v1146_v52  ;;  %v5928_v54 = vpop.f32.mrf.mxu1  ;;  %v2412_v52 = vld [vmem:[#allocation2 + $0x410] sm:$0xff]  ;;  %3881 = vmatprep.subr.bf16.mxu0 %v3924_v40 }
 0x1f6   :  { %3867 = vmatprep.mubr.msk.bf16.mxu1 %vm737_vm3, %v2781_v4  ;;  %v1347_v14 = vadd.f32 %v1283_v16, %v1147_v46  ;;  %v1682_v38 = vmul.f32 %v5568_v43, %v5889_v10  ;;  %v1683_v37 = vmul.f32 %v5568_v43, %v2210_v17  ;;  %v2481_v6 = vmul.f32 %v5554_v32, %v2409_v27  ;;  %v2411_v4 = vld [vmem:[#allocation2 + $0x408] sm:$0xff] }
 0x1f7   :  { %v2345_v13 = vadd.f32 %v2281_v62, %v2144_v41  ;;  %v2346_v5 = vadd.f32 %v2282_v21, %v2145_v30  ;;  %v2482_v11 = vmul.f32 %v5554_v32, %v2410_v12  ;;  %v2681_v22 = vmul.f32 %v5626_v29, %v2609_v25  ;;  %v2611_v46 = vld [vmem:[#allocation2 + $0x409] sm:$0xff]  ;;  %3882 = vmatpush3.bf16.msra.mxu0 %v3924_v40 }
 0x1f8   :  { %v2682_v44 = vmul.f32 %v5626_v29, %v2610_v47  ;;  %v1546_v42 = vadd.f32 %v1482_v7, %v1346_v31  ;;  %v1547_v63 = vadd.f32 %v1483_v57, %v1347_v14  ;;  %v1882_v56 = vmul.f32 %v5583_v58, %v2409_v27  ;;  %v5945_v31 = vpop.f32.mrf.mxu1 }
 0x1f9   :  { %v2545_v39 = vadd.f32 %v2481_v6, %v2345_v13  ;;  %v2546_v34 = vadd.f32 %v2482_v11, %v2346_v5  ;;  %v1883_v0 = vmul.f32 %v5583_v58, %v2410_v12  ;;  %v2082_v55 = vmul.f32 %v5658_v51, %v2609_v25 }
 0x1fa   :  { %v1746_v9 = vadd.f32 %v1682_v38, %v1546_v42  ;;  %v1747_v24 = vadd.f32 %v1683_v37, %v1547_v63  ;;  %v2083_v62 = vmul.f32 %v5658_v51, %v2610_v47  ;;  %v2283_v45 = vmul.f32 %v5598_v26, %v5922_v53  ;;  %v2612_v38 = vld [vmem:[#allocation2 + $0x411] sm:$0xff] }
 0x1fb   :  { %v2745_v59 = vadd.f32 %v2681_v22, %v2545_v39  ;;  %v2746_v36 = vadd.f32 %v2682_v44, %v2546_v34  ;;  %v1084_v33 = vmul.f32 %v5513_v28, %v5889_v10  ;;  %v2284_v16 = vmul.f32 %v5598_v26, %v5926_v50 }
 0x1fc   :  { %v1946_v60 = vadd.f32 %v1882_v56, %v1746_v9  ;;  %v1947_v18 = vadd.f32 %v1883_v0, %v1747_v24  ;;  %v1085_v7 = vmul.f32 %v5513_v28, %v2210_v17  ;;  %v1284_v21 = vmul.f32 %v5535_v2, %v2409_v27  ;;  %v5964_v0 = vld [vmem:[#allocation2 + $0x42f] sm:$0xff] }
 0x1fd   :  { %v2782_v41 = vpack.c.bf16 %v2746_v36, %v2745_v59  ;;  %v1148_v30 = vadd.f32 %v5529_v48, %v1084_v33  ;;  %v1484_v57 = vmul.f32 %v5547_v15, %v2609_v25  ;;  %v1285_v13 = vmul.f32 %v5535_v2, %v2410_v12  ;;  %v5959_v12 = vld [vmem:[#allocation2 + $0x427] sm:$0xff]  ;;  %v3955_v33 = vld [vmem:[%s6259_s3] ss:$0 sm:$0xff] }
 0x1fe   :  { %v2146_v10 = vadd.f32 %v2082_v55, %v1946_v60  ;;  %v2147_v14 = vadd.f32 %v2083_v62, %v1947_v18  ;;  %v1149_v37 = vadd.f32 %v5529_v48, %v1085_v7  ;;  %v2483_v28 = vmul.f32 %v5554_v32, %v2411_v4 }
 0x1ff   :  { %3868 = vmatmul.mubr.msk.bf16.gmra.mxu1 %vm737_vm3, %v2782_v41  ;;  %v2484_v17 = vmul.f32 %v5554_v32, %v2412_v52  ;;  %v2683_v27 = vmul.f32 %v5626_v29, %v2611_v46  ;;  %v1348_v5 = vadd.f32 %v1284_v21, %v1148_v30  ;;  %v1485_v22 = vmul.f32 %v5547_v15, %v2610_v47  ;;  %v5961_v32 = vpop.f32.mrf.mxu1  ;;  %v3956_v41 = vld [vmem:[%s6259_s3 + $0x1] ss:$0 sm:$0xff] }
 0x200   :  { %v2347_v25 = vadd.f32 %v2283_v45, %v2146_v10  ;;  %v2348_v6 = vadd.f32 %v2284_v16, %v2147_v14  ;;  %v1349_v11 = vadd.f32 %v1285_v13, %v1149_v37  ;;  %v2684_v44 = vmul.f32 %v5626_v29, %v2612_v38  ;;  %v2413_v45 = vld [vmem:[#allocation2 + $0x428] sm:$0xff]  ;;  %v3957_v10 = vld [vmem:[%s6261_s4] ss:$0 sm:$0xff] }
 0x201   :  { %v1548_v42 = vadd.f32 %v1484_v57, %v1348_v5  ;;  %v1684_v48 = vmul.f32 %v5568_v43, %v5922_v53  ;;  %v1685_v2 = vmul.f32 %v5568_v43, %v5926_v50  ;;  %v1884_v56 = vmul.f32 %v5583_v58, %v2411_v4  ;;  %v5978_v18 = vpop.f32.mrf.mxu1  ;;  %v2414_v57 = vld [vmem:[#allocation2 + $0x430] sm:$0xff] }
 0x202   :  { %v2547_v63 = vadd.f32 %v2483_v28, %v2347_v25  ;;  %v2548_v39 = vadd.f32 %v2484_v17, %v2348_v6  ;;  %v1549_v34 = vadd.f32 %v1485_v22, %v1349_v11  ;;  %v1885_v47 = vmul.f32 %v5583_v58, %v2412_v52  ;;  %v2613_v28 = vld [vmem:[#allocation2 + $0x429] sm:$0xff] }
 0x203   :  { %v1748_v15 = vadd.f32 %v1684_v48, %v1548_v42  ;;  %v2084_v9 = vmul.f32 %v5658_v51, %v2611_v46  ;;  %v2085_v24 = vmul.f32 %v5658_v51, %v2612_v38  ;;  %v2285_v40 = vmul.f32 %v5598_v26, %v5959_v12 }
 0x204   :  { %v2747_v55 = vadd.f32 %v2683_v27, %v2547_v63  ;;  %v2748_v43 = vadd.f32 %v2684_v44, %v2548_v39  ;;  %v1749_v62 = vadd.f32 %v1685_v2, %v1549_v34  ;;  %v2286_v36 = vmul.f32 %v5598_v26, %v5964_v0  ;;  %v3960_v27 = vld [vmem:[%s6259_s3 + $0x3] ss:$0 sm:$0xff]  ;;  %v6001_v44 = vpop.f32.mrf.mxu1 }
 0x205   :  { %v1948_v59 = vadd.f32 %v1884_v56, %v1748_v15  ;;  %v1086_v58 = vmul.f32 %v3955_v33, %v5922_v53  ;;  %v1087_v60 = vmul.f32 %v3955_v33, %v5926_v50  ;;  %v1286_v30 = vmul.f32 %v3956_v41, %v2411_v4  ;;  %v3958_v50 = vld [vmem:[%s6259_s3 + $0x2] ss:$0 sm:$0xff]  ;;  %v5993_v4 = vld [vmem:[%s6259_s3 + $0x7] ss:$0 sm:$0xff]  ;;  %v3961_v15 = vld [vmem:[%s6259_s3 + $0x4] ss:$0 sm:$0xff] }
 0x206   :  { %v2783_v16 = vpack.c.bf16 %v2748_v43, %v2747_v55  ;;  %v1949_v7 = vadd.f32 %v1885_v47, %v1749_v62  ;;  %v1287_v21 = vmul.f32 %v3956_v41, %v2412_v52  ;;  %v1486_v37 = vmul.f32 %v3958_v50, %v2611_v46  ;;  %v2614_v46 = vld [vmem:[#allocation2 + $0x431] sm:$0xff] }
 0x207   :  { %v2148_v26 = vadd.f32 %v2084_v9, %v1948_v59  ;;  %v1150_v14 = vadd.f32 %v3957_v10, %v1086_v58  ;;  %v1151_v53 = vadd.f32 %v3957_v10, %v1087_v60  ;;  %v2485_v52 = vmul.f32 %v5993_v4, %v2413_v45  ;;  %v2215_v58 = vld [vmem:[#allocation2 + $0x447] sm:$0xff]  ;;  %v2216_v60 = vld [vmem:[#allocation2 + $0x44f] sm:$0xff] }
 0x208   :  { %3871 = vmatprep.mubr.msk.bf16.mxu1 %vm737_vm3, %v2783_v16  ;;  %v2149_v13 = vadd.f32 %v2085_v24, %v1949_v7  ;;  %v1487_v17 = vmul.f32 %v3958_v50, %v2612_v38  ;;  %v1686_v5 = vmul.f32 %v3960_v27, %v5959_v12  ;;  %v1687_v22 = vmul.f32 %v3960_v27, %v5964_v0 }
 0x209   :  { %v2349_v25 = vadd.f32 %v2285_v40, %v2148_v26  ;;  %v1350_v6 = vadd.f32 %v1286_v30, %v1150_v14  ;;  %v1351_v11 = vadd.f32 %v1287_v21, %v1151_v53  ;;  %v2486_v48 = vmul.f32 %v5993_v4, %v2414_v57  ;;  %v6011_v40 = vpop.f32.mrf.mxu1  ;;  %v2415_v53 = vld [vmem:[#allocation2 + $0x448] sm:$0xff] }
 0x20a   :  { %v2350_v42 = vadd.f32 %v2286_v36, %v2149_v13  ;;  %v2685_v38 = vmul.f32 %v5626_v29, %v2613_v28  ;;  %v2686_v56 = vmul.f32 %v5626_v29, %v2614_v46  ;;  %v1886_v47 = vmul.f32 %v3961_v15, %v2413_v45 }
 0x20b   :  { %v2549_v2 = vadd.f32 %v2485_v52, %v2349_v25  ;;  %v1550_v63 = vadd.f32 %v1486_v37, %v1350_v6  ;;  %v1551_v39 = vadd.f32 %v1487_v17, %v1351_v11  ;;  %v1887_v9 = vmul.f32 %v3961_v15, %v2414_v57  ;;  %v2416_v37 = vld [vmem:[#allocation2 + $0x450] sm:$0xff]  ;;  %v3962_v25 = vld [vmem:[%s6259_s3 + $0x6] ss:$0 sm:$0xff]  ;;  %v6018_v11 = vpop.f32.mrf.mxu1 }
 0x20c   :  { %v2550_v34 = vadd.f32 %v2486_v48, %v2350_v42  ;;  %v2086_v43 = vmul.f32 %v5658_v51, %v2613_v28  ;;  %v2087_v62 = vmul.f32 %v5658_v51, %v2614_v46  ;;  %v1088_v29 = vmul.f32 %v3955_v33, %v5959_v12 }
 0x20d   :  { %v1750_v24 = vadd.f32 %v1686_v5, %v1550_v63  ;;  %v1751_v55 = vadd.f32 %v1687_v22, %v1551_v39  ;;  %v2749_v59 = vadd.f32 %v2685_v38, %v2549_v2  ;;  %v1089_v16 = vmul.f32 %v3955_v33, %v5964_v0  ;;  %v2615_v0 = vld [vmem:[#allocation2 + $0x449] sm:$0xff] }
 0x20e   :  { %v2750_v36 = vadd.f32 %v2686_v56, %v2550_v34  ;;  %v1288_v21 = vmul.f32 %v3956_v41, %v2413_v45  ;;  %v1289_v26 = vmul.f32 %v3956_v41, %v2414_v57  ;;  %v1152_v13 = vadd.f32 %v3957_v10, %v1088_v29  ;;  %v2616_v45 = vld [vmem:[#allocation2 + $0x451] sm:$0xff]  ;;  %v3963_v56 = vld [vmem:[%s6259_s3 + $0x8] ss:$0 sm:$0xff] }
 0x20f   :  { %v1950_v7 = vadd.f32 %v1886_v47, %v1750_v24  ;;  %v1951_v30 = vadd.f32 %v1887_v9, %v1751_v55  ;;  %v1153_v52 = vadd.f32 %v3957_v10, %v1089_v16  ;;  %v1488_v51 = vmul.f32 %v3958_v50, %v2613_v28  ;;  %v2217_v24 = vld [vmem:[#allocation2 + $0x467] sm:$0xff] }
 0x210   :  { %v2784_v14 = vpack.c.bf16 %v2750_v36, %v2749_v59  ;;  %v2287_v6 = vmul.f32 %v3962_v25, %v2215_v58  ;;  %v2288_v12 = vmul.f32 %v3962_v25, %v2216_v60  ;;  %v1352_v33 = vadd.f32 %v1288_v21, %v1152_v13  ;;  %v2417_v16 = vld [vmem:[#allocation2 + $0x468] sm:$0xff] }
 0x211   :  { %v2150_v17 = vadd.f32 %v2086_v43, %v1950_v7  ;;  %v2151_v5 = vadd.f32 %v2087_v62, %v1951_v30  ;;  %v1353_v41 = vadd.f32 %v1289_v26, %v1153_v52  ;;  %v1489_v57 = vmul.f32 %v3958_v50, %v2614_v46  ;;  %v2218_v50 = vld [vmem:[#allocation2 + $0x46f] sm:$0xff]  ;;  %v6026_v46 = vpop.f32.mrf.mxu1 }
 0x212   :  { %3872 = vmatmul.mubr.msk.bf16.gmra.mxu1 %vm737_vm3, %v2784_v14  ;;  %v2487_v28 = vmul.f32 %v5993_v4, %v2415_v53  ;;  %v2488_v42 = vmul.f32 %v5993_v4, %v2416_v37  ;;  %v1552_v48 = vadd.f32 %v1488_v51, %v1352_v33  ;;  %v1688_v38 = vmul.f32 %v3960_v27, %v2215_v58  ;;  %v2418_v7 = vld [vmem:[#allocation2 + $0x470] sm:$0xff] }
 0x213   :  { %v2351_v22 = vadd.f32 %v2287_v6, %v2150_v17  ;;  %v2352_v10 = vadd.f32 %v2288_v12, %v2151_v5  ;;  %v1553_v2 = vadd.f32 %v1489_v57, %v1353_v41  ;;  %v1689_v63 = vmul.f32 %v3960_v27, %v2216_v60  ;;  %v3964_v27 = vld [vmem:[%s6259_s3 + $0x5] ss:$0 sm:$0xff]  ;;  %v2617_v52 = vld [vmem:[#allocation2 + $0x469] sm:$0xff]  ;;  %v2618_v51 = vld [vmem:[#allocation2 + $0x471] sm:$0xff]  ;;  %v6031_v17 = vpop.f32.mrf.mxu1 }
 0x214   :  { %v2687_v47 = vmul.f32 %v3963_v56, %v2615_v0  ;;  %v2688_v9 = vmul.f32 %v3963_v56, %v2616_v45  ;;  %v1752_v55 = vadd.f32 %v1688_v38, %v1552_v48  ;;  %v1888_v62 = vmul.f32 %v3961_v15, %v2415_v53  ;;  %v6041_v57 = vld [vmem:[%s6263_s6] ss:$0 sm:$0xff] }
 0x215   :  { %v2551_v39 = vadd.f32 %v2487_v28, %v2351_v22  ;;  %v2552_v34 = vadd.f32 %v2488_v42, %v2352_v10  ;;  %v1753_v43 = vadd.f32 %v1689_v63, %v1553_v2  ;;  %v1889_v59 = vmul.f32 %v3961_v15, %v2416_v37  ;;  %v6036_v33 = vpop.f32.mrf.mxu1 }
 0x216   :  { %v2088_v58 = vmul.f32 %v3964_v27, %v2615_v0  ;;  %v2089_v60 = vmul.f32 %v3964_v27, %v2616_v45  ;;  %v1952_v30 = vadd.f32 %v1888_v62, %v1752_v55  ;;  %v2289_v26 = vmul.f32 %v3962_v25, %v2217_v24 }
 0x217   :  { %v2751_v36 = vadd.f32 %v2687_v47, %v2551_v39  ;;  %v2752_v29 = vadd.f32 %v2688_v9, %v2552_v34  ;;  %v1953_v21 = vadd.f32 %v1889_v59, %v1753_v43  ;;  %v2290_v14 = vmul.f32 %v3962_v25, %v2218_v50  ;;  %v2999_v28 = vpop.f32.mrf.mxu1 }
 0x218   :  { %v2152_v15 = vadd.f32 %v2088_v58, %v1952_v30  ;;  %v2489_v37 = vmul.f32 %v5993_v4, %v2417_v16  ;;  %v2490_v5 = vmul.f32 %v5993_v4, %v2418_v7  ;;  %v2689_v0 = vmul.f32 %v3963_v56, %v2617_v52 }
 0x219   :  { %v2785_v13 = vpack.c.bf16 %v2752_v29, %v2751_v36  ;;  %v2153_v53 = vadd.f32 %v2089_v60, %v1953_v21  ;;  %v2690_v45 = vmul.f32 %v3963_v56, %v2618_v51  ;;  %v2933_v4 = vadd.f32 %v6041_v57, %v5814_v23 }
 0x21a   :  { %v2353_v6 = vadd.f32 %v2289_v26, %v2152_v15  ;;  %v2941_v48 = vadd.f32 %v5802_v3, %v6041_v57  ;;  %v2949_v2 = vadd.f32 %v6041_v57, %v5872_v20  ;;  %v2936_v63 = vadd.f32 %v6041_v57, %v5841_v1 }
 0x21b   :  { %3875 = vmatprep.mubr.msk.bf16.mxu1 %vm737_vm3, %v2785_v13  ;;  %v2354_v12 = vadd.f32 %v2290_v14, %v2153_v53  ;;  %v3187_v38 = vmax.f32 %v2933_v4, 0.0  ;;  %v2944_v23 = vadd.f32 %v5828_v49, %v6041_v57  ;;  %v2952_v47 = vadd.f32 %v6041_v57, %v5899_v61 }
 0x21c   :  { %v2553_v25 = vadd.f32 %v2489_v37, %v2353_v6  ;;  %v3189_v34 = vmax.f32 %v2941_v48, 0.0  ;;  %v3191_v56 = vmax.f32 %v2949_v2, 0.0  ;;  %v2957_v3 = vadd.f32 %v5859_v8, %v6041_v57 }
 0x21d   :  { %v2554_v41 = vadd.f32 %v2490_v5, %v2354_v12  ;;  %v3252_v20 = vsel %vm3251_vm4, %v3187_v38, 0.0  ;;  %v3188_v9 = vmax.f32 %v2936_v63, 0.0  ;;  %v2965_v1 = vadd.f32 %v6041_v57, %v5928_v54 }
 0x21e   :  { %v2753_v22 = vadd.f32 %v2689_v0, %v2553_v25  ;;  %v3253_v50 = vsel %vm3251_vm4, %v3189_v34, 0.0  ;;  %v3190_v55 = vmax.f32 %v2944_v23, 0.0  ;;  %v3255_v49 = vsel %vm3251_vm4, %v3191_v56, 0.0 }
 0x21f   :  { %v2754_v10 = vadd.f32 %v2690_v45, %v2554_v41  ;;  %v6052_v39 = vpop.f32.mrf.mxu1  ;;  %v3192_v43 = vmax.f32 %v2952_v47, 0.0  ;;  %v3254_v62 = vadd.f32 %v3253_v50, %v3252_v20  ;;  %v3193_v59 = vmax.f32 %v2957_v3, 0.0 }
 0x220   :  { %v3283_v61 = vsel %vm3251_vm4, %v3188_v9, 0.0  ;;  %v2960_v8 = vadd.f32 %v5884_v19, %v6041_v57  ;;  %v3195_v36 = vmax.f32 %v2965_v1, 0.0  ;;  %v2968_v29 = vadd.f32 %v6041_v57, %v5961_v32 }
 0x221   :  { %v2786_v42 = vpack.c.bf16 %v2754_v10, %v2753_v22  ;;  %v3012_v24 = vpop.f32.mrf.mxu1  ;;  %v3256_v27 = vadd.f32 %v3255_v49, %v3254_v62  ;;  %v3284_v58 = vsel %vm3251_vm4, %v3190_v55, 0.0  ;;  %v3286_v60 = vsel %vm3251_vm4, %v3192_v43, 0.0 }
 0x222   :  { %v2973_v16 = vadd.f32 %v5912_v35, %v6041_v57  ;;  %v2981_v7 = vadd.f32 %v6041_v57, %v6001_v44  ;;  %v3285_v30 = vadd.f32 %v3284_v58, %v3283_v61  ;;  %v3257_v19 = vsel %vm3251_vm4, %v3193_v59, 0.0 }
 0x223   :  { %3876 = vmatmul.mubr.msk.bf16.gmra.mxu1 %vm737_vm3, %v2786_v42  ;;  %v6070_v54 = vpop.f32.mrf.mxu1  ;;  %v3194_v21 = vmax.f32 %v2960_v8, 0.0  ;;  %v3259_v26 = vsel %vm3251_vm4, %v3195_v36, 0.0  ;;  %v3196_v32 = vmax.f32 %v2968_v29, 0.0  ;;  %v3258_v13 = vadd.f32 %v3257_v19, %v3256_v27 }
 0x224   :  { %v3287_v14 = vadd.f32 %v3286_v60, %v3285_v30  ;;  %v3197_v51 = vmax.f32 %v2973_v16, 0.0  ;;  %v2976_v15 = vadd.f32 %v5945_v31, %v6041_v57  ;;  %v3199_v53 = vmax.f32 %v2981_v7, 0.0 }
 0x225   :  { %v3015_v52 = vpop.f32.mrf.mxu1  ;;  %v2984_v35 = vadd.f32 %v6041_v57, %v6018_v11  ;;  %v3260_v37 = vadd.f32 %v3259_v26, %v3258_v13  ;;  %v3288_v44 = vsel %vm3251_vm4, %v3194_v21, 0.0  ;;  %v3290_v5 = vsel %vm3251_vm4, %v3196_v32, 0.0 }
 0x226   :  { %v2989_v6 = vadd.f32 %v5978_v18, %v6041_v57  ;;  %v2997_v12 = vadd.f32 %v6041_v57, %v6031_v17  ;;  %v3289_v0 = vadd.f32 %v3288_v44, %v3287_v14  ;;  %v3261_v25 = vsel %vm3251_vm4, %v3197_v51, 0.0 }
 0x227   :  { %v3198_v31 = vmax.f32 %v2976_v15, 0.0  ;;  %v3263_v41 = vsel %vm3251_vm4, %v3199_v53, 0.0  ;;  %v3200_v22 = vmax.f32 %v2984_v35, 0.0  ;;  %v3262_v10 = vadd.f32 %v3261_v25, %v3260_v37 }
 0x228   :  { %v3291_v11 = vadd.f32 %v3290_v5, %v3289_v0  ;;  %v3201_v4 = vmax.f32 %v2989_v6, 0.0  ;;  %v2992_v42 = vadd.f32 %v6011_v40, %v6041_v57  ;;  %v3203_v48 = vmax.f32 %v2997_v12, 0.0 }
 0x229   :  { %v3000_v18 = vadd.f32 %v6041_v57, %v2999_v28  ;;  %v3264_v2 = vadd.f32 %v3263_v41, %v3262_v10  ;;  %v3292_v17 = vsel %vm3251_vm4, %v3198_v31, 0.0  ;;  %v3294_v63 = vsel %vm3251_vm4, %v3200_v22, 0.0 }
 0x22a   :  { %v3005_v34 = vadd.f32 %v6026_v46, %v6041_v57  ;;  %v3013_v23 = vadd.f32 %v6041_v57, %v3012_v24  ;;  %v3293_v56 = vadd.f32 %v3292_v17, %v3291_v11  ;;  %v3265_v47 = vsel %vm3251_vm4, %v3201_v4, 0.0 }
 0x22b   :  { %v3202_v3 = vmax.f32 %v2992_v42, 0.0  ;;  %v3267_v40 = vsel %vm3251_vm4, %v3203_v48, 0.0  ;;  %v3204_v20 = vmax.f32 %v3000_v18, 0.0  ;;  %v3266_v28 = vadd.f32 %v3265_v47, %v3264_v2 }
 0x22c   :  { %v3295_v9 = vadd.f32 %v3294_v63, %v3293_v56  ;;  %v3205_v50 = vmax.f32 %v3005_v34, 0.0  ;;  %v3008_v55 = vadd.f32 %v6036_v33, %v6041_v57  ;;  %v3207_v49 = vmax.f32 %v3013_v23, 0.0 }
 0x22d   :  { %v3016_v43 = vadd.f32 %v6041_v57, %v3015_v52  ;;  %v3268_v46 = vadd.f32 %v3267_v40, %v3266_v28  ;;  %v3296_v24 = vsel %vm3251_vm4, %v3202_v3, 0.0  ;;  %v3298_v62 = vsel %vm3251_vm4, %v3204_v20, 0.0 }
 0x22e   :  { %v3021_v59 = vadd.f32 %v6052_v39, %v6041_v57  ;;  %v3297_v8 = vadd.f32 %v3296_v24, %v3295_v9  ;;  %v3269_v29 = vsel %vm3251_vm4, %v3205_v50, 0.0  ;;  %v3206_v27 = vmax.f32 %v3008_v55, 0.0 }
 0x22f   :  { %v3271_v33 = vsel %vm3251_vm4, %v3207_v49, 0.0  ;;  %v3208_v58 = vmax.f32 %v3016_v43, 0.0  ;;  %v3270_v16 = vadd.f32 %v3269_v29, %v3268_v46  ;;  %v3024_v30 = vadd.f32 %v6070_v54, %v6041_v57 }
 0x230   :  { %v3299_v60 = vadd.f32 %v3298_v62, %v3297_v8  ;;  %v3209_v7 = vmax.f32 %v3021_v59, 0.0  ;;  %v3300_v26 = vsel %vm3251_vm4, %v3206_v27, 0.0 }
 0x231   :  { %v3272_v39 = vadd.f32 %v3271_v33, %v3270_v16  ;;  %v3302_v32 = vsel %vm3251_vm4, %v3208_v58, 0.0  ;;  %v3210_v51 = vmax.f32 %v3024_v30, 0.0 }
 0x232   :  { %v3301_v13 = vadd.f32 %v3300_v26, %v3299_v60  ;;  %v3273_v52 = vsel %vm3251_vm4, %v3209_v7, 0.0 }
 0x233   :  { %v3841_v45 = vpop.f32.mrf.mxu1  ;;  %v3274_v37 = vadd.f32 %v3273_v52, %v3272_v39  ;;  %v3304_v0 = vsel %vm3251_vm4, %v3210_v51, 0.0 }
 0x234   :  { %v3037_v14 = vadd.f32 %v3841_v45, %v6041_v57  ;;  %v3303_v35 = vadd.f32 %v3302_v32, %v3301_v13 }
 0x235   :  { %v3028_v38 = vpop.f32.mrf.mxu1 }
 0x236   :  { %v3029_v61 = vadd.f32 %v6041_v57, %v3028_v38  ;;  %v3213_v44 = vmax.f32 %v3037_v14, 0.0  ;;  %v3305_v41 = vadd.f32 %v3304_v0, %v3303_v35 }
 0x237   :  { %v3842_v1 = vpop.f32.mrf.mxu1 }
 0x238   :  { %v3211_v19 = vmax.f32 %v3029_v61, 0.0  ;;  %v3040_v5 = vadd.f32 %v3842_v1, %v6041_v57  ;;  %v3277_v11 = vsel %vm3251_vm4, %v3213_v44, 0.0 }
 0x239   :  { %v3031_v36 = vpop.f32.mrf.mxu1 }
 0x23a   :  { %v3032_v21 = vadd.f32 %v6041_v57, %v3031_v36  ;;  %v3275_v15 = vsel %vm3251_vm4, %v3211_v19, 0.0  ;;  %v3214_v10 = vmax.f32 %v3040_v5, 0.0 }
 0x23b   :  { %v3276_v6 = vadd.f32 %v3275_v15, %v3274_v37 }
 0x23c   :  { %v3212_v53 = vmax.f32 %v3032_v21, 0.0  ;;  %v3308_v23 = vsel %vm3251_vm4, %v3214_v10, 0.0 }
 0x23d   :  { %v3278_v18 = vadd.f32 %v3277_v11, %v3276_v6 }
 0x23e   :  { %v3306_v25 = vsel %vm3251_vm4, %v3212_v53, 0.0 }
 0x23f   :  { %v3307_v48 = vadd.f32 %v3306_v25, %v3305_v41 }
 0x241   :  { %v3309_v3 = vadd.f32 %v3308_v23, %v3307_v48 }
 0x249   :  { %v3845_v54 = vpop.f32.mrf.mxu1 }
 0x24a   :  { %v3053_v45 = vadd.f32 %v3845_v54, %v6041_v57 }
 0x24b   :  { %v3044_v12 = vpop.f32.mrf.mxu1 }
 0x24c   :  { %v3045_v31 = vadd.f32 %v6041_v57, %v3044_v12  ;;  %v3217_v38 = vmax.f32 %v3053_v45, 0.0 }
 0x24d   :  { %v3846_v22 = vpop.f32.mrf.mxu1 }
 0x24e   :  { %v3215_v4 = vmax.f32 %v3045_v31, 0.0  ;;  %v3056_v42 = vadd.f32 %v3846_v22, %v6041_v57  ;;  %v3281_v40 = vsel %vm3251_vm4, %v3217_v38, 0.0 }
 0x24f   :  { %v3047_v2 = vpop.f32.mrf.mxu1 }
 0x250   :  { %v3279_v17 = vsel %vm3251_vm4, %v3215_v4, 0.0  ;;  %v3048_v63 = vadd.f32 %v6041_v57, %v3047_v2  ;;  %v3218_v56 = vmax.f32 %v3056_v42, 0.0 }
 0x251   :  { %v3280_v34 = vadd.f32 %v3279_v17, %v3278_v18 }
 0x252   :  { %v3216_v47 = vmax.f32 %v3048_v63, 0.0  ;;  %v3312_v1 = vsel %vm3251_vm4, %v3218_v56, 0.0 }
 0x253   :  { %v3282_v9 = vadd.f32 %v3281_v40, %v3280_v34 }
 0x254   :  { %v3310_v20 = vsel %vm3251_vm4, %v3216_v47, 0.0 }
 0x255   :  { %v3311_v28 = vadd.f32 %v3310_v20, %v3309_v3  ;;  %v3377_v55 = vmul.f32 0.0625, %v3282_v9 }
 0x257   :  { %v3313_v50 = vadd.f32 %v3312_v1, %v3311_v28 }
 0x259   :  { %v3378_v49 = vmul.f32 0.0625, %v3313_v50 }
 0x25b   :  { %v3381_v43 = vpack.c.bf16 %v3378_v49, %v3377_v55 }
 0x25d   :  { %3883 = vmatprep.mubr.msk.bf16.mxu0 %vm3251_vm4, %v3381_v43  ;;  %v3849_v46 = vpop.f32.mrf.mxu1 }
 0x25e   :  { %v3069_v14 = vadd.f32 %v3849_v46, %v6041_v57 }
 0x25f   :  { %v3060_v24 = vpop.f32.mrf.mxu1 }
 0x260   :  { %v3061_v32 = vadd.f32 %v6041_v57, %v3060_v24  ;;  %v3221_v53 = vmax.f32 %v3069_v14, 0.0 }
 0x261   :  { %v3850_v62 = vpop.f32.mrf.mxu1 }
 0x262   :  { %v3219_v15 = vmax.f32 %v3061_v32, 0.0  ;;  %v3072_v35 = vadd.f32 %v3850_v62, %v6041_v57  ;;  %v3315_v25 = vsel %vm3251_vm4, %v3221_v53, 0.0 }
 0x263   :  { %v3063_v59 = vpop.f32.mrf.mxu1 }
 0x264   :  { %v3064_v52 = vadd.f32 %v6041_v57, %v3063_v59  ;;  %v3314_v6 = vsel %vm3251_vm4, %v3219_v15, 0.0  ;;  %v3222_v45 = vmax.f32 %v3072_v35, 0.0 }
 0x265   :  { %v3316_v22 = vadd.f32 %v3315_v25, %v3314_v6 }
 0x266   :  { %v3220_v44 = vmax.f32 %v3064_v52, 0.0  ;;  %v3346_v38 = vsel %vm3251_vm4, %v3222_v45, 0.0 }
 0x268   :  { %v3345_v11 = vsel %vm3251_vm4, %v3220_v44, 0.0 }
 0x269   :  { %v3347_v23 = vadd.f32 %v3346_v38, %v3345_v11 }
 0x272   :  { %v3853_v61 = vpop.f32.mrf.mxu1 }
 0x273   :  { %v3085_v12 = vadd.f32 %v3853_v61, %v6041_v57 }
 0x274   :  { %v3076_v8 = vpop.f32.mrf.mxu1 }
 0x275   :  { %v3077_v13 = vadd.f32 %v6041_v57, %v3076_v8  ;;  %v3225_v4 = vmax.f32 %v3085_v12, 0.0 }
 0x276   :  { %v3854_v36 = vpop.f32.mrf.mxu1 }
 0x277   :  { %v3223_v37 = vmax.f32 %v3077_v13, 0.0  ;;  %v3088_v42 = vadd.f32 %v3854_v36, %v6041_v57  ;;  %v3319_v47 = vsel %vm3251_vm4, %v3225_v4, 0.0 }
 0x278   :  { %v3079_v29 = vpop.f32.mrf.mxu1 }
 0x279   :  { %v3080_v54 = vadd.f32 %v6041_v57, %v3079_v29  ;;  %v3317_v31 = vsel %vm3251_vm4, %v3223_v37, 0.0  ;;  %v3226_v3 = vmax.f32 %v3088_v42, 0.0 }
 0x27a   :  { %v3318_v2 = vadd.f32 %v3317_v31, %v3316_v22 }
 0x27b   :  { %v3224_v41 = vmax.f32 %v3080_v54, 0.0  ;;  %v3350_v24 = vsel %vm3251_vm4, %v3226_v3, 0.0 }
 0x27c   :  { %v3320_v28 = vadd.f32 %v3319_v47, %v3318_v2 }
 0x27d   :  { %v3348_v17 = vsel %vm3251_vm4, %v3224_v41, 0.0 }
 0x27e   :  { %v3349_v9 = vadd.f32 %v3348_v17, %v3347_v23 }
 0x280   :  { %v3351_v8 = vadd.f32 %v3350_v24, %v3349_v9 }
 0x286   :  { %v3857_v27 = vpop.f32.mrf.mxu1 }
 0x287   :  { %v3101_v63 = vadd.f32 %v3857_v27, %v6041_v57 }
 0x288   :  { %v3092_v33 = vpop.f32.mrf.mxu1 }
 0x289   :  { %v3093_v0 = vadd.f32 %v6041_v57, %v3092_v33  ;;  %v3229_v1 = vmax.f32 %v3101_v63, 0.0 }
 0x28a   :  { %v3858_v58 = vpop.f32.mrf.mxu1 }
 0x28b   :  { %v3227_v48 = vmax.f32 %v3093_v0, 0.0  ;;  %v3104_v50 = vadd.f32 %v3858_v58, %v6041_v57  ;;  %v3323_v36 = vsel %vm3251_vm4, %v3229_v1, 0.0 }
 0x28c   :  { %v3095_v60 = vpop.f32.mrf.mxu1 }
 0x28d   :  { %v3096_v18 = vadd.f32 %v6041_v57, %v3095_v60  ;;  %v3321_v40 = vsel %vm3251_vm4, %v3227_v48, 0.0  ;;  %v3230_v29 = vmax.f32 %v3104_v50, 0.0 }
 0x28e   :  { %v3322_v43 = vadd.f32 %v3321_v40, %v3320_v28 }
 0x28f   :  { %v3228_v20 = vmax.f32 %v3096_v18, 0.0 }
 0x290   :  { %v3324_v60 = vadd.f32 %v3323_v36, %v3322_v43 }
 0x291   :  { %v3352_v62 = vsel %vm3251_vm4, %v3228_v20, 0.0 }
 0x292   :  { %v3353_v58 = vadd.f32 %v3352_v62, %v3351_v8 }
 0x29a   :  { %v3861_v16 = vpop.f32.mrf.mxu1 }
 0x29b   :  { %v3117_v59 = vadd.f32 %v3861_v16, %v6041_v57 }
 0x29c   :  { %v3108_v7 = vpop.f32.mrf.mxu1 }
 0x29d   :  { %v3109_v34 = vadd.f32 %v6041_v57, %v3108_v7 }
 0x29e   :  { %v6134_v30 = vpop.f32.mrf.mxu1 }
 0x29f   :  { %v3231_v55 = vmax.f32 %v3109_v34, 0.0  ;;  %v3120_v32 = vadd.f32 %v6134_v30, %v6041_v57 }
 0x2a0   :  { %v3111_v19 = vpop.f32.mrf.mxu1 }
 0x2a1   :  { %v3112_v49 = vadd.f32 %v6041_v57, %v3111_v19  ;;  %v3325_v27 = vsel %vm3251_vm4, %v3231_v55, 0.0  ;;  %v3233_v19 = vmax.f32 %v3117_v59, 0.0  ;;  %v3234_v44 = vmax.f32 %v3120_v32, 0.0 }
 0x2a2   :  { %v3326_v16 = vadd.f32 %v3325_v27, %v3324_v60 }
 0x2a3   :  { %v3232_v33 = vmax.f32 %v3112_v49, 0.0  ;;  %v3327_v54 = vsel %vm3251_vm4, %v3233_v19, 0.0  ;;  %v3358_v22 = vsel %vm3251_vm4, %v3234_v44, 0.0 }
 0x2a5   :  { %v3356_v15 = vsel %vm3251_vm4, %v3232_v33, 0.0 }
 0x2ad   :  { %v6136_v21 = vpop.f32.mrf.mxu1 }
 0x2ae   :  { %v3133_v53 = vadd.f32 %v6136_v21, %v6041_v57 }
 0x2af   :  { %v3124_v39 = vpop.f32.mrf.mxu1 }
 0x2b0   :  { %v3125_v61 = vadd.f32 %v6041_v57, %v3124_v39  ;;  %v3354_v39 = vsel %vm3251_vm4, %v3230_v29, 0.0  ;;  %v3237_v25 = vmax.f32 %v3133_v53, 0.0 }
 0x2b1   :  { %v6138_v26 = vpop.f32.mrf.mxu1  ;;  %v3355_v37 = vadd.f32 %v3354_v39, %v3353_v58 }
 0x2b2   :  { %v3235_v14 = vmax.f32 %v3125_v61, 0.0  ;;  %v3136_v45 = vadd.f32 %v6138_v26, %v6041_v57  ;;  %v3331_v18 = vsel %vm3251_vm4, %v3237_v25, 0.0 }
 0x2b3   :  { %v3127_v51 = vpop.f32.mrf.mxu1  ;;  %v3357_v12 = vadd.f32 %v3356_v15, %v3355_v37 }
 0x2b4   :  { %v3128_v13 = vadd.f32 %v6041_v57, %v3127_v51  ;;  %v3329_v30 = vsel %vm3251_vm4, %v3235_v14, 0.0  ;;  %v3328_v51 = vadd.f32 %v3327_v54, %v3326_v16  ;;  %v3238_v2 = vmax.f32 %v3136_v45, 0.0 }
 0x2b5   :  { %v3359_v42 = vadd.f32 %v3358_v22, %v3357_v12 }
 0x2b6   :  { %v3236_v6 = vmax.f32 %v3128_v13, 0.0  ;;  %v3330_v21 = vadd.f32 %v3329_v30, %v3328_v51 }
 0x2b8   :  { %v3360_v11 = vsel %vm3251_vm4, %v3236_v6, 0.0  ;;  %v3332_v63 = vadd.f32 %v3331_v18, %v3330_v21 }
 0x2b9   :  { %v3361_v17 = vadd.f32 %v3360_v11, %v3359_v42 }
 0x2bf   :  { %v6146_v5 = vpop.f32.mrf.mxu1 }
 0x2c1   :  { %v3140_v10 = vpop.f32.mrf.mxu1 }
 0x2c2   :  { %v3141_v35 = vadd.f32 %v6041_v57, %v3140_v10  ;;  %v3149_v10 = vadd.f32 %v6146_v5, %v6041_v57  ;;  %v3362_v5 = vsel %vm3251_vm4, %v3238_v2, 0.0 }
 0x2c3   :  { %v3870_v56 = vpop.f32.mrf.mxu1  ;;  %v3363_v28 = vadd.f32 %v3362_v5, %v3361_v17 }
 0x2c4   :  { %v3239_v31 = vmax.f32 %v3141_v35, 0.0  ;;  %v3241_v34 = vmax.f32 %v3149_v10, 0.0  ;;  %v3152_v23 = vadd.f32 %v3870_v56, %v6041_v57 }
 0x2c5   :  { %v3143_v46 = vpop.f32.mrf.mxu1 }
 0x2c6   :  { %v3144_v41 = vadd.f32 %v6041_v57, %v3143_v46  ;;  %v3333_v26 = vsel %vm3251_vm4, %v3239_v31, 0.0  ;;  %v3335_v1 = vsel %vm3251_vm4, %v3241_v34, 0.0  ;;  %v3242_v50 = vmax.f32 %v3152_v23, 0.0 }
 0x2c7   :  { %v3334_v40 = vadd.f32 %v3333_v26, %v3332_v63 }
 0x2c8   :  { %v3240_v38 = vmax.f32 %v3144_v41, 0.0  ;;  %v3366_v8 = vsel %vm3251_vm4, %v3242_v50, 0.0 }
 0x2c9   :  { %v3336_v46 = vadd.f32 %v3335_v1, %v3334_v40 }
 0x2ca   :  { %v3364_v20 = vsel %vm3251_vm4, %v3240_v38, 0.0 }
 0x2cb   :  { %v3365_v43 = vadd.f32 %v3364_v20, %v3363_v28 }
 0x2cd   :  { %v3367_v33 = vadd.f32 %v3366_v8, %v3365_v43 }
 0x2d2   :  { %v3873_v7 = vpop.f32.mrf.mxu1 }
 0x2d3   :  { %v3165_v9 = vadd.f32 %v3873_v7, %v6041_v57 }
 0x2d4   :  { %v3156_v52 = vpop.f32.mrf.mxu1 }
 0x2d5   :  { %v3157_v4 = vadd.f32 %v6041_v57, %v3156_v52  ;;  %v3245_v24 = vmax.f32 %v3165_v9, 0.0 }
 0x2d6   :  { %v3874_v0 = vpop.f32.mrf.mxu1 }
 0x2d7   :  { %v3243_v47 = vmax.f32 %v3157_v4, 0.0  ;;  %v3168_v62 = vadd.f32 %v3874_v0, %v6041_v57  ;;  %v3339_v60 = vsel %vm3251_vm4, %v3245_v24, 0.0 }
 0x2d8   :  { %v3159_v48 = vpop.f32.mrf.mxu1 }
 0x2d9   :  { %v3160_v3 = vadd.f32 %v6041_v57, %v3159_v48  ;;  %v3337_v55 = vsel %vm3251_vm4, %v3243_v47, 0.0  ;;  %v3246_v7 = vmax.f32 %v3168_v62, 0.0 }
 0x2da   :  { %v3338_v59 = vadd.f32 %v3337_v55, %v3336_v46 }
 0x2db   :  { %v3244_v49 = vmax.f32 %v3160_v3, 0.0  ;;  %v3370_v35 = vsel %vm3251_vm4, %v3246_v7, 0.0 }
 0x2dc   :  { %v3340_v13 = vadd.f32 %v3339_v60, %v3338_v59 }
 0x2dd   :  { %v3368_v36 = vsel %vm3251_vm4, %v3244_v49, 0.0 }
 0x2de   :  { %v3369_v14 = vadd.f32 %v3368_v36, %v3367_v33 }
 0x2e0   :  { %v3371_v44 = vadd.f32 %v3370_v35, %v3369_v14  ;;  %v3536_v35 = vld [vmem:[%s6267_s11] sm:$0xff] }
 0x2e3   :  { %v3877_v56 = vpop.f32.mrf.mxu1 }
 0x2e4   :  { %v3181_v29 = vadd.f32 %v3877_v56, %v6041_v57 }
 0x2e5   :  { %v3172_v61 = vpop.f32.mrf.mxu1 }
 0x2e6   :  { %v3173_v27 = vadd.f32 %v6041_v57, %v3172_v61  ;;  %v3249_v52 = vmax.f32 %v3181_v29, 0.0 }
 0x2e7   :  { %v3878_v58 = vpop.f32.mrf.mxu1 }
 0x2e8   :  { %v3247_v19 = vmax.f32 %v3173_v27, 0.0  ;;  %v3184_v32 = vadd.f32 %v3878_v58, %v6041_v57  ;;  %v3343_v30 = vsel %vm3251_vm4, %v3249_v52, 0.0 }
 0x2e9   :  { %v3175_v16 = vpop.f32.mrf.mxu1 }
 0x2ea   :  { %v3341_v39 = vsel %vm3251_vm4, %v3247_v19, 0.0  ;;  %v3176_v15 = vadd.f32 %v6041_v57, %v3175_v16  ;;  %v3250_v37 = vmax.f32 %v3184_v32, 0.0  ;;  %v3670_v57 = vld [vmem:[%s6264_s8] ss:$0 sm:$0xff] }
 0x2eb   :  { %v3342_v53 = vadd.f32 %v3341_v39, %v3340_v13  ;;  %v3675_v16 = vld [vmem:[%s6265_s9] ss:$0 sm:$0xff] }
 0x2ec   :  { %v3248_v54 = vmax.f32 %v3176_v15, 0.0  ;;  %v3374_v0 = vsel %vm3251_vm4, %v3250_v37, 0.0  ;;  %v3676_v39 = vld [vmem:[%s6266_s10] ss:$0 sm:$0xff] }
 0x2ed   :  { %v3344_v12 = vadd.f32 %v3343_v30, %v3342_v53 }
 0x2ee   :  { %v3372_v6 = vsel %vm3251_vm4, %v3248_v54, 0.0 }
 0x2ef   :  { %v3373_v51 = vadd.f32 %v3372_v6, %v3371_v44  ;;  %v3379_v45 = vmul.f32 0.0625, %v3344_v12 }
 0x2f1   :  { %v3375_v25 = vadd.f32 %v3374_v0, %v3373_v51  ;;  %v3537_v0 = vld [vmem:[%s6267_s11 + $0x8] sm:$0xff] }
 0x2f3   :  { %v3380_v31 = vmul.f32 0.0625, %v3375_v25 }
 0x2f5   :  { %v3382_v41 = vpack.c.bf16 %v3380_v31, %v3379_v45  ;;  %v3538_v31 = vld [vmem:[%s6267_s11 + $0x10] sm:$0xff] }
 0x2f7   :  { %3884 = vmatmul.mubr.msk.bf16.vlgmr.msra.gmra.mxu0 %vm3251_vm4, %v3382_v41 }
 0x3b7   :  { %v3885_v21 = vpop.f32.mrf.mxu0 }
 0x3b8   :  { %v3455_v22 = vadd.f32 %v3885_v21, %v3670_v57 }
 0x3b9   :  { %v3446_v11 = vpop.f32.mrf.mxu0 }
 0x3ba   :  { %v3447_v10 = vadd.f32 %v3670_v57, %v3446_v11  ;;  %v3467_v4 = vsel %vm3251_vm4, %v3455_v22, 0.0 }
 0x3bb   :  { %3468 = vadd.xlane.f32.xlu1 %v3467_v4  ;;  %v3886_v42 = vpop.f32.mrf.mxu0 }
 0x3bc   :  { %v3458_v48 = vadd.f32 %v3886_v42, %v3670_v57  ;;  %v3461_v18 = vsel %vm3251_vm4, %v3447_v10, 0.0 }
 0x3bd   :  { %v3449_v2 = vpop.f32.mrf.mxu0  ;;  %3462 = vadd.xlane.f32.xlu0 %v3461_v18 }
 0x3be   :  { %v3450_v26 = vadd.f32 %v3670_v57, %v3449_v2  ;;  %v3470_v38 = vsel %vm3251_vm4, %v3458_v48, 0.0 }
 0x3bf   :  { %3471 = vadd.xlane.f32.xlu1 %v3470_v38 }
 0x3c0   :  { %v3464_v17 = vsel %vm3251_vm4, %v3450_v26, 0.0 }
 0x3c1   :  { %3465 = vadd.xlane.f32.xlu0 %v3464_v17 }
 0x444   :  { %v3469_v63 = vpop.xlane.xlu1 %3468 }
 0x445   :  { %v3476_v34 = vmul.f32 0.03125, %v3469_v63 }
 0x446   :  { %v3463_v23 = vpop.xlane.xlu0 %3462 }
 0x447   :  { %v3474_v47 = vmul.f32 0.03125, %v3463_v23  ;;  %v3480_v40 = vsub.f32 %v3455_v22, %v3476_v34 }
 0x448   :  { %v3472_v3 = vpop.xlane.xlu1 %3471 }
 0x449   :  { %v3478_v5 = vsub.f32 %v3447_v10, %v3474_v47  ;;  %v3477_v20 = vmul.f32 0.03125, %v3472_v3  ;;  %v3484_v43 = vmul.f32 %v3480_v40, %v3480_v40  ;;  %v3539_v10 = vld [vmem:[%s6267_s11 + $0x18] sm:$0xff] }
 0x44a   :  { %v3466_v9 = vpop.xlane.xlu0 %3465 }
 0x44b   :  { %v3475_v28 = vmul.f32 0.03125, %v3466_v9  ;;  %v3482_v1 = vmul.f32 %v3478_v5, %v3478_v5  ;;  %v3481_v50 = vsub.f32 %v3458_v48, %v3477_v20  ;;  %v3492_v56 = vsel %vm3251_vm4, %v3484_v43, 0.0 }
 0x44d   :  { %v3479_v55 = vsub.f32 %v3450_v26, %v3475_v28  ;;  %v3486_v49 = vsel %vm3251_vm4, %v3482_v1, 0.0  ;;  %v3485_v62 = vmul.f32 %v3481_v50, %v3481_v50 }
 0x44e   :  { %3487 = vadd.xlane.f32.xlu0 %v3486_v49 }
 0x44f   :  { %v3483_v46 = vmul.f32 %v3479_v55, %v3479_v55  ;;  %v3495_v59 = vsel %vm3251_vm4, %v3485_v62, 0.0 }
 0x451   :  { %v3489_v24 = vsel %vm3251_vm4, %v3483_v46, 0.0 }
 0x452   :  { %3493 = vadd.xlane.f32.xlu0 %v3492_v56  ;;  %3490 = vadd.xlane.f32.xlu1 %v3489_v24 }
 0x456   :  { %3496 = vadd.xlane.f32.xlu1 %v3495_v59 }
 0x4d7   :  { %v3488_v61 = vpop.xlane.xlu0 %3487 }
 0x4d8   :  { %v3498_v8 = vmul.f32 0.03125, %v3488_v61 }
 0x4da   :  { %v3502_v36 = vadd.f32 1e-05, %v3498_v8 }
 0x4db   :  { %v3491_v29 = vpop.xlane.xlu1 %3490  ;;  %v3494_v27 = vpop.xlane.xlu0 %3493 }
 0x4dc   :  { %3925 = vrsqrt.f32 %v3502_v36  ;;  %v3499_v33 = vmul.f32 0.03125, %v3491_v29  ;;  %v3500_v58 = vmul.f32 0.03125, %v3494_v27 }
 0x4de   :  { %v3503_v60 = vadd.f32 1e-05, %v3499_v33  ;;  %v3504_v7 = vadd.f32 1e-05, %v3500_v58 }
 0x4df   :  { %v3497_v19 = vpop.xlane.xlu1 %3496 }
 0x4e0   :  { %3927 = vrsqrt.f32 %v3503_v60  ;;  %v3501_v32 = vmul.f32 0.03125, %v3497_v19 }
 0x4e1   :  { %3929 = vrsqrt.f32 %v3504_v7 }
 0x4e2   :  { %v3505_v14 = vadd.f32 1e-05, %v3501_v32 }
 0x4e4   :  { %3931 = vrsqrt.f32 %v3505_v14 }
 0x4e9   :  { %v3926_v13 = vpop.eup %3925 }
 0x4ea   :  { %v3510_v52 = vmul.f32 %v3926_v13, %v3478_v5 }
 0x4ec   :  { %v3521_v15 = vmul.f32 %v3675_v16, %v3510_v52 }
 0x4ed   :  { %v3928_v53 = vpop.eup %3927 }
 0x4ee   :  { %v3930_v37 = vpop.eup %3929  ;;  %v3532_v54 = vadd.f32 %v3676_v39, %v3521_v15  ;;  %v3511_v44 = vmul.f32 %v3928_v53, %v3479_v55 }
 0x4ef   :  { %v3512_v30 = vmul.f32 %v3930_v37, %v3480_v40 }
 0x4f0   :  { %v3540_v6 = vadd.f32 %v3536_v35, %v3532_v54  ;;  %v3522_v12 = vmul.f32 %v3675_v16, %v3511_v44 }
 0x4f1   :  { %v3932_v51 = vpop.eup %3931  ;;  %v3523_v25 = vmul.f32 %v3675_v16, %v3512_v30 }
 0x4f2   :  { %3544 = vst.msk [vmem:[%s6268_s12] sm:$0xff] %vm3251_vm4, %v3540_v6  ;;  %v3533_v45 = vadd.f32 %v3676_v39, %v3522_v12  ;;  %v3513_v41 = vmul.f32 %v3932_v51, %v3481_v50 }
 0x4f3   :  { %v3534_v57 = vadd.f32 %v3676_v39, %v3523_v25 }
 0x4f4   :  { %v3541_v21 = vadd.f32 %v3537_v0, %v3533_v45  ;;  %v3524_v22 = vmul.f32 %v3675_v16, %v3513_v41 }
 0x4f5   :  { %v3542_v11 = vadd.f32 %v3538_v31, %v3534_v57 }
 0x4f6   :  { %3545 = vst.msk [vmem:[%s6268_s12 + $0x8] sm:$0xff] %vm3251_vm4, %v3541_v21  ;;  %v3535_v4 = vadd.f32 %v3676_v39, %v3524_v22 }
 0x4f7   :  { %3546 = vst.msk [vmem:[%s6268_s12 + $0x10] sm:$0xff] %vm3251_vm4, %v3542_v11 }
 0x4f8   :  { %v3543_v42 = vadd.f32 %v3539_v10, %v3535_v4 }
 0x4fa   :  { %3547 = vst.msk [vmem:[%s6268_s12 + $0x18] sm:$0xff] %vm3251_vm4, %v3543_v42 }

// kernel: mel_performer_forward.3
= control target key start
LH: loop header
LB: loop body
LE: loop exit
PB: predicated region body
PF: predicated region fallthrough
CT: control target
= control target key end

     0   :  { %s13851_s0 = inlined_call_operand.vmem [shape: f32[32,32], index: 0, kind: input, shape index: {}]   ;;  %s13852_s1 = inlined_call_operand.vmem [shape: f32[2,1,32], index: 1, kind: input, shape index: {}]   ;;  %s13853_s2 = inlined_call_operand.vmem [shape: f32[2,1,32], index: 2, kind: input, shape index: {}]   ;;  %s13854_s3 = inlined_call_operand.vmem [shape: bf16[2,32,3104], index: 3, kind: input, shape index: {}]   ;;  %s13855_s4 = inlined_call_operand.vmem [shape: f32[2,1,3104], index: 4, kind: input, shape index: {}]   ;;  %s13856_s5 = inlined_call_operand.vmem [shape: bf16[1536,32], index: 5, kind: input, shape index: {}]   ;;  %s13857_s6 = inlined_call_operand.vmem [shape: bf16[2,32,32], index: 6, kind: input, shape index: {}]   ;;  %s13858_s7 = inlined_call_operand.vmem [shape: f32[2,1,32], index: 7, kind: input, shape index: {}]   ;;  %s13859_s8 = inlined_call_operand.vmem [shape: f32[2,1,32], index: 8, kind: input, shape index: {}]   ;;  %s13860_s9 = inlined_call_operand.vmem [shape: f32[2,1,32], index: 9, kind: input, shape index: {}]   ;;  %s13861_s10 = inlined_call_operand.vmem [shape: bf16[2,32,256], index: 10, kind: input, shape index: {}]   ;;  %s13862_s11 = inlined_call_operand.vmem [shape: f32[2,1,256], index: 11, kind: input, shape index: {}]   ;;  %s13863_s12 = inlined_call_operand.vmem [shape: bf16[2,128,32], index: 12, kind: input, shape index: {}]   ;;  %s13864_s13 = inlined_call_operand.vmem [shape: f32[2,1,32], index: 13, kind: input, shape index: {}]   ;;  %s13865_s14 = inlined_call_operand.vmem [shape: bf16[32,16], index: 14, kind: input, shape index: {}]   ;;  %s13866_s15 = inlined_call_operand.vmem [shape: f32[1,16], index: 15, kind: input, shape index: {}]   ;;  %s13867_s16 = inlined_call_operand.vmem [shape: f32[1,16], index: 16, kind: input, shape index: {}]   ;;  %s13868_s17 = inlined_call_operand.vmem [shape: f32[1,16], index: 17, kind: input, shape index: {}]   ;;  %s13869_s18 = inlined_call_operand.vmem [shape: bf16[16,1], index: 18, kind: input, shape index: {}]   ;;  %s13870_s19 = inlined_call_operand.<no memory space> [shape: f32[1,1], index: 19, kind: input, shape index: {}]   ;;  %s13871_s20 = inlined_call_operand.hbm [shape: f32[32,32], index: 20, kind: output, shape index: {0}]   ;;  %s13872_s21 = inlined_call_operand.vmem [shape: f32[32,1], index: 21, kind: output, shape index: {1}]  }
   0x1   :  { %14115 = sst [smem:[#allocation206_spill]] %s13851_s0  ;;  %v27_v0 = vstv %s13870_s19 }
   0x2   :  { %14116 = sst [smem:[#allocation207_spill]] %s13852_s1  ;;  %28 = vst [vmem:[#allocation4] sm:$0x1] %v27_v0 }
   0x3   :  { %14117 = sst [smem:[#allocation208_spill]] %s13853_s2 }
   0x4   :  { %14118 = sst [smem:[#allocation209_spill]] %s13854_s3 }
   0x5   :  { %14119 = sst [smem:[#allocation210_spill]] %s13855_s4 }
   0x6   :  { %14120 = sst [smem:[#allocation211_spill]] %s13856_s5 }
   0x7   :  { %14121 = sst [smem:[#allocation212_spill]] %s13857_s6 }
   0x8   :  { %14122 = sst [smem:[#allocation213_spill]] %s13867_s16 }
   0x9   :  { %14123 = sst [smem:[#allocation214_spill]] %s13868_s17 }
   0xa   :  { %14124 = sst [smem:[#allocation215_spill]] %s13869_s18 }
   0xb   :  { %14125 = sst [smem:[#allocation216_spill]] %s13871_s20 }
   0xc   :  { %14126 = sst [smem:[#allocation217_spill]] %s13872_s21 }
   0xd   :  { %29 = vsyncpa [#allocation6], 0  ;;  %s9949_s26 = smov 0  }
   0xe LB: > { %14127 = sst [smem:[#allocation8_spill]] %s9830_s26  ;;  %s9955_s27 = sadd.s32 4294967295, %s9830_s26   ;;  %s9830_s26 = sphi %s9949_s26, %s35_s26  }
   0xf   : > { %p7908_p0 = scmp.ge.s32.totalorder %s9830_s26, 1  ;;  %p679_p1 = scmp.lt.s32.totalorder %s9830_s26, 3 }
  0x11   : > { %p680_p2 = pnand %p7908_p0, %p679_p1 }
  0x13   : > { %683 = sbr.rel (%p680_p2) target bundleno = 3337 (0xd09), region = 100 }
  0x18   : > { %p775_p3 = scmp.lt.s32.totalorder %s9955_s27, 1  ;;  %s14130_s6 = sld [smem:[#allocation212_spill]] }
  0x19   : > { %s14131_s20 = sld [smem:[#allocation209_spill]]  ;;  %p7917_p4 = scmp.ne.s32.totalorder %s9955_s27, 0 }
  0x1a   : > { %s9961_s19 = scalar_select %p775_p3, %s9955_s27, 1 }
  0x1b   : > { %s14132_s5 = sld [smem:[#allocation210_spill]] }
  0x1c   : > { %s9415_s23 = smul.u32 400, %s9961_s19  ;;  %s8323_s1 = sshll.u32 %s9961_s19, 4 }
  0x1d   : > { %s9416_s24 = smul.u32 25, %s9961_s19  ;;  %s800_s2 = scalar_lea.vmem %s13859_s8, %s9961_s19 }
  0x1e   : > { %s9977_s3 = scalar_lea.vmem %s14130_s6, %s8323_s1  ;;  %s803_s6 = scalar_lea.vmem %s13860_s9, %s9961_s19 }
  0x1f   : > { %s9982_s21 = scalar_lea.vmem %s14131_s20, %s9415_s23  ;;  %s8324_s26 = sshll.u32 %s9961_s19, 5 }
  0x20   : > { %s10005_s28 = scalar_lea.vmem %s13861_s10, %s8324_s26  ;;  %s7914_s17 = sshll.u32 %s9961_s19, 1 }
  0x21   : > { %s9991_s22 = scalar_lea.vmem %s14132_s5, %s9416_s24  ;;  %s10011_s24 = scalar_lea.vmem %s13862_s11, %s7914_s17 }
  0x22   : > { %s8325_s4 = sshll.u32 %s9961_s19, 6  ;;  %s820_s25 = scalar_lea.vmem %s13864_s13, %s9961_s19 }
  0x23   : > { %s10017_s18 = scalar_lea.vmem %s13863_s12, %s8325_s4  ;;  %825 = sbr.rel (%p7917_p4) target bundleno = 47 (0x2f), region = 104 }
  0x24   : > { %s14133_s23 = sld [smem:[#allocation206_spill]] (!%p7917_p4) }
  0x28   : > { %vm830_vm0 = vcmask 261120  }
  0x2a   : > { %v826_v1 = vld [vmem:[%s14133_s23] sm:$0xff]  ;;  %v827_v2 = vld [vmem:[%s14133_s23 + $0x8] sm:$0xff]  ;;  %v828_v3 = vld [vmem:[%s14133_s23 + $0x10] sm:$0xff] }
  0x2b   : > { %831 = vst.msk [vmem:[#allocation2] sm:$0xff] %vm830_vm0, %v826_v1  ;;  %832 = vst.msk [vmem:[#allocation2 + $0x8] sm:$0xff] %vm830_vm0, %v827_v2  ;;  %v829_v4 = vld [vmem:[%s14133_s23 + $0x18] sm:$0xff] }
  0x2c   : > { %833 = vst.msk [vmem:[#allocation2 + $0x10] sm:$0xff] %vm830_vm0, %v828_v3  ;;  %839 = vst.msk [vmem:[#allocation3] sm:$0xff] %vm830_vm0, %v826_v1 }
  0x2d   : > { %840 = vst.msk [vmem:[#allocation3 + $0x8] sm:$0xff] %vm830_vm0, %v827_v2  ;;  %841 = vst.msk [vmem:[#allocation3 + $0x10] sm:$0xff] %vm830_vm0, %v828_v3 }
  0x2e   : > { %834 = vst.msk [vmem:[#allocation2 + $0x18] sm:$0xff] %vm830_vm0, %v829_v4  ;;  %842 = vst.msk [vmem:[#allocation3 + $0x18] sm:$0xff] %vm830_vm0, %v829_v4 }
  0x2f PF: > { %vm1039_vm1 = vcmask 261120   ;;  %v9435_v33 = vld [vmem:[%s9982_s21 + $0xcc] ss:$100 sps:$4 sm:$0xff]   ;;  %v9437_v34 = vld [vmem:[%s9982_s21 + $0xdc] ss:$100 sps:$4 sm:$0xff]   ;;  %v13877_v41 = vmov 0  }
  0x30   : > { %v9439_v35 = vld [vmem:[%s9982_s21 + $0xc8] ss:$100 sps:$4 sm:$0xff]   ;;  %v9440_v36 = vld [vmem:[%s9982_s21 + $0xd8] ss:$100 sps:$4 sm:$0xff]   ;;  %1572 = vmatprep.subr.bf16.mxu1 %v9435_v33  ;;  %1678 = vmatprep.subr.bf16.mxu0 %v9437_v34  ;;  %v9445_v39 = vld [vmem:[%s9982_s21] ss:$100 sps:$4 sm:$0xff]  }
  0x31   : > { %1573 = vmatpush1.bf16.msra.mxu1 %v9439_v35  ;;  %1679 = vmatpush1.bf16.msra.mxu0 %v9440_v36  ;;  %v9441_v37 = vld [vmem:[%s9982_s21 + $0x4] ss:$100 sps:$4 sm:$0xff]   ;;  %v9443_v38 = vld [vmem:[%s9982_s21 + $0x14] ss:$100 sps:$4 sm:$0xff]   ;;  %v9452_v43 = vld [vmem:[%s9982_s21 + $0xec] ss:$100 sps:$4 sm:$0xff]  }
  0x32   : > { %v9446_v40 = vld [vmem:[%s9982_s21 + $0x10] ss:$100 sps:$4 sm:$0xff]   ;;  %1574 = vmatprep.subr.bf16.mxu1 %v9441_v37  ;;  %1680 = vmatprep.subr.bf16.mxu0 %v9443_v38  ;;  %s14134_s26 = sld [smem:[#allocation207_spill]]  ;;  %v9480_v33 = vld [vmem:[%s9982_s21 + $0x40] ss:$100 sps:$4 sm:$0xff]   ;;  %vm3765_vm2 = vcmask 130048  }
  0x33   : > { %v1035_v5 = vld [vmem:[#allocation3] sm:$0xff]  ;;  %1592 = vmatprep.mubr.bf16.mxu1 %v13877_v41  ;;  %1698 = vmatprep.mubr.bf16.mxu0 %v13877_v41  ;;  %v9449_v42 = vld [vmem:[%s9982_s21 + $0xd4] ss:$100 sps:$4 sm:$0xff]   ;;  %s14136_s29 = sld [smem:[#allocation208_spill]]  ;;  %p8307_p5 = scmp.ne.s32.totalorder %s9955_s27, 1 }
  0x34   : > { %v1037_v6 = vld [vmem:[#allocation3 + $0x10] sm:$0xff]  ;;  %v1036_v7 = vld [vmem:[#allocation3 + $0x8] sm:$0xff]  ;;  %v1040_v8 = vsel %vm1039_vm1, %v1035_v5, 0.0  ;;  %v9488_v35 = vld [vmem:[%s9982_s21 + $0x11c] ss:$100 sps:$4 sm:$0xff]   ;;  %s14138_s5 = sld [smem:[#allocation211_spill]] }
  0x35   : > { %v1046_v9 = vsel %vm1039_vm1, %v1037_v6, 0.0  ;;  %v1038_v10 = vld [vmem:[#allocation3 + $0x18] sm:$0xff]  ;;  %1041 = vadd.xlane.f32.xlu0 %v1040_v8  ;;  %v1043_v11 = vsel %vm1039_vm1, %v1036_v7, 0.0  ;;  %1575 = vmatpush1.bf16.msra.mxu1 %v9445_v39  ;;  %v9447_v8 = vld [vmem:[%s9982_s21 + $0xd0] ss:$100 sps:$4 sm:$0xff]   ;;  %s14787_s16 = sld [smem:[#allocation213_spill]] (!%p8307_p5) }
  0x36   : > { %1047 = vadd.xlane.f32.xlu1 %v1046_v9  ;;  %v1049_v12 = vsel %vm1039_vm1, %v1038_v10, 0.0  ;;  %1681 = vmatpush1.bf16.msra.mxu0 %v9446_v40  ;;  %v9450_v9 = vld [vmem:[%s9982_s21 + $0xe8] ss:$100 sps:$4 sm:$0xff]   ;;  %v9483_v36 = vld [vmem:[%s9982_s21 + $0x100] ss:$100 sps:$4 sm:$0xff]   ;;  %s14788_s1 = sld [smem:[#allocation214_spill]] (!%p8307_p5) }
  0x37   : > { %1625 = vmatprep.subr.bf16.mxu1 %v9449_v42  ;;  %1784 = vmatprep.subr.bf16.mxu0 %v9452_v43  ;;  %v9485_v34 = vld [vmem:[%s9982_s21 + $0x104] ss:$100 sps:$4 sm:$0xff]   ;;  %v9486_v37 = vld [vmem:[%s9982_s21 + $0x118] ss:$100 sps:$4 sm:$0xff]   ;;  %v9492_v42 = vld [vmem:[%s9982_s21 + $0x50] ss:$100 sps:$4 sm:$0xff]  }
  0x38   : > { %s14135_s20 = scalar_lea.vmem %s14134_s26, %s9961_s19  ;;  %v9491_v38 = vld [vmem:[%s9982_s21 + $0x3c] ss:$100 sps:$4 sm:$0xff]   ;;  %v9494_v39 = vld [vmem:[%s9982_s21 + $0x54] ss:$100 sps:$4 sm:$0xff]  }
  0x39   : > { %1044 = vadd.xlane.f32.xlu0 %v1043_v11  ;;  %v7918_v58 = vld [vmem:[%s14135_s20] ss:$0 sm:$0xff]  ;;  %s14137_s30 = scalar_lea.vmem %s14136_s29, %s9961_s19  ;;  %v9458_v11 = vld [vmem:[%s9982_s21 + $0x24] ss:$100 sps:$4 sm:$0xff]   ;;  %v9489_v40 = vld [vmem:[%s9982_s21 + $0x38] ss:$100 sps:$4 sm:$0xff]  }
  0x3a   : > { %1050 = vadd.xlane.f32.xlu1 %v1049_v12  ;;  %v7919_v63 = vld [vmem:[%s14137_s30] ss:$0 sm:$0xff]  ;;  %v9497_v43 = vld [vmem:[%s9982_s21 + $0x114] ss:$100 sps:$4 sm:$0xff]   ;;  %s14786_s30 = sld [smem:[#allocation215_spill]] (!%p8307_p5) }
  0xbe   : > { %v1042_v13 = vpop.xlane.xlu0 %1041 }
  0xbf   : > { %v1048_v14 = vpop.xlane.xlu1 %1047  ;;  %v1053_v15 = vmul.f32 0.03125, %v1042_v13 }
  0xc0   : > { %v1055_v16 = vmul.f32 0.03125, %v1048_v14  ;;  %v9453_v14 = vld [vmem:[%s9982_s21 + $0x8] ss:$100 sps:$4 sm:$0xff]  }
  0xc1   : > { %v1057_v17 = vsub.f32 %v1035_v5, %v1053_v15  ;;  %v9456_v15 = vld [vmem:[%s9982_s21 + $0x20] ss:$100 sps:$4 sm:$0xff]  }
  0xc2   : > { %v10040_v18 = vsub.f32 %v1037_v6, %v1055_v16  ;;  %v1045_v19 = vpop.xlane.xlu0 %1044  ;;  %v9461_v16 = vld [vmem:[%s9982_s21 + $0xe4] ss:$100 sps:$4 sm:$0xff]  }
  0xc3   : > { %v1051_v20 = vpop.xlane.xlu1 %1050  ;;  %v1054_v21 = vmul.f32 0.03125, %v1045_v19  ;;  %v1061_v23 = vmul.f32 %v1057_v17, %v1057_v17 }
  0xc4   : > { %v1056_v22 = vmul.f32 0.03125, %v1051_v20  ;;  %v1063_v24 = vmul.f32 %v10040_v18, %v10040_v18  ;;  %v9459_v20 = vld [vmem:[%s9982_s21 + $0xe0] ss:$100 sps:$4 sm:$0xff]  }
  0xc5   : > { %v1058_v25 = vsub.f32 %v1036_v7, %v1054_v21  ;;  %v1065_v27 = vsel %vm1039_vm1, %v1061_v23, 0.0  ;;  %v9462_v21 = vld [vmem:[%s9982_s21 + $0xf8] ss:$100 sps:$4 sm:$0xff]  }
  0xc6   : > { %v10044_v26 = vsub.f32 %v1038_v10, %v1056_v22  ;;  %1066 = vadd.xlane.f32.xlu0 %v1065_v27  ;;  %v1071_v28 = vsel %vm1039_vm1, %v1063_v24, 0.0  ;;  %v9455_v10 = vld [vmem:[%s9982_s21 + $0xc] ss:$100 sps:$4 sm:$0xff]   ;;  %v9467_v22 = vld [vmem:[%s9982_s21 + $0x1c] ss:$100 sps:$4 sm:$0xff]  }
  0xc7   : > { %v1062_v29 = vmul.f32 %v1058_v25, %v1058_v25  ;;  %v9470_v23 = vld [vmem:[%s9982_s21 + $0x34] ss:$100 sps:$4 sm:$0xff]   ;;  %v9476_v27 = vld [vmem:[%s9982_s21 + $0x10c] ss:$100 sps:$4 sm:$0xff]  }
  0xc8   : > { %v1064_v30 = vmul.f32 %v10044_v26, %v10044_v26  ;;  %v9465_v24 = vld [vmem:[%s9982_s21 + $0x18] ss:$100 sps:$4 sm:$0xff]  }
  0xc9   : > { %v1068_v31 = vsel %vm1039_vm1, %v1062_v29, 0.0  ;;  %v9474_v29 = vld [vmem:[%s9982_s21 + $0x108] ss:$100 sps:$4 sm:$0xff]  }
  0xca   : > { %1072 = vadd.xlane.f32.xlu0 %v1071_v28  ;;  %1069 = vadd.xlane.f32.xlu1 %v1068_v31  ;;  %v1074_v32 = vsel %vm1039_vm1, %v1064_v30, 0.0  ;;  %v9471_v28 = vld [vmem:[%s9982_s21 + $0xf0] ss:$100 sps:$4 sm:$0xff]   ;;  %v9482_v31 = vld [vmem:[%s9982_s21 + $0x44] ss:$100 sps:$4 sm:$0xff]  }
  0xcb   : > { %v9479_v30 = vld [vmem:[%s9982_s21 + $0x2c] ss:$100 sps:$4 sm:$0xff]  }
  0xce   : > { %1075 = vadd.xlane.f32.xlu1 %v1074_v32  ;;  %v9477_v32 = vld [vmem:[%s9982_s21 + $0x28] ss:$100 sps:$4 sm:$0xff]  }
 0x14f   : > { %v1067_v44 = vpop.xlane.xlu0 %1066 }
 0x150   : > { %v1077_v45 = vmul.f32 0.03125, %v1067_v44  ;;  %v9498_v44 = vld [vmem:[%s9982_s21 + $0x128] ss:$100 sps:$4 sm:$0xff]  }
 0x152   : > { %v1081_v46 = vadd.f32 1e-05, %v1077_v45  ;;  %v9495_v45 = vld [vmem:[%s9982_s21 + $0x110] ss:$100 sps:$4 sm:$0xff]  }
 0x153   : > { %v1070_v47 = vpop.xlane.xlu1 %1069  ;;  %v1073_v48 = vpop.xlane.xlu0 %1072 }
 0x154   : > { %9621 = vrsqrt.f32 %v1081_v46  ;;  %v1078_v49 = vmul.f32 0.03125, %v1070_v47  ;;  %v1079_v50 = vmul.f32 0.03125, %v1073_v48  ;;  %v9501_v46 = vld [vmem:[%s9982_s21 + $0x4c] ss:$100 sps:$4 sm:$0xff]   ;;  %v9502_v47 = vld [vmem:[%s9982_s21 + $0x60] ss:$100 sps:$4 sm:$0xff]  }
 0x155   : > { %v9499_v48 = vld [vmem:[%s9982_s21 + $0x48] ss:$100 sps:$4 sm:$0xff]  }
 0x156   : > { %v1082_v51 = vadd.f32 1e-05, %v1078_v49  ;;  %v1083_v52 = vadd.f32 1e-05, %v1079_v50  ;;  %v9505_v49 = vld [vmem:[%s9982_s21 + $0x124] ss:$100 sps:$4 sm:$0xff]  }
 0x157   : > { %v1076_v53 = vpop.xlane.xlu1 %1075  ;;  %v9503_v50 = vld [vmem:[%s9982_s21 + $0x120] ss:$100 sps:$4 sm:$0xff]  }
 0x158   : > { %9623 = vrsqrt.f32 %v1082_v51  ;;  %v1080_v54 = vmul.f32 0.03125, %v1076_v53  ;;  %v9508_v51 = vld [vmem:[%s9982_s21 + $0x5c] ss:$100 sps:$4 sm:$0xff]  }
 0x159   : > { %9625 = vrsqrt.f32 %v1083_v52  ;;  %v9506_v52 = vld [vmem:[%s9982_s21 + $0x58] ss:$100 sps:$4 sm:$0xff]  }
 0x15a   : > { %v1084_v55 = vadd.f32 1e-05, %v1080_v54  ;;  %v9509_v53 = vld [vmem:[%s14138_s5 + $0x78] sm:$0xff]  }
 0x15b   : > { %v9510_v54 = vld [vmem:[%s14138_s5 + $0x38] sm:$0xff]  }
 0x15c   : > { %9627 = vrsqrt.f32 %v1084_v55  ;;  %v9511_v55 = vld [vmem:[%s14138_s5 + $0x70] sm:$0xff]  }
 0x161   : > { %v9622_v56 = vpop.eup %9621 }
 0x162   : > { %v1089_v57 = vmul.f32 %v9622_v56, %v1057_v17  ;;  %v9464_v17 = vld [vmem:[%s9982_s21 + $0xfc] ss:$100 sps:$4 sm:$0xff]   ;;  %v9512_v56 = vld [vmem:[%s14138_s5 + $0x30] sm:$0xff]  }
 0x164   : > { %v1100_v60 = vmul.f32 %v7918_v58, %v1089_v57  ;;  %v9513_v57 = vld [vmem:[%s14138_s5 + $0x68] sm:$0xff]  }
 0x165   : > { %v9624_v59 = vpop.eup %9623 }
 0x166   : > { %v1090_v61 = vmul.f32 %v9624_v59, %v1058_v25  ;;  %v9626_v62 = vpop.eup %9625  ;;  %v1111_v2 = vadd.f32 %v7919_v63, %v1100_v60  ;;  %v9468_v25 = vld [vmem:[%s9982_s21 + $0x30] ss:$100 sps:$4 sm:$0xff]   ;;  %v9515_v59 = vld [vmem:[%s14138_s5 + $0x60] sm:$0xff]  }
 0x167   : > { %v1091_v4 = vmul.f32 %v9626_v62, %v10040_v18  ;;  %v9516_v60 = vld [vmem:[%s14138_s5 + $0x20] sm:$0xff]   ;;  %v9518_v62 = vld [vmem:[%s14138_s5 + $0x18] sm:$0xff]  }
 0x168   : > { %v1101_v0 = vmul.f32 %v7918_v58, %v1090_v61  ;;  %v9517_v61 = vld [vmem:[%s14138_s5 + $0x58] sm:$0xff]  }
 0x169   : > { %v9628_v1 = vpop.eup %9627  ;;  %v1102_v12 = vmul.f32 %v7918_v58, %v1091_v4  ;;  %v9524_v4 = vld [vmem:[%s14138_s5] sm:$0xff]  }
 0x16a   : > { %v1112_v3 = vadd.f32 %v7919_v63, %v1101_v0  ;;  %v1092_v5 = vmul.f32 %v9628_v1, %v10044_v26  ;;  %v9473_v26 = vld [vmem:[%s9982_s21 + $0xf4] ss:$100 sps:$4 sm:$0xff]   ;;  %v9521_v1 = vld [vmem:[%s14138_s5 + $0x48] sm:$0xff]  }
 0x16b   : > { %v1113_v18 = vadd.f32 %v7919_v63, %v1102_v12  ;;  %v9520_v0 = vld [vmem:[%s14138_s5 + $0x10] sm:$0xff]   ;;  %v9537_v12 = vld [vmem:[%s14138_s5 + $0xe0] sm:$0xff]  }
 0x16c   : > { %v10076_v6 = vpack.c.bf16 %v1112_v3, %v1111_v2  ;;  %v1103_v7 = vmul.f32 %v7918_v58, %v1092_v5  ;;  %v9514_v58 = vld [vmem:[%s14138_s5 + $0x28] sm:$0xff]   ;;  %v9523_v3 = vld [vmem:[%s14138_s5 + $0x40] sm:$0xff]   ;;  %v9525_v5 = vld [vmem:[%s14138_s5 + $0xf8] sm:$0xff]  }
 0x16d   : > { %v9522_v2 = vld [vmem:[%s14138_s5 + $0x8] sm:$0xff]  }
 0x16e   : > { %7971 = vmatmul.mubr.msk.bf16.vlgmr.msra.gmra.mxu1 %vm1039_vm1, %v10076_v6  ;;  %7975 = vmatmul.mubr.msk.bf16.vlgmr.msra.gmra.mxu0 %vm1039_vm1, %v10076_v6  ;;  %v1114_v13 = vadd.f32 %v7919_v63, %v1103_v7  ;;  %v9519_v63 = vld [vmem:[%s14138_s5 + $0x50] sm:$0xff]   ;;  %v9527_v7 = vld [vmem:[%s14138_s5 + $0xb8] sm:$0xff]  }
 0x16f   : > { %1602 = vmatprep.mubr.bf16.mxu1 %v13877_v41  ;;  %1708 = vmatprep.mubr.bf16.mxu0 %v13877_v41 }
 0x170   : > { %1626 = vmatpush1.bf16.msra.mxu1 %v9447_v8  ;;  %1785 = vmatpush1.bf16.msra.mxu0 %v9450_v9  ;;  %v10092_v19 = vpack.c.bf16 %v1114_v13, %v1113_v18  ;;  %v9529_v8 = vld [vmem:[%s14138_s5 + $0xf0] sm:$0xff]   ;;  %v9539_v13 = vld [vmem:[%s14138_s5 + $0xa0] sm:$0xff]   ;;  %v9549_v18 = vld [vmem:[%s14138_s5 + $0xc8] sm:$0xff]  }
 0x171   : > { %1627 = vmatprep.subr.bf16.mxu1 %v9455_v10  ;;  %1786 = vmatprep.subr.bf16.mxu0 %v9458_v11  ;;  %v9531_v9 = vld [vmem:[%s14138_s5 + $0xb0] sm:$0xff]   ;;  %v9533_v10 = vld [vmem:[%s14138_s5 + $0xe8] sm:$0xff]  }
 0x172   : > { %v9535_v11 = vld [vmem:[%s14138_s5 + $0xa8] sm:$0xff]  }
 0x174   : > { %1628 = vmatpush1.bf16.msra.mxu1 %v9453_v14  ;;  %1787 = vmatpush1.bf16.msra.mxu0 %v9456_v15  ;;  %v9541_v14 = vld [vmem:[%s14138_s5 + $0xd8] sm:$0xff]  }
 0x175   : > { %1731 = vmatprep.subr.bf16.mxu1 %v9461_v16  ;;  %1890 = vmatprep.subr.bf16.mxu0 %v9464_v17  ;;  %v9543_v15 = vld [vmem:[%s14138_s5 + $0x98] sm:$0xff]   ;;  %v9545_v16 = vld [vmem:[%s14138_s5 + $0xd0] sm:$0xff]  }
 0x176   : > { %7972 = vmatmul.mubr.msk.bf16.gmra.mxu1 %vm1039_vm1, %v10092_v19  ;;  %7976 = vmatmul.mubr.msk.bf16.gmra.mxu0 %vm1039_vm1, %v10092_v19  ;;  %v9547_v17 = vld [vmem:[%s14138_s5 + $0x90] sm:$0xff]  }
 0x177   : > { %1645 = vmatprep.mubr.bf16.mxu1 %v13877_v41  ;;  %1804 = vmatprep.mubr.bf16.mxu0 %v13877_v41 }
 0x17e   : > { %7973 = vmatmul.mubr.msk.bf16.vlgmr.msra.gmra.mxu1 %vm1039_vm1, %v10076_v6  ;;  %7979 = vmatmul.mubr.msk.bf16.vlgmr.msra.gmra.mxu0 %vm1039_vm1, %v10076_v6 }
 0x17f   : > { %1655 = vmatprep.mubr.bf16.mxu1 %v13877_v41  ;;  %1814 = vmatprep.mubr.bf16.mxu0 %v13877_v41 }
 0x180   : > { %1732 = vmatpush1.bf16.msra.mxu1 %v9459_v20  ;;  %1891 = vmatpush1.bf16.msra.mxu0 %v9462_v21  ;;  %v1177_v20 = vlaneseq  ;;  %v9553_v21 = vld [vmem:[%s14138_s5 + $0xc0] sm:$0xff]  }
 0x181   : > { %1733 = vmatprep.subr.bf16.mxu1 %v9467_v22  ;;  %1892 = vmatprep.subr.bf16.mxu0 %v9470_v23  ;;  %v9555_v22 = vld [vmem:[%s14138_s5 + $0x80] sm:$0xff]  }
 0x182   : > { %v10293_v23 = vshrl.u32 %v1177_v20, 7 }
 0x184   : > { %1734 = vmatpush1.bf16.msra.mxu1 %v9465_v24  ;;  %1893 = vmatpush1.bf16.msra.mxu0 %v9468_v25  ;;  %v10296_v24 = vsub.s32 0, %v10293_v23  ;;  %v10299_v25 = vld [vmem:[%s9991_s22] sm:$0xff] }
 0x185   : > { %1837 = vmatprep.subr.bf16.mxu1 %v9473_v26  ;;  %1996 = vmatprep.subr.bf16.mxu0 %v9476_v27  ;;  %v10302_v26 = vsub.s32 4, %v10293_v23  ;;  %v10305_v27 = vsub.s32 1, %v10293_v23 }
 0x186   : > { %7974 = vmatmul.mubr.msk.bf16.gmra.mxu1 %vm1039_vm1, %v10092_v19  ;;  %7980 = vmatmul.mubr.msk.bf16.gmra.mxu0 %vm1039_vm1, %v10092_v19  ;;  %14139 = vst [vmem:[#allocation9_spill] sm:$0xff] %v10296_v24 }
 0x187   : > { %1751 = vmatprep.mubr.bf16.mxu1 %v13877_v41  ;;  %1910 = vmatprep.mubr.bf16.mxu0 %v13877_v41  ;;  %14140 = vst [vmem:[#allocation10_spill] sm:$0xff] %v10305_v27 }
 0x18e   : > { %7977 = vmatmul.mubr.msk.bf16.vlgmr.msra.gmra.mxu1 %vm1039_vm1, %v10076_v6  ;;  %7983 = vmatmul.mubr.msk.bf16.vlgmr.msra.gmra.mxu0 %vm1039_vm1, %v10076_v6 }
 0x18f   : > { %1761 = vmatprep.mubr.bf16.mxu1 %v13877_v41  ;;  %1920 = vmatprep.mubr.bf16.mxu0 %v13877_v41 }
 0x190   : > { %1838 = vmatpush1.bf16.msra.mxu1 %v9471_v28  ;;  %1997 = vmatpush1.bf16.msra.mxu0 %v9474_v29  ;;  %v10309_v28 = vrot.slane %v10299_v25, %v10296_v24  ;;  %v10313_v29 = vrot.slane %v10299_v25, %v10302_v26 }
 0x191   : > { %1839 = vmatprep.subr.bf16.mxu1 %v9479_v30  ;;  %1998 = vmatprep.subr.bf16.mxu0 %v9482_v31  ;;  %v9557_v30 = vld [vmem:[%s14138_s5 + $0x1f8] sm:$0xff]  }
 0x194   : > { %1840 = vmatpush1.bf16.msra.mxu1 %v9477_v32  ;;  %1999 = vmatpush1.bf16.msra.mxu0 %v9480_v33  ;;  %v1184_v33 = vrot.slane %v10299_v25, %v10305_v27 }
 0x195   : > { %1943 = vmatprep.subr.bf16.mxu1 %v9485_v34  ;;  %2102 = vmatprep.subr.bf16.mxu0 %v9488_v35 }
 0x196   : > { %7978 = vmatmul.mubr.msk.bf16.gmra.mxu1 %vm1039_vm1, %v10092_v19  ;;  %7984 = vmatmul.mubr.msk.bf16.gmra.mxu0 %vm1039_vm1, %v10092_v19 }
 0x197   : > { %1857 = vmatprep.mubr.bf16.mxu1 %v13877_v41  ;;  %2016 = vmatprep.mubr.bf16.mxu0 %v13877_v41 }
 0x19e   : > { %7981 = vmatmul.mubr.msk.bf16.vlgmr.msra.gmra.mxu1 %vm1039_vm1, %v10076_v6  ;;  %7987 = vmatmul.mubr.msk.bf16.vlgmr.msra.gmra.mxu0 %vm1039_vm1, %v10076_v6 }
 0x19f   : > { %1867 = vmatprep.mubr.bf16.mxu1 %v13877_v41  ;;  %2026 = vmatprep.mubr.bf16.mxu0 %v13877_v41 }
 0x1a0   : > { %1944 = vmatpush1.bf16.msra.mxu1 %v9483_v36  ;;  %2103 = vmatpush1.bf16.msra.mxu0 %v9486_v37 }
 0x1a1   : > { %1945 = vmatprep.subr.bf16.mxu1 %v9491_v38  ;;  %2104 = vmatprep.subr.bf16.mxu0 %v9494_v39 }
 0x1a4   : > { %1946 = vmatpush1.bf16.msra.mxu1 %v9489_v40  ;;  %2105 = vmatpush1.bf16.msra.mxu0 %v9492_v42 }
 0x1a5   : > { %2049 = vmatprep.subr.bf16.mxu1 %v9497_v43  ;;  %8977 = vmatprep.subr.bf16.mxu0 %v9498_v44 }
 0x1a6   : > { %7982 = vmatmul.mubr.msk.bf16.gmra.mxu1 %vm1039_vm1, %v10092_v19  ;;  %7988 = vmatmul.mubr.msk.bf16.gmra.mxu0 %vm1039_vm1, %v10092_v19 }
 0x1a7   : > { %1963 = vmatprep.mubr.bf16.mxu1 %v13877_v41  ;;  %2122 = vmatprep.mubr.bf16.mxu0 %v13877_v41 }
 0x1ae   : > { %7985 = vmatmul.mubr.msk.bf16.vlgmr.msra.gmra.mxu1 %vm1039_vm1, %v10076_v6  ;;  %7991 = vmatmul.mubr.msk.bf16.vlgmr.msra.gmra.mxu0 %vm1039_vm1, %v10076_v6 }
 0x1af   : > { %1973 = vmatprep.mubr.bf16.mxu1 %v13877_v41  ;;  %2132 = vmatprep.mubr.bf16.mxu0 %v13877_v41 }
 0x1b0   : > { %2050 = vmatpush1.bf16.msra.mxu1 %v9495_v45  ;;  %8978 = vmatpush3.bf16.msra.mxu0 %v9498_v44 }
 0x1b1   : > { %2051 = vmatprep.subr.bf16.mxu1 %v9501_v46  ;;  %8979 = vmatprep.subr.bf16.mxu0 %v9502_v47 }
 0x1b4   : > { %2052 = vmatpush1.bf16.msra.mxu1 %v9499_v48  ;;  %8980 = vmatpush3.bf16.msra.mxu0 %v9502_v47 }
 0x1b5   : > { %2155 = vmatprep.subr.bf16.mxu1 %v9505_v49  ;;  %8358 = vmatprep.subr.bf16.mxu0 %v9525_v5 }
 0x1b6   : > { %7986 = vmatmul.mubr.msk.bf16.gmra.mxu1 %vm1039_vm1, %v10092_v19  ;;  %7992 = vmatmul.mubr.msk.bf16.gmra.mxu0 %vm1039_vm1, %v10092_v19 }
 0x1b7   : > { %8981 = vmatprep.mubr.msk.bf16.mxu0 %vm1039_vm1, %v10076_v6  ;;  %2069 = vmatprep.mubr.bf16.mxu1 %v13877_v41 }
 0x1be   : > { %7989 = vmatmul.mubr.msk.bf16.vlgmr.msra.gmra.mxu1 %vm1039_vm1, %v10076_v6  ;;  %8982 = vmatmul.mubr.msk.bf16.vlgmr.msra.gmra.mxu0 %vm1039_vm1, %v10092_v19 }
 0x1bf   : > { %2079 = vmatprep.mubr.bf16.mxu1 %v13877_v41  ;;  %2156 = vmatpush1.bf16.msra.mxu1 %v9503_v50 }
 0x1c0   : > { %2157 = vmatprep.subr.bf16.mxu1 %v9508_v51  ;;  %8359 = vmatpush3.bf16.msra.mxu0 %v9527_v7 }
 0x1c1   : > { %8360 = vmatprep.subr.bf16.mxu0 %v9529_v8 }
 0x1c3   : > { %2158 = vmatpush1.bf16.msra.mxu1 %v9506_v52 }
 0x1c4   : > { %8330 = vmatprep.subr.bf16.mxu1 %v9509_v53  ;;  %8361 = vmatpush3.bf16.msra.mxu0 %v9531_v9 }
 0x1c5   : > { %8362 = vmatprep.subr.bf16.mxu0 %v9533_v10 }
 0x1c6   : > { %7990 = vmatmul.mubr.msk.bf16.gmra.mxu1 %vm1039_vm1, %v10092_v19 }
 0x1c7   : > { %2175 = vmatprep.mubr.bf16.mxu1 %v13877_v41 }
 0x1c8   : > { %8363 = vmatpush3.bf16.msra.mxu0 %v9535_v11 }
 0x1c9   : > { %8364 = vmatprep.subr.bf16.mxu0 %v9537_v12 }
 0x1cc   : > { %8365 = vmatpush3.bf16.msra.mxu0 %v9539_v13 }
 0x1cd   : > { %8366 = vmatprep.subr.bf16.mxu0 %v9541_v14  ;;  %v1199_v14 = vsub.s32 5, %v10293_v23 }
 0x1ce   : > { %7993 = vmatmul.mubr.msk.bf16.vlgmr.msra.gmra.mxu1 %vm1039_vm1, %v10076_v6  ;;  %v9526_v6 = vld [vmem:[%s14138_s5 + $0x178] sm:$0xff]  }
 0x1cf   : > { %2185 = vmatprep.mubr.bf16.mxu1 %v13877_v41  ;;  %8331 = vmatpush3.bf16.msra.mxu1 %v9510_v54 }
 0x1d0   : > { %8332 = vmatprep.subr.bf16.mxu1 %v9511_v55  ;;  %8367 = vmatpush3.bf16.msra.mxu0 %v9543_v15 }
 0x1d1   : > { %8368 = vmatprep.subr.bf16.mxu0 %v9545_v16 }
 0x1d3   : > { %8333 = vmatpush3.bf16.msra.mxu1 %v9512_v56 }
 0x1d4   : > { %8334 = vmatprep.subr.bf16.mxu1 %v9513_v57  ;;  %8369 = vmatpush3.bf16.msra.mxu0 %v9547_v17 }
 0x1d5   : > { %8370 = vmatprep.subr.bf16.mxu0 %v9549_v18 }
 0x1d6   : > { %7994 = vmatmul.mubr.msk.bf16.gmra.mxu1 %vm1039_vm1, %v10092_v19  ;;  %v9551_v19 = vld [vmem:[%s14138_s5 + $0x88] sm:$0xff]  }
 0x1d7   : > { %8335 = vmatpush3.bf16.msra.mxu1 %v9514_v58 }
 0x1d8   : > { %8336 = vmatprep.subr.bf16.mxu1 %v9515_v59  ;;  %8371 = vmatpush3.bf16.msra.mxu0 %v9551_v19 }
 0x1d9   : > { %8372 = vmatprep.subr.bf16.mxu0 %v9553_v21 }
 0x1db   : > { %8337 = vmatpush3.bf16.msra.mxu1 %v9516_v60 }
 0x1dc   : > { %8338 = vmatprep.subr.bf16.mxu1 %v9517_v61  ;;  %8373 = vmatpush3.bf16.msra.mxu0 %v9555_v22  ;;  %v1200_v22 = vrot.slane %v10299_v25, %v1199_v14 }
 0x1dd   : > { %8414 = vmatprep.subr.bf16.mxu0 %v9557_v30  ;;  %v1187_v30 = vsub.s32 2, %v10293_v23 }
 0x1df   : > { %8339 = vmatpush3.bf16.msra.mxu1 %v9518_v62 }
 0x1e0   : > { %8340 = vmatprep.subr.bf16.mxu1 %v9519_v63 }
 0x1e3   : > { %8341 = vmatpush3.bf16.msra.mxu1 %v9520_v0 }
 0x1e4   : > { %8342 = vmatprep.subr.bf16.mxu1 %v9521_v1 }
 0x1e7   : > { %8343 = vmatpush3.bf16.msra.mxu1 %v9522_v2 }
 0x1e8   : > { %8344 = vmatprep.subr.bf16.mxu1 %v9523_v3 }
 0x1eb   : > { %8345 = vmatpush3.bf16.msra.mxu1 %v9524_v4 }
 0x1ec   : > { %8386 = vmatprep.subr.bf16.mxu1 %v9526_v6 }
 0x22e   : > { %v1594_v31 = vpop.f32.mrf.mxu1  ;;  %v1700_v32 = vpop.f32.mrf.mxu0 }
 0x22f   : > { %v1595_v34 = vadd.f32 %v1594_v31, %v10309_v28  ;;  %v1701_v35 = vadd.f32 %v1700_v32, %v10313_v29  ;;  %v1191_v31 = vsub.s32 3, %v10293_v23 }
 0x230   : > { %v1596_v36 = vpop.f32.mrf.mxu1  ;;  %v1702_v37 = vpop.f32.mrf.mxu0 }
 0x231   : > { %v1597_v38 = vadd.f32 %v1596_v36, %v1184_v33  ;;  %v2245_v42 = vmax.f32 %v1595_v34, 0.0  ;;  %v2249_v43 = vmax.f32 %v1701_v35, 0.0  ;;  %v1170_v34 = vld [vmem:[%s9991_s22 + $0x8] sm:$0xff]  ;;  %v1203_v35 = vsub.s32 6, %v10293_v23 }
 0x232   : > { %v1598_v39 = vpop.f32.mrf.mxu1  ;;  %v1704_v40 = vpop.f32.mrf.mxu0  ;;  %v10375_v36 = vsub.s32 7, %v10293_v23  ;;  %v10393_v23 = vrot.slane %v10299_v25, %v1191_v31 }
 0x233   : > { %v1599_v44 = vadd.f32 %v1598_v39, %v10309_v28  ;;  %v1705_v45 = vadd.f32 %v1704_v40, %v10313_v29  ;;  %v2246_v49 = vmax.f32 %v1597_v38, 0.0  ;;  %v10324_v54 = vadd.f32 0.001, %v2245_v42 }
 0x234   : > { %v1600_v46 = vpop.f32.mrf.mxu1  ;;  %v1706_v47 = vpop.f32.mrf.mxu0  ;;  %v10326_v56 = vadd.f32 0.001, %v2249_v43  ;;  %v1703_v40 = vadd.f32 %v1702_v37, %v1200_v22  ;;  %v10430_v19 = vrot.slane %v1170_v34, %v1203_v35 }
 0x235   : > { %v1601_v48 = vadd.f32 %v1600_v46, %v1184_v33  ;;  %v2257_v50 = vmax.f32 %v1599_v44, 0.0  ;;  %v2261_v51 = vmax.f32 %v1705_v45, 0.0  ;;  %14141 = vst [vmem:[#allocation11_spill] sm:$0xff] %v10324_v54  ;;  %v10334_v62 = vadd.f32 0.001, %v2246_v49  ;;  %v10386_v45 = vld [vmem:[%s9991_s22 + $0x10] sm:$0xff] }
 0x236   : > { %v1604_v52 = vpop.f32.mrf.mxu1  ;;  %v1710_v53 = vpop.f32.mrf.mxu0  ;;  %14142 = vst [vmem:[#allocation12_spill] sm:$0xff] %v10326_v56  ;;  %v1707_v42 = vadd.f32 %v1706_v47, %v1200_v22  ;;  %v10383_v44 = vrot.slane %v10299_v25, %v1187_v30  ;;  %v10396_v49 = vrot.slane %v1170_v34, %v10305_v27 }
 0x237   : > { %v2258_v55 = vmax.f32 %v1601_v48, 0.0  ;;  %v10328_v57 = vadd.f32 0.001, %v2257_v50  ;;  %v10330_v58 = vadd.f32 0.001, %v2261_v51  ;;  %14146 = vst [vmem:[#allocation16_spill] sm:$0xff] %v10334_v62  ;;  %v1605_v43 = vadd.f32 %v1604_v52, %v10309_v28 }
 0x238   : > { %v1606_v59 = vpop.f32.mrf.mxu1  ;;  %v1712_v60 = vpop.f32.mrf.mxu0  ;;  %v1711_v46 = vadd.f32 %v1710_v53, %v10313_v29  ;;  %v10390_v48 = vrot.slane %v1170_v34, %v10296_v24  ;;  %v10403_v50 = vrot.slane %v10299_v25, %v1203_v35  ;;  %v10406_v51 = vrot.slane %v1170_v34, %v10302_v26 }
 0x239   : > { %14143 = vst [vmem:[#allocation13_spill] sm:$0xff] %v10328_v57  ;;  %14144 = vst [vmem:[#allocation14_spill] sm:$0xff] %v10330_v58  ;;  %v10332_v61 = vadd.f32 0.001, %v2258_v55  ;;  %v1607_v1 = vadd.f32 %v1606_v59, %v1184_v33  ;;  %v10410_v52 = vrot.slane %v10299_v25, %v10375_v36  ;;  %v10412_v53 = vrot.slane %v1170_v34, %v1199_v14 }
 0x23a   : > { %v1608_v2 = vpop.f32.mrf.mxu1  ;;  %v1714_v3 = vpop.f32.mrf.mxu0  ;;  %v2250_v25 = vmax.f32 %v1703_v40, 0.0  ;;  %v2269_v41 = vmax.f32 %v1605_v43, 0.0  ;;  %v2273_v0 = vmax.f32 %v1711_v46, 0.0  ;;  %v1713_v63 = vadd.f32 %v1712_v60, %v1200_v22 }
 0x23b   : > { %14145 = vst [vmem:[#allocation15_spill] sm:$0xff] %v10332_v61  ;;  %v2270_v7 = vmax.f32 %v1607_v1, 0.0  ;;  %v10418_v1 = vrot.slane %v1170_v34, %v1187_v30  ;;  %v1609_v6 = vadd.f32 %v1608_v2, %v10309_v28  ;;  %v10441_v40 = vrot.slane %v1170_v34, %v10375_v36 }
 0x23c   : > { %v1610_v4 = vpop.f32.mrf.mxu1  ;;  %v1716_v5 = vpop.f32.mrf.mxu0  ;;  %v10450_v2 = vrot.slane %v10386_v45, %v1187_v30 }
 0x23d   : > { %v1611_v8 = vadd.f32 %v1610_v4, %v1184_v33  ;;  %v10351_v15 = vadd.f32 0.001, %v2270_v7  ;;  %v10422_v4 = vrot.slane %v10386_v45, %v10296_v24  ;;  %v10424_v7 = vrot.slane %v1170_v34, %v1191_v31 }
 0x23e   : > { %v10342_v9 = vpop.f32.mrf.mxu1  ;;  %v10344_v10 = vpop.f32.mrf.mxu0  ;;  %v10437_v24 = vrot.slane %v10386_v45, %v10302_v26  ;;  %14149 = vst [vmem:[#allocation19_spill] sm:$0xff] %v10450_v2  ;;  %v10453_v26 = vrot.slane %v10386_v45, %v1191_v31  ;;  %v2274_v34 = vmax.f32 %v1713_v63, 0.0  ;;  %v2281_v30 = vmax.f32 %v1609_v6, 0.0 }
 0x23f   : > { %v2282_v11 = vmax.f32 %v1611_v8, 0.0  ;;  %14147 = vst [vmem:[#allocation17_spill] sm:$0xff] %v10351_v15  ;;  %v10428_v8 = vrot.slane %v10386_v45, %v10305_v27  ;;  %v1717_v27 = vadd.f32 %v1716_v5, %v1200_v22  ;;  %v10466_v22 = vadd.f32 0.001, %v2273_v0 }
 0x240   : > { %v10346_v12 = vpop.f32.mrf.mxu1  ;;  %v10348_v13 = vpop.f32.mrf.mxu0  ;;  %14150 = vst [vmem:[#allocation20_spill] sm:$0xff] %v10453_v26  ;;  %v1807_v31 = vadd.f32 %v10344_v10, %v10390_v48  ;;  %v10487_v26 = vadd.f32 0.001, %v2281_v30 }
 0x241   : > { %v10353_v16 = vadd.f32 0.001, %v2282_v11  ;;  %v2262_v11 = vmax.f32 %v1707_v42, 0.0  ;;  %v10444_v42 = vrot.slane %v10386_v45, %v1199_v14  ;;  %v10462_v14 = vadd.f32 0.001, %v2269_v41  ;;  %14155 = vst [vmem:[#allocation25_spill] sm:$0xff] %v10466_v22 }
 0x242   : > { %v10355_v17 = vpop.f32.mrf.mxu1  ;;  %v10357_v18 = vpop.f32.mrf.mxu0  ;;  %14157 = vst [vmem:[#allocation27_spill] sm:$0xff] %v10487_v26 }
 0x243   : > { %14148 = vst [vmem:[#allocation18_spill] sm:$0xff] %v10353_v16  ;;  %v1715_v16 = vadd.f32 %v1714_v3, %v10313_v29  ;;  %v10456_v29 = vrot.slane %v10386_v45, %v1203_v35  ;;  %v10458_v3 = vadd.f32 0.001, %v2250_v25  ;;  %v10460_v5 = vadd.f32 0.001, %v2262_v11  ;;  %14154 = vst [vmem:[#allocation24_spill] sm:$0xff] %v10462_v14 }
 0x244   : > { %v10361_v20 = vpop.f32.mrf.mxu1  ;;  %v10363_v21 = vpop.f32.mrf.mxu0  ;;  %v2286_v25 = vmax.f32 %v1717_v27, 0.0  ;;  %v1650_v11 = vadd.f32 %v10346_v12, %v10393_v23  ;;  %v1652_v63 = vadd.f32 %v10355_v17, %v10383_v44  ;;  %v1811_v27 = vadd.f32 %v10357_v18, %v10390_v48 }
 0x245   : > { %14151 = vst [vmem:[#allocation21_spill] sm:$0xff] %v10456_v29  ;;  %14152 = vst [vmem:[#allocation22_spill] sm:$0xff] %v10458_v3  ;;  %v2285_v29 = vmax.f32 %v1715_v16, 0.0 }
 0x246   : > { %v10368_v32 = vpop.f32.mrf.mxu1  ;;  %v10370_v33 = vpop.f32.mrf.mxu0  ;;  %14153 = vst [vmem:[#allocation23_spill] sm:$0xff] %v10460_v5  ;;  %v2259_v14 = vmax.f32 %v1652_v63, 0.0  ;;  %v2265_v15 = vmax.f32 %v1811_v27, 0.0 }
 0x248   : > { %v10377_v38 = vpop.f32.mrf.mxu1  ;;  %v10379_v39 = vpop.f32.mrf.mxu0 }
 0x24a   : > { %v10398_v37 = vpop.f32.mrf.mxu1  ;;  %v10400_v47 = vpop.f32.mrf.mxu0 }
 0x24c   : > { %v10414_v55 = vpop.f32.mrf.mxu1  ;;  %v10416_v59 = vpop.f32.mrf.mxu0 }
 0x24e   : > { %v10433_v58 = vpop.f32.mrf.mxu1  ;;  %v1912_v56 = vpop.f32.mrf.mxu0 }
 0x24f   : > { %v1913_v60 = vadd.f32 %v1912_v56, %v10406_v51  ;;  %v1648_v56 = vadd.f32 %v10342_v9, %v10383_v44  ;;  %v1809_v9 = vadd.f32 %v10348_v13, %v10396_v49  ;;  %v2253_v13 = vmax.f32 %v1807_v31, 0.0 }
 0x250   : > { %v10447_v43 = vpop.f32.mrf.mxu1  ;;  %v1914_v28 = vpop.f32.mrf.mxu0  ;;  %v10499_v31 = vadd.f32 0.001, %v2286_v25  ;;  %v1817_v25 = vadd.f32 %v10370_v33, %v10390_v48 }
 0x251   : > { %v2341_v0 = vmax.f32 %v1913_v60, 0.0  ;;  %v1915_v6 = vadd.f32 %v1914_v28, %v10412_v53  ;;  %v2247_v2 = vmax.f32 %v1648_v56, 0.0  ;;  %v10493_v60 = vrot.slane %v10386_v45, %v10375_v36 }
 0x252   : > { %v10470_v46 = vpop.f32.mrf.mxu1  ;;  %v1916_v35 = vpop.f32.mrf.mxu0  ;;  %v10495_v28 = vadd.f32 0.001, %v2285_v29  ;;  %v2248_v56 = vmax.f32 %v1650_v11, 0.0  ;;  %14160 = vst [vmem:[#allocation30_spill] sm:$0xff] %v10499_v31  ;;  %v1654_v36 = vadd.f32 %v10361_v20, %v10393_v23  ;;  %v10505_v45 = vadd.f32 0.001, %v2253_v13 }
 0x253   : > { %v1917_v41 = vadd.f32 %v1916_v35, %v10406_v51  ;;  %v10485_v35 = vadd.f32 0.001, %v2274_v34  ;;  %14158 = vst [vmem:[#allocation28_spill] sm:$0xff] %v10493_v60  ;;  %v2342_v34 = vmax.f32 %v1915_v6, 0.0  ;;  %v10501_v26 = vadd.f32 0.001, %v2247_v2 }
 0x254   : > { %v10480_v10 = vpop.f32.mrf.mxu1  ;;  %v1918_v22 = vpop.f32.mrf.mxu0  ;;  %14159 = vst [vmem:[#allocation29_spill] sm:$0xff] %v10495_v28  ;;  %14162 = vst [vmem:[#allocation32_spill] sm:$0xff] %v10505_v45  ;;  %v1813_v29 = vadd.f32 %v10363_v21, %v10396_v49  ;;  %v10511_v6 = vadd.f32 0.001, %v2248_v56  ;;  %v1658_v2 = vadd.f32 %v10368_v32, %v10383_v44  ;;  %v1660_v20 = vadd.f32 %v10377_v38, %v10393_v23 }
 0x255   : > { %v2353_v16 = vmax.f32 %v1917_v41, 0.0  ;;  %v1919_v12 = vadd.f32 %v1918_v22, %v10412_v53  ;;  %14156 = vst [vmem:[#allocation26_spill] sm:$0xff] %v10485_v35  ;;  %v2254_v41 = vmax.f32 %v1809_v9, 0.0  ;;  %v2389_v22 = vadd.f32 0.001, %v2341_v0  ;;  %14161 = vst [vmem:[#allocation31_spill] sm:$0xff] %v10501_v26 }
 0x256   : > { %v10489_v5 = vpop.f32.mrf.mxu1  ;;  %v1922_v17 = vpop.f32.mrf.mxu0  ;;  %14163 = vst [vmem:[#allocation33_spill] sm:$0xff] %v10511_v6  ;;  %v2390_v21 = vadd.f32 0.001, %v2342_v34  ;;  %v2260_v45 = vmax.f32 %v1654_v36, 0.0  ;;  %v1819_v32 = vadd.f32 %v10379_v39, %v10396_v49  ;;  %v2266_v28 = vmax.f32 %v1813_v29, 0.0 }
 0x257   : > { %v2401_v3 = vadd.f32 0.001, %v2353_v16  ;;  %v2354_v18 = vmax.f32 %v1919_v12, 0.0  ;;  %v10519_v27 = vadd.f32 0.001, %v2254_v41  ;;  %v1923_v33 = vadd.f32 %v1922_v17, %v10406_v51 }
 0x258   : > { %v10497_v35 = vpop.f32.mrf.mxu1  ;;  %v1924_v30 = vpop.f32.mrf.mxu0  ;;  %v10521_v16 = vadd.f32 0.001, %v2259_v14  ;;  %v2271_v34 = vmax.f32 %v1658_v2, 0.0  ;;  %v2277_v60 = vmax.f32 %v1817_v25, 0.0  ;;  %v10542_v25 = vadd.f32 0.001, %v2266_v28 }
 0x259   : > { %v2437_v11 = vadd.f32 %v2401_v3, %v2389_v22  ;;  %v2402_v9 = vadd.f32 0.001, %v2354_v18  ;;  %14164 = vst [vmem:[#allocation34_spill] sm:$0xff] %v10519_v27  ;;  %v10526_v18 = vadd.f32 0.001, %v2265_v15  ;;  %v3547_v27 = vpack.c.bf16 %v2401_v3, %v2389_v22 }
 0x25a   : > { %v10509_v63 = vpop.f32.mrf.mxu1  ;;  %v1926_v0 = vpop.f32.mrf.mxu0  ;;  %14165 = vst [vmem:[#allocation35_spill] sm:$0xff] %v10521_v16  ;;  %v1662_v16 = vadd.f32 %v10398_v37, %v10383_v44  ;;  %v10539_v3 = vadd.f32 0.001, %v2260_v45  ;;  %v2278_v22 = vmax.f32 %v1819_v32, 0.0  ;;  %v2365_v29 = vmax.f32 %v1923_v33, 0.0 }
 0x25b   : > { %v1927_v12 = vadd.f32 %v1926_v0, %v10406_v51  ;;  %14166 = vst [vmem:[#allocation36_spill] sm:$0xff] %v10526_v18  ;;  %v2438_v38 = vrot.slane %v2437_v11, 4  ;;  %v2444_v41 = vadd.f32 %v2402_v9, %v2390_v21  ;;  %v2272_v0 = vmax.f32 %v1660_v20, 0.0  ;;  %3573 = vxpose.xlu0.c.b16.start.end [1/1] (short) %v3547_v27, 128 }
 0x25c   : > { %v10524_v13 = vpop.f32.mrf.mxu1  ;;  %v1928_v56 = vpop.f32.mrf.mxu0  ;;  %v3548_v18 = vpack.c.bf16 %v2402_v9, %v2390_v21  ;;  %14168 = vst [vmem:[#allocation38_spill] sm:$0xff] %v10539_v3  ;;  %v1925_v2 = vadd.f32 %v1924_v30, %v10412_v53  ;;  %v1821_v44 = vadd.f32 %v10400_v47, %v10390_v48  ;;  %v10546_v21 = vadd.f32 0.001, %v2271_v34 }
 0x25d   : > { %v2377_v15 = vmax.f32 %v1927_v12, 0.0  ;;  %v1929_v36 = vadd.f32 %v1928_v56, %v10412_v53  ;;  %v2439_v37 = vadd.f32 %v2438_v38, %v2437_v11  ;;  %v2445_v20 = vrot.slane %v2444_v41, 4 }
 0x25e   : > { %v1859_v14 = vpop.f32.mrf.mxu1  ;;  %v2018_v31 = vpop.f32.mrf.mxu0  ;;  %3589 = vxpose.xlu1.c.b16.start.end [1/1] (short) %v3548_v18, 128  ;;  %14169 = vst [vmem:[#allocation39_spill] sm:$0xff] %v10546_v21  ;;  %v2283_v12 = vmax.f32 %v1662_v16, 0.0  ;;  %v1664_v45 = vadd.f32 %v10414_v55, %v10393_v23  ;;  %v10550_v32 = vadd.f32 0.001, %v2277_v60  ;;  %v10552_v53 = vadd.f32 0.001, %v2272_v0 }
 0x25f   : > { %v10535_v39 = vadd.f32 %v1859_v14, %v10418_v1  ;;  %v2378_v56 = vmax.f32 %v1929_v36, 0.0  ;;  %v1823_v28 = vadd.f32 %v10416_v59, %v10396_v49  ;;  %v10556_v48 = vadd.f32 0.001, %v2377_v15 }
 0x260   : > { %v10537_v51 = vpop.f32.mrf.mxu1  ;;  %v2020_v17 = vpop.f32.mrf.mxu0  ;;  %14170 = vst [vmem:[#allocation40_spill] sm:$0xff] %v10550_v32  ;;  %14171 = vst [vmem:[#allocation41_spill] sm:$0xff] %v10552_v53  ;;  %v10560_v11 = vadd.f32 0.001, %v2278_v22  ;;  %v10562_v18 = vadd.f32 0.001, %v2365_v29  ;;  %v2446_v60 = vadd.f32 %v2445_v20, %v2444_v41  ;;  %v2019_v33 = vadd.f32 %v2018_v31, %v10422_v4 }
 0x261   : > { %14167 = vst [vmem:[#allocation37_spill] sm:$0xff] %v10535_v39  ;;  %v2366_v16 = vmax.f32 %v1925_v2, 0.0  ;;  %v2440_v55 = vrot.slane %v2439_v37, 2  ;;  %v10569_v14 = vadd.f32 0.001, %v2283_v12  ;;  %v2289_v34 = vmax.f32 %v1821_v44, 0.0 }
 0x262   : > { %v1863_v9 = vpop.f32.mrf.mxu1  ;;  %v2022_v27 = vpop.f32.mrf.mxu0  ;;  %14172 = vst [vmem:[#allocation42_spill] sm:$0xff] %v10560_v11  ;;  %v2284_v0 = vmax.f32 %v1664_v45, 0.0  ;;  %v10571_v15 = vadd.f32 0.001, %v2378_v56  ;;  %v2290_v36 = vmax.f32 %v1823_v28, 0.0  ;;  %v1754_v22 = vadd.f32 %v10433_v58, %v10403_v50 }
 0x263   : > { %v10565_v23 = vadd.f32 %v1863_v9, %v10418_v1  ;;  %v2023_v38 = vadd.f32 %v2022_v27, %v10422_v4  ;;  %14174 = vst [vmem:[#allocation44_spill] sm:$0xff] %v10569_v14  ;;  %v1756_v29 = vadd.f32 %v10447_v43, %v10410_v52  ;;  %v2521_v31 = vadd.f32 %v10556_v48, %v10562_v18 }
 0x264   : > { %v10558_v47 = vpop.f32.mrf.mxu1  ;;  %v2024_v30 = vpop.f32.mrf.mxu0  ;;  %14175 = vst [vmem:[#allocation45_spill] sm:$0xff] %v10571_v15  ;;  %v1758_v20 = vadd.f32 %v10470_v46, %v10403_v50  ;;  %v10583_v44 = vadd.f32 0.001, %v2366_v16  ;;  %v2441_v12 = vadd.f32 %v2440_v55, %v2439_v37  ;;  %v2447_v58 = vrot.slane %v2446_v60, 2 }
 0x265   : > { %14173 = vst [vmem:[#allocation43_spill] sm:$0xff] %v10565_v23  ;;  %v2357_v9 = vmax.f32 %v2023_v38, 0.0  ;;  %v2345_v45 = vmax.f32 %v2019_v33, 0.0  ;;  %v2025_v43 = vadd.f32 %v2024_v30, %v10428_v8  ;;  %v10589_v23 = vadd.f32 0.001, %v2289_v34 }
 0x266   : > { %v1869_v49 = vpop.f32.mrf.mxu1  ;;  %v2028_v59 = vpop.f32.mrf.mxu0  ;;  %14177 = vst [vmem:[#allocation47_spill] sm:$0xff] %v10583_v44  ;;  %v10591_v39 = vadd.f32 0.001, %v2284_v0  ;;  %v2528_v46 = vadd.f32 %v10571_v15, %v10583_v44  ;;  %v10596_v38 = vadd.f32 0.001, %v2290_v36  ;;  %v1760_v37 = vadd.f32 %v10480_v10, %v10410_v52 }
 0x267   : > { %v10586_v27 = vadd.f32 %v1869_v49, %v10418_v1  ;;  %14179 = vst [vmem:[#allocation49_spill] sm:$0xff] %v10589_v23  ;;  %v2029_v16 = vadd.f32 %v2028_v59, %v10422_v4  ;;  %v2522_v55 = vrot.slane %v2521_v31, 4  ;;  %v2021_v33 = vadd.f32 %v2020_v17, %v10428_v8 }
 0x268   : > { %v10579_v41 = vpop.f32.mrf.mxu1  ;;  %v2030_v2 = vpop.f32.mrf.mxu0  ;;  %14180 = vst [vmem:[#allocation50_spill] sm:$0xff] %v10591_v39  ;;  %14181 = vst [vmem:[#allocation51_spill] sm:$0xff] %v10596_v38  ;;  %v2251_v34 = vmax.f32 %v1754_v22, 0.0  ;;  %v2263_v0 = vmax.f32 %v1758_v20, 0.0  ;;  %v10603_v23 = vadd.f32 0.001, %v2357_v9  ;;  %v2448_v15 = vadd.f32 %v2447_v58, %v2446_v60 }
 0x269   : > { %14176 = vst [vmem:[#allocation46_spill] sm:$0xff] %v10579_v41  ;;  %14178 = vst [vmem:[#allocation48_spill] sm:$0xff] %v10586_v27  ;;  %v2252_v27 = vmax.f32 %v1756_v29, 0.0  ;;  %v2442_v32 = vrot.slane %v2441_v12, 1  ;;  %v10605_v44 = vadd.f32 0.001, %v2345_v45  ;;  %v1766_v22 = vadd.f32 %v10497_v35, %v10410_v52 }
 0x26a   : > { %v1873_v56 = vpop.f32.mrf.mxu1  ;;  %v2032_v28 = vpop.f32.mrf.mxu0  ;;  %v2358_v59 = vmax.f32 %v2025_v43, 0.0  ;;  %v2529_v38 = vrot.slane %v2528_v46, 4  ;;  %v2369_v11 = vmax.f32 %v2029_v16, 0.0  ;;  %v2264_v41 = vmax.f32 %v1760_v37, 0.0 }
 0x26b   : > { %v10608_v10 = vadd.f32 %v1873_v56, %v10418_v1  ;;  %v2033_v17 = vadd.f32 %v2032_v28, %v10422_v4  ;;  %v2523_v29 = vadd.f32 %v2522_v55, %v2521_v31  ;;  %v2346_v20 = vmax.f32 %v2021_v33, 0.0 }
 0x26c   : > { %v10601_v30 = vpop.f32.mrf.mxu1  ;;  %v2034_v49 = vpop.f32.mrf.mxu0  ;;  %v10615_v60 = vadd.f32 0.001, %v2251_v34  ;;  %v10617_v58 = vadd.f32 0.001, %v2252_v27  ;;  %v2465_v45 = vadd.f32 %v10603_v23, %v10605_v44  ;;  %v10621_v43 = vadd.f32 0.001, %v2263_v0 }
 0x26d   : > { %14182 = vst [vmem:[#allocation52_spill] sm:$0xff] %v10601_v30  ;;  %14183 = vst [vmem:[#allocation53_spill] sm:$0xff] %v10608_v10  ;;  %v2381_v1 = vmax.f32 %v2033_v17, 0.0  ;;  %v2443_v4 = vadd.f32 %v2442_v32, %v2441_v12  ;;  %v10625_v56 = vadd.f32 %v10489_v5, %v10403_v50  ;;  %v10627_v35 = vadd.f32 0.001, %v2358_v59 }
 0x26e   : > { %v1965_v36 = vpop.f32.mrf.mxu1  ;;  %v2124_v30 = vpop.f32.mrf.mxu0  ;;  %14184 = vst [vmem:[#allocation54_spill] sm:$0xff] %v10621_v43  ;;  %v2530_v28 = vadd.f32 %v2529_v38, %v2528_v46  ;;  %v10629_v16 = vadd.f32 0.001, %v2369_v11  ;;  %v2449_v27 = vrot.slane %v2448_v15, 1  ;;  %v10635_v33 = vadd.f32 0.001, %v2264_v41 }
 0x26f   : > { %14185 = vst [vmem:[#allocation55_spill] sm:$0xff] %v10625_v56  ;;  %14186 = vst [vmem:[#allocation56_spill] sm:$0xff] %v10627_v35  ;;  %v10631_v37 = vadd.f32 0.001, %v2381_v1  ;;  %v2276_v34 = vmax.f32 %v1766_v22, 0.0  ;;  %v2524_v0 = vrot.slane %v2523_v29, 2  ;;  %v2031_v59 = vadd.f32 %v2030_v2, %v10428_v8 }
 0x270   : > { %v10613_v9 = vpop.f32.mrf.mxu1  ;;  %14187 = vst [vmem:[#allocation57_spill] sm:$0xff] %v10629_v16  ;;  %v10633_v55 = vpop.f32.mrf.mxu0  ;;  %v10637_v32 = vadd.f32 0.001, %v2346_v20  ;;  %v2466_v5 = vrot.slane %v2465_v45, 4  ;;  %v2035_v11 = vadd.f32 %v2034_v49, %v10428_v8  ;;  %v2605_v38 = vmul.f32 %v2443_v4, %v10324_v54 }
 0x271   : > { %14188 = vst [vmem:[#allocation58_spill] sm:$0xff] %v10631_v37  ;;  %v10646_v17 = vadd.f32 %v10524_v13, %v10410_v52  ;;  %v10650_v41 = vadd.f32 %v10537_v51, %v10424_v7  ;;  %v2450_v22 = vadd.f32 %v2449_v27, %v2448_v15  ;;  %v2617_v2 = vmul.f32 %v2443_v4, %v10328_v57 }
 0x272   : > { %v1969_v31 = vpop.f32.mrf.mxu1  ;;  %14189 = vst [vmem:[#allocation59_spill] sm:$0xff] %v10637_v32  ;;  %v2531_v1 = vrot.slane %v2530_v28, 2  ;;  %v2472_v46 = vadd.f32 %v10627_v35, %v10637_v32  ;;  %v2125_v8 = vadd.f32 %v2124_v30, %v10437_v24  ;;  %v2128_v49 = vpop.f32.mrf.mxu0  ;;  %v2525_v52 = vadd.f32 %v2524_v0, %v2523_v29  ;;  %v9528_v29 = vld [vmem:[%s14138_s5 + $0x138] sm:$0xff]  }
 0x273   : > { %v2606_v13 = vmul.f32 %v2450_v22, %v10334_v62  ;;  %v2618_v51 = vmul.f32 %v2450_v22, %v10332_v61  ;;  %v2467_v15 = vadd.f32 %v2466_v5, %v2465_v45  ;;  %v2370_v27 = vmax.f32 %v2031_v59, 0.0 }
 0x274   : > { %v1971_v12 = vpop.f32.mrf.mxu1  ;;  %v2382_v43 = vmax.f32 %v2035_v11, 0.0  ;;  %v1966_v4 = vadd.f32 %v1965_v36, %v10430_v19  ;;  %v10664_v57 = vadd.f32 0.001, %v2276_v34  ;;  %v2288_v35 = vmax.f32 %v10646_v17, 0.0  ;;  %v9530_v36 = vld [vmem:[%s14138_s5 + $0x170] sm:$0xff]   ;;  %v2130_v34 = vpop.f32.mrf.mxu0 }
 0x275   : > { %v2256_v30 = vmax.f32 %v10650_v41, 0.0  ;;  %v2654_v32 = vpack.c.bf16 %v2618_v51, %v2606_v13  ;;  %v2532_v22 = vadd.f32 %v2531_v1, %v2530_v28  ;;  %v2473_v54 = vrot.slane %v2472_v46, 4 }
 0x276   : > { %v10652_v20 = vpop.f32.mrf.mxu1  ;;  %14190 = vst [vmem:[#allocation60_spill] sm:$0xff] %v10664_v57  ;;  %v2349_v45 = vmax.f32 %v2125_v8, 0.0  ;;  %v2653_v5 = vpack.c.bf16 %v2617_v2, %v2605_v38  ;;  %v2526_v59 = vrot.slane %v2525_v52, 1  ;;  %v1970_v11 = vadd.f32 %v1969_v31, %v10430_v19  ;;  %v9532_v31 = vld [vmem:[%s14138_s5 + $0x130] sm:$0xff]  }
 0x277   : > { %3285 = vmatprep.mubr.bf16.mxu1 %v2654_v32  ;;  %v2129_v17 = vadd.f32 %v2128_v49, %v10437_v24  ;;  %v1972_v41 = vadd.f32 %v1971_v12, %v10441_v40  ;;  %v2468_v51 = vrot.slane %v2467_v15, 2  ;;  %v10681_v28 = vadd.f32 0.001, %v2370_v27 }
 0x278   : > { %v10661_v10 = vpop.f32.mrf.mxu1  ;;  %v10683_v1 = vadd.f32 0.001, %v2382_v43  ;;  %v2343_v38 = vmax.f32 %v1966_v4, 0.0  ;;  %3286 = vmatmul.mubr.bf16.vlgmr.msra.gmra.mxu1 %v2653_v5  ;;  %v1968_v2 = vadd.f32 %v10613_v9, %v10441_v40  ;;  %v2355_v32 = vmax.f32 %v1970_v11, 0.0  ;;  %v9534_v9 = vld [vmem:[%s14138_s5 + $0x168] sm:$0xff]  }
 0x279   : > { %14191 = vst [vmem:[#allocation61_spill] sm:$0xff] %v10681_v28  ;;  %8387 = vmatpush3.bf16.msra.mxu1 %v9528_v29  ;;  %v2361_v8 = vmax.f32 %v2129_v17, 0.0  ;;  %v2131_v12 = vadd.f32 %v2130_v34, %v10444_v42  ;;  %v2474_v27 = vadd.f32 %v2473_v54, %v2472_v46  ;;  %v2549_v43 = vadd.f32 %v10631_v37, %v10629_v16  ;;  %v2134_v54 = vpop.f32.mrf.mxu0 }
 0x27a   : > { %v10671_v0 = vpop.f32.mrf.mxu1  ;;  %14192 = vst [vmem:[#allocation62_spill] sm:$0xff] %v10683_v1  ;;  %v10695_v4 = vadd.f32 0.001, %v2349_v45  ;;  %8388 = vmatprep.subr.bf16.mxu1 %v9530_v36  ;;  %v2533_v29 = vrot.slane %v2532_v22, 1  ;;  %v2127_v5 = vadd.f32 %v10633_v55, %v10444_v42  ;;  %v10702_v11 = vadd.f32 0.001, %v2355_v32 }
 0x27b   : > { %v10704_v34 = vadd.f32 0.001, %v2361_v8  ;;  %v2356_v17 = vmax.f32 %v1972_v41, 0.0  ;;  %v2469_v62 = vadd.f32 %v2468_v51, %v2467_v15  ;;  %v10708_v45 = vadd.f32 0.001, %v2343_v38  ;;  %v9536_v41 = vld [vmem:[%s14138_s5 + $0x128] sm:$0xff]   ;;  %v10731_v55 = vpop.f32.mrf.mxu0 }
 0x27c   : > { %v10679_v13 = vpop.f32.mrf.mxu1  ;;  %14193 = vst [vmem:[#allocation63_spill] sm:$0xff] %v10695_v4  ;;  %v2534_v36 = vadd.f32 %v2533_v29, %v2532_v22  ;;  %v2527_v61 = vadd.f32 %v2526_v59, %v2525_v52  ;;  %v2556_v16 = vadd.f32 %v10683_v1, %v10681_v28  ;;  %v2344_v37 = vmax.f32 %v1968_v2, 0.0  ;;  %v14195_v52 = vld [vmem:[#allocation17_spill] sm:$0xff]  ;;  %v14196_v51 = vld [vmem:[#allocation18_spill] sm:$0xff] }
 0x27d   : > { %14194 = vst [vmem:[#allocation64_spill] sm:$0xff] %v10704_v34  ;;  %8389 = vmatpush3.bf16.msra.mxu1 %v9532_v31  ;;  %v2362_v32 = vmax.f32 %v2131_v12, 0.0  ;;  %v2550_v15 = vrot.slane %v2549_v43, 4  ;;  %v2451_v22 = vadd.f32 %v10702_v11, %v10708_v45  ;;  %v10725_v2 = vadd.f32 %v10509_v63, %v10403_v50  ;;  %v9538_v1 = vld [vmem:[%s14138_s5 + $0x160] sm:$0xff]  }
 0x27e   : > { %v10691_v49 = vpop.f32.mrf.mxu1  ;;  %v2630_v59 = vmul.f32 %v2534_v36, %v14195_v52  ;;  %v2642_v38 = vmul.f32 %v2534_v36, %v14196_v51  ;;  %8390 = vmatprep.subr.bf16.mxu1 %v9534_v9  ;;  %v10727_v31 = vadd.f32 0.001, %v2288_v35  ;;  %v2350_v12 = vmax.f32 %v2127_v5, 0.0  ;;  %v14200_v51 = vld [vmem:[#allocation24_spill] sm:$0xff] }
 0x27f   : > { %14197 = vst [vmem:[#allocation65_spill] sm:$0xff] %v10725_v2  ;;  %v10729_v29 = vadd.f32 0.001, %v2356_v17  ;;  %v10738_v52 = vadd.f32 0.001, %v2256_v30  ;;  %v2475_v9 = vrot.slane %v2474_v27, 2  ;;  %v2629_v50 = vmul.f32 %v2527_v61, %v14200_v51 }
 0x280   : > { %v10706_v46 = vpop.f32.mrf.mxu1  ;;  %14198 = vst [vmem:[#allocation66_spill] sm:$0xff] %v10727_v31  ;;  %v2666_v36 = vpack.c.bf16 %v2642_v38, %v2630_v59  ;;  %v9540_v63 = vld [vmem:[%s14138_s5 + $0x120] sm:$0xff]   ;;  %v2470_v35 = vrot.slane %v2469_v62, 1  ;;  %v2557_v5 = vrot.slane %v2556_v16, 4  ;;  %v2392_v17 = vadd.f32 0.001, %v2344_v37 }
 0x281   : > { %14199 = vst [vmem:[#allocation67_spill] sm:$0xff] %v10738_v52  ;;  %v10744_v56 = vadd.f32 0.001, %v2362_v32  ;;  %8391 = vmatpush3.bf16.msra.mxu1 %v9536_v41  ;;  %v10746_v31 = vadd.f32 %v2550_v15, %v2549_v43  ;;  %v2452_v57 = vrot.slane %v2451_v22, 4  ;;  %v2135_v30 = vadd.f32 %v2134_v54, %v10437_v24  ;;  %v14202_v52 = vld [vmem:[#allocation27_spill] sm:$0xff]  ;;  %v2138_v54 = vpop.f32.mrf.mxu0 }
 0x282   : > { %v10717_v8 = vpop.f32.mrf.mxu1  ;;  %3293 = vmatprep.mubr.bf16.mxu1 %v2666_v36  ;;  %v2641_v59 = vmul.f32 %v2527_v61, %v14202_v52  ;;  %v9542_v38 = vld [vmem:[%s14138_s5 + $0x158] sm:$0xff]   ;;  %v10755_v2 = vadd.f32 0.001, %v2350_v12  ;;  %v2458_v37 = vadd.f32 %v10729_v29, %v2392_v17  ;;  %v1976_v43 = vadd.f32 %v10652_v20, %v10430_v19  ;;  %8392 = vmatprep.subr.bf16.mxu1 %v9538_v1 }
 0x283   : > { %14201 = vst [vmem:[#allocation68_spill] sm:$0xff] %v10744_v56  ;;  %v1980_v32 = vadd.f32 %v10671_v0, %v10430_v19  ;;  %v10764_v61 = vadd.f32 %v10558_v47, %v10424_v7  ;;  %v2476_v41 = vadd.f32 %v2475_v9, %v2474_v27  ;;  %v1978_v12 = vadd.f32 %v10661_v10, %v10441_v40  ;;  %v9544_v47 = vld [vmem:[%s14138_s5 + $0x118] sm:$0xff]   ;;  %v9546_v10 = vld [vmem:[%s14138_s5 + $0x150] sm:$0xff]  }
 0x284   : > { %v10736_v28 = vpop.f32.mrf.mxu1  ;;  %14203 = vst [vmem:[#allocation69_spill] sm:$0xff] %v10755_v2  ;;  %v2665_v15 = vpack.c.bf16 %v2641_v59, %v2629_v50  ;;  %v10768_v36 = vadd.f32 %v2470_v35, %v2469_v62  ;;  %v2493_v52 = vadd.f32 %v10704_v34, %v10695_v4  ;;  %v10774_v20 = vadd.f32 %v10744_v56, %v10755_v2  ;;  %v14211_v56 = vld [vmem:[#allocation14_spill] sm:$0xff]  ;;  %v14212_v4 = vld [vmem:[#allocation19_spill] sm:$0xff] }
 0x285   : > { %v2379_v19 = vmax.f32 %v1980_v32, 0.0  ;;  %8393 = vmatpush3.bf16.msra.mxu1 %v9540_v63  ;;  %v2558_v0 = vadd.f32 %v2557_v5, %v2556_v16  ;;  %v2453_v1 = vadd.f32 %v2452_v57, %v2451_v22  ;;  %v2373_v27 = vmax.f32 %v2135_v30, 0.0  ;;  %v9548_v30 = vld [vmem:[%s14138_s5 + $0x110] sm:$0xff]  }
 0x286   : > { %v10753_v51 = vpop.f32.mrf.mxu1  ;;  %3294 = vmatmul.mubr.bf16.gmra.mxu1 %v2665_v15  ;;  %v2139_v62 = vadd.f32 %v2138_v54, %v10437_v24  ;;  %8394 = vmatprep.subr.bf16.mxu1 %v9542_v38  ;;  %v2552_v50 = vrot.slane %v10746_v31, 2  ;;  %v2459_v63 = vrot.slane %v2458_v37, 4  ;;  %v2367_v35 = vmax.f32 %v1976_v43, 0.0  ;;  %v2140_v24 = vpop.f32.mrf.mxu0 }
 0x287   : > { %v3549_v59 = vpack.c.bf16 %v10702_v11, %v10708_v45  ;;  %v2368_v16 = vmax.f32 %v1978_v12, 0.0  ;;  %v1982_v22 = vadd.f32 %v10679_v13, %v10441_v40  ;;  %v3550_v5 = vpack.c.bf16 %v10729_v29, %v2392_v17  ;;  %v9550_v11 = vld [vmem:[%s14138_s5 + $0x148] sm:$0xff]  }
 0x288   : > { %v10783_v9 = vpop.f32.mrf.mxu1  ;;  %v2385_v57 = vmax.f32 %v2139_v62, 0.0  ;;  %v2494_v38 = vrot.slane %v2493_v52, 4  ;;  %v2501_v32 = vrot.slane %v10774_v20, 4  ;;  %v10795_v54 = vadd.f32 0.001, %v2379_v19 }
 0x289   : > { %3605 = vxpose.xlu0.c.b16.start.end [1/1] (short) %v3549_v59, 128  ;;  %v2477_v43 = vrot.slane %v2476_v41, 1  ;;  %8395 = vmatpush3.bf16.msra.mxu1 %v9544_v47  ;;  %v2454_v40 = vrot.slane %v2453_v1, 2  ;;  %v10800_v13 = vadd.f32 0.001, %v2373_v27  ;;  %v2380_v29 = vmax.f32 %v1982_v22, 0.0 }
 0x28a   : > { %v10802_v45 = vadd.f32 0.001, %v2385_v57  ;;  %3621 = vxpose.xlu1.c.b16.start.end [1/1] (short) %v3550_v5, 128  ;;  %8396 = vmatprep.subr.bf16.mxu1 %v9546_v10  ;;  %v10804_v17 = vpop.f32.mrf.mxu1  ;;  %v2460_v15 = vadd.f32 %v2459_v63, %v2458_v37  ;;  %v10806_v12 = vadd.f32 0.001, %v2367_v35  ;;  %v2141_v19 = vadd.f32 %v2140_v24, %v10444_v42  ;;  %v14207_v37 = vld [vmem:[#allocation22_spill] sm:$0xff]  ;;  %v14208_v35 = vld [vmem:[#allocation23_spill] sm:$0xff] }
 0x28b   : > { %14204 = vst [vmem:[#allocation70_spill] sm:$0xff] %v10800_v13  ;;  %v2478_v47 = vadd.f32 %v2477_v43, %v2476_v41  ;;  %v10809_v62 = vadd.f32 0.001, %v2368_v16  ;;  %v2137_v59 = vadd.f32 %v10731_v55, %v10444_v42  ;;  %v10815_v57 = vadd.f32 0.001, %v2380_v29  ;;  %v9552_v41 = vld [vmem:[%s14138_s5 + $0x108] sm:$0xff]  }
 0x28c   : > { %14205 = vst [vmem:[#allocation71_spill] sm:$0xff] %v10802_v45  ;;  %v2559_v22 = vrot.slane %v2558_v0, 2  ;;  %v2535_v10 = vadd.f32 %v10795_v54, %v10806_v12  ;;  %v14209_v16 = vld [vmem:[#allocation12_spill] sm:$0xff]  ;;  %v10829_v55 = vadd.f32 %v2552_v50, %v10746_v31  ;;  %v2455_v24 = vadd.f32 %v2454_v40, %v2453_v1  ;;  %v2087_v29 = vpop.f32.mrf.mxu1 }
 0x28d   : > { %14206 = vst [vmem:[#allocation72_spill] sm:$0xff] %v10815_v57  ;;  %v2610_v63 = vmul.f32 %v2478_v47, %v14207_v37  ;;  %v2622_v5 = vmul.f32 %v2478_v47, %v14208_v35  ;;  %8397 = vmatpush3.bf16.msra.mxu1 %v9548_v30  ;;  %v10826_v42 = vmul.f32 %v10768_v36, %v14209_v16  ;;  %v9554_v30 = vld [vmem:[%s14138_s5 + $0x140] sm:$0xff]   ;;  %v2386_v27 = vmax.f32 %v2141_v19, 0.0 }
 0x28e   : > { %v2542_v43 = vadd.f32 %v10815_v57, %v10809_v62  ;;  %8398 = vmatprep.subr.bf16.mxu1 %v9550_v11  ;;  %v10836_v47 = vadd.f32 %v2494_v38, %v2493_v52  ;;  %v14210_v37 = vld [vmem:[#allocation20_spill] sm:$0xff]  ;;  %v2621_v31 = vmul.f32 %v10768_v36, %v14211_v56  ;;  %v2461_v1 = vrot.slane %v2460_v15, 2 }
 0x28f   : > { %v2658_v35 = vpack.c.bf16 %v2622_v5, %v2610_v63  ;;  %v2074_v16 = vadd.f32 %v10706_v46, %v14210_v37  ;;  %v10843_v50 = vadd.f32 %v2501_v32, %v10774_v20  ;;  %v2374_v11 = vmax.f32 %v2137_v59, 0.0  ;;  %v9556_v46 = vld [vmem:[%s14138_s5 + $0x100] sm:$0xff]   ;;  %v9558_v32 = vld [vmem:[%s14138_s5 + $0x278] sm:$0xff]  }
 0x290   : > { %v10845_v40 = vadd.f32 %v2559_v22, %v2558_v0  ;;  %v2536_v2 = vrot.slane %v2535_v10, 4  ;;  %v2072_v52 = vadd.f32 %v10691_v49, %v14212_v4  ;;  %v2076_v38 = vadd.f32 %v10717_v8, %v14212_v4  ;;  %v2177_v49 = vpop.f32.mrf.mxu1  ;;  %v14217_v5 = vld [vmem:[#allocation35_spill] sm:$0xff] }
 0x291   : > { %3383 = vmatprep.mubr.bf16.mxu1 %v2658_v35  ;;  %8399 = vmatpush3.bf16.msra.mxu1 %v9552_v41  ;;  %v2456_v36 = vrot.slane %v2455_v24, 1  ;;  %v2543_v19 = vrot.slane %v2542_v43, 4  ;;  %v2348_v20 = vmax.f32 %v2074_v16, 0.0  ;;  %v2078_v0 = vadd.f32 %v10736_v28, %v14210_v37 }
 0x292   : > { %8400 = vmatprep.subr.bf16.mxu1 %v9554_v30  ;;  %v2496_v8 = vrot.slane %v10836_v47, 2  ;;  %v10861_v22 = vadd.f32 0.001, %v2386_v27  ;;  %v2359_v63 = vmax.f32 %v2076_v38, 0.0  ;;  %v2462_v35 = vadd.f32 %v2461_v1, %v2460_v15  ;;  %v2179_v15 = vpop.f32.mrf.mxu1 }
 0x293   : > { %v10864_v41 = vadd.f32 0.001, %v2374_v11  ;;  %v2360_v16 = vmax.f32 %v2078_v0, 0.0  ;;  %v2537_v28 = vadd.f32 %v2536_v2, %v2535_v10  ;;  %v2347_v30 = vmax.f32 %v2072_v52, 0.0  ;;  %v9560_v52 = vld [vmem:[%s14138_s5 + $0x238] sm:$0xff]  }
 0x294   : > { %v2082_v56 = vadd.f32 %v10753_v51, %v14212_v4  ;;  %v2084_v34 = vadd.f32 %v10783_v9, %v14210_v37  ;;  %v2457_v59 = vadd.f32 %v2456_v36, %v2455_v24  ;;  %v2544_v57 = vadd.f32 %v2543_v19, %v2542_v43 }
 0x295   : > { %8401 = vmatpush3.bf16.msra.mxu1 %v9556_v46  ;;  %v10870_v27 = vadd.f32 0.001, %v2348_v20  ;;  %v10872_v38 = vadd.f32 0.001, %v2360_v16  ;;  %v2577_v1 = vadd.f32 %v10802_v45, %v10800_v13  ;;  %v10878_v2 = vadd.f32 %v10861_v22, %v10864_v41 }
 0x296   : > { %8442 = vmatprep.subr.bf16.mxu1 %v9558_v32  ;;  %v10880_v51 = vadd.f32 0.001, %v2359_v63  ;;  %v2371_v10 = vmax.f32 %v2082_v56, 0.0  ;;  %v2086_v24 = vadd.f32 %v10804_v17, %v14212_v4  ;;  %v2088_v43 = vadd.f32 %v2087_v29, %v14210_v37  ;;  %v9562_v56 = vld [vmem:[%s14138_s5 + $0x270] sm:$0xff]   ;;  %v2181_v37 = vpop.f32.mrf.mxu1 }
 0x297   : > { %v2486_v9 = vadd.f32 %v10872_v38, %v10870_v27  ;;  %v2463_v11 = vrot.slane %v2462_v35, 1  ;;  %v2538_v46 = vrot.slane %v2537_v28, 2  ;;  %v10890_v36 = vadd.f32 0.001, %v2347_v30 }
 0x298   : > { %14213 = vst [vmem:[#allocation20_spill] sm:$0xff] %v10880_v51  ;;  %v2372_v19 = vmax.f32 %v2084_v34, 0.0  ;;  %v2657_v20 = vpack.c.bf16 %v2621_v31, %v10826_v42  ;;  %v2545_v0 = vrot.slane %v2544_v57, 2  ;;  %v2383_v32 = vmax.f32 %v2086_v24, 0.0 }
 0x299   : > { %14214 = vst [vmem:[#allocation19_spill] sm:$0xff] %v10890_v36  ;;  %v2384_v4 = vmax.f32 %v2088_v43, 0.0  ;;  %v2464_v17 = vadd.f32 %v2463_v11, %v2462_v35  ;;  %v2479_v29 = vadd.f32 %v10880_v51, %v10890_v36  ;;  %v2487_v63 = vrot.slane %v2486_v9, 4  ;;  %v9564_v35 = vld [vmem:[%s14138_s5 + $0x230] sm:$0xff]  }
 0x29a   : > { %v10898_v16 = vadd.f32 0.001, %v2371_v10  ;;  %3384 = vmatmul.mubr.bf16.vlgmr.msra.gmra.mxu1 %v2657_v20  ;;  %v2607_v34 = vmul.f32 %v2457_v59, %v10501_v26  ;;  %v10901_v30 = vadd.f32 0.001, %v2383_v32  ;;  %v2619_v24 = vmul.f32 %v2457_v59, %v14217_v5  ;;  %v14218_v20 = vld [vmem:[#allocation21_spill] sm:$0xff] }
 0x29b   : > { %v10903_v42 = vadd.f32 0.001, %v2384_v4  ;;  %v2608_v31 = vmul.f32 %v2464_v17, %v10511_v6  ;;  %8443 = vmatpush3.bf16.msra.mxu1 %v9560_v52  ;;  %v10911_v43 = vadd.f32 %v2496_v8, %v10836_v47  ;;  %v10913_v10 = vadd.f32 0.001, %v2372_v19  ;;  %v9566_v4 = vld [vmem:[%s14138_s5 + $0x268] sm:$0xff]   ;;  %v2183_v47 = vpop.f32.mrf.mxu1  ;;  %v14219_v6 = vld [vmem:[#allocation28_spill] sm:$0xff] }
 0x29c   : > { %14215 = vst [vmem:[#allocation73_spill] sm:$0xff] %v10898_v16  ;;  %14216 = vst [vmem:[#allocation74_spill] sm:$0xff] %v10901_v30  ;;  %v2620_v11 = vmul.f32 %v2464_v17, %v10539_v3  ;;  %v2178_v32 = vadd.f32 %v2177_v49, %v14218_v20  ;;  %8444 = vmatprep.subr.bf16.mxu1 %v9562_v56  ;;  %v2578_v59 = vrot.slane %v2577_v1, 4  ;;  %v2585_v5 = vrot.slane %v10878_v2, 4  ;;  %v9559_v56 = vld [vmem:[%s14138_s5 + $0x1b8] sm:$0xff]  }
 0x29d   : > { %v2546_v52 = vadd.f32 %v2545_v0, %v2544_v57  ;;  %v10923_v8 = vadd.f32 %v2538_v46, %v2537_v28  ;;  %v2570_v19 = vadd.f32 %v10903_v42, %v10913_v10  ;;  %v2561_v49 = vrot.slane %v10845_v40, 1  ;;  %v9561_v28 = vld [vmem:[%s14138_s5 + $0x1f0] sm:$0xff]   ;;  %v9568_v46 = vld [vmem:[%s14138_s5 + $0x228] sm:$0xff]   ;;  %v2187_v51 = vpop.f32.mrf.mxu1 }
 0x29e   : > { %v2656_v17 = vpack.c.bf16 %v2620_v11, %v2608_v31  ;;  %v2480_v3 = vrot.slane %v2479_v29, 4  ;;  %v10931_v57 = vadd.f32 %v2487_v63, %v2486_v9  ;;  %v2655_v0 = vpack.c.bf16 %v2619_v24, %v2607_v34 }
 0x29f   : > { %v2180_v13 = vadd.f32 %v2179_v15, %v14219_v6  ;;  %8445 = vmatpush3.bf16.msra.mxu1 %v9564_v35  ;;  %v2351_v31 = vmax.f32 %v2178_v32, 0.0  ;;  %v2562_v11 = vadd.f32 %v2561_v49, %v10845_v40  ;;  %v2182_v26 = vadd.f32 %v2181_v37, %v14218_v20  ;;  %v9570_v15 = vld [vmem:[%s14138_s5 + $0x260] sm:$0xff]   ;;  %v14221_v40 = vld [vmem:[#allocation26_spill] sm:$0xff] }
 0x2a0   : > { %3334 = vmatprep.mubr.bf16.mxu0 %v2656_v17  ;;  %v2184_v9 = vadd.f32 %v2183_v47, %v14219_v6  ;;  %8446 = vmatprep.subr.bf16.mxu1 %v9566_v4  ;;  %v14220_v63 = vrot.slane %v10843_v50, 2  ;;  %v10949_v24 = vadd.f32 %v2578_v59, %v2577_v1  ;;  %v2547_v32 = vrot.slane %v2546_v52, 1  ;;  %v14222_v37 = vld [vmem:[#allocation30_spill] sm:$0xff] }
 0x2a1   : > { %3335 = vmatmul.mubr.bf16.vlgmr.msra.gmra.mxu0 %v2655_v0  ;;  %v2352_v35 = vmax.f32 %v2180_v13, 0.0  ;;  %v2571_v17 = vrot.slane %v2570_v19, 4  ;;  %v2634_v49 = vmul.f32 %v2562_v11, %v14221_v40  ;;  %v2646_v45 = vmul.f32 %v2562_v11, %v14222_v37  ;;  %v9563_v47 = vld [vmem:[%s14138_s5 + $0x1b0] sm:$0xff]   ;;  %v9565_v59 = vld [vmem:[%s14138_s5 + $0x1e8] sm:$0xff]  }
 0x2a2   : > { %v2504_v34 = vadd.f32 %v14220_v63, %v10843_v50  ;;  %8415 = vmatpush3.bf16.msra.mxu0 %v9559_v56  ;;  %v2363_v4 = vmax.f32 %v2182_v26, 0.0  ;;  %v2540_v36 = vrot.slane %v10923_v8, 1  ;;  %v10958_v50 = vadd.f32 %v2585_v5, %v10878_v2  ;;  %v9572_v26 = vld [vmem:[%s14138_s5 + $0x220] sm:$0xff]   ;;  %v10974_v5 = vpop.f32.mrf.mxu0 }
 0x2a3   : > { %v2481_v1 = vadd.f32 %v2480_v3, %v2479_v29  ;;  %8416 = vmatprep.subr.bf16.mxu0 %v9561_v28  ;;  %v2364_v13 = vmax.f32 %v2184_v9, 0.0  ;;  %8447 = vmatpush3.bf16.msra.mxu1 %v9568_v46  ;;  %v2489_v56 = vrot.slane %v10931_v57, 2  ;;  %v10967_v0 = vadd.f32 0.001, %v2351_v31  ;;  %v9574_v3 = vld [vmem:[%s14138_s5 + $0x258] sm:$0xff]  }
 0x2a4   : > { %v2670_v11 = vpack.c.bf16 %v2646_v45, %v2634_v49  ;;  %v10969_v63 = vadd.f32 0.001, %v2363_v4  ;;  %8448 = vmatprep.subr.bf16.mxu1 %v9570_v15  ;;  %v2563_v2 = vadd.f32 %v10901_v30, %v10898_v16  ;;  %v10978_v29 = vadd.f32 0.001, %v2352_v35  ;;  %v9567_v49 = vld [vmem:[%s14138_s5 + $0x1a8] sm:$0xff]   ;;  %v10990_v35 = vpop.f32.mrf.mxu1  ;;  %v11004_v40 = vpop.f32.mrf.mxu0 }
 0x2a5   : > { %v10980_v28 = vadd.f32 0.001, %v2364_v13  ;;  %v2548_v46 = vadd.f32 %v2547_v32, %v2546_v52  ;;  %v2572_v31 = vadd.f32 %v2571_v17, %v2570_v19  ;;  %v14223_v9 = vrot.slane %v10829_v55, 1  ;;  %v9569_v13 = vld [vmem:[%s14138_s5 + $0x1e0] sm:$0xff]  }
 0x2a6   : > { %3391 = vmatprep.mubr.bf16.mxu1 %v2670_v11  ;;  %8417 = vmatpush3.bf16.msra.mxu0 %v9563_v47  ;;  %v2505_v4 = vrot.slane %v2504_v34, 1  ;;  %v2482_v17 = vrot.slane %v2481_v1, 2  ;;  %v14225_v11 = vld [vmem:[#allocation29_spill] sm:$0xff]  ;;  %v2188_v45 = vadd.f32 %v2187_v51, %v14218_v20  ;;  %v2587_v37 = vrot.slane %v10958_v50, 2  ;;  %v11023_v16 = vpop.f32.mrf.mxu0 }
 0x2a7   : > { %v2555_v15 = vadd.f32 %v14223_v9, %v10829_v55  ;;  %v2514_v52 = vadd.f32 %v10980_v28, %v10978_v29  ;;  %v2632_v19 = vmul.f32 %v2548_v46, %v10552_v53  ;;  %v2644_v32 = vmul.f32 %v2548_v46, %v10591_v39  ;;  %8418 = vmatprep.subr.bf16.mxu0 %v9565_v59  ;;  %v14224_v55 = vld [vmem:[#allocation25_spill] sm:$0xff]  ;;  %v9576_v46 = vld [vmem:[%s14138_s5 + $0x218] sm:$0xff]  }
 0x2a8   : > { %8449 = vmatpush3.bf16.msra.mxu1 %v9572_v26  ;;  %v2541_v59 = vadd.f32 %v2540_v36, %v10923_v8  ;;  %v2506_v26 = vadd.f32 %v2505_v4, %v2504_v34  ;;  %v2564_v51 = vrot.slane %v2563_v2, 4  ;;  %v2573_v39 = vrot.slane %v2572_v31, 2  ;;  %v9578_v36 = vld [vmem:[%s14138_s5 + $0x250] sm:$0xff]  }
 0x2a9   : > { %v2633_v47 = vmul.f32 %v2555_v15, %v14224_v55  ;;  %v2645_v9 = vmul.f32 %v2555_v15, %v14225_v11  ;;  %8450 = vmatprep.subr.bf16.mxu1 %v9574_v3  ;;  %v2668_v53 = vpack.c.bf16 %v2644_v32, %v2632_v19  ;;  %v2490_v15 = vadd.f32 %v2489_v56, %v10931_v57  ;;  %v2191_v55 = vpop.f32.mrf.mxu1  ;;  %v9571_v3 = vld [vmem:[%s14138_s5 + $0x1a0] sm:$0xff]   ;;  %v14226_v57 = vld [vmem:[#allocation34_spill] sm:$0xff] }
 0x2aa   : > { %8419 = vmatpush3.bf16.msra.mxu0 %v9567_v49  ;;  %v2515_v8 = vrot.slane %v2514_v52, 4  ;;  %v2631_v34 = vmul.f32 %v2541_v59, %v10546_v21  ;;  %v2643_v4 = vmul.f32 %v2541_v59, %v10569_v14  ;;  %v2614_v56 = vmul.f32 %v2506_v26, %v14226_v57  ;;  %v9573_v14 = vld [vmem:[%s14138_s5 + $0x1d8] sm:$0xff]  }
 0x2ab   : > { %v2669_v11 = vpack.c.bf16 %v2645_v9, %v2633_v47  ;;  %3342 = vmatprep.mubr.bf16.mxu0 %v2668_v53  ;;  %v2498_v19 = vrot.slane %v10911_v43, 1  ;;  %v2483_v49 = vadd.f32 %v2482_v17, %v2481_v1  ;;  %v2375_v32 = vmax.f32 %v2188_v45, 0.0  ;;  %8420 = vmatprep.subr.bf16.mxu0 %v9569_v13  ;;  %v9580_v1 = vld [vmem:[%s14138_s5 + $0x210] sm:$0xff]  }
 0x2ac   : > { %v2626_v47 = vmul.f32 %v2506_v26, %v10542_v25  ;;  %v2588_v9 = vadd.f32 %v2587_v37, %v10958_v50  ;;  %v2667_v30 = vpack.c.bf16 %v2643_v4, %v2631_v34  ;;  %v3559_v53 = vpack.c.bf16 %v10556_v48, %v10562_v18  ;;  %8451 = vmatpush3.bf16.msra.mxu1 %v9576_v46  ;;  %v2193_v48 = vpop.f32.mrf.mxu1  ;;  %v9575_v18 = vld [vmem:[%s14138_s5 + $0x198] sm:$0xff]  }
 0x2ad   : > { %3392 = vmatmul.mubr.bf16.gmra.mxu1 %v2669_v11  ;;  %v2192_v59 = vadd.f32 %v2191_v55, %v14218_v20  ;;  %v2580_v45 = vrot.slane %v10949_v24, 2  ;;  %v2565_v37 = vadd.f32 %v2564_v51, %v2563_v2  ;;  %v3551_v13 = vpack.c.bf16 %v10603_v23, %v10605_v44  ;;  %8452 = vmatprep.subr.bf16.mxu1 %v9578_v36  ;;  %v9582_v20 = vld [vmem:[%s14138_s5 + $0x248] sm:$0xff]   ;;  %v9577_v23 = vld [vmem:[%s14138_s5 + $0x1d0] sm:$0xff]  }
 0x2ae   : > { %v2662_v50 = vpack.c.bf16 %v2626_v47, %v2614_v56  ;;  %8421 = vmatpush3.bf16.msra.mxu0 %v9571_v3  ;;  %v2574_v17 = vadd.f32 %v2573_v39, %v2572_v31  ;;  %v2516_v55 = vadd.f32 %v2515_v8, %v2514_v52  ;;  %4855 = vxpose.xlu0.c.b16.start.end [1/1] (short) %v3559_v53, 128  ;;  %v2491_v11 = vrot.slane %v2490_v15, 1  ;;  %v14227_v44 = vld [vmem:[#allocation46_spill] sm:$0xff]  ;;  %v2233_v39 = vpop.f32.mrf.mxu0  ;;  %v14229_v53 = vld [vmem:[#allocation32_spill] sm:$0xff] }
 0x2af   : > { %3343 = vmatmul.mubr.bf16.gmra.mxu0 %v2667_v30  ;;  %v2387_v2 = vmax.f32 %v2192_v59, 0.0  ;;  %v11048_v26 = vadd.f32 %v14227_v44, %v10424_v7  ;;  %v2499_v46 = vadd.f32 %v2498_v19, %v10911_v43  ;;  %v2484_v51 = vrot.slane %v2483_v49, 1  ;;  %3637 = vxpose.xlu1.c.b16.start.end [1/1] (short) %v3551_v13, 128  ;;  %v9584_v36 = vld [vmem:[%s14138_s5 + $0x208] sm:$0xff]   ;;  %v14228_v43 = vld [vmem:[#allocation52_spill] sm:$0xff] }
 0x2b0   : > { %v11051_v3 = vadd.f32 0.001, %v2375_v32  ;;  %3481 = vmatprep.mubr.bf16.mxu1 %v2662_v50  ;;  %v2194_v31 = vadd.f32 %v2193_v48, %v14219_v6  ;;  %8422 = vmatprep.subr.bf16.mxu0 %v9573_v14  ;;  %v2492_v52 = vadd.f32 %v2491_v11, %v2490_v15  ;;  %v2589_v8 = vrot.slane %v2588_v9, 1  ;;  %v9579_v14 = vld [vmem:[%s14138_s5 + $0x190] sm:$0xff]   ;;  %v9586_v15 = vld [vmem:[%s14138_s5 + $0x240] sm:$0xff]  }
 0x2b1   : > { %v11053_v30 = vadd.f32 0.001, %v2387_v2  ;;  %8453 = vmatpush3.bf16.msra.mxu1 %v9580_v1  ;;  %v11061_v34 = vadd.f32 %v14228_v43, %v10424_v7  ;;  %v2581_v4 = vadd.f32 %v2580_v45, %v10949_v24  ;;  %v2566_v56 = vrot.slane %v2565_v37, 2  ;;  %v11073_v32 = vld [vmem:[%s9991_s22 + $0x18] ss:$0 sm:$0xff]  ;;  %v14230_v13 = vld [vmem:[#allocation36_spill] sm:$0xff]  ;;  %s14783_s22 = scalar_lea.vmem %s13858_s7, %s9961_s19 }
 0x2b2   : > { %v2190_v19 = vadd.f32 %v10990_v35, %v14219_v6  ;;  %8423 = vmatpush3.bf16.msra.mxu0 %v9575_v18  ;;  %8454 = vmatprep.subr.bf16.mxu1 %v9582_v20  ;;  %v2517_v7 = vrot.slane %v2516_v55, 2  ;;  %v2612_v47 = vmul.f32 %v2492_v52, %v10617_v58  ;;  %v9581_v6 = vld [vmem:[%s14138_s5 + $0x1c8] sm:$0xff]   ;;  %v2575_v35 = vrot.slane %v2574_v17, 1  ;;  %v9588_v2 = vld [vmem:[%s14138_s5 + $0x200] sm:$0xff]  }
 0x2b3   : > { %8424 = vmatprep.subr.bf16.mxu0 %v9577_v23  ;;  %v2613_v59 = vmul.f32 %v2499_v46, %v14229_v53  ;;  %v2485_v1 = vadd.f32 %v2484_v51, %v2483_v49  ;;  %v2234_v45 = vadd.f32 %v11073_v32, %v2233_v39  ;;  %v2624_v50 = vmul.f32 %v2492_v52, %v10635_v33  ;;  %v9583_v51 = vld [vmem:[%s14138_s5 + $0x188] sm:$0xff]   ;;  %v9585_v39 = vld [vmem:[%s14138_s5 + $0x1c0] sm:$0xff]  }
 0x2b4   : > { %v2625_v48 = vmul.f32 %v2499_v46, %v14230_v13  ;;  %v2231_v18 = vadd.f32 %v11073_v32, %v11004_v40  ;;  %v2388_v20 = vmax.f32 %v2194_v31, 0.0  ;;  %v2590_v11 = vadd.f32 %v2589_v8, %v2588_v9  ;;  %v14231_v9 = vld [vmem:[#allocation42_spill] sm:$0xff] }
 0x2b5   : > { %8455 = vmatpush3.bf16.msra.mxu1 %v9584_v36  ;;  %v2582_v23 = vrot.slane %v2581_v4, 1  ;;  %v2567_v44 = vadd.f32 %v2566_v56, %v2565_v37  ;;  %v2376_v43 = vmax.f32 %v2190_v19, 0.0  ;;  %v2660_v49 = vpack.c.bf16 %v2624_v50, %v2612_v47  ;;  %v14232_v36 = vld [vmem:[#allocation54_spill] sm:$0xff]  ;;  %v14233_v19 = vld [vmem:[#allocation51_spill] sm:$0xff] }
 0x2b6   : > { %8425 = vmatpush3.bf16.msra.mxu0 %v9579_v14  ;;  %8456 = vmatprep.subr.bf16.mxu1 %v9586_v15  ;;  %v2280_v46 = vmax.f32 %v11048_v26, 0.0  ;;  %v2518_v40 = vadd.f32 %v2517_v7, %v2516_v55  ;;  %v2576_v31 = vadd.f32 %v2575_v35, %v2574_v17  ;;  %v2638_v52 = vmul.f32 %v2590_v11, %v14231_v9  ;;  %v14234_v15 = vld [vmem:[#allocation65_spill] sm:$0xff] }
 0x2b7   : > { %8426 = vmatprep.subr.bf16.mxu0 %v9581_v6  ;;  %v2611_v37 = vmul.f32 %v2485_v1, %v10615_v60  ;;  %v2623_v8 = vmul.f32 %v2485_v1, %v14232_v36  ;;  %v3571_v56 = vpack.c.bf16 %v2234_v45, %v2231_v18  ;;  %3432 = vmatprep.mubr.bf16.mxu0 %v2660_v49  ;;  %v2287_v47 = vmax.f32 %v14234_v15, 0.0  ;;  %v9587_v1 = vld [vmem:[%s14138_s5 + $0x180] sm:$0xff]  }
 0x2b8   : > { %v2650_v14 = vmul.f32 %v2590_v11, %v14233_v19  ;;  %v14235_v55 = vmax.f32 %v10764_v61, 0.0  ;;  %v2292_v7 = vmax.f32 %v11061_v34, 0.0  ;;  %v11107_v6 = vadd.f32 0.001, %v2388_v20  ;;  %v9589_v61 = vld [vmem:[%s14138_s5 + $0x2f8] sm:$0xff]   ;;  %v14237_v20 = vld [vmem:[#allocation66_spill] sm:$0xff] }
 0x2b9   : > { %8457 = vmatpush3.bf16.msra.mxu1 %v9588_v2  ;;  %v2568_v17 = vrot.slane %v2567_v44, 1  ;;  %v11109_v35 = vadd.f32 0.001, %v2376_v43  ;;  %v2661_v45 = vpack.c.bf16 %v2625_v48, %v2613_v59  ;;  %v2583_v50 = vadd.f32 %v2582_v23, %v2581_v4  ;;  %v14236_v34 = vld [vmem:[#allocation60_spill] sm:$0xff] }
 0x2ba   : > { %v11104_v26 = vadd.f32 0.001, %v14235_v55  ;;  %8427 = vmatpush3.bf16.msra.mxu0 %v9583_v51  ;;  %8985 = vmatprep.subr.bf16.mxu1 %v3571_v56  ;;  %v2636_v18 = vmul.f32 %v2576_v31, %v14236_v34  ;;  %v2648_v2 = vmul.f32 %v2576_v31, %v14237_v20  ;;  %v2674_v11 = vpack.c.bf16 %v2650_v14, %v2638_v52  ;;  %v9590_v52 = vld [vmem:[%s14138_s5 + $0x2b8] sm:$0xff]   ;;  %v14242_v55 = vld [vmem:[#allocation49_spill] sm:$0xff] }
 0x2bb   : > { %8428 = vmatprep.subr.bf16.mxu0 %v9585_v39  ;;  %v2519_v43 = vrot.slane %v2518_v40, 1  ;;  %v11119_v49 = vadd.f32 0.001, %v2280_v46  ;;  %v2507_v51 = vadd.f32 %v10969_v63, %v10967_v0  ;;  %v2659_v15 = vpack.c.bf16 %v2623_v8, %v2611_v37  ;;  %v14240_v39 = vld [vmem:[#allocation72_spill] sm:$0xff] }
 0x2bc   : > { %3482 = vmatmul.mubr.bf16.vlgmr.msra.gmra.mxu1 %v2661_v45  ;;  %v11125_v48 = vadd.f32 0.001, %v2292_v7  ;;  %v2598_v23 = vadd.f32 %v11107_v6, %v11109_v35  ;;  %v2569_v37 = vadd.f32 %v2568_v17, %v2567_v44  ;;  %v14241_v8 = vld [vmem:[#allocation40_spill] sm:$0xff]  ;;  %v2649_v7 = vmul.f32 %v2583_v50, %v14242_v55 }
 0x2bd   : > { %14238 = vst [vmem:[#allocation21_spill] sm:$0xff] %v11119_v49  ;;  %v3581_v59 = vpop.trf.xlu0  ;;  %3489 = vmatprep.mubr.bf16.mxu1 %v2674_v11  ;;  %8986 = vmatpush3.bf16.msra.mxu1 %v3571_v56  ;;  %v2637_v14 = vmul.f32 %v2583_v50, %v14241_v8  ;;  %v2672_v11 = vpack.c.bf16 %v2648_v2, %v2636_v18  ;;  %v11161_v31 = vadd.f32 0.001, %v2287_v47  ;;  %v9592_v56 = vld [vmem:[%s14138_s5 + $0x2b0] sm:$0xff]   ;;  %v2508_v2 = vrot.slane %v2507_v51, 4 }
 0x2be   : > { %14239 = vst [vmem:[#allocation28_spill] sm:$0xff] %v11125_v48  ;;  %8429 = vmatpush3.bf16.msra.mxu0 %v9587_v1  ;;  %v9591_v1 = vld [vmem:[%s14138_s5 + $0x2f0] sm:$0xff]   ;;  %v2520_v24 = vadd.f32 %v2519_v43, %v2518_v40 }
 0x2bf   : > { %8470 = vmatprep.subr.bf16.mxu0 %v9589_v61  ;;  %v14243_v61 = vld [vmem:[#allocation67_spill] sm:$0xff]  ;;  %14247 = vst [vmem:[#allocation46_spill] sm:$0xff] %v11161_v31  ;;  %v2673_v18 = vpack.c.bf16 %v2649_v7, %v2637_v14  ;;  %v2647_v47 = vmul.f32 %v2569_v37, %v11161_v31  ;;  %v9594_v7 = vld [vmem:[%s14138_s5 + $0x2a8] sm:$0xff]  }
 0x2c0   : > { %v11138_v45 = vpop.trf.xlu1  ;;  %v14244_v40 = vld [vmem:[#allocation55_spill] sm:$0xff] }
 0x2c1   : > { %v3582_v17 = vpop.trf.xlu0  ;;  %v14245_v43 = vmax.f32 %v14244_v40, 0.0  ;;  %3433 = vmatmul.mubr.bf16.vlgmr.msra.gmra.mxu0 %v2659_v15  ;;  %v9593_v15 = vld [vmem:[%s14138_s5 + $0x2e8] sm:$0xff]  }
 0x2c2   : > { %3440 = vmatprep.mubr.bf16.mxu0 %v2672_v11  ;;  %8471 = vmatpush3.bf16.msra.mxu0 %v9590_v52  ;;  %v2599_v11 = vrot.slane %v2598_v23, 4  ;;  %v2616_v52 = vmul.f32 %v2520_v24, %v14243_v61 }
 0x2c3   : > { %v11159_v46 = vadd.f32 0.001, %v14245_v43  ;;  %8472 = vmatprep.subr.bf16.mxu0 %v9591_v1  ;;  %v2628_v43 = vmul.f32 %v2520_v24, %v11104_v26  ;;  %v2509_v1 = vadd.f32 %v2508_v2, %v2507_v51  ;;  %v9596_v51 = vld [vmem:[%s14138_s5 + $0x2a0] sm:$0xff]  }
 0x2c4   : > { %v11168_v50 = vpop.trf.xlu1  ;;  %3490 = vmatmul.mubr.bf16.gmra.mxu1 %v2673_v18  ;;  %v9595_v18 = vld [vmem:[%s14138_s5 + $0x2e0] sm:$0xff]   ;;  %v2600_v24 = vadd.f32 %v2599_v11, %v2598_v23  ;;  %v9597_v23 = vld [vmem:[%s14138_s5 + $0x2d8] sm:$0xff]  }
 0x2c5   : > { %14246 = vst [vmem:[#allocation34_spill] sm:$0xff] %v11159_v46  ;;  %v2635_v40 = vmul.f32 %v2569_v37, %v11159_v46  ;;  %v3583_v14 = vpop.trf.xlu0  ;;  %8987 = vmatprep.mubr.msk.bf16.mxu1 %vm3765_vm2, %v3581_v59  ;;  %v2591_v37 = vadd.f32 %v11053_v30, %v11051_v3  ;;  %v2664_v31 = vpack.c.bf16 %v2628_v43, %v2616_v52  ;;  %v14249_v46 = vld [vmem:[#allocation45_spill] sm:$0xff]  ;;  %v2510_v2 = vrot.slane %v2509_v1, 2 }
 0x2c6   : > { %8473 = vmatpush3.bf16.msra.mxu0 %v9592_v56  ;;  %v14248_v56 = vld [vmem:[#allocation47_spill] sm:$0xff] }
 0x2c7   : > { %v2671_v44 = vpack.c.bf16 %v2647_v47, %v2635_v40  ;;  %8474 = vmatprep.subr.bf16.mxu0 %v9593_v15  ;;  %v3560_v34 = vpack.c.bf16 %v14249_v46, %v14248_v56  ;;  %v2592_v40 = vrot.slane %v2591_v37, 4  ;;  %v14250_v47 = vld [vmem:[#allocation59_spill] sm:$0xff]  ;;  %v14251_v15 = vld [vmem:[#allocation56_spill] sm:$0xff]  ;;  %v2511_v52 = vadd.f32 %v2510_v2, %v2509_v1 }
 0x2c8   : > { %v11186_v4 = vpop.trf.xlu1  ;;  %v3552_v20 = vpack.c.bf16 %v14251_v15, %v14250_v47  ;;  %v14253_v2 = vld [vmem:[#allocation43_spill] sm:$0xff]  ;;  %v9602_v47 = vld [vmem:[%s14138_s5 + $0x288] sm:$0xff]  }
 0x2c9   : > { %v3584_v59 = vpop.trf.xlu0  ;;  %3441 = vmatmul.mubr.bf16.gmra.mxu0 %v2671_v44  ;;  %v2601_v44 = vrot.slane %v2600_v24, 2  ;;  %v2593_v43 = vadd.f32 %v2592_v40, %v2591_v37  ;;  %v2267_v40 = vmax.f32 %v14253_v2, 0.0  ;;  %v14257_v2 = vld [vmem:[#allocation53_spill] sm:$0xff] }
 0x2ca   : > { %8475 = vmatpush3.bf16.msra.mxu0 %v9594_v7  ;;  %3530 = vmatprep.mubr.bf16.mxu0 %v2664_v31  ;;  %v9598_v31 = vld [vmem:[%s14138_s5 + $0x298] sm:$0xff]  }
 0x2cb   : > { %8476 = vmatprep.subr.bf16.mxu0 %v9595_v18  ;;  %4871 = vxpose.xlu0.c.b16.start.end [1/1] (short) %v3560_v34, 128  ;;  %v9599_v34 = vld [vmem:[%s14138_s5 + $0x2d0] sm:$0xff]   ;;  %v2602_v7 = vadd.f32 %v2601_v44, %v2600_v24  ;;  %v9601_v18 = vld [vmem:[%s14138_s5 + $0x2c8] sm:$0xff]  }
 0x2cc   : > { %8988 = vmatmul.mubr.msk.bf16.vlgmr.msra.gmra.mxu1 %vm3765_vm2, %v3582_v17  ;;  %3653 = vxpose.xlu1.c.b16.start.end [1/1] (short) %v3552_v20, 128  ;;  %v11200_v46 = vpop.trf.xlu1  ;;  %v9600_v20 = vld [vmem:[%s14138_s5 + $0x290] sm:$0xff]   ;;  %v2512_v17 = vrot.slane %v2511_v52, 1 }
 0x2cd   : > { %8991 = vmatprep.mubr.msk.bf16.mxu1 %vm3765_vm2, %v3583_v14  ;;  %v3585_v11 = vpop.trf.xlu0  ;;  %v2594_v14 = vrot.slane %v2593_v43, 2  ;;  %v2603_v37 = vrot.slane %v2602_v7, 1 }
 0x2ce   : > { %8477 = vmatpush3.bf16.msra.mxu0 %v9596_v51  ;;  %v14252_v51 = vld [vmem:[#allocation37_spill] sm:$0xff]  ;;  %v2513_v15 = vadd.f32 %v2512_v17, %v2511_v52  ;;  %v2239_v17 = vadd.f32 %v10974_v5, %v11073_v32 }
 0x2cf   : > { %8478 = vmatprep.subr.bf16.mxu0 %v9597_v23  ;;  %v2255_v24 = vmax.f32 %v14252_v51, 0.0  ;;  %v2595_v23 = vadd.f32 %v2594_v14, %v2593_v43  ;;  %v2604_v44 = vadd.f32 %v2603_v37, %v2602_v7  ;;  %v9604_v52 = vld [vmem:[%s14138_s5 + $0x280] sm:$0xff]  }
 0x2d0   : > { %v11214_v1 = vpop.trf.xlu1  ;;  %v14256_v51 = vld [vmem:[#allocation48_spill] sm:$0xff] }
 0x2d1   : > { %v3586_v56 = vpop.trf.xlu0  ;;  %v2640_v37 = vmul.f32 %v2604_v44, %v11119_v49 }
 0x2d2   : > { %8479 = vmatpush3.bf16.msra.mxu0 %v9598_v31  ;;  %v11226_v31 = vadd.f32 0.001, %v2255_v24  ;;  %v2279_v24 = vmax.f32 %v14256_v51, 0.0 }
 0x2d3   : > { %8480 = vmatprep.subr.bf16.mxu0 %v9599_v34  ;;  %v11228_v34 = vadd.f32 0.001, %v2267_v40  ;;  %v2291_v40 = vmax.f32 %v14257_v2, 0.0 }
 0x2d4   : > { %8992 = vmatmul.mubr.msk.bf16.gmra.mxu1 %vm3765_vm2, %v3584_v59  ;;  %v9603_v59 = vld [vmem:[%s14138_s5 + $0x2c0] sm:$0xff]   ;;  %14254 = vst [vmem:[#allocation52_spill] sm:$0xff] %v11226_v31  ;;  %v2615_v14 = vmul.f32 %v2513_v15, %v11226_v31 }
 0x2d5   : > { %8995 = vmatprep.mubr.msk.bf16.mxu1 %vm3765_vm2, %v3585_v11  ;;  %14255 = vst [vmem:[#allocation32_spill] sm:$0xff] %v11228_v34  ;;  %v2242_v11 = vadd.f32 %v11023_v16, %v11073_v32  ;;  %v3587_v43 = vpop.trf.xlu0  ;;  %v2627_v7 = vmul.f32 %v2513_v15, %v11228_v34  ;;  %v2652_v16 = vmul.f32 %v2604_v44, %v11125_v48  ;;  %v11247_v49 = vadd.f32 0.001, %v2291_v40  ;;  %v9654_v34 = vld [vmem:[%s14138_s5 + $0x38] sm:$0xff]  }
 0x2d6   : > { %8481 = vmatpush3.bf16.msra.mxu0 %v9600_v20  ;;  %v3602_v20 = vpop.trf.xlu1 }
 0x2d7   : > { %8482 = vmatprep.subr.bf16.mxu0 %v9601_v18  ;;  %v2596_v18 = vrot.slane %v2595_v23, 1  ;;  %v2663_v5 = vpack.c.bf16 %v2627_v7, %v2615_v14  ;;  %v2676_v55 = vpack.c.bf16 %v2652_v16, %v2640_v37  ;;  %14259 = vst [vmem:[#allocation54_spill] sm:$0xff] %v11247_v49  ;;  %v14262_v7 = vpack.c.bf16 %v10795_v54, %v10806_v12 }
 0x2d9   : > { %v2597_v32 = vadd.f32 %v2596_v18, %v2595_v23  ;;  %v3588_v44 = vpop.trf.xlu0 }
 0x2da   : > { %8483 = vmatpush3.bf16.msra.mxu0 %v9602_v47  ;;  %v3572_v47 = vpack.c.bf16 %v2242_v11, %v2239_v17  ;;  %v3603_v15 = vpop.trf.xlu1  ;;  %v14261_v17 = vld [vmem:[#allocation20_spill] sm:$0xff] }
 0x2db   : > { %8484 = vmatprep.subr.bf16.mxu0 %v9603_v59  ;;  %v11245_v59 = vadd.f32 0.001, %v2279_v24  ;;  %v2651_v11 = vmul.f32 %v2597_v32, %v11247_v49 }
 0x2dc   : > { %8996 = vmatmul.mubr.msk.bf16.gmra.mxu1 %vm3765_vm2, %v3586_v56 }
 0x2dd   : > { %8999 = vmatprep.mubr.msk.bf16.mxu1 %vm3765_vm2, %v3587_v43  ;;  %14258 = vst [vmem:[#allocation36_spill] sm:$0xff] %v11245_v59  ;;  %v2639_v56 = vmul.f32 %v2597_v32, %v11245_v59  ;;  %v14260_v43 = vld [vmem:[#allocation19_spill] sm:$0xff] }
 0x2de   : > { %8485 = vmatpush3.bf16.msra.mxu0 %v9604_v52  ;;  %v3604_v23 = vpop.trf.xlu1  ;;  %v3553_v14 = vpack.c.bf16 %v14261_v17, %v14260_v43  ;;  %v14266_v43 = vld [vmem:[#allocation57_spill] sm:$0xff] }
 0x2df   : > { %9179 = vmatprep.subr.bf16.mxu0 %v3572_v47  ;;  %v2675_v52 = vpack.c.bf16 %v2651_v11, %v2639_v56 }
 0x2e1   : > { %3531 = vmatmul.mubr.bf16.vlgmr.msra.gmra.mxu0 %v2663_v5 }
 0x2e2   : > { %3538 = vmatprep.mubr.bf16.mxu0 %v2676_v55  ;;  %9180 = vmatpush3.bf16.msra.mxu0 %v3572_v47  ;;  %v14264_v47 = vpack.c.bf16 %v10872_v38, %v10870_v27 }
 0x2e4   : > { %9000 = vmatmul.mubr.msk.bf16.gmra.mxu1 %vm3765_vm2, %v3588_v44 }
 0x2e5   : > { %9003 = vmatprep.mubr.msk.bf16.mxu1 %vm3765_vm2, %v11138_v45 }
 0x2e8   : > { %4887 = vxpose.xlu0.c.b16.start.end [1/1] (short) %v14262_v7, 128  ;;  %v14269_v7 = vld [vmem:[#allocation63_spill] sm:$0xff] }
 0x2e9   : > { %3539 = vmatmul.mubr.bf16.gmra.mxu0 %v2675_v52  ;;  %3669 = vxpose.xlu1.c.b16.start.end [1/1] (short) %v3553_v14, 128  ;;  %v14265_v52 = vld [vmem:[#allocation58_spill] sm:$0xff]  ;;  %v14268_v14 = vld [vmem:[#allocation64_spill] sm:$0xff] }
 0x2ea   : > { %v14267_v17 = vpack.c.bf16 %v14265_v52, %v14266_v43  ;;  %v14272_v52 = vld [vmem:[#allocation62_spill] sm:$0xff] }
 0x2eb   : > { %v3613_v55 = vpop.trf.xlu0 }
 0x2ec   : > { %v3629_v18 = vpop.trf.xlu1  ;;  %9004 = vmatmul.mubr.msk.bf16.gmra.mxu1 %vm3765_vm2, %v11168_v50 }
 0x2ed   : > { %9007 = vmatprep.mubr.msk.bf16.mxu1 %vm3765_vm2, %v11186_v4 }
 0x2ef   : > { %v3614_v45 = vpop.trf.xlu0 }
 0x2f0   : > { %v3630_v37 = vpop.trf.xlu1 }
 0x2f3   : > { %v3615_v16 = vpop.trf.xlu0 }
 0x2f4   : > { %v3631_v51 = vpop.trf.xlu1  ;;  %9008 = vmatmul.mubr.msk.bf16.gmra.mxu1 %vm3765_vm2, %v11200_v46  ;;  %v14263_v46 = vpack.c.bf16 %v14240_v39, %v10809_v62 }
 0x2f5   : > { %9011 = vmatprep.mubr.msk.bf16.mxu1 %vm3765_vm2, %v11214_v1 }
 0x2f7   : > { %v3616_v54 = vpop.trf.xlu0 }
 0x2f8   : > { %v3632_v12 = vpop.trf.xlu1 }
 0x2fb   : > { %v3617_v24 = vpop.trf.xlu0 }
 0x2fc   : > { %v3633_v2 = vpop.trf.xlu1  ;;  %9012 = vmatmul.mubr.msk.bf16.gmra.mxu1 %vm3765_vm2, %v3602_v20 }
 0x2fd   : > { %9015 = vmatprep.mubr.msk.bf16.mxu1 %vm3765_vm2, %v3603_v15 }
 0x2ff   : > { %v3618_v50 = vpop.trf.xlu0 }
 0x300   : > { %v3634_v4 = vpop.trf.xlu1 }
 0x303   : > { %v3619_v40 = vpop.trf.xlu0 }
 0x304   : > { %9016 = vmatmul.mubr.msk.bf16.gmra.mxu1 %vm3765_vm2, %v3604_v23  ;;  %v3635_v1 = vpop.trf.xlu1 }
 0x305   : > { %9019 = vmatprep.mubr.msk.bf16.mxu1 %vm3765_vm2, %v3613_v55  ;;  %4903 = vxpose.xlu0.c.b16.start.end [1/1] (short) %v14263_v46, 128  ;;  %v14270_v55 = vpack.c.bf16 %v14268_v14, %v14269_v7  ;;  %v14273_v7 = vld [vmem:[#allocation69_spill] sm:$0xff] }
 0x306   : > { %3685 = vxpose.xlu1.c.b16.start.end [1/1] (short) %v14264_v47, 128 }
 0x307   : > { %v3620_v5 = vpop.trf.xlu0 }
 0x308   : > { %v11278_v20 = vpop.trf.xlu1 }
 0x30c   : > { %9020 = vmatmul.mubr.msk.bf16.gmra.mxu1 %vm3765_vm2, %v3614_v45 }
 0x30d   : > { %9023 = vmatprep.mubr.msk.bf16.mxu1 %vm3765_vm2, %v3615_v16 }
 0x310   : > { %v4863_v32 = vpop.trf.xlu0 }
 0x311   : > { %9181 = vmatprep.mubr.msk.bf16.mxu0 %vm3765_vm2, %v4863_v32  ;;  %v11282_v15 = vpop.trf.xlu1 }
 0x314   : > { %9024 = vmatmul.mubr.msk.bf16.gmra.mxu1 %vm3765_vm2, %v3616_v54  ;;  %v4864_v62 = vpop.trf.xlu0 }
 0x315   : > { %9027 = vmatprep.mubr.msk.bf16.mxu1 %vm3765_vm2, %v3617_v24  ;;  %9182 = vmatmul.mubr.msk.bf16.vlgmr.msra.gmra.mxu0 %vm3765_vm2, %v4864_v62  ;;  %v11287_v27 = vpop.trf.xlu1 }
 0x318   : > { %v4865_v38 = vpop.trf.xlu0 }
 0x319   : > { %9185 = vmatprep.mubr.msk.bf16.mxu0 %vm3765_vm2, %v4865_v38  ;;  %v11290_v39 = vpop.trf.xlu1 }
 0x31c   : > { %9028 = vmatmul.mubr.msk.bf16.gmra.mxu1 %vm3765_vm2, %v3618_v50  ;;  %v4866_v44 = vpop.trf.xlu0 }
 0x31d   : > { %9031 = vmatprep.mubr.msk.bf16.mxu1 %vm3765_vm2, %v3619_v40  ;;  %9186 = vmatmul.mubr.msk.bf16.gmra.mxu0 %vm3765_vm2, %v4866_v44  ;;  %v11295_v56 = vpop.trf.xlu1 }
 0x320   : > { %v4867_v11 = vpop.trf.xlu0 }
 0x321   : > { %9189 = vmatprep.mubr.msk.bf16.mxu0 %vm3765_vm2, %v4867_v11  ;;  %v11298_v23 = vpop.trf.xlu1 }
 0x322   : > { %4919 = vxpose.xlu0.c.b16.start.end [1/1] (short) %v14267_v17, 128 }
 0x323   : > { %3701 = vxpose.xlu1.c.b16.start.end [1/1] (short) %v14270_v55, 128  ;;  %v14274_v55 = vld [vmem:[#allocation68_spill] sm:$0xff] }
 0x324   : > { %9032 = vmatmul.mubr.msk.bf16.gmra.mxu1 %vm3765_vm2, %v3620_v5  ;;  %v4868_v45 = vpop.trf.xlu0 }
 0x325   : > { %9035 = vmatprep.mubr.msk.bf16.mxu1 %vm3765_vm2, %v3629_v18  ;;  %9190 = vmatmul.mubr.msk.bf16.gmra.mxu0 %vm3765_vm2, %v4868_v45  ;;  %v11309_v16 = vpop.trf.xlu1  ;;  %v3556_v45 = vpack.c.bf16 %v14274_v55, %v14273_v7 }
 0x328   : > { %v4869_v54 = vpop.trf.xlu0 }
 0x329   : > { %9193 = vmatprep.mubr.msk.bf16.mxu0 %vm3765_vm2, %v4869_v54  ;;  %v11312_v24 = vpop.trf.xlu1 }
 0x32c   : > { %9036 = vmatmul.mubr.msk.bf16.gmra.mxu1 %vm3765_vm2, %v3630_v37  ;;  %v4870_v50 = vpop.trf.xlu0 }
 0x32d   : > { %9039 = vmatprep.mubr.msk.bf16.mxu1 %vm3765_vm2, %v3631_v51  ;;  %9194 = vmatmul.mubr.msk.bf16.gmra.mxu0 %vm3765_vm2, %v4870_v50  ;;  %v11317_v40 = vpop.trf.xlu1 }
 0x330   : > { %v4879_v46 = vpop.trf.xlu0 }
 0x331   : > { %9197 = vmatprep.mubr.msk.bf16.mxu0 %vm3765_vm2, %v4879_v46  ;;  %v11320_v18 = vpop.trf.xlu1 }
 0x334   : > { %9040 = vmatmul.mubr.msk.bf16.gmra.mxu1 %vm3765_vm2, %v3632_v12  ;;  %v4880_v47 = vpop.trf.xlu0 }
 0x335   : > { %9043 = vmatprep.mubr.msk.bf16.mxu1 %vm3765_vm2, %v3633_v2  ;;  %9198 = vmatmul.mubr.msk.bf16.gmra.mxu0 %vm3765_vm2, %v4880_v47  ;;  %v11325_v37 = vpop.trf.xlu1  ;;  %v14271_v2 = vld [vmem:[#allocation61_spill] sm:$0xff] }
 0x336   : > { %v3564_v43 = vpack.c.bf16 %v14272_v52, %v14271_v2 }
 0x338   : > { %v8346_v5 = vpop.f32.mrf.mxu1  ;;  %v4881_v51 = vpop.trf.xlu0 }
 0x339   : > { %9201 = vmatprep.mubr.msk.bf16.mxu0 %vm3765_vm2, %v4881_v51  ;;  %v11330_v38 = vpop.trf.xlu1 }
 0x33a   : > { %v8347_v32 = vpop.f32.mrf.mxu1 }
 0x33b   : > { %v11328_v62 = vadd.f32 %v8347_v32, %v8346_v5 }
 0x33c   : > { %v8349_v44 = vpop.f32.mrf.mxu1  ;;  %9044 = vmatmul.mubr.msk.bf16.gmra.mxu1 %vm3765_vm2, %v3634_v4  ;;  %v4882_v12 = vpop.trf.xlu0 }
 0x33d   : > { %9047 = vmatprep.mubr.msk.bf16.mxu1 %vm3765_vm2, %v3635_v1  ;;  %9202 = vmatmul.mubr.msk.bf16.gmra.mxu0 %vm3765_vm2, %v4882_v12  ;;  %v11339_v14 = vpop.trf.xlu1 }
 0x33e   : > { %v8350_v11 = vpop.f32.mrf.mxu1 }
 0x33f   : > { %v11337_v17 = vadd.f32 %v8350_v11, %v8349_v44  ;;  %4935 = vxpose.xlu0.c.b16.start.end [1/1] (short) %v3564_v43, 128 }
 0x340   : > { %3717 = vxpose.xlu1.c.b16.start.end [1/1] (short) %v3556_v45, 128  ;;  %v4883_v54 = vpop.trf.xlu0 }
 0x341   : > { %9205 = vmatprep.mubr.msk.bf16.mxu0 %vm3765_vm2, %v4883_v54  ;;  %v11344_v4 = vpop.trf.xlu1  ;;  %v14275_v54 = vld [vmem:[#allocation74_spill] sm:$0xff] }
 0x344   : > { %9048 = vmatmul.mubr.msk.bf16.gmra.mxu1 %vm3765_vm2, %v11278_v20  ;;  %v4884_v1 = vpop.trf.xlu0 }
 0x345   : > { %9051 = vmatprep.mubr.msk.bf16.mxu1 %vm3765_vm2, %v11282_v15  ;;  %9206 = vmatmul.mubr.msk.bf16.gmra.mxu0 %vm3765_vm2, %v4884_v1  ;;  %v11351_v46 = vpop.trf.xlu1 }
 0x346   : > { %v8352_v50 = vpop.f32.mrf.mxu1 }
 0x348   : > { %v8353_v47 = vpop.f32.mrf.mxu1  ;;  %v4885_v51 = vpop.trf.xlu0 }
 0x349   : > { %v11353_v5 = vadd.f32 %v8353_v47, %v8352_v50  ;;  %9209 = vmatprep.mubr.msk.bf16.mxu0 %vm3765_vm2, %v4885_v51  ;;  %v11356_v44 = vpop.trf.xlu1  ;;  %v14278_v47 = vpack.c.bf16 %v10969_v63, %v10967_v0 }
 0x34a   : > { %v8355_v32 = vpop.f32.mrf.mxu1 }
 0x34c   : > { %v8356_v12 = vpop.f32.mrf.mxu1  ;;  %9052 = vmatmul.mubr.msk.bf16.gmra.mxu1 %vm3765_vm2, %v11287_v27  ;;  %v4886_v15 = vpop.trf.xlu0 }
 0x34d   : > { %v11358_v20 = vadd.f32 %v8356_v12, %v8355_v32  ;;  %9055 = vmatprep.mubr.msk.bf16.mxu1 %vm3765_vm2, %v11290_v39  ;;  %9210 = vmatmul.mubr.msk.bf16.gmra.mxu0 %vm3765_vm2, %v4886_v15  ;;  %v11365_v11 = vpop.trf.xlu1 }
 0x350   : > { %v4895_v2 = vpop.trf.xlu0 }
 0x351   : > { %9213 = vmatprep.mubr.msk.bf16.mxu0 %vm3765_vm2, %v4895_v2  ;;  %v11368_v52 = vpop.trf.xlu1 }
 0x354   : > { %9056 = vmatmul.mubr.msk.bf16.gmra.mxu1 %vm3765_vm2, %v11295_v56  ;;  %v4896_v43 = vpop.trf.xlu0  ;;  %v14276_v56 = vld [vmem:[#allocation73_spill] sm:$0xff] }
 0x355   : > { %9059 = vmatprep.mubr.msk.bf16.mxu1 %vm3765_vm2, %v11298_v23  ;;  %9214 = vmatmul.mubr.msk.bf16.gmra.mxu0 %vm3765_vm2, %v4896_v43  ;;  %v11375_v27 = vpop.trf.xlu1  ;;  %v14277_v1 = vpack.c.bf16 %v14275_v54, %v14276_v56 }
 0x358   : > { %v4897_v39 = vpop.trf.xlu0 }
 0x359   : > { %9217 = vmatprep.mubr.msk.bf16.mxu0 %vm3765_vm2, %v4897_v39  ;;  %v11378_v55 = vpop.trf.xlu1 }
 0x35a   : > { %v8402_v7 = vpop.f32.mrf.mxu1 }
 0x35c   : > { %v8403_v45 = vpop.f32.mrf.mxu1  ;;  %9060 = vmatmul.mubr.msk.bf16.gmra.mxu1 %vm3765_vm2, %v11309_v16  ;;  %4951 = vxpose.xlu0.c.b16.start.end [1/1] (short) %v14277_v1, 128  ;;  %v4898_v50 = vpop.trf.xlu0 }
 0x35d   : > { %v8404_v23 = vadd.f32 %v8403_v45, %v8402_v7  ;;  %9063 = vmatprep.mubr.msk.bf16.mxu1 %vm3765_vm2, %v11312_v24  ;;  %3733 = vxpose.xlu1.c.b16.start.end [1/1] (short) %v14278_v47, 128  ;;  %v11391_v32 = vpop.trf.xlu1 }
 0x35e   : > { %9218 = vmatmul.mubr.msk.bf16.gmra.mxu0 %vm3765_vm2, %v4898_v50  ;;  %v8405_v51 = vpop.f32.mrf.mxu1 }
 0x360   : > { %v8406_v12 = vpop.f32.mrf.mxu1  ;;  %v4899_v16 = vpop.trf.xlu0 }
 0x361   : > { %v8374_v15 = vpop.f32.mrf.mxu0  ;;  %v8407_v2 = vadd.f32 %v8406_v12, %v8405_v51  ;;  %9221 = vmatprep.mubr.msk.bf16.mxu0 %vm3765_vm2, %v4899_v16  ;;  %v11394_v43 = vpop.trf.xlu1 }
 0x363   : > { %v8375_v39 = vpop.f32.mrf.mxu0 }
 0x364   : > { %v8376_v7 = vadd.f32 %v8375_v39, %v8374_v15  ;;  %9064 = vmatmul.mubr.msk.bf16.gmra.mxu1 %vm3765_vm2, %v11317_v40  ;;  %v4900_v0 = vpop.trf.xlu0 }
 0x365   : > { %v8377_v63 = vpop.f32.mrf.mxu0  ;;  %9067 = vmatprep.mubr.msk.bf16.mxu1 %vm3765_vm2, %v11320_v18  ;;  %v11402_v45 = vpop.trf.xlu1 }
 0x366   : > { %v3337_v24 = vadd.f32 %v8376_v7, %v11328_v62  ;;  %9222 = vmatmul.mubr.msk.bf16.gmra.mxu0 %vm3765_vm2, %v4900_v0 }
 0x367   : > { %v8378_v54 = vpop.f32.mrf.mxu0 }
 0x368   : > { %v8379_v56 = vadd.f32 %v8378_v54, %v8377_v63  ;;  %v3386_v1 = vadd.f32 %v8404_v23, %v3337_v24  ;;  %v4901_v50 = vpop.trf.xlu0 }
 0x369   : > { %9225 = vmatprep.mubr.msk.bf16.mxu0 %vm3765_vm2, %v4901_v50  ;;  %v11406_v40 = vpop.trf.xlu1 }
 0x36a   : > { %v3340_v47 = vadd.f32 %v8379_v56, %v11337_v17 }
 0x36c   : > { %9068 = vmatmul.mubr.msk.bf16.gmra.mxu1 %vm3765_vm2, %v11325_v37  ;;  %v11410_v18 = vadd.f32 %v8407_v2, %v3340_v47  ;;  %v4902_v62 = vpop.trf.xlu0 }
 0x36d   : > { %v8408_v51 = vpop.f32.mrf.mxu1  ;;  %9071 = vmatprep.mubr.msk.bf16.mxu1 %vm3765_vm2, %v11330_v38  ;;  %v11415_v23 = vpop.trf.xlu1 }
 0x36e   : > { %9226 = vmatmul.mubr.msk.bf16.gmra.mxu0 %vm3765_vm2, %v4902_v62 }
 0x36f   : > { %v8409_v12 = vpop.f32.mrf.mxu1  ;;  %v8380_v17 = vpop.f32.mrf.mxu0 }
 0x370   : > { %v8410_v16 = vadd.f32 %v8409_v12, %v8408_v51  ;;  %v4911_v7 = vpop.trf.xlu0 }
 0x371   : > { %v8411_v15 = vpop.f32.mrf.mxu1  ;;  %v8381_v39 = vpop.f32.mrf.mxu0  ;;  %9229 = vmatprep.mubr.msk.bf16.mxu0 %vm3765_vm2, %v4911_v7 }
 0x372   : > { %v8382_v0 = vadd.f32 %v8381_v39, %v8380_v17  ;;  %v11418_v37 = vpop.trf.xlu1 }
 0x373   : > { %v8412_v63 = vpop.f32.mrf.mxu1  ;;  %v8383_v2 = vpop.f32.mrf.mxu0 }
 0x374   : > { %v8413_v24 = vadd.f32 %v8412_v63, %v8411_v15  ;;  %v3345_v38 = vadd.f32 %v8382_v0, %v11353_v5  ;;  %9072 = vmatmul.mubr.msk.bf16.gmra.mxu1 %vm3765_vm2, %v11339_v14  ;;  %v4912_v56 = vpop.trf.xlu0  ;;  %v14279_v5 = vpack.c.bf16 %v10903_v42, %v10913_v10 }
 0x375   : > { %v8384_v54 = vpop.f32.mrf.mxu0  ;;  %9075 = vmatprep.mubr.msk.bf16.mxu1 %vm3765_vm2, %v11344_v4  ;;  %v14280_v4 = vpack.c.bf16 %v10980_v28, %v10978_v29 }
 0x376   : > { %v8385_v50 = vadd.f32 %v8384_v54, %v8383_v2  ;;  %9230 = vmatmul.mubr.msk.bf16.gmra.mxu0 %vm3765_vm2, %v4912_v56  ;;  %v3394_v47 = vadd.f32 %v8410_v16, %v3345_v38  ;;  %v11426_v51 = vpop.trf.xlu1 }
 0x378   : > { %v3348_v62 = vadd.f32 %v8385_v50, %v11358_v20  ;;  %v4913_v12 = vpop.trf.xlu0 }
 0x379   : > { %4967 = vxpose.xlu0.c.b16.start.end [1/1] (short) %v14279_v5, 128  ;;  %9233 = vmatprep.mubr.msk.bf16.mxu0 %vm3765_vm2, %v4913_v12 }
 0x37a   : > { %v3397_v14 = vadd.f32 %v8413_v24, %v3348_v62  ;;  %v11433_v17 = vpop.trf.xlu1  ;;  %3749 = vxpose.xlu1.c.b16.start.end [1/1] (short) %v14280_v4, 128 }
 0x37c   : > { %v8458_v15 = vpop.f32.mrf.mxu1  ;;  %9076 = vmatmul.mubr.msk.bf16.gmra.mxu1 %vm3765_vm2, %v11351_v46  ;;  %v4914_v16 = vpop.trf.xlu0 }
 0x37d   : > { %9079 = vmatprep.mubr.msk.bf16.mxu1 %vm3765_vm2, %v11356_v44 }
 0x37e   : > { %9234 = vmatmul.mubr.msk.bf16.gmra.mxu0 %vm3765_vm2, %v4914_v16  ;;  %v8459_v42 = vpop.f32.mrf.mxu1  ;;  %v11443_v10 = vpop.trf.xlu1 }
 0x37f   : > { %v8460_v20 = vadd.f32 %v8459_v42, %v8458_v15 }
 0x380   : > { %v8461_v39 = vpop.f32.mrf.mxu1  ;;  %v4915_v7 = vpop.trf.xlu0 }
 0x381   : > { %v8430_v0 = vpop.f32.mrf.mxu0  ;;  %9237 = vmatprep.mubr.msk.bf16.mxu0 %vm3765_vm2, %v4915_v7 }
 0x382   : > { %v8462_v29 = vpop.f32.mrf.mxu1  ;;  %v11446_v28 = vpop.trf.xlu1 }
 0x383   : > { %v8431_v63 = vpop.f32.mrf.mxu0  ;;  %v8463_v46 = vadd.f32 %v8462_v29, %v8461_v39 }
 0x384   : > { %v8432_v2 = vadd.f32 %v8431_v63, %v8430_v0  ;;  %v8464_v24 = vpop.f32.mrf.mxu1  ;;  %9080 = vmatmul.mubr.msk.bf16.gmra.mxu1 %vm3765_vm2, %v11365_v11  ;;  %v4916_v44 = vpop.trf.xlu0 }
 0x385   : > { %v8433_v38 = vpop.f32.mrf.mxu0  ;;  %9083 = vmatprep.mubr.msk.bf16.mxu1 %vm3765_vm2, %v11368_v52 }
 0x386   : > { %v3435_v54 = vadd.f32 %v8432_v2, %v3386_v1  ;;  %9238 = vmatmul.mubr.msk.bf16.gmra.mxu0 %vm3765_vm2, %v4916_v44  ;;  %v8465_v56 = vpop.f32.mrf.mxu1  ;;  %v11453_v50 = vpop.trf.xlu1 }
 0x387   : > { %v8434_v62 = vpop.f32.mrf.mxu0  ;;  %v8466_v12 = vadd.f32 %v8465_v56, %v8464_v24 }
 0x388   : > { %v11455_v5 = vadd.f32 %v8460_v20, %v3435_v54  ;;  %v8435_v4 = vadd.f32 %v8434_v62, %v8433_v38  ;;  %v8467_v15 = vpop.f32.mrf.mxu1  ;;  %v4917_v16 = vpop.trf.xlu0 }
 0x389   : > { %v8436_v42 = vpop.f32.mrf.mxu0  ;;  %9241 = vmatprep.mubr.msk.bf16.mxu0 %vm3765_vm2, %v4917_v16 }
 0x38a   : > { %v3438_v11 = vadd.f32 %v8435_v4, %v11410_v18  ;;  %v8468_v39 = vpop.f32.mrf.mxu1  ;;  %v11459_v52 = vpop.trf.xlu1 }
 0x38b   : > { %v8437_v1 = vpop.f32.mrf.mxu0  ;;  %v8469_v7 = vadd.f32 %v8468_v39, %v8467_v15  ;;  %v14281_v39 = vld [vmem:[#allocation71_spill] sm:$0xff] }
 0x38c   : > { %v11461_v0 = vadd.f32 %v8463_v46, %v3438_v11  ;;  %v8438_v29 = vadd.f32 %v8437_v1, %v8436_v42  ;;  %v11463_v63 = vpop.f32.mrf.mxu1  ;;  %9084 = vmatmul.mubr.msk.bf16.gmra.mxu1 %vm3765_vm2, %v11375_v27  ;;  %v4918_v20 = vpop.trf.xlu0  ;;  %v14282_v1 = vld [vmem:[#allocation70_spill] sm:$0xff] }
 0x38d   : > { %v8439_v2 = vpop.f32.mrf.mxu0  ;;  %9087 = vmatprep.mubr.msk.bf16.mxu1 %vm3765_vm2, %v11378_v55 }
 0x38e   : > { %v3443_v18 = vadd.f32 %v8438_v29, %v3394_v47  ;;  %9242 = vmatmul.mubr.msk.bf16.gmra.mxu0 %vm3765_vm2, %v4918_v20  ;;  %v11470_v24 = vpop.f32.mrf.mxu1  ;;  %v11472_v44 = vpop.trf.xlu1  ;;  %v14283_v29 = vpack.c.bf16 %v14281_v39, %v14282_v1 }
 0x38f   : > { %v8440_v46 = vpop.f32.mrf.mxu0 }
 0x390   : > { %v11474_v38 = vadd.f32 %v8466_v12, %v3443_v18  ;;  %v8441_v54 = vadd.f32 %v8440_v46, %v8439_v2  ;;  %v11476_v56 = vpop.f32.mrf.mxu1  ;;  %v4927_v62 = vpop.trf.xlu0 }
 0x391   : > { %9245 = vmatprep.mubr.msk.bf16.mxu0 %vm3765_vm2, %v4927_v62 }
 0x392   : > { %v3446_v4 = vadd.f32 %v8441_v54, %v3397_v14  ;;  %v11481_v55 = vpop.f32.mrf.mxu1  ;;  %v11483_v47 = vpop.trf.xlu1 }
 0x394   : > { %v11487_v16 = vadd.f32 %v8469_v7, %v3446_v4  ;;  %v11489_v12 = vpop.f32.mrf.mxu1  ;;  %9088 = vmatmul.mubr.msk.bf16.gmra.mxu1 %vm3765_vm2, %v11391_v32  ;;  %v4928_v42 = vpop.trf.xlu0  ;;  %v14284_v7 = vpack.c.bf16 %v10861_v22, %v10864_v41 }
 0x395   : > { %9091 = vmatprep.mubr.msk.bf16.mxu1 %vm3765_vm2, %v11394_v43 }
 0x396   : > { %9246 = vmatmul.mubr.msk.bf16.gmra.mxu0 %vm3765_vm2, %v4928_v42  ;;  %v11496_v14 = vpop.f32.mrf.mxu1  ;;  %v11498_v11 = vpop.trf.xlu1  ;;  %4983 = vxpose.xlu0.c.b16.start.end [1/1] (short) %v14283_v29, 128 }
 0x397   : > { %4999 = vxpose.xlu1.c.b16.start.end [1/1] (short) %v14284_v7, 128 }
 0x398   : > { %v11506_v20 = vpop.f32.mrf.mxu1  ;;  %v4929_v32 = vpop.trf.xlu0 }
 0x399   : > { %9249 = vmatprep.mubr.msk.bf16.mxu0 %vm3765_vm2, %v4929_v32 }
 0x39a   : > { %v11511_v2 = vpop.f32.mrf.mxu1  ;;  %v11513_v18 = vpop.trf.xlu1 }
 0x39c   : > { %v11517_v54 = vpop.f32.mrf.mxu1  ;;  %9092 = vmatmul.mubr.msk.bf16.gmra.mxu1 %vm3765_vm2, %v11402_v45  ;;  %v4930_v22 = vpop.trf.xlu0 }
 0x39d   : > { %9095 = vmatprep.mubr.msk.bf16.mxu1 %vm3765_vm2, %v11406_v40 }
 0x39e   : > { %9250 = vmatmul.mubr.msk.bf16.gmra.mxu0 %vm3765_vm2, %v4930_v22  ;;  %v11524_v41 = vpop.f32.mrf.mxu1  ;;  %v11526_v62 = vpop.trf.xlu1 }
 0x3a0   : > { %v11528_v4 = vpop.f32.mrf.mxu1  ;;  %v4931_v42 = vpop.trf.xlu0 }
 0x3a1   : > { %v8486_v39 = vpop.f32.mrf.mxu0  ;;  %9253 = vmatprep.mubr.msk.bf16.mxu0 %vm3765_vm2, %v4931_v42 }
 0x3a2   : > { %v11531_v1 = vpop.f32.mrf.mxu1  ;;  %v11533_v29 = vpop.trf.xlu1 }
 0x3a3   : > { %v8487_v45 = vpop.f32.mrf.mxu0 }
 0x3a4   : > { %v8488_v7 = vadd.f32 %v8487_v45, %v8486_v39  ;;  %v11535_v32 = vpop.f32.mrf.mxu1  ;;  %9096 = vmatmul.mubr.msk.bf16.gmra.mxu1 %vm3765_vm2, %v11415_v23  ;;  %v4932_v40 = vpop.trf.xlu0 }
 0x3a5   : > { %v8489_v22 = vpop.f32.mrf.mxu0  ;;  %9099 = vmatprep.mubr.msk.bf16.mxu1 %vm3765_vm2, %v11418_v37 }
 0x3a6   : > { %v11542_v15 = vadd.f32 %v8488_v7, %v11455_v5  ;;  %9254 = vmatmul.mubr.msk.bf16.gmra.mxu0 %vm3765_vm2, %v4932_v40  ;;  %v11545_v42 = vpop.f32.mrf.mxu1  ;;  %v11547_v27 = vpop.trf.xlu1 }
 0x3a7   : > { %v8490_v39 = vpop.f32.mrf.mxu0 }
 0x3a8   : > { %14285 = vst [vmem:[#allocation65_spill] sm:$0xff] %v11542_v15  ;;  %v8491_v45 = vadd.f32 %v8490_v39, %v8489_v22  ;;  %v11549_v46 = vpop.f32.mrf.mxu1  ;;  %v4933_v43 = vpop.trf.xlu0 }
 0x3a9   : > { %v8492_v23 = vpop.f32.mrf.mxu0  ;;  %9257 = vmatprep.mubr.msk.bf16.mxu0 %vm3765_vm2, %v4933_v43  ;;  %v6143_v48 = vpack.c.bf16 %v11549_v46, %v11535_v32 }
 0x3aa   : > { %v11552_v49 = vadd.f32 %v8491_v45, %v11461_v0  ;;  %v11555_v37 = vpop.f32.mrf.mxu1  ;;  %v11557_v5 = vpop.trf.xlu1 }
 0x3ab   : > { %v8493_v7 = vpop.f32.mrf.mxu0  ;;  %v6335_v31 = vmul.bf16 %v9654_v34, %v6143_v48  ;;  %v6142_v46 = vpack.c.bf16 %v11555_v37, %v11545_v42  ;;  %v9656_v42 = vld [vmem:[%s14138_s5 + $0x30] sm:$0xff]  }
 0x3ac   : > { %14286 = vst [vmem:[#allocation72_spill] sm:$0xff] %v11552_v49  ;;  %v8494_v40 = vadd.f32 %v8493_v7, %v8492_v23  ;;  %v11559_v15 = vpop.f32.mrf.mxu1  ;;  %9100 = vmatmul.mubr.msk.bf16.gmra.mxu1 %vm3765_vm2, %v11426_v51  ;;  %v4934_v22 = vpop.trf.xlu0 }
 0x3ad   : > { %v8495_v39 = vpop.f32.mrf.mxu0  ;;  %9103 = vmatprep.mubr.msk.bf16.mxu1 %vm3765_vm2, %v11433_v17  ;;  %v6334_v37 = vmul.bf16 %v9656_v42, %v6142_v46 }
 0x3ae   : > { %v11566_v0 = vadd.f32 %v8494_v40, %v11474_v38  ;;  %9258 = vmatmul.mubr.msk.bf16.gmra.mxu0 %vm3765_vm2, %v4934_v22  ;;  %v11569_v43 = vpop.f32.mrf.mxu1  ;;  %v11571_v45 = vpop.trf.xlu1  ;;  %v14289_v40 = vpack.c.bf16 %v11053_v30, %v11051_v3 }
 0x3af   : > { %v8496_v23 = vpop.f32.mrf.mxu0 }
 0x3b0   : > { %14287 = vst [vmem:[#allocation67_spill] sm:$0xff] %v11566_v0  ;;  %v8497_v7 = vadd.f32 %v8496_v23, %v8495_v39  ;;  %v11573_v49 = vpop.f32.mrf.mxu1  ;;  %v4943_v59 = vpop.trf.xlu0  ;;  %v14290_v39 = vpack.c.bf16 %v11107_v6, %v11109_v35 }
 0x3b1   : > { %9261 = vmatprep.mubr.msk.bf16.mxu0 %vm3765_vm2, %v4943_v59 }
 0x3b2   : > { %v11576_v51 = vadd.f32 %v8497_v7, %v11487_v16  ;;  %v11579_v17 = vpop.f32.mrf.mxu1  ;;  %v11581_v38 = vpop.trf.xlu1 }
 0x3b3   : > { %5015 = vxpose.xlu0.c.b16.start.end [1/1] (short) %v14289_v40, 128 }
 0x3b4   : > { %14288 = vst [vmem:[#allocation55_spill] sm:$0xff] %v11576_v51  ;;  %v11586_v22 = vpop.f32.mrf.mxu1  ;;  %9104 = vmatmul.mubr.msk.bf16.gmra.mxu1 %vm3765_vm2, %v11443_v10  ;;  %5031 = vxpose.xlu1.c.b16.start.end [1/1] (short) %v14290_v39, 128  ;;  %v4944_v16 = vpop.trf.xlu0 }
 0x3b5   : > { %9107 = vmatprep.mubr.msk.bf16.mxu1 %vm3765_vm2, %v11446_v28 }
 0x3b6   : > { %9262 = vmatmul.mubr.msk.bf16.gmra.mxu0 %vm3765_vm2, %v4944_v16  ;;  %v11596_v59 = vpop.f32.mrf.mxu1  ;;  %v11598_v23 = vpop.trf.xlu1 }
 0x3b8   : > { %v11600_v3 = vpop.f32.mrf.mxu1  ;;  %v4945_v30 = vpop.trf.xlu0 }
 0x3b9   : > { %9265 = vmatprep.mubr.msk.bf16.mxu0 %vm3765_vm2, %v4945_v30  ;;  %v6147_v46 = vpack.c.bf16 %v11600_v3, %v11586_v22 }
 0x3ba   : > { %v11603_v10 = vpop.f32.mrf.mxu1  ;;  %v11605_v7 = vpop.trf.xlu1 }
 0x3bc   : > { %v9013_v6 = vpop.f32.mrf.mxu1  ;;  %9108 = vmatmul.mubr.msk.bf16.gmra.mxu1 %vm3765_vm2, %v11453_v50  ;;  %v4946_v35 = vpop.trf.xlu0 }
 0x3bd   : > { %9111 = vmatprep.mubr.msk.bf16.mxu1 %vm3765_vm2, %v11459_v52 }
 0x3be   : > { %9266 = vmatmul.mubr.msk.bf16.gmra.mxu0 %vm3765_vm2, %v4946_v35  ;;  %v11612_v28 = vpop.f32.mrf.mxu1  ;;  %v11614_v40 = vpop.trf.xlu1 }
 0x3c0   : > { %v9014_v39 = vpop.f32.mrf.mxu1  ;;  %v4947_v16 = vpop.trf.xlu0 }
 0x3c1   : > { %9269 = vmatprep.mubr.msk.bf16.mxu0 %vm3765_vm2, %v4947_v16 }
 0x3c2   : > { %v4187_v30 = vpop.f32.mrf.mxu1  ;;  %v11617_v51 = vpop.trf.xlu1 }
 0x3c4   : > { %v9017_v0 = vpop.f32.mrf.mxu1  ;;  %9112 = vmatmul.mubr.msk.bf16.gmra.mxu1 %vm3765_vm2, %v11472_v44  ;;  %v4948_v50 = vpop.trf.xlu0  ;;  %v9653_v44 = vld [vmem:[%s14138_s5 + $0x78] sm:$0xff]  }
 0x3c5   : > { %9115 = vmatprep.mubr.msk.bf16.mxu1 %vm3765_vm2, %v11483_v47 }
 0x3c6   : > { %9270 = vmatmul.mubr.msk.bf16.gmra.mxu0 %vm3765_vm2, %v4948_v50  ;;  %v4200_v52 = vpop.f32.mrf.mxu1  ;;  %v11624_v35 = vpop.trf.xlu1 }
 0x3c8   : > { %v9018_v16 = vpop.f32.mrf.mxu1  ;;  %v4949_v8 = vpop.trf.xlu0 }
 0x3c9   : > { %v6151_v21 = vpack.c.bf16 %v9018_v16, %v9017_v0  ;;  %9273 = vmatprep.mubr.msk.bf16.mxu0 %vm3765_vm2, %v4949_v8  ;;  %v6149_v8 = vpack.c.bf16 %v9014_v39, %v9013_v6 }
 0x3ca   : > { %v4203_v19 = vpop.f32.mrf.mxu1  ;;  %v11629_v9 = vpop.trf.xlu1 }
 0x3cb   : > { %v6343_v47 = vmul.bf16 %v9653_v44, %v6151_v21  ;;  %v6150_v50 = vpack.c.bf16 %v4203_v19, %v4200_v52  ;;  %v9655_v21 = vld [vmem:[%s14138_s5 + $0x70] sm:$0xff]  }
 0x3cc   : > { %v11639_v32 = vpop.f32.mrf.mxu1  ;;  %9116 = vmatmul.mubr.msk.bf16.gmra.mxu1 %vm3765_vm2, %v11498_v11  ;;  %v4950_v0 = vpop.trf.xlu0  ;;  %v6141_v11 = vpack.c.bf16 %v11528_v4, %v11517_v54 }
 0x3cd   : > { %v6342_v19 = vmul.bf16 %v9655_v21, %v6150_v50  ;;  %8692 = vmatprep.subr.bf16.mxu1 %v6343_v47  ;;  %9119 = vmatprep.mubr.msk.bf16.mxu1 %vm3765_vm2, %v11513_v18  ;;  %v9657_v18 = vld [vmem:[%s14138_s5 + $0x68] sm:$0xff]  }
 0x3ce   : > { %9274 = vmatmul.mubr.msk.bf16.gmra.mxu0 %vm3765_vm2, %v4950_v0  ;;  %v11649_v48 = vpop.f32.mrf.mxu1  ;;  %8693 = vmatpush3.bf16.msra.mxu1 %v6335_v31  ;;  %v11651_v34 = vpop.trf.xlu1  ;;  %v6341_v39 = vmul.bf16 %v9657_v18, %v6149_v8  ;;  %v6148_v31 = vpack.c.bf16 %v4187_v30, %v11612_v28  ;;  %v9658_v47 = vld [vmem:[%s14138_s5 + $0x28] sm:$0xff]   ;;  %v6140_v30 = vpack.c.bf16 %v11531_v1, %v11524_v41  ;;  %v9659_v8 = vld [vmem:[%s14138_s5 + $0x60] sm:$0xff]  }
 0x3cf   : > { %8694 = vmatprep.subr.bf16.mxu1 %v6342_v19  ;;  %v6333_v28 = vmul.bf16 %v9658_v47, %v6141_v11  ;;  %v9660_v1 = vld [vmem:[%s14138_s5 + $0x20] sm:$0xff]  }
 0x3d0   : > { %v11658_v6 = vpop.f32.mrf.mxu1  ;;  %v4959_v52 = vpop.trf.xlu0  ;;  %v6340_v0 = vmul.bf16 %v9659_v8, %v6148_v31  ;;  %v6332_v22 = vmul.bf16 %v9660_v1, %v6140_v30  ;;  %v9663_v1 = vld [vmem:[%s14138_s5 + $0x50] sm:$0xff]  }
 0x3d1   : > { %9277 = vmatprep.mubr.msk.bf16.mxu0 %vm3765_vm2, %v4959_v52 }
 0x3d2   : > { %v11667_v54 = vpop.f32.mrf.mxu1  ;;  %8695 = vmatpush3.bf16.msra.mxu1 %v6334_v37  ;;  %v11669_v4 = vpop.trf.xlu1  ;;  %v6146_v37 = vpack.c.bf16 %v11603_v10, %v11596_v59  ;;  %v9662_v59 = vld [vmem:[%s14138_s5 + $0x18] sm:$0xff]   ;;  %v14294_v10 = vpack.c.bf16 %v11506_v20, %v11489_v12 }
 0x3d3   : > { %8696 = vmatprep.subr.bf16.mxu1 %v6341_v39 }
 0x3d4   : > { %v11678_v50 = vpop.f32.mrf.mxu1  ;;  %9120 = vmatmul.mubr.msk.bf16.gmra.mxu1 %vm3765_vm2, %v11526_v62  ;;  %v4960_v21 = vpop.trf.xlu0 }
 0x3d5   : > { %9123 = vmatprep.mubr.msk.bf16.mxu1 %vm3765_vm2, %v11533_v29  ;;  %v11689_v19 = vpop.f32.mrf.mxu0  ;;  %v9661_v29 = vld [vmem:[%s14138_s5 + $0x58] sm:$0xff]  }
 0x3d6   : > { %14291 = vst [vmem:[#allocation47_spill] sm:$0xff] %v11689_v19  ;;  %9278 = vmatmul.mubr.msk.bf16.gmra.mxu0 %vm3765_vm2, %v4960_v21  ;;  %v11692_v41 = vpop.f32.mrf.mxu1  ;;  %8697 = vmatpush3.bf16.msra.mxu1 %v6333_v28  ;;  %v11694_v62 = vpop.trf.xlu1  ;;  %v6339_v42 = vmul.bf16 %v9661_v29, %v6147_v46  ;;  %v6331_v46 = vmul.bf16 %v9662_v59, %v14294_v10  ;;  %v9665_v59 = vld [vmem:[%s14138_s5 + $0x48] sm:$0xff]  }
 0x3d7   : > { %8698 = vmatprep.subr.bf16.mxu1 %v6340_v0  ;;  %v11699_v3 = vpop.f32.mrf.mxu0  ;;  %v6145_v21 = vpack.c.bf16 %v11573_v49, %v11559_v15  ;;  %v9664_v15 = vld [vmem:[%s14138_s5 + $0x10] sm:$0xff]  }
 0x3d8   : > { %14292 = vst [vmem:[#allocation45_spill] sm:$0xff] %v11699_v3  ;;  %v11701_v11 = vpop.f32.mrf.mxu1  ;;  %v4961_v18 = vpop.trf.xlu0 }
 0x3d9   : > { %v11710_v31 = vpop.f32.mrf.mxu0  ;;  %9281 = vmatprep.mubr.msk.bf16.mxu0 %vm3765_vm2, %v4961_v18  ;;  %v6337_v10 = vmul.bf16 %v9665_v59, %v6145_v21  ;;  %v9666_v21 = vld [vmem:[%s14138_s5 + $0x8] sm:$0xff]  }
 0x3da   : > { %14293 = vst [vmem:[#allocation59_spill] sm:$0xff] %v11710_v31  ;;  %v11713_v52 = vpop.f32.mrf.mxu1  ;;  %8699 = vmatpush3.bf16.msra.mxu1 %v6332_v22  ;;  %v11719_v30 = vpop.trf.xlu1  ;;  %v6338_v22 = vmul.bf16 %v9663_v1, %v6146_v37 }
 0x3db   : > { %8700 = vmatprep.subr.bf16.mxu1 %v6339_v42  ;;  %v11727_v8 = vpop.f32.mrf.mxu0  ;;  %v14297_v42 = vpack.c.bf16 %v11511_v2, %v11496_v14 }
 0x3dc   : > { %14295 = vst [vmem:[#allocation56_spill] sm:$0xff] %v11727_v8  ;;  %v11729_v0 = vpop.f32.mrf.mxu1  ;;  %9124 = vmatmul.mubr.msk.bf16.gmra.mxu1 %vm3765_vm2, %v11547_v27  ;;  %v4962_v12 = vpop.trf.xlu0 }
 0x3dd   : > { %9127 = vmatprep.mubr.msk.bf16.mxu1 %vm3765_vm2, %v11557_v5  ;;  %v11742_v20 = vpop.f32.mrf.mxu0  ;;  %v6330_v37 = vmul.bf16 %v9664_v15, %v14297_v42 }
 0x3de   : > { %14296 = vst [vmem:[#allocation37_spill] sm:$0xff] %v11742_v20  ;;  %9282 = vmatmul.mubr.msk.bf16.gmra.mxu0 %vm3765_vm2, %v4962_v12  ;;  %v11745_v27 = vpop.f32.mrf.mxu1  ;;  %8701 = vmatpush3.bf16.msra.mxu1 %v6331_v46  ;;  %v11747_v49 = vpop.trf.xlu1  ;;  %v6144_v46 = vpack.c.bf16 %v11579_v17, %v11569_v43  ;;  %v14300_v43 = vpack.c.bf16 %v11476_v56, %v11463_v63 }
 0x3df   : > { %8702 = vmatprep.subr.bf16.mxu1 %v6338_v22  ;;  %v11755_v18 = vpop.f32.mrf.mxu0 }
 0x3e0   : > { %14298 = vst [vmem:[#allocation43_spill] sm:$0xff] %v11755_v18  ;;  %v11757_v5 = vpop.f32.mrf.mxu1  ;;  %v4963_v1 = vpop.trf.xlu0  ;;  %v6329_v17 = vmul.bf16 %v9666_v21, %v14300_v43  ;;  %v14303_v21 = vpack.c.bf16 %v11481_v55, %v11470_v24 }
 0x3e1   : > { %v11764_v22 = vpop.f32.mrf.mxu0  ;;  %9285 = vmatprep.mubr.msk.bf16.mxu0 %vm3765_vm2, %v4963_v1 }
 0x3e2   : > { %14299 = vst [vmem:[#allocation48_spill] sm:$0xff] %v11764_v22  ;;  %v11767_v12 = vpop.f32.mrf.mxu1  ;;  %8703 = vmatpush3.bf16.msra.mxu1 %v6330_v37  ;;  %v11771_v2 = vpop.trf.xlu1  ;;  %v9667_v37 = vld [vmem:[%s14138_s5 + $0x40] sm:$0xff]  }
 0x3e3   : > { %8704 = vmatprep.subr.bf16.mxu1 %v6337_v10  ;;  %v11779_v15 = vpop.f32.mrf.mxu0  ;;  %v6336_v59 = vmul.bf16 %v9667_v37, %v6144_v46  ;;  %v9668_v46 = vld [vmem:[%s14138_s5] sm:$0xff]  }
 0x3e4   : > { %14301 = vst [vmem:[#allocation53_spill] sm:$0xff] %v11779_v15  ;;  %v11781_v42 = vpop.f32.mrf.mxu1  ;;  %9128 = vmatmul.mubr.msk.bf16.gmra.mxu1 %vm3765_vm2, %v11571_v45  ;;  %v4964_v1 = vpop.trf.xlu0  ;;  %v6328_v43 = vmul.bf16 %v9668_v46, %v14303_v21 }
 0x3e5   : > { %9131 = vmatprep.mubr.msk.bf16.mxu1 %vm3765_vm2, %v11581_v38  ;;  %v11792_v63 = vpop.f32.mrf.mxu0 }
 0x3e6   : > { %14302 = vst [vmem:[#allocation19_spill] sm:$0xff] %v11792_v63  ;;  %9286 = vmatmul.mubr.msk.bf16.gmra.mxu0 %vm3765_vm2, %v4964_v1  ;;  %v11795_v56 = vpop.f32.mrf.mxu1  ;;  %8705 = vmatpush3.bf16.msra.mxu1 %v6329_v17  ;;  %v11797_v45 = vpop.trf.xlu1 }
 0x3e7   : > { %8706 = vmatprep.subr.bf16.mxu1 %v6336_v59  ;;  %v11805_v37 = vpop.f32.mrf.mxu0 }
 0x3e8   : > { %14304 = vst [vmem:[#allocation20_spill] sm:$0xff] %v11805_v37  ;;  %v11807_v38 = vpop.f32.mrf.mxu1  ;;  %v4965_v29 = vpop.trf.xlu0 }
 0x3e9   : > { %v11809_v1 = vpop.f32.mrf.mxu0  ;;  %9289 = vmatprep.mubr.msk.bf16.mxu0 %vm3765_vm2, %v4965_v29 }
 0x3ea   : > { %14305 = vst [vmem:[#allocation58_spill] sm:$0xff] %v11809_v1  ;;  %v11812_v17 = vpop.f32.mrf.mxu1  ;;  %8707 = vmatpush3.bf16.msra.mxu1 %v6328_v43  ;;  %v11816_v47 = vpop.trf.xlu1 }
 0x3eb   : > { %v11818_v10 = vpop.f32.mrf.mxu0 }
 0x3ec   : > { %14306 = vst [vmem:[#allocation57_spill] sm:$0xff] %v11818_v10  ;;  %v11820_v24 = vpop.f32.mrf.mxu1  ;;  %9132 = vmatmul.mubr.msk.bf16.gmra.mxu1 %vm3765_vm2, %v11598_v23  ;;  %v4966_v46 = vpop.trf.xlu0 }
 0x3ed   : > { %9135 = vmatprep.mubr.msk.bf16.mxu1 %vm3765_vm2, %v11605_v7  ;;  %v11828_v29 = vpop.f32.mrf.mxu0 }
 0x3ee   : > { %14307 = vst [vmem:[#allocation64_spill] sm:$0xff] %v11828_v29  ;;  %9290 = vmatmul.mubr.msk.bf16.gmra.mxu0 %vm3765_vm2, %v4966_v46  ;;  %v11831_v21 = vpop.f32.mrf.mxu1  ;;  %v11833_v43 = vpop.trf.xlu1 }
 0x3ef   : > { %v11835_v14 = vpop.f32.mrf.mxu0 }
 0x3f0   : > { %14308 = vst [vmem:[#allocation63_spill] sm:$0xff] %v11835_v14  ;;  %v11837_v59 = vpop.f32.mrf.mxu1  ;;  %v4975_v23 = vpop.trf.xlu0 }
 0x3f1   : > { %v11839_v44 = vpop.f32.mrf.mxu0  ;;  %9293 = vmatprep.mubr.msk.bf16.mxu0 %vm3765_vm2, %v4975_v23 }
 0x3f2   : > { %14309 = vst [vmem:[#allocation61_spill] sm:$0xff] %v11839_v44  ;;  %v11842_v55 = vpop.f32.mrf.mxu1  ;;  %v11846_v16 = vpop.trf.xlu1 }
 0x3f3   : > { %v11848_v46 = vpop.f32.mrf.mxu0 }
 0x3f4   : > { %14310 = vst [vmem:[#allocation62_spill] sm:$0xff] %v11848_v46  ;;  %v11850_v28 = vpop.f32.mrf.mxu1  ;;  %9136 = vmatmul.mubr.msk.bf16.gmra.mxu1 %vm3765_vm2, %v11614_v40  ;;  %v4976_v3 = vpop.trf.xlu0 }
 0x3f5   : > { %9139 = vmatprep.mubr.msk.bf16.mxu1 %vm3765_vm2, %v11617_v51  ;;  %v11858_v23 = vpop.f32.mrf.mxu0 }
 0x3f6   : > { %14311 = vst [vmem:[#allocation69_spill] sm:$0xff] %v11858_v23  ;;  %9294 = vmatmul.mubr.msk.bf16.gmra.mxu0 %vm3765_vm2, %v4976_v3  ;;  %v11861_v7 = vpop.f32.mrf.mxu1  ;;  %v11863_v8 = vpop.trf.xlu1 }
 0x3f7   : > { %v11865_v19 = vpop.f32.mrf.mxu0 }
 0x3f8   : > { %14312 = vst [vmem:[#allocation68_spill] sm:$0xff] %v11865_v19  ;;  %v11867_v31 = vpop.f32.mrf.mxu1  ;;  %v4977_v40 = vpop.trf.xlu0 }
 0x3f9   : > { %v11869_v18 = vpop.f32.mrf.mxu0  ;;  %9297 = vmatprep.mubr.msk.bf16.mxu0 %vm3765_vm2, %v4977_v40 }
 0x3fa   : > { %14313 = vst [vmem:[#allocation74_spill] sm:$0xff] %v11869_v18  ;;  %v11872_v39 = vpop.f32.mrf.mxu1  ;;  %v11886_v40 = vpop.trf.xlu1 }
 0x3fb   : > { %v11876_v15 = vpop.f32.mrf.mxu0 }
 0x3fc   : > { %14314 = vst [vmem:[#allocation73_spill] sm:$0xff] %v11876_v15  ;;  %v11878_v3 = vpop.f32.mrf.mxu1  ;;  %9140 = vmatmul.mubr.msk.bf16.gmra.mxu1 %vm3765_vm2, %v11624_v35  ;;  %v4978_v22 = vpop.trf.xlu0 }
 0x3fd   : > { %9143 = vmatprep.mubr.msk.bf16.mxu1 %vm3765_vm2, %v11629_v9  ;;  %v11888_v37 = vpop.f32.mrf.mxu0 }
 0x3fe   : > { %14315 = vst [vmem:[#allocation71_spill] sm:$0xff] %v11888_v37  ;;  %9298 = vmatmul.mubr.msk.bf16.gmra.mxu0 %vm3765_vm2, %v4978_v22  ;;  %v11891_v51 = vpop.f32.mrf.mxu1  ;;  %v11902_v19 = vpop.trf.xlu1  ;;  %v6159_v37 = vpack.c.bf16 %v11807_v38, %v11781_v42 }
 0x3ff   : > { %v11893_v23 = vpop.f32.mrf.mxu0 }
 0x400   : > { %14316 = vst [vmem:[#allocation70_spill] sm:$0xff] %v11893_v23  ;;  %v9046_v18 = vpop.f32.mrf.mxu1  ;;  %v4979_v10 = vpop.trf.xlu0  ;;  %v9675_v23 = vld [vmem:[%s14138_s5 + $0xe0] sm:$0xff]  }
 0x401   : > { %v11895_v35 = vpop.f32.mrf.mxu0  ;;  %9301 = vmatprep.mubr.msk.bf16.mxu0 %vm3765_vm2, %v4979_v10 }
 0x402   : > { %14317 = vst [vmem:[#allocation75_spill] sm:$0xff] %v11895_v35  ;;  %v11898_v20 = vpop.f32.mrf.mxu1  ;;  %v11919_v29 = vpop.trf.xlu1 }
 0x403   : > { %v11904_v15 = vpop.f32.mrf.mxu0 }
 0x404   : > { %14318 = vst [vmem:[#allocation76_spill] sm:$0xff] %v11904_v15  ;;  %v9049_v22 = vpop.f32.mrf.mxu1  ;;  %9144 = vmatmul.mubr.msk.bf16.gmra.mxu1 %vm3765_vm2, %v11651_v34  ;;  %v4980_v1 = vpop.trf.xlu0 }
 0x405   : > { %9147 = vmatprep.mubr.msk.bf16.mxu1 %vm3765_vm2, %v11669_v4  ;;  %v11912_v10 = vpop.f32.mrf.mxu0 }
 0x406   : > { %9302 = vmatmul.mubr.msk.bf16.gmra.mxu0 %vm3765_vm2, %v4980_v1  ;;  %v4328_v9 = vpop.f32.mrf.mxu1  ;;  %v9669_v1 = vld [vmem:[%s14138_s5 + $0xf8] sm:$0xff]  }
 0x407   : > { %v11917_v35 = vpop.f32.mrf.mxu0 }
 0x408   : > { %v9050_v14 = vpop.f32.mrf.mxu1  ;;  %v4981_v46 = vpop.trf.xlu0 }
 0x409   : > { %v6167_v34 = vpack.c.bf16 %v9050_v14, %v9049_v22  ;;  %v11921_v63 = vpop.f32.mrf.mxu0  ;;  %9305 = vmatprep.mubr.msk.bf16.mxu0 %vm3765_vm2, %v4981_v46  ;;  %v9670_v14 = vld [vmem:[%s14138_s5 + $0xb8] sm:$0xff]   ;;  %v6158_v46 = vpack.c.bf16 %v11812_v17, %v11795_v56  ;;  %v11953_v56 = vpop.trf.xlu1 }
 0x40a   : > { %v4331_v4 = vpop.f32.mrf.mxu1  ;;  %v6351_v22 = vmul.bf16 %v9670_v14, %v6159_v37  ;;  %v6165_v37 = vpack.c.bf16 %v9046_v18, %v11878_v3 }
 0x40b   : > { %v6359_v42 = vmul.bf16 %v9669_v1, %v6167_v34  ;;  %v6166_v38 = vpack.c.bf16 %v4331_v4, %v4328_v9  ;;  %v11932_v15 = vpop.f32.mrf.mxu0  ;;  %v9671_v9 = vld [vmem:[%s14138_s5 + $0xf0] sm:$0xff]  }
 0x40c   : > { %v11934_v44 = vpop.f32.mrf.mxu1  ;;  %9148 = vmatmul.mubr.msk.bf16.gmra.mxu1 %vm3765_vm2, %v11694_v62  ;;  %v4982_v34 = vpop.trf.xlu0 }
 0x40d   : > { %v6358_v4 = vmul.bf16 %v9671_v9, %v6166_v38  ;;  %8714 = vmatprep.subr.bf16.mxu0 %v6359_v42  ;;  %9151 = vmatprep.mubr.msk.bf16.mxu1 %vm3765_vm2, %v11719_v30  ;;  %v11948_v1 = vpop.f32.mrf.mxu0  ;;  %v6157_v42 = vpack.c.bf16 %v11757_v5, %v11729_v0  ;;  %v9672_v30 = vld [vmem:[%s14138_s5 + $0xb0] sm:$0xff]   ;;  %v6164_v9 = vpack.c.bf16 %v11898_v20, %v11891_v51  ;;  %v9674_v20 = vld [vmem:[%s14138_s5 + $0xa8] sm:$0xff]  }
 0x40e   : > { %9306 = vmatmul.mubr.msk.bf16.gmra.mxu0 %vm3765_vm2, %v4982_v34  ;;  %v11951_v62 = vpop.f32.mrf.mxu1  ;;  %v6350_v18 = vmul.bf16 %v9672_v30, %v6158_v46 }
 0x40f   : > { %8715 = vmatpush3.bf16.msra.mxu0 %v6351_v22  ;;  %v11955_v17 = vpop.f32.mrf.mxu0  ;;  %v9673_v22 = vld [vmem:[%s14138_s5 + $0xe8] sm:$0xff]   ;;  %v6349_v51 = vmul.bf16 %v9674_v20, %v6157_v42  ;;  %v6356_v42 = vmul.bf16 %v9675_v23, %v6164_v9  ;;  %v9677_v9 = vld [vmem:[%s14138_s5 + $0xd8] sm:$0xff]  }
 0x410   : > { %8716 = vmatprep.subr.bf16.mxu0 %v6358_v4  ;;  %v11957_v14 = vpop.f32.mrf.mxu1  ;;  %v4991_v3 = vpop.trf.xlu0  ;;  %v6357_v34 = vmul.bf16 %v9673_v22, %v6165_v37 }
 0x411   : > { %v11971_v4 = vpop.f32.mrf.mxu0  ;;  %9309 = vmatprep.mubr.msk.bf16.mxu0 %vm3765_vm2, %v4991_v3  ;;  %v6156_v3 = vpack.c.bf16 %v11767_v12, %v11745_v27 }
 0x412   : > { %v11974_v0 = vpop.f32.mrf.mxu1 }
 0x413   : > { %8717 = vmatpush3.bf16.msra.mxu0 %v6350_v18  ;;  %v11980_v30 = vpop.f32.mrf.mxu0 }
 0x414   : > { %8718 = vmatprep.subr.bf16.mxu0 %v6357_v34  ;;  %v11982_v37 = vpop.f32.mrf.mxu1  ;;  %9152 = vmatmul.mubr.msk.bf16.gmra.mxu1 %vm3765_vm2, %v11747_v49  ;;  %v4992_v18 = vpop.trf.xlu0  ;;  %v6163_v49 = vpack.c.bf16 %v11867_v31, %v11850_v28  ;;  %v9676_v31 = vld [vmem:[%s14138_s5 + $0xa0] sm:$0xff]  }
 0x415   : > { %9155 = vmatprep.mubr.msk.bf16.mxu1 %vm3765_vm2, %v11771_v2  ;;  %v11995_v34 = vpop.trf.xlu1  ;;  %v12002_v20 = vpop.f32.mrf.mxu0  ;;  %v6348_v28 = vmul.bf16 %v9676_v31, %v6156_v3 }
 0x416   : > { %14319 = vst [vmem:[#allocation77_spill] sm:$0xff] %v12002_v20  ;;  %9310 = vmatmul.mubr.msk.bf16.gmra.mxu0 %vm3765_vm2, %v4992_v18  ;;  %v12005_v27 = vpop.f32.mrf.mxu1  ;;  %v6355_v18 = vmul.bf16 %v9677_v9, %v6163_v49 }
 0x417   : > { %8719 = vmatpush3.bf16.msra.mxu0 %v6349_v51  ;;  %v12007_v12 = vpop.f32.mrf.mxu0  ;;  %v6162_v51 = vpack.c.bf16 %v11872_v39, %v11861_v7  ;;  %v9678_v39 = vld [vmem:[%s14138_s5 + $0x98] sm:$0xff]   ;;  %v14323_v7 = vpack.c.bf16 %v11701_v11, %v11678_v50 }
 0x418   : > { %14320 = vst [vmem:[#allocation78_spill] sm:$0xff] %v12007_v12  ;;  %8720 = vmatprep.subr.bf16.mxu0 %v6356_v42  ;;  %v12009_v2 = vpop.f32.mrf.mxu1  ;;  %v4993_v22 = vpop.trf.xlu0 }
 0x419   : > { %v12021_v42 = vpop.f32.mrf.mxu0  ;;  %9313 = vmatprep.mubr.msk.bf16.mxu0 %vm3765_vm2, %v4993_v22  ;;  %v12030_v46 = vpop.trf.xlu1  ;;  %v6347_v22 = vmul.bf16 %v9678_v39, %v14323_v7 }
 0x41a   : > { %14321 = vst [vmem:[#allocation79_spill] sm:$0xff] %v12021_v42  ;;  %v12024_v5 = vpop.f32.mrf.mxu1 }
 0x41b   : > { %8721 = vmatpush3.bf16.msra.mxu0 %v6348_v28  ;;  %v12032_v38 = vpop.f32.mrf.mxu0 }
 0x41c   : > { %14322 = vst [vmem:[#allocation80_spill] sm:$0xff] %v12032_v38  ;;  %8722 = vmatprep.subr.bf16.mxu0 %v6355_v18  ;;  %v12034_v49 = vpop.f32.mrf.mxu1  ;;  %9156 = vmatmul.mubr.msk.bf16.gmra.mxu1 %vm3765_vm2, %v11797_v45  ;;  %v4994_v9 = vpop.trf.xlu0  ;;  %v6161_v18 = vpack.c.bf16 %v11837_v59, %v11820_v24  ;;  %v9679_v45 = vld [vmem:[%s14138_s5 + $0xd0] sm:$0xff]   ;;  %v14326_v59 = vpack.c.bf16 %v11713_v52, %v11692_v41 }
 0x41d   : > { %9159 = vmatprep.mubr.msk.bf16.mxu1 %vm3765_vm2, %v11816_v47  ;;  %v6354_v3 = vmul.bf16 %v9679_v45, %v6162_v51  ;;  %v9680_v47 = vld [vmem:[%s14138_s5 + $0x90] sm:$0xff]   ;;  %v5007_v7 = vpop.trf.xlu1 }
 0x41e   : > { %v12053_v31 = vpop.f32.mrf.mxu0  ;;  %9314 = vmatmul.mubr.msk.bf16.gmra.mxu0 %vm3765_vm2, %v4994_v9  ;;  %v12056_v50 = vpop.f32.mrf.mxu1  ;;  %v6346_v24 = vmul.bf16 %v9680_v47, %v14326_v59  ;;  %v9681_v9 = vld [vmem:[%s14138_s5 + $0xc8] sm:$0xff]  }
 0x41f   : > { %14324 = vst [vmem:[#allocation81_spill] sm:$0xff] %v12053_v31  ;;  %8723 = vmatpush3.bf16.msra.mxu0 %v6347_v22  ;;  %v6353_v22 = vmul.bf16 %v9681_v9, %v6161_v18 }
 0x420   : > { %v12058_v11 = vpop.f32.mrf.mxu0  ;;  %8724 = vmatprep.subr.bf16.mxu0 %v6354_v3  ;;  %v12060_v39 = vpop.f32.mrf.mxu1  ;;  %v6160_v3 = vpack.c.bf16 %v11842_v55, %v11831_v21  ;;  %v9682_v55 = vld [vmem:[%s14138_s5 + $0x88] sm:$0xff]   ;;  %v14329_v21 = vpack.c.bf16 %v11658_v6, %v11639_v32 }
 0x421   : > { %14325 = vst [vmem:[#allocation82_spill] sm:$0xff] %v12058_v11  ;;  %v4995_v51 = vpop.trf.xlu0  ;;  %v5008_v32 = vpop.trf.xlu1 }
 0x422   : > { %v12073_v45 = vpop.f32.mrf.mxu0  ;;  %9317 = vmatprep.mubr.msk.bf16.mxu0 %vm3765_vm2, %v4995_v51  ;;  %v12076_v28 = vpop.f32.mrf.mxu1  ;;  %v6345_v18 = vmul.bf16 %v9682_v55, %v14329_v21  ;;  %v9683_v51 = vld [vmem:[%s14138_s5 + $0xc0] sm:$0xff]  }
 0x423   : > { %14327 = vst [vmem:[#allocation83_spill] sm:$0xff] %v12073_v45  ;;  %8725 = vmatpush3.bf16.msra.mxu0 %v6346_v24 }
 0x424   : > { %v12080_v52 = vpop.f32.mrf.mxu0  ;;  %8726 = vmatprep.subr.bf16.mxu0 %v6353_v22  ;;  %v12082_v47 = vpop.f32.mrf.mxu1  ;;  %9160 = vmatmul.mubr.msk.bf16.gmra.mxu1 %vm3765_vm2, %v11833_v43  ;;  %v6352_v43 = vmul.bf16 %v9683_v51, %v6160_v3  ;;  %v14332_v3 = vpack.c.bf16 %v11667_v54, %v11649_v48 }
 0x425   : > { %14328 = vst [vmem:[#allocation84_spill] sm:$0xff] %v12080_v52  ;;  %v4996_v24 = vpop.trf.xlu0  ;;  %9163 = vmatprep.mubr.msk.bf16.mxu1 %vm3765_vm2, %v11846_v16  ;;  %v9684_v16 = vld [vmem:[%s14138_s5 + $0x80] sm:$0xff]  }
 0x426   : > { %v12099_v9 = vpop.f32.mrf.mxu0  ;;  %9318 = vmatmul.mubr.msk.bf16.gmra.mxu0 %vm3765_vm2, %v4996_v24  ;;  %v12102_v22 = vpop.f32.mrf.mxu1  ;;  %v6344_v21 = vmul.bf16 %v9684_v16, %v14332_v3 }
 0x427   : > { %14330 = vst [vmem:[#allocation85_spill] sm:$0xff] %v12099_v9  ;;  %8727 = vmatpush3.bf16.msra.mxu0 %v6345_v18  ;;  %v5009_v16 = vpop.trf.xlu1  ;;  %v14348_v9 = vld [vmem:[#allocation16_spill] sm:$0xff] }
 0x428   : > { %v12104_v6 = vpop.f32.mrf.mxu0  ;;  %8728 = vmatprep.subr.bf16.mxu0 %v6352_v43  ;;  %v12106_v55 = vpop.f32.mrf.mxu1 }
 0x429   : > { %14331 = vst [vmem:[#allocation86_spill] sm:$0xff] %v12104_v6  ;;  %v4997_v51 = vpop.trf.xlu0 }
 0x42a   : > { %v12114_v59 = vpop.f32.mrf.mxu0  ;;  %9321 = vmatprep.mubr.msk.bf16.mxu0 %vm3765_vm2, %v4997_v51  ;;  %v12117_v18 = vpop.f32.mrf.mxu1 }
 0x42b   : > { %14333 = vst [vmem:[#allocation87_spill] sm:$0xff] %v12114_v59  ;;  %8729 = vmatpush3.bf16.msra.mxu0 %v6344_v21 }
 0x42c   : > { %v12121_v43 = vpop.f32.mrf.mxu0  ;;  %v12123_v41 = vpop.f32.mrf.mxu1  ;;  %9164 = vmatmul.mubr.msk.bf16.gmra.mxu1 %vm3765_vm2, %v11863_v8 }
 0x42d   : > { %14334 = vst [vmem:[#allocation88_spill] sm:$0xff] %v12121_v43  ;;  %v4998_v54 = vpop.trf.xlu0  ;;  %9167 = vmatprep.mubr.msk.bf16.mxu1 %vm3765_vm2, %v11886_v40  ;;  %v5010_v40 = vpop.trf.xlu1 }
 0x42e   : > { %v12131_v3 = vpop.f32.mrf.mxu0  ;;  %9322 = vmatmul.mubr.msk.bf16.gmra.mxu0 %vm3765_vm2, %v4998_v54  ;;  %v12134_v21 = vpop.f32.mrf.mxu1 }
 0x42f   : > { %14335 = vst [vmem:[#allocation89_spill] sm:$0xff] %v12131_v3  ;;  %9325 = vmatprep.mubr.msk.bf16.mxu0 %vm3765_vm2, %v5007_v7 }
 0x430   : > { %v12137_v51 = vpop.f32.mrf.mxu0  ;;  %v12139_v24 = vpop.f32.mrf.mxu1 }
 0x431   : > { %14336 = vst [vmem:[#allocation90_spill] sm:$0xff] %v12137_v51  ;;  %v5011_v11 = vpop.trf.xlu1  ;;  %v5023_v6 = vpop.trf.xlu0 }
 0x432   : > { %v12141_v8 = vpop.f32.mrf.mxu0  ;;  %v12143_v48 = vpop.f32.mrf.mxu1 }
 0x433   : > { %14337 = vst [vmem:[#allocation91_spill] sm:$0xff] %v12141_v8  ;;  %v14357_v8 = vld [vmem:[#allocation13_spill] sm:$0xff] }
 0x434   : > { %v12147_v12 = vpop.f32.mrf.mxu0  ;;  %v12149_v38 = vpop.f32.mrf.mxu1  ;;  %9168 = vmatmul.mubr.msk.bf16.gmra.mxu1 %vm3765_vm2, %v11902_v19 }
 0x435   : > { %14338 = vst [vmem:[#allocation92_spill] sm:$0xff] %v12147_v12  ;;  %9171 = vmatprep.mubr.msk.bf16.mxu1 %vm3765_vm2, %v11919_v29  ;;  %v5012_v29 = vpop.trf.xlu1 }
 0x436   : > { %v12157_v54 = vpop.f32.mrf.mxu0  ;;  %9326 = vmatmul.mubr.msk.bf16.gmra.mxu0 %vm3765_vm2, %v5008_v32  ;;  %v12160_v20 = vpop.f32.mrf.mxu1 }
 0x437   : > { %14339 = vst [vmem:[#allocation93_spill] sm:$0xff] %v12157_v54  ;;  %9329 = vmatprep.mubr.msk.bf16.mxu0 %vm3765_vm2, %v5009_v16 }
 0x438   : > { %v12163_v23 = vpop.f32.mrf.mxu0  ;;  %v12165_v42 = vpop.f32.mrf.mxu1 }
 0x439   : > { %14340 = vst [vmem:[#allocation94_spill] sm:$0xff] %v12163_v23 }
 0x43a   : > { %v12167_v19 = vpop.f32.mrf.mxu0  ;;  %v12169_v52 = vpop.f32.mrf.mxu1 }
 0x43b   : > { %14341 = vst [vmem:[#allocation95_spill] sm:$0xff] %v12167_v19 }
 0x43c   : > { %v12173_v7 = vpop.f32.mrf.mxu0  ;;  %v12175_v31 = vpop.f32.mrf.mxu1  ;;  %9172 = vmatmul.mubr.msk.bf16.gmra.mxu1 %vm3765_vm2, %v11953_v56 }
 0x43d   : > { %14342 = vst [vmem:[#allocation96_spill] sm:$0xff] %v12173_v7  ;;  %9175 = vmatprep.mubr.msk.bf16.mxu1 %vm3765_vm2, %v11995_v34  ;;  %v14347_v7 = vld [vmem:[#allocation15_spill] sm:$0xff]  ;;  %v5024_v34 = vpop.trf.xlu0 }
 0x43e   : > { %v12183_v16 = vpop.f32.mrf.mxu0  ;;  %9330 = vmatmul.mubr.msk.bf16.gmra.mxu0 %vm3765_vm2, %v5010_v40  ;;  %v12186_v45 = vpop.f32.mrf.mxu1  ;;  %v14349_v59 = vpack.c.bf16 %v14347_v7, %v14348_v9  ;;  %v12221_v7 = vld [vmem:[%s14138_s5 + $0x178] sm:$0xff]  }
 0x43f   : > { %14343 = vst [vmem:[#allocation97_spill] sm:$0xff] %v12183_v16  ;;  %9333 = vmatprep.mubr.msk.bf16.mxu0 %vm3765_vm2, %v5011_v11  ;;  %v5013_v40 = vpop.trf.xlu1  ;;  %v6175_v16 = vpack.c.bf16 %v12106_v55, %v12082_v47  ;;  %v14353_v47 = vld [vmem:[#allocation22_spill] sm:$0xff]  ;;  %v14354_v55 = vld [vmem:[#allocation23_spill] sm:$0xff] }
 0x440   : > { %v12189_v54 = vpop.f32.mrf.mxu0  ;;  %v9078_v19 = vpop.f32.mrf.mxu1  ;;  %v6525_v3 = vpack.c.bf16 %v14354_v55, %v14353_v47 }
 0x441   : > { %14344 = vst [vmem:[#allocation98_spill] sm:$0xff] %v12189_v54 }
 0x442   : > { %v12191_v56 = vpop.f32.mrf.mxu0  ;;  %v12193_v43 = vpop.f32.mrf.mxu1 }
 0x443   : > { %14345 = vst [vmem:[#allocation99_spill] sm:$0xff] %v12191_v56  ;;  %v5014_v9 = vpop.trf.xlu1 }
 0x444   : > { %v12197_v32 = vpop.f32.mrf.mxu0  ;;  %v9081_v23 = vpop.f32.mrf.mxu1  ;;  %9176 = vmatmul.mubr.msk.bf16.gmra.mxu1 %vm3765_vm2, %v12030_v46 }
 0x445   : > { %14346 = vst [vmem:[#allocation100_spill] sm:$0xff] %v12197_v32  ;;  %6576 = vmatprep.mubr.bf16.mxu1 %v14349_v59  ;;  %v6174_v59 = vpack.c.bf16 %v12117_v18, %v12102_v22  ;;  %v5025_v18 = vpop.trf.xlu0 }
 0x446   : > { %v12206_v51 = vpop.f32.mrf.mxu0  ;;  %9334 = vmatmul.mubr.msk.bf16.gmra.mxu0 %vm3765_vm2, %v5012_v29  ;;  %v4456_v12 = vpop.f32.mrf.mxu1 }
 0x447   : > { %14350 = vst [vmem:[#allocation15_spill] sm:$0xff] %v12206_v51  ;;  %9337 = vmatprep.mubr.msk.bf16.mxu0 %vm3765_vm2, %v5013_v40 }
 0x448   : > { %v12212_v46 = vpop.f32.mrf.mxu0  ;;  %v9082_v56 = vpop.f32.mrf.mxu1 }
 0x449   : > { %14351 = vst [vmem:[#allocation16_spill] sm:$0xff] %v12212_v46  ;;  %v6183_v11 = vpack.c.bf16 %v9082_v56, %v9081_v23  ;;  %v12229_v23 = vld [vmem:[%s14138_s5 + $0x138] sm:$0xff]  }
 0x44a   : > { %v12214_v54 = vpop.f32.mrf.mxu0  ;;  %v4459_v32 = vpop.f32.mrf.mxu1  ;;  %14355 = vst [vmem:[#allocation22_spill] sm:$0xff] %v12229_v23  ;;  %v6367_v56 = vmul.bf16 %v12229_v23, %v6175_v16  ;;  %v12247_v16 = vld [vmem:[%s14138_s5 + $0x170] sm:$0xff]  }
 0x44b   : > { %14352 = vst [vmem:[#allocation101_spill] sm:$0xff] %v12214_v54  ;;  %v6375_v29 = vmul.bf16 %v12221_v7, %v6183_v11  ;;  %v6182_v40 = vpack.c.bf16 %v4459_v32, %v4456_v12  ;;  %v14358_v11 = vld [vmem:[#allocation11_spill] sm:$0xff]  ;;  %v6181_v32 = vpack.c.bf16 %v9078_v19, %v12175_v31  ;;  %14360 = vst [vmem:[#allocation13_spill] sm:$0xff] %v12247_v16 }
 0x44c   : > { %v12234_v51 = vpop.f32.mrf.mxu0  ;;  %v12236_v54 = vpop.f32.mrf.mxu1  ;;  %v14359_v12 = vpack.c.bf16 %v14357_v8, %v14358_v11  ;;  %v6173_v31 = vpack.c.bf16 %v12060_v39, %v12034_v49  ;;  %v12261_v19 = vld [vmem:[%s14138_s5 + $0x130] sm:$0xff]   ;;  %v6180_v49 = vpack.c.bf16 %v12193_v43, %v12186_v45  ;;  %v6172_v43 = vpack.c.bf16 %v12076_v28, %v12056_v50 }
 0x44d   : > { %14356 = vst [vmem:[#allocation23_spill] sm:$0xff] %v12234_v51  ;;  %v6374_v22 = vmul.bf16 %v12247_v16, %v6182_v40  ;;  %8736 = vmatprep.subr.bf16.mxu1 %v6375_v29  ;;  %14362 = vst [vmem:[#allocation102_spill] sm:$0xff] %v12261_v19 }
 0x44e   : > { %6577 = vmatmul.mubr.bf16.vlgmr.msra.gmra.mxu1 %v14359_v12  ;;  %v12250_v55 = vpop.f32.mrf.mxu0  ;;  %9338 = vmatmul.mubr.msk.bf16.gmra.mxu0 %vm3765_vm2, %v5014_v9  ;;  %v12253_v8 = vpop.f32.mrf.mxu1  ;;  %v12271_v9 = vld [vmem:[%s14138_s5 + $0x168] sm:$0xff]  }
 0x44f   : > { %6658 = vmatprep.mubr.bf16.mxu1 %v6525_v3  ;;  %14361 = vst [vmem:[#allocation11_spill] sm:$0xff] %v12250_v55  ;;  %8737 = vmatpush3.bf16.msra.mxu1 %v6367_v56  ;;  %v6366_v3 = vmul.bf16 %v12261_v19, %v6174_v59  ;;  %14364 = vst [vmem:[#allocation104_spill] sm:$0xff] %v12271_v9  ;;  %v5026_v12 = vpop.trf.xlu0  ;;  %v5039_v55 = vpop.trf.xlu1 }
 0x450   : > { %9341 = vmatprep.mubr.msk.bf16.mxu0 %vm3765_vm2, %v5023_v6  ;;  %8738 = vmatprep.subr.bf16.mxu1 %v6374_v22  ;;  %v12264_v29 = vpop.f32.mrf.mxu0  ;;  %v12266_v40 = vpop.f32.mrf.mxu1  ;;  %v6373_v6 = vmul.bf16 %v12271_v9, %v6181_v32  ;;  %v12287_v32 = vld [vmem:[%s14138_s5 + $0x128] sm:$0xff]  }
 0x451   : > { %14363 = vst [vmem:[#allocation103_spill] sm:$0xff] %v12264_v29  ;;  %14366 = vst [vmem:[#allocation106_spill] sm:$0xff] %v12287_v32  ;;  %v6365_v45 = vmul.bf16 %v12287_v32, %v6173_v31 }
 0x452   : > { %v12278_v56 = vpop.f32.mrf.mxu0  ;;  %v12280_v59 = vpop.f32.mrf.mxu1 }
 0x453   : > { %14365 = vst [vmem:[#allocation105_spill] sm:$0xff] %v12278_v56  ;;  %8739 = vmatpush3.bf16.msra.mxu1 %v6366_v3  ;;  %v6179_v3 = vpack.c.bf16 %v12165_v42, %v12149_v38  ;;  %v12315_v38 = vld [vmem:[%s14138_s5 + $0x120] sm:$0xff]  }
 0x454   : > { %8740 = vmatprep.subr.bf16.mxu1 %v6373_v6  ;;  %v12292_v22 = vpop.f32.mrf.mxu0  ;;  %v12294_v47 = vpop.f32.mrf.mxu1  ;;  %v12301_v6 = vld [vmem:[%s14138_s5 + $0x160] sm:$0xff]   ;;  %14370 = vst [vmem:[#allocation110_spill] sm:$0xff] %v12315_v38  ;;  %v6364_v42 = vmul.bf16 %v12315_v38, %v6172_v43 }
 0x455   : > { %14367 = vst [vmem:[#allocation107_spill] sm:$0xff] %v12292_v22  ;;  %14368 = vst [vmem:[#allocation108_spill] sm:$0xff] %v12301_v6  ;;  %v6372_v11 = vmul.bf16 %v12301_v6, %v6180_v49 }
 0x456   : > { %v12306_v39 = vpop.f32.mrf.mxu0  ;;  %9342 = vmatmul.mubr.msk.bf16.gmra.mxu0 %vm3765_vm2, %v5024_v34  ;;  %v12309_v28 = vpop.f32.mrf.mxu1  ;;  %v12325_v34 = vld [vmem:[%s14138_s5 + $0x158] sm:$0xff]  }
 0x457   : > { %14369 = vst [vmem:[#allocation109_spill] sm:$0xff] %v12306_v39  ;;  %8741 = vmatpush3.bf16.msra.mxu1 %v6365_v45  ;;  %9345 = vmatprep.mubr.msk.bf16.mxu0 %vm3765_vm2, %v5025_v18  ;;  %14372 = vst [vmem:[#allocation112_spill] sm:$0xff] %v12325_v34  ;;  %v6371_v45 = vmul.bf16 %v12325_v34, %v6179_v3  ;;  %v6178_v18 = vpack.c.bf16 %v12169_v52, %v12160_v20  ;;  %v12341_v3 = vld [vmem:[%s14138_s5 + $0x118] sm:$0xff]  }
 0x458   : > { %8742 = vmatprep.subr.bf16.mxu1 %v6372_v11  ;;  %v12318_v50 = vpop.f32.mrf.mxu0  ;;  %v12320_v49 = vpop.f32.mrf.mxu1  ;;  %14374 = vst [vmem:[#allocation114_spill] sm:$0xff] %v12341_v3  ;;  %v14375_v20 = vpack.c.bf16 %v12009_v2, %v11982_v37 }
 0x459   : > { %14371 = vst [vmem:[#allocation111_spill] sm:$0xff] %v12318_v50  ;;  %v5027_v11 = vpop.trf.xlu0 }
 0x45a   : > { %v12332_v46 = vpop.f32.mrf.mxu0  ;;  %v12334_v43 = vpop.f32.mrf.mxu1  ;;  %v6363_v52 = vmul.bf16 %v12341_v3, %v14375_v20 }
 0x45b   : > { %14373 = vst [vmem:[#allocation113_spill] sm:$0xff] %v12332_v46  ;;  %8743 = vmatpush3.bf16.msra.mxu1 %v6364_v42  ;;  %v6177_v42 = vpack.c.bf16 %v12139_v24, %v12123_v41  ;;  %v12370_v41 = vld [vmem:[%s14138_s5 + $0x110] sm:$0xff]   ;;  %v14380_v24 = vpack.c.bf16 %v12024_v5, %v12005_v27 }
 0x45c   : > { %8744 = vmatprep.subr.bf16.mxu1 %v6371_v45  ;;  %v12347_v31 = vpop.f32.mrf.mxu0  ;;  %v12349_v29 = vpop.f32.mrf.mxu1  ;;  %v12356_v45 = vld [vmem:[%s14138_s5 + $0x150] sm:$0xff]   ;;  %14379 = vst [vmem:[#allocation118_spill] sm:$0xff] %v12370_v41 }
 0x45d   : > { %14376 = vst [vmem:[#allocation115_spill] sm:$0xff] %v12347_v31  ;;  %14377 = vst [vmem:[#allocation116_spill] sm:$0xff] %v12356_v45  ;;  %v6370_v51 = vmul.bf16 %v12356_v45, %v6178_v18  ;;  %v5028_v20 = vpop.trf.xlu0  ;;  %v6362_v18 = vmul.bf16 %v12370_v41, %v14380_v24  ;;  %v12397_v24 = vld [vmem:[%s14138_s5 + $0x108] sm:$0xff]  }
 0x45e   : > { %v12361_v37 = vpop.f32.mrf.mxu0  ;;  %9346 = vmatmul.mubr.msk.bf16.gmra.mxu0 %vm3765_vm2, %v5026_v12  ;;  %v12364_v2 = vpop.f32.mrf.mxu1  ;;  %14384 = vst [vmem:[#allocation122_spill] sm:$0xff] %v12397_v24 }
 0x45f   : > { %14378 = vst [vmem:[#allocation117_spill] sm:$0xff] %v12361_v37  ;;  %8745 = vmatpush3.bf16.msra.mxu1 %v6363_v52  ;;  %9349 = vmatprep.mubr.msk.bf16.mxu0 %vm3765_vm2, %v5027_v11  ;;  %v12383_v52 = vld [vmem:[%s14138_s5 + $0x148] sm:$0xff]   ;;  %v6176_v11 = vpack.c.bf16 %v12143_v48, %v12134_v21 }
 0x460   : > { %8746 = vmatprep.subr.bf16.mxu1 %v6370_v51  ;;  %v12376_v22 = vpop.f32.mrf.mxu0  ;;  %v12378_v12 = vpop.f32.mrf.mxu1  ;;  %14382 = vst [vmem:[#allocation120_spill] sm:$0xff] %v12383_v52  ;;  %v6369_v51 = vmul.bf16 %v12383_v52, %v6177_v42  ;;  %v14385_v42 = vpack.c.bf16 %v11957_v14, %v11934_v44 }
 0x461   : > { %14381 = vst [vmem:[#allocation119_spill] sm:$0xff] %v12376_v22  ;;  %v5029_v31 = vpop.trf.xlu0  ;;  %v5040_v14 = vpop.trf.xlu1 }
 0x462   : > { %v12388_v56 = vpop.f32.mrf.mxu0  ;;  %v12390_v5 = vpop.f32.mrf.mxu1  ;;  %v6361_v48 = vmul.bf16 %v12397_v24, %v14385_v42  ;;  %v12424_v42 = vld [vmem:[%s14138_s5 + $0x100] sm:$0xff]  }
 0x463   : > { %14383 = vst [vmem:[#allocation121_spill] sm:$0xff] %v12388_v56  ;;  %8747 = vmatpush3.bf16.msra.mxu1 %v6362_v18  ;;  %v12410_v18 = vld [vmem:[%s14138_s5 + $0x140] sm:$0xff]   ;;  %14389 = vst [vmem:[#allocation126_spill] sm:$0xff] %v12424_v42 }
 0x464   : > { %8748 = vmatprep.subr.bf16.mxu1 %v6369_v51  ;;  %v12403_v21 = vpop.f32.mrf.mxu0  ;;  %v12405_v50 = vpop.f32.mrf.mxu1  ;;  %14387 = vst [vmem:[#allocation124_spill] sm:$0xff] %v12410_v18  ;;  %v6368_v51 = vmul.bf16 %v12410_v18, %v6176_v11  ;;  %v14390_v11 = vpack.c.bf16 %v11974_v0, %v11951_v62  ;;  %v6529_v62 = vpack.c.bf16 %v10542_v25, %v14226_v57 }
 0x465   : > { %14386 = vst [vmem:[#allocation123_spill] sm:$0xff] %v12403_v21  ;;  %v5041_v22 = vpop.trf.xlu1 }
 0x466   : > { %v12415_v39 = vpop.f32.mrf.mxu0  ;;  %9350 = vmatmul.mubr.msk.bf16.gmra.mxu0 %vm3765_vm2, %v5028_v20  ;;  %v12418_v44 = vpop.f32.mrf.mxu1  ;;  %v6360_v27 = vmul.bf16 %v12424_v42, %v14390_v11  ;;  %v14394_v11 = vld [vmem:[#allocation14_spill] sm:$0xff]  ;;  %v14395_v42 = vld [vmem:[#allocation12_spill] sm:$0xff] }
 0x467   : > { %14388 = vst [vmem:[#allocation125_spill] sm:$0xff] %v12415_v39  ;;  %8749 = vmatpush3.bf16.msra.mxu1 %v6361_v48  ;;  %9353 = vmatprep.mubr.msk.bf16.mxu0 %vm3765_vm2, %v5029_v31  ;;  %v14396_v41 = vpack.c.bf16 %v14394_v11, %v14395_v42 }
 0x468   : > { %8750 = vmatprep.subr.bf16.mxu1 %v6368_v51  ;;  %v12430_v18 = vpop.f32.mrf.mxu0  ;;  %v12432_v20 = vpop.f32.mrf.mxu1 }
 0x469   : > { %14391 = vst [vmem:[#allocation127_spill] sm:$0xff] %v12430_v18  ;;  %v5030_v51 = vpop.trf.xlu0  ;;  %v5042_v42 = vpop.trf.xlu1 }
 0x46a   : > { %v12434_v24 = vpop.f32.mrf.mxu0  ;;  %v12436_v48 = vpop.f32.mrf.mxu1 }
 0x46b   : > { %14392 = vst [vmem:[#allocation128_spill] sm:$0xff] %v12434_v24  ;;  %8751 = vmatpush3.bf16.msra.mxu1 %v6360_v27 }
 0x46c   : > { %v12440_v46 = vpop.f32.mrf.mxu0  ;;  %v12442_v52 = vpop.f32.mrf.mxu1 }
 0x46d   : > { %14393 = vst [vmem:[#allocation129_spill] sm:$0xff] %v12440_v46 }
 0x46e   : > { %6659 = vmatmul.mubr.bf16.vlgmr.msra.gmra.mxu1 %v14396_v41  ;;  %v12451_v27 = vpop.f32.mrf.mxu0  ;;  %9354 = vmatmul.mubr.msk.bf16.gmra.mxu0 %vm3765_vm2, %v5030_v51  ;;  %v12454_v31 = vpop.f32.mrf.mxu1 }
 0x46f   : > { %14397 = vst [vmem:[#allocation14_spill] sm:$0xff] %v12451_v27  ;;  %6740 = vmatprep.mubr.bf16.mxu1 %v6529_v62  ;;  %9357 = vmatprep.mubr.msk.bf16.mxu0 %vm3765_vm2, %v5039_v55  ;;  %v5043_v41 = vpop.trf.xlu1 }
 0x470   : > { %v12457_v21 = vpop.f32.mrf.mxu0  ;;  %v12459_v25 = vpop.f32.mrf.mxu1 }
 0x471   : > { %14398 = vst [vmem:[#allocation12_spill] sm:$0xff] %v12457_v21 }
 0x472   : > { %v12461_v57 = vpop.f32.mrf.mxu0  ;;  %v12463_v0 = vpop.f32.mrf.mxu1 }
 0x473   : > { %14399 = vst [vmem:[#allocation130_spill] sm:$0xff] %v12461_v57  ;;  %v5044_v6 = vpop.trf.xlu1 }
 0x474   : > { %v12467_v11 = vpop.f32.mrf.mxu0  ;;  %v12469_v51 = vpop.f32.mrf.mxu1 }
 0x475   : > { %14400 = vst [vmem:[#allocation131_spill] sm:$0xff] %v12467_v11 }
 0x476   : > { %v12473_v55 = vpop.f32.mrf.mxu0  ;;  %9358 = vmatmul.mubr.msk.bf16.gmra.mxu0 %vm3765_vm2, %v5040_v14  ;;  %v12476_v45 = vpop.f32.mrf.mxu1 }
 0x477   : > { %14401 = vst [vmem:[#allocation132_spill] sm:$0xff] %v12473_v55  ;;  %9361 = vmatprep.mubr.msk.bf16.mxu0 %vm3765_vm2, %v5041_v22 }
 0x478   : > { %v12479_v3 = vpop.f32.mrf.mxu0  ;;  %v12481_v37 = vpop.f32.mrf.mxu1 }
 0x479   : > { %14402 = vst [vmem:[#allocation133_spill] sm:$0xff] %v12479_v3 }
 0x47a   : > { %v12483_v56 = vpop.f32.mrf.mxu0  ;;  %v12485_v34 = vpop.f32.mrf.mxu1 }
 0x47b   : > { %14403 = vst [vmem:[#allocation134_spill] sm:$0xff] %v12483_v56 }
 0x47c   : > { %v12489_v38 = vpop.f32.mrf.mxu0  ;;  %v12491_v18 = vpop.f32.mrf.mxu1 }
 0x47d   : > { %14404 = vst [vmem:[#allocation135_spill] sm:$0xff] %v12489_v38  ;;  %v5045_v38 = vpop.trf.xlu1 }
 0x47e   : > { %v12495_v22 = vpop.f32.mrf.mxu0  ;;  %9362 = vmatmul.mubr.msk.bf16.gmra.mxu0 %vm3765_vm2, %v5042_v42  ;;  %v12498_v46 = vpop.f32.mrf.mxu1  ;;  %v12526_v42 = vld [vmem:[%s14138_s5 + $0x1f8] sm:$0xff]  }
 0x47f   : > { %14405 = vst [vmem:[#allocation136_spill] sm:$0xff] %v12495_v22  ;;  %9365 = vmatprep.mubr.msk.bf16.mxu0 %vm3765_vm2, %v5043_v41  ;;  %14412 = vst [vmem:[#allocation143_spill] sm:$0xff] %v12526_v42 }
 0x480   : > { %v12501_v32 = vpop.f32.mrf.mxu0  ;;  %v9110_v39 = vpop.f32.mrf.mxu1 }
 0x481   : > { %14406 = vst [vmem:[#allocation137_spill] sm:$0xff] %v12501_v32 }
 0x482   : > { %v12503_v62 = vpop.f32.mrf.mxu0  ;;  %v12505_v55 = vpop.f32.mrf.mxu1 }
 0x483   : > { %14407 = vst [vmem:[#allocation138_spill] sm:$0xff] %v12503_v62  ;;  %v5046_v62 = vpop.trf.xlu1 }
 0x484   : > { %v12509_v14 = vpop.f32.mrf.mxu0  ;;  %v9113_v3 = vpop.f32.mrf.mxu1 }
 0x485   : > { %14408 = vst [vmem:[#allocation139_spill] sm:$0xff] %v12509_v14  ;;  %v14414_v14 = vld [vmem:[#allocation33_spill] sm:$0xff] }
 0x486   : > { %v12513_v24 = vpop.f32.mrf.mxu0  ;;  %9366 = vmatmul.mubr.msk.bf16.gmra.mxu0 %vm3765_vm2, %v5044_v6  ;;  %v4584_v41 = vpop.f32.mrf.mxu1 }
 0x487   : > { %14409 = vst [vmem:[#allocation140_spill] sm:$0xff] %v12513_v24  ;;  %9369 = vmatprep.mubr.msk.bf16.mxu0 %vm3765_vm2, %v5045_v38 }
 0x488   : > { %v12517_v9 = vpop.f32.mrf.mxu0  ;;  %v9114_v19 = vpop.f32.mrf.mxu1 }
 0x489   : > { %14410 = vst [vmem:[#allocation141_spill] sm:$0xff] %v12517_v9  ;;  %v6199_v21 = vpack.c.bf16 %v9114_v19, %v9113_v3  ;;  %v14415_v19 = vld [vmem:[#allocation38_spill] sm:$0xff] }
 0x48a   : > { %v12519_v11 = vpop.f32.mrf.mxu0  ;;  %v4587_v56 = vpop.f32.mrf.mxu1  ;;  %v6523_v3 = vpack.c.bf16 %v14415_v19, %v14414_v14 }
 0x48b   : > { %14411 = vst [vmem:[#allocation142_spill] sm:$0xff] %v12519_v11  ;;  %v6391_v6 = vmul.bf16 %v12526_v42, %v6199_v21  ;;  %v6198_v11 = vpack.c.bf16 %v4587_v56, %v4584_v41  ;;  %v6191_v21 = vpack.c.bf16 %v12432_v20, %v12405_v50  ;;  %v14417_v56 = vld [vmem:[#allocation35_spill] sm:$0xff] }
 0x48c   : > { %v12529_v32 = vpop.f32.mrf.mxu0  ;;  %v12531_v38 = vpop.f32.mrf.mxu1  ;;  %v12561_v50 = vld [vmem:[%s14138_s5 + $0x1f0] sm:$0xff]  }
 0x48d   : > { %14413 = vst [vmem:[#allocation144_spill] sm:$0xff] %v12529_v32  ;;  %8758 = vmatprep.subr.bf16.mxu0 %v6391_v6  ;;  %14418 = vst [vmem:[#allocation33_spill] sm:$0xff] %v12561_v50  ;;  %v6390_v20 = vmul.bf16 %v12561_v50, %v6198_v11  ;;  %v14421_v50 = vpack.c.bf16 %v10635_v33, %v10617_v58  ;;  %v12601_v33 = vld [vmem:[%s14138_s5 + $0x1e8] sm:$0xff]  }
 0x48e   : > { %v12535_v9 = vpop.f32.mrf.mxu0  ;;  %9370 = vmatmul.mubr.msk.bf16.gmra.mxu0 %vm3765_vm2, %v5046_v62  ;;  %v12538_v22 = vpop.f32.mrf.mxu1  ;;  %v12571_v62 = vld [vmem:[%s14138_s5 + $0x1b8] sm:$0xff]   ;;  %14424 = vst [vmem:[#allocation146_spill] sm:$0xff] %v12601_v33 }
 0x48f   : > { %6617 = vmatprep.mubr.bf16.mxu0 %v6523_v3  ;;  %v14416_v3 = vld [vmem:[#allocation31_spill] sm:$0xff]  ;;  %14419 = vst [vmem:[#allocation38_spill] sm:$0xff] %v12571_v62  ;;  %v6383_v19 = vmul.bf16 %v12571_v62, %v6191_v21 }
 0x490   : > { %v12540_v24 = vpop.f32.mrf.mxu0  ;;  %v12542_v16 = vpop.f32.mrf.mxu1  ;;  %v6522_v41 = vpack.c.bf16 %v14417_v56, %v14416_v3  ;;  %v6190_v3 = vpack.c.bf16 %v12436_v48, %v12418_v44  ;;  %v6197_v56 = vpack.c.bf16 %v9110_v39, %v12491_v18  ;;  %v6189_v44 = vpack.c.bf16 %v12378_v12, %v12349_v29  ;;  %v12593_v39 = vld [vmem:[%s14138_s5 + $0x1b0] sm:$0xff]  }
 0x491   : > { %14423 = vst [vmem:[#allocation145_spill] sm:$0xff] %v12593_v39  ;;  %v6196_v29 = vpack.c.bf16 %v12505_v55, %v12498_v46  ;;  %v12621_v46 = vld [vmem:[%s14138_s5 + $0x1a8] sm:$0xff]  }
 0x492   : > { %v12548_v14 = vpop.f32.mrf.mxu0  ;;  %v12550_v6 = vpop.f32.mrf.mxu1  ;;  %v6382_v18 = vmul.bf16 %v12593_v39, %v6190_v3  ;;  %v6389_v48 = vmul.bf16 %v12601_v33, %v6197_v56  ;;  %14427 = vst [vmem:[#allocation149_spill] sm:$0xff] %v12621_v46  ;;  %v6381_v55 = vmul.bf16 %v12621_v46, %v6189_v44  ;;  %v6188_v3 = vpack.c.bf16 %v12390_v5, %v12364_v2  ;;  %v12651_v5 = vld [vmem:[%s14138_s5 + $0x1d8] sm:$0xff]  }
 0x493   : > { %v6195_v56 = vpack.c.bf16 %v12481_v37, %v12469_v51  ;;  %v12645_v37 = vld [vmem:[%s14138_s5 + $0x1a0] sm:$0xff]   ;;  %14432 = vst [vmem:[#allocation154_spill] sm:$0xff] %v12651_v5 }
 0x494   : > { %v12564_v42 = vpop.f32.mrf.mxu0  ;;  %v12566_v32 = vpop.f32.mrf.mxu1  ;;  %14431 = vst [vmem:[#allocation153_spill] sm:$0xff] %v12645_v37  ;;  %v6380_v2 = vmul.bf16 %v12645_v37, %v6188_v3 }
 0x495   : > { %v6387_v51 = vmul.bf16 %v12651_v5, %v6195_v56  ;;  %v12669_v56 = vld [vmem:[%s14138_s5 + $0x198] sm:$0xff]  }
 0x496   : > { %v12577_v23 = vpop.f32.mrf.mxu0  ;;  %6618 = vmatmul.mubr.bf16.vlgmr.msra.gmra.mxu0 %v6522_v41  ;;  %v12579_v11 = vpop.f32.mrf.mxu1  ;;  %14435 = vst [vmem:[#allocation157_spill] sm:$0xff] %v12669_v56 }
 0x497   : > { %14420 = vst [vmem:[#allocation31_spill] sm:$0xff] %v12577_v23  ;;  %6699 = vmatprep.mubr.bf16.mxu0 %v14421_v50  ;;  %8759 = vmatpush3.bf16.msra.mxu0 %v6383_v19  ;;  %v6186_v23 = vpack.c.bf16 %v12334_v43, %v12309_v28  ;;  %v12696_v28 = vld [vmem:[%s14138_s5 + $0x190] sm:$0xff]  }
 0x498   : > { %v12584_v27 = vpop.f32.mrf.mxu0  ;;  %8760 = vmatprep.subr.bf16.mxu0 %v6390_v20  ;;  %v12586_v57 = vpop.f32.mrf.mxu1  ;;  %14440 = vst [vmem:[#allocation161_spill] sm:$0xff] %v12696_v28 }
 0x499   : > { %14422 = vst [vmem:[#allocation35_spill] sm:$0xff] %v12584_v27  ;;  %v6378_v43 = vmul.bf16 %v12696_v28, %v6186_v23 }
 0x49a   : > { %v12606_v12 = vpop.f32.mrf.mxu0  ;;  %v12608_v21 = vpop.f32.mrf.mxu1 }
 0x49b   : > { %14425 = vst [vmem:[#allocation147_spill] sm:$0xff] %v12606_v12  ;;  %8761 = vmatpush3.bf16.msra.mxu0 %v6382_v18  ;;  %v12631_v18 = vld [vmem:[%s14138_s5 + $0x1e0] sm:$0xff]  }
 0x49c   : > { %v12614_v50 = vpop.f32.mrf.mxu0  ;;  %8762 = vmatprep.subr.bf16.mxu0 %v6389_v48  ;;  %v12616_v20 = vpop.f32.mrf.mxu1  ;;  %14428 = vst [vmem:[#allocation150_spill] sm:$0xff] %v12631_v18  ;;  %v6388_v48 = vmul.bf16 %v12631_v18, %v6196_v29  ;;  %v6194_v29 = vpack.c.bf16 %v12485_v34, %v12476_v45  ;;  %v14436_v34 = vpack.c.bf16 %v12320_v49, %v12294_v47 }
 0x49d   : > { %14426 = vst [vmem:[#allocation148_spill] sm:$0xff] %v12614_v50 }
 0x49e   : > { %v12634_v19 = vpop.f32.mrf.mxu0  ;;  %v12636_v41 = vpop.f32.mrf.mxu1  ;;  %v6379_v45 = vmul.bf16 %v12669_v56, %v14436_v34 }
 0x49f   : > { %14429 = vst [vmem:[#allocation151_spill] sm:$0xff] %v12634_v19  ;;  %8763 = vmatpush3.bf16.msra.mxu0 %v6381_v55 }
 0x4a0   : > { %v12638_v58 = vpop.f32.mrf.mxu0  ;;  %8764 = vmatprep.subr.bf16.mxu0 %v6388_v48  ;;  %v12640_v44 = vpop.f32.mrf.mxu1 }
 0x4a1   : > { %14430 = vst [vmem:[#allocation152_spill] sm:$0xff] %v12638_v58 }
 0x4a2   : > { %v12656_v55 = vpop.f32.mrf.mxu0  ;;  %v12658_v48 = vpop.f32.mrf.mxu1 }
 0x4a3   : > { %14433 = vst [vmem:[#allocation155_spill] sm:$0xff] %v12656_v55  ;;  %8765 = vmatpush3.bf16.msra.mxu0 %v6380_v2  ;;  %v6193_v2 = vpack.c.bf16 %v12459_v25, %v12442_v52  ;;  %v12702_v52 = vld [vmem:[%s14138_s5 + $0x1c8] sm:$0xff]  }
 0x4a4   : > { %v12662_v27 = vpop.f32.mrf.mxu0  ;;  %8766 = vmatprep.subr.bf16.mxu0 %v6387_v51  ;;  %v12664_v3 = vpop.f32.mrf.mxu1  ;;  %v12682_v51 = vld [vmem:[%s14138_s5 + $0x1d0] sm:$0xff]   ;;  %14441 = vst [vmem:[#allocation162_spill] sm:$0xff] %v12702_v52 }
 0x4a5   : > { %14434 = vst [vmem:[#allocation156_spill] sm:$0xff] %v12662_v27  ;;  %14437 = vst [vmem:[#allocation158_spill] sm:$0xff] %v12682_v51  ;;  %v6386_v50 = vmul.bf16 %v12682_v51, %v6194_v29  ;;  %v6385_v25 = vmul.bf16 %v12702_v52, %v6193_v2  ;;  %v6192_v29 = vpack.c.bf16 %v12463_v0, %v12454_v31  ;;  %v12720_v2 = vld [vmem:[%s14138_s5 + $0x188] sm:$0xff]  }
 0x4a6   : > { %v12685_v12 = vpop.f32.mrf.mxu0  ;;  %v12687_v27 = vpop.f32.mrf.mxu1  ;;  %14444 = vst [vmem:[#allocation165_spill] sm:$0xff] %v12720_v2  ;;  %v14445_v31 = vpack.c.bf16 %v12266_v40, %v12236_v54  ;;  %v6184_v52 = vpack.c.bf16 %v12280_v59, %v12253_v8  ;;  %v12745_v8 = vld [vmem:[%s14138_s5 + $0x180] sm:$0xff]  }
 0x4a7   : > { %14438 = vst [vmem:[#allocation159_spill] sm:$0xff] %v12685_v12  ;;  %8767 = vmatpush3.bf16.msra.mxu0 %v6379_v45  ;;  %14449 = vst [vmem:[#allocation169_spill] sm:$0xff] %v12745_v8 }
 0x4a8   : > { %v12689_v47 = vpop.f32.mrf.mxu0  ;;  %8768 = vmatprep.subr.bf16.mxu0 %v6386_v50  ;;  %v12691_v49 = vpop.f32.mrf.mxu1  ;;  %v6377_v0 = vmul.bf16 %v12720_v2, %v14445_v31  ;;  %v6376_v40 = vmul.bf16 %v12745_v8, %v6184_v52  ;;  %v14453_v8 = vpack.c.bf16 %v11104_v26, %v14243_v61 }
 0x4a9   : > { %14439 = vst [vmem:[#allocation160_spill] sm:$0xff] %v12689_v47 }
 0x4aa   : > { %v12707_v50 = vpop.f32.mrf.mxu0  ;;  %v12709_v34 = vpop.f32.mrf.mxu1 }
 0x4ab   : > { %14442 = vst [vmem:[#allocation163_spill] sm:$0xff] %v12707_v50  ;;  %8769 = vmatpush3.bf16.msra.mxu0 %v6378_v43  ;;  %v12731_v43 = vld [vmem:[%s14138_s5 + $0x1c0] sm:$0xff]  }
 0x4ac   : > { %v12713_v51 = vpop.f32.mrf.mxu0  ;;  %8770 = vmatprep.subr.bf16.mxu0 %v6385_v25  ;;  %v12715_v23 = vpop.f32.mrf.mxu1  ;;  %14446 = vst [vmem:[#allocation166_spill] sm:$0xff] %v12731_v43  ;;  %v6384_v25 = vmul.bf16 %v12731_v43, %v6192_v29 }
 0x4ad   : > { %14443 = vst [vmem:[#allocation164_spill] sm:$0xff] %v12713_v51 }
 0x4ae   : > { %v12734_v45 = vpop.f32.mrf.mxu0  ;;  %v12736_v28 = vpop.f32.mrf.mxu1 }
 0x4af   : > { %14447 = vst [vmem:[#allocation167_spill] sm:$0xff] %v12734_v45  ;;  %8771 = vmatpush3.bf16.msra.mxu0 %v6377_v0  ;;  %v6526_v0 = vpack.c.bf16 %v14232_v36, %v10615_v60 }
 0x4b0   : > { %v12738_v58 = vpop.f32.mrf.mxu0  ;;  %8772 = vmatprep.subr.bf16.mxu0 %v6384_v25  ;;  %v12740_v54 = vpop.f32.mrf.mxu1 }
 0x4b1   : > { %14448 = vst [vmem:[#allocation168_spill] sm:$0xff] %v12738_v58  ;;  %v6209_v39 = vpack.c.bf16 %v12740_v54, %v12715_v23  ;;  %v12947_v23 = vld [vmem:[%s14138_s5 + $0x210] sm:$0xff]   ;;  %v14481_v54 = vpack.c.bf16 %v12608_v21, %v12579_v11  ;;  %v12974_v21 = vld [vmem:[%s14138_s5 + $0x208] sm:$0xff]   ;;  %v9733_v11 = vld [vmem:[%s14138_s5 + $0x78] sm:$0xff]  }
 0x4b2   : > { %v12748_v59 = vpop.f32.mrf.mxu0  ;;  %v12750_v29 = vpop.f32.mrf.mxu1  ;;  %14480 = vst [vmem:[#allocation198_spill] sm:$0xff] %v12947_v23  ;;  %14485 = vst [vmem:[#allocation202_spill] sm:$0xff] %v12974_v21 }
 0x4b3   : > { %14450 = vst [vmem:[#allocation170_spill] sm:$0xff] %v12748_v59  ;;  %8773 = vmatpush3.bf16.msra.mxu0 %v6376_v40 }
 0x4b4   : > { %v12756_v25 = vpop.f32.mrf.mxu0  ;;  %v12758_v43 = vpop.f32.mrf.mxu1 }
 0x4b5   : > { %14451 = vst [vmem:[#allocation171_spill] sm:$0xff] %v12756_v25  ;;  %v12960_v25 = vld [vmem:[%s14138_s5 + $0x248] sm:$0xff]  }
 0x4b6   : > { %v12762_v56 = vpop.f32.mrf.mxu0  ;;  %6700 = vmatmul.mubr.bf16.vlgmr.msra.gmra.mxu0 %v6526_v0  ;;  %v12764_v52 = vpop.f32.mrf.mxu1  ;;  %14483 = vst [vmem:[#allocation200_spill] sm:$0xff] %v12960_v25 }
 0x4b7   : > { %14452 = vst [vmem:[#allocation172_spill] sm:$0xff] %v12762_v56  ;;  %6781 = vmatprep.mubr.bf16.mxu0 %v14453_v8  ;;  %v12808_v56 = vld [vmem:[%s14138_s5 + $0x278] sm:$0xff]  }
 0x4b8   : > { %v12769_v40 = vpop.f32.mrf.mxu0  ;;  %v12771_v31 = vpop.f32.mrf.mxu1 }
 0x4b9   : > { %14454 = vst [vmem:[#allocation173_spill] sm:$0xff] %v12769_v40  ;;  %v6207_v40 = vpack.c.bf16 %v12691_v49, %v12664_v3  ;;  %v12814_v3 = vld [vmem:[%s14138_s5 + $0x238] sm:$0xff]   ;;  %v6206_v49 = vpack.c.bf16 %v12709_v34, %v12687_v27  ;;  %v6205_v27 = vpack.c.bf16 %v12640_v44, %v12616_v20  ;;  %v12840_v34 = vld [vmem:[%s14138_s5 + $0x230] sm:$0xff]  }
 0x4ba   : > { %v12773_v60 = vpop.f32.mrf.mxu0  ;;  %v12775_v36 = vpop.f32.mrf.mxu1 }
 0x4bb   : > { %14455 = vst [vmem:[#allocation174_spill] sm:$0xff] %v12773_v60 }
 0x4bc   : > { %v12779_v19 = vpop.f32.mrf.mxu0  ;;  %v9141_v0 = vpop.f32.mrf.mxu1 }
 0x4bd   : > { %14456 = vst [vmem:[#allocation175_spill] sm:$0xff] %v12779_v19 }
 0x4be   : > { %v12783_v5 = vpop.f32.mrf.mxu0  ;;  %v4696_v26 = vpop.f32.mrf.mxu1 }
 0x4bf   : > { %14457 = vst [vmem:[#allocation176_spill] sm:$0xff] %v12783_v5 }
 0x4c0   : > { %v12785_v61 = vpop.f32.mrf.mxu0  ;;  %v9142_v8 = vpop.f32.mrf.mxu1 }
 0x4c1   : > { %14458 = vst [vmem:[#allocation177_spill] sm:$0xff] %v12785_v61  ;;  %v6213_v5 = vpack.c.bf16 %v9142_v8, %v9141_v0  ;;  %v6398_v0 = vmul.bf16 %v12840_v34, %v6206_v49  ;;  %v6211_v49 = vpack.c.bf16 %v12771_v31, %v12758_v43 }
 0x4c2   : > { %v12787_v37 = vpop.f32.mrf.mxu0  ;;  %v4699_v18 = vpop.f32.mrf.mxu1 }
 0x4c3   : > { %14459 = vst [vmem:[#allocation178_spill] sm:$0xff] %v12787_v37 }
 0x4c4   : > { %v12791_v47 = vpop.f32.mrf.mxu0  ;;  %v9145_v2 = vpop.f32.mrf.mxu1 }
 0x4c5   : > { %14460 = vst [vmem:[#allocation179_spill] sm:$0xff] %v12791_v47 }
 0x4c6   : > { %v12795_v60 = vpop.f32.mrf.mxu0  ;;  %v4712_v55 = vpop.f32.mrf.mxu1 }
 0x4c7   : > { %14461 = vst [vmem:[#allocation180_spill] sm:$0xff] %v12795_v60 }
 0x4c8   : > { %v12799_v19 = vpop.f32.mrf.mxu0  ;;  %v9146_v46 = vpop.f32.mrf.mxu1 }
 0x4c9   : > { %14462 = vst [vmem:[#allocation181_spill] sm:$0xff] %v12799_v19  ;;  %v6215_v12 = vpack.c.bf16 %v9146_v46, %v9145_v2  ;;  %v6399_v46 = vmul.bf16 %v12814_v3, %v6207_v40 }
 0x4ca   : > { %v12801_v50 = vpop.f32.mrf.mxu0  ;;  %v4715_v33 = vpop.f32.mrf.mxu1 }
 0x4cb   : > { %14463 = vst [vmem:[#allocation182_spill] sm:$0xff] %v12801_v50  ;;  %v6407_v61 = vmul.bf16 %v12808_v56, %v6215_v12  ;;  %v6214_v47 = vpack.c.bf16 %v4715_v33, %v4712_v55  ;;  %v12828_v33 = vld [vmem:[%s14138_s5 + $0x270] sm:$0xff]  }
 0x4cc   : > { %v12819_v2 = vpop.f32.mrf.mxu0  ;;  %v12821_v51 = vpop.f32.mrf.mxu1 }
 0x4cd   : > { %14464 = vst [vmem:[#allocation183_spill] sm:$0xff] %v12819_v2  ;;  %v6406_v12 = vmul.bf16 %v12828_v33, %v6214_v47  ;;  %8780 = vmatprep.subr.bf16.mxu1 %v6407_v61  ;;  %v12850_v61 = vld [vmem:[%s14138_s5 + $0x268] sm:$0xff]  }
 0x4ce   : > { %v12831_v55 = vpop.f32.mrf.mxu0  ;;  %v12833_v40 = vpop.f32.mrf.mxu1  ;;  %8781 = vmatpush3.bf16.msra.mxu1 %v6399_v46  ;;  %v6405_v46 = vmul.bf16 %v12850_v61, %v6213_v5  ;;  %v12866_v5 = vld [vmem:[%s14138_s5 + $0x228] sm:$0xff]  }
 0x4cf   : > { %14465 = vst [vmem:[#allocation184_spill] sm:$0xff] %v12831_v55  ;;  %8782 = vmatprep.subr.bf16.mxu1 %v6406_v12  ;;  %v6212_v12 = vpack.c.bf16 %v4699_v18, %v4696_v26  ;;  %v6397_v18 = vmul.bf16 %v12866_v5, %v6205_v27  ;;  %v6204_v26 = vpack.c.bf16 %v12658_v48, %v12636_v41  ;;  %v12892_v48 = vld [vmem:[%s14138_s5 + $0x220] sm:$0xff]  }
 0x4d0   : > { %v12843_v8 = vpop.f32.mrf.mxu0  ;;  %v12845_v47 = vpop.f32.mrf.mxu1  ;;  %14471 = vst [vmem:[#allocation190_spill] sm:$0xff] %v12892_v48 }
 0x4d1   : > { %14466 = vst [vmem:[#allocation185_spill] sm:$0xff] %v12843_v8  ;;  %v6396_v43 = vmul.bf16 %v12892_v48, %v6204_v26 }
 0x4d2   : > { %v12855_v44 = vpop.f32.mrf.mxu0  ;;  %v12857_v37 = vpop.f32.mrf.mxu1  ;;  %8783 = vmatpush3.bf16.msra.mxu1 %v6398_v0 }
 0x4d3   : > { %14467 = vst [vmem:[#allocation186_spill] sm:$0xff] %v12855_v44  ;;  %8784 = vmatprep.subr.bf16.mxu1 %v6405_v46  ;;  %v12880_v46 = vld [vmem:[%s14138_s5 + $0x260] sm:$0xff]  }
 0x4d4   : > { %v12871_v20 = vpop.f32.mrf.mxu0  ;;  %v12873_v0 = vpop.f32.mrf.mxu1  ;;  %14469 = vst [vmem:[#allocation188_spill] sm:$0xff] %v12880_v46  ;;  %v6404_v19 = vmul.bf16 %v12880_v46, %v6212_v12  ;;  %v12902_v12 = vld [vmem:[%s14138_s5 + $0x258] sm:$0xff]  }
 0x4d5   : > { %14468 = vst [vmem:[#allocation187_spill] sm:$0xff] %v12871_v20  ;;  %14473 = vst [vmem:[#allocation192_spill] sm:$0xff] %v12902_v12  ;;  %v6403_v27 = vmul.bf16 %v12902_v12, %v6211_v49  ;;  %v12920_v49 = vld [vmem:[%s14138_s5 + $0x218] sm:$0xff]  }
 0x4d6   : > { %v12885_v2 = vpop.f32.mrf.mxu0  ;;  %v12887_v41 = vpop.f32.mrf.mxu1  ;;  %8785 = vmatpush3.bf16.msra.mxu1 %v6397_v18  ;;  %14475 = vst [vmem:[#allocation194_spill] sm:$0xff] %v12920_v49 }
 0x4d7   : > { %14470 = vst [vmem:[#allocation189_spill] sm:$0xff] %v12885_v2  ;;  %8786 = vmatprep.subr.bf16.mxu1 %v6404_v19  ;;  %v6210_v19 = vpack.c.bf16 %v12775_v36, %v12764_v52  ;;  %v14476_v52 = vpack.c.bf16 %v12586_v57, %v12566_v32 }
 0x4d8   : > { %v12895_v31 = vpop.f32.mrf.mxu0  ;;  %v12897_v60 = vpop.f32.mrf.mxu1 }
 0x4d9   : > { %14472 = vst [vmem:[#allocation191_spill] sm:$0xff] %v12895_v31  ;;  %v6395_v36 = vmul.bf16 %v12920_v49, %v14476_v52  ;;  %v6394_v52 = vmul.bf16 %v12947_v23, %v14481_v54 }
 0x4da   : > { %v12909_v50 = vpop.f32.mrf.mxu0  ;;  %v12911_v26 = vpop.f32.mrf.mxu1  ;;  %8787 = vmatpush3.bf16.msra.mxu1 %v6396_v43 }
 0x4db   : > { %14474 = vst [vmem:[#allocation193_spill] sm:$0xff] %v12909_v50  ;;  %8788 = vmatprep.subr.bf16.mxu1 %v6403_v27  ;;  %v12935_v27 = vld [vmem:[%s14138_s5 + $0x250] sm:$0xff]  }
 0x4dc   : > { %v12926_v18 = vpop.f32.mrf.mxu0  ;;  %v12928_v43 = vpop.f32.mrf.mxu1  ;;  %14478 = vst [vmem:[#allocation196_spill] sm:$0xff] %v12935_v27  ;;  %v6402_v58 = vmul.bf16 %v12935_v27, %v6210_v19 }
 0x4dd   : > { %14477 = vst [vmem:[#allocation195_spill] sm:$0xff] %v12926_v18 }
 0x4de   : > { %v12940_v32 = vpop.f32.mrf.mxu0  ;;  %v12942_v57 = vpop.f32.mrf.mxu1  ;;  %8789 = vmatpush3.bf16.msra.mxu1 %v6395_v36  ;;  %v6208_v36 = vpack.c.bf16 %v12750_v29, %v12736_v28 }
 0x4df   : > { %14479 = vst [vmem:[#allocation197_spill] sm:$0xff] %v12940_v32  ;;  %8790 = vmatprep.subr.bf16.mxu1 %v6402_v58  ;;  %v6401_v58 = vmul.bf16 %v12960_v25, %v6209_v39  ;;  %v14486_v39 = vpack.c.bf16 %v12542_v16, %v12531_v38  ;;  %v12999_v16 = vld [vmem:[%s14138_s5 + $0x200] sm:$0xff]   ;;  %v14490_v38 = vpack.c.bf16 %v12550_v6, %v12538_v22  ;;  %v9734_v6 = vld [vmem:[%s14138_s5 + $0x38] sm:$0xff]  }
 0x4e0   : > { %v12953_v19 = vpop.f32.mrf.mxu0  ;;  %v12955_v8 = vpop.f32.mrf.mxu1  ;;  %14489 = vst [vmem:[#allocation205_spill] sm:$0xff] %v12999_v16  ;;  %v6528_v22 = vpack.c.bf16 %v14230_v13, %v14229_v53  ;;  %v14495_v53 = vpack.c.bf16 %v11980_v30, %v11955_v17 }
 0x4e1   : > { %14482 = vst [vmem:[#allocation199_spill] sm:$0xff] %v12953_v19  ;;  %v6393_v54 = vmul.bf16 %v12974_v21, %v14486_v39  ;;  %v6392_v39 = vmul.bf16 %v12999_v16, %v14490_v38  ;;  %v14492_v38 = vld [vmem:[#allocation61_spill] sm:$0xff]  ;;  %v14493_v16 = vld [vmem:[#allocation64_spill] sm:$0xff] }
 0x4e2   : > { %v12965_v20 = vpop.f32.mrf.mxu0  ;;  %v12967_v62 = vpop.f32.mrf.mxu1  ;;  %8791 = vmatpush3.bf16.msra.mxu1 %v6394_v52  ;;  %v12987_v52 = vld [vmem:[%s14138_s5 + $0x240] sm:$0xff]   ;;  %v14494_v44 = vpack.c.bf16 %v14492_v38, %v14493_v16  ;;  %v14496_v16 = vld [vmem:[#allocation18_spill] sm:$0xff]  ;;  %v14500_v38 = vld [vmem:[#allocation63_spill] sm:$0xff] }
 0x4e3   : > { %14484 = vst [vmem:[#allocation201_spill] sm:$0xff] %v12965_v20  ;;  %8792 = vmatprep.subr.bf16.mxu1 %v6401_v58  ;;  %14488 = vst [vmem:[#allocation204_spill] sm:$0xff] %v12987_v52  ;;  %v6400_v58 = vmul.bf16 %v12987_v52, %v6208_v36 }
 0x4e4   : > { %v12980_v28 = vpop.f32.mrf.mxu0  ;;  %v12982_v29 = vpop.f32.mrf.mxu1  ;;  %v6431_v52 = vmul.bf16 %v9734_v6, %v14494_v44  ;;  %v14497_v44 = vld [vmem:[#allocation17_spill] sm:$0xff]  ;;  %v14499_v6 = vld [vmem:[#allocation62_spill] sm:$0xff] }
 0x4e5   : > { %14487 = vst [vmem:[#allocation203_spill] sm:$0xff] %v12980_v28  ;;  %v14501_v2 = vpack.c.bf16 %v14499_v6, %v14500_v38 }
 0x4e6   : > { %v12992_v45 = vpop.f32.mrf.mxu0  ;;  %v12994_v59 = vpop.f32.mrf.mxu1  ;;  %8793 = vmatpush3.bf16.msra.mxu1 %v6393_v54  ;;  %v14491_v54 = vpack.c.bf16 %v11971_v4, %v11948_v1  ;;  %v9735_v4 = vld [vmem:[%s14138_s5 + $0x70] sm:$0xff]  }
 0x4e7   : > { %8794 = vmatprep.subr.bf16.mxu1 %v6400_v58  ;;  %v6438_v13 = vmul.bf16 %v9735_v4, %v14495_v53  ;;  %v14502_v4 = vpack.c.bf16 %v11921_v63, %v11912_v10  ;;  %v9739_v63 = vld [vmem:[%s14138_s5 + $0x60] sm:$0xff]   ;;  %v14506_v10 = vpack.c.bf16 %v11932_v15, %v11917_v35  ;;  %v9741_v15 = vld [vmem:[%s14138_s5 + $0x58] sm:$0xff]  }
 0x4e8   : > { %v13005_v36 = vpop.f32.mrf.mxu0  ;;  %v13007_v31 = vpop.f32.mrf.mxu1  ;;  %v6439_v58 = vmul.bf16 %v9733_v11, %v14491_v54  ;;  %v14498_v54 = vpack.c.bf16 %v14496_v16, %v14497_v44  ;;  %v14503_v44 = vld [vmem:[#allocation58_spill] sm:$0xff]  ;;  %v14512_v35 = vld [vmem:[#allocation75_spill] sm:$0xff] }
 0x4e9   : > { %v6223_v46 = vpack.c.bf16 %v13007_v31, %v12982_v29  ;;  %v13181_v31 = vld [vmem:[%s14138_s5 + $0x2f8] sm:$0xff]  }
 0x4ea   : > { %v13015_v18 = vpop.f32.mrf.mxu0  ;;  %v13017_v55 = vpop.f32.mrf.mxu1  ;;  %8795 = vmatpush3.bf16.msra.mxu1 %v6392_v39 }
 0x4eb   : > { %8824 = vmatprep.subr.bf16.mxu1 %v6439_v58  ;;  %v9736_v58 = vld [vmem:[%s14138_s5 + $0x30] sm:$0xff]  }
 0x4ec   : > { %v13027_v21 = vpop.f32.mrf.mxu0  ;;  %v13029_v1 = vpop.f32.mrf.mxu1  ;;  %v6430_v17 = vmul.bf16 %v9736_v58, %v14501_v2  ;;  %v9738_v2 = vld [vmem:[%s14138_s5 + $0x28] sm:$0xff]  }
 0x4ed   : > { %6741 = vmatmul.mubr.bf16.vlgmr.msra.gmra.mxu1 %v6528_v22 }
 0x4ee   : > { %v13037_v11 = vpop.f32.mrf.mxu0  ;;  %v13039_v39 = vpop.f32.mrf.mxu1  ;;  %8825 = vmatpush3.bf16.msra.mxu1 %v6431_v52  ;;  %6822 = vmatprep.mubr.bf16.mxu1 %v14498_v54  ;;  %v9737_v52 = vld [vmem:[%s14138_s5 + $0x68] sm:$0xff]   ;;  %v14504_v54 = vld [vmem:[#allocation19_spill] sm:$0xff] }
 0x4ef   : > { %8826 = vmatprep.subr.bf16.mxu1 %v6438_v13  ;;  %v6437_v53 = vmul.bf16 %v9737_v52, %v14502_v4  ;;  %v14505_v58 = vpack.c.bf16 %v14503_v44, %v14504_v54  ;;  %v14509_v44 = vld [vmem:[#allocation20_spill] sm:$0xff] }
 0x4f0   : > { %v13050_v30 = vpop.f32.mrf.mxu0  ;;  %v13052_v22 = vpop.f32.mrf.mxu1 }
 0x4f1   : > { %v6429_v6 = vmul.bf16 %v9738_v2, %v14505_v58  ;;  %v14508_v2 = vld [vmem:[#allocation57_spill] sm:$0xff] }
 0x4f2   : > { %v13060_v13 = vpop.f32.mrf.mxu0  ;;  %v13062_v16 = vpop.f32.mrf.mxu1  ;;  %8827 = vmatpush3.bf16.msra.mxu1 %v6430_v17  ;;  %v6436_v17 = vmul.bf16 %v9739_v63, %v14506_v10  ;;  %v14510_v54 = vpack.c.bf16 %v14508_v2, %v14509_v44  ;;  %v14513_v63 = vld [vmem:[#allocation71_spill] sm:$0xff]  ;;  %v14516_v2 = vld [vmem:[#allocation48_spill] sm:$0xff]  ;;  %v14517_v44 = vld [vmem:[#allocation37_spill] sm:$0xff] }
 0x4f3   : > { %8828 = vmatprep.subr.bf16.mxu1 %v6437_v53  ;;  %v9740_v53 = vld [vmem:[%s14138_s5 + $0x20] sm:$0xff]  }
 0x4f4   : > { %v13070_v38 = vpop.f32.mrf.mxu0  ;;  %v13072_v50 = vpop.f32.mrf.mxu1  ;;  %v6428_v58 = vmul.bf16 %v9740_v53, %v14510_v54  ;;  %v9742_v53 = vld [vmem:[%s14138_s5 + $0x18] sm:$0xff]   ;;  %v14518_v54 = vpack.c.bf16 %v14516_v2, %v14517_v44  ;;  %v14524_v2 = vld [vmem:[#allocation53_spill] sm:$0xff] }
 0x4f5   : > { %v14525_v44 = vld [vmem:[#allocation43_spill] sm:$0xff] }
 0x4f6   : > { %v13080_v52 = vpop.f32.mrf.mxu0  ;;  %v13082_v4 = vpop.f32.mrf.mxu1  ;;  %8829 = vmatpush3.bf16.msra.mxu1 %v6429_v6  ;;  %v14514_v6 = vpack.c.bf16 %v14512_v35, %v14513_v63  ;;  %v14520_v35 = vld [vmem:[#allocation76_spill] sm:$0xff]  ;;  %v14521_v63 = vld [vmem:[#allocation70_spill] sm:$0xff] }
 0x4f7   : > { %14507 = vst [vmem:[#allocation61_spill] sm:$0xff] %v13080_v52  ;;  %8830 = vmatprep.subr.bf16.mxu1 %v6436_v17 }
 0x4f8   : > { %v13090_v25 = vpop.f32.mrf.mxu0  ;;  %v13092_v23 = vpop.f32.mrf.mxu1  ;;  %v6435_v10 = vmul.bf16 %v9741_v15, %v14514_v6  ;;  %v9743_v15 = vld [vmem:[%s14138_s5 + $0x50] sm:$0xff]  }
 0x4f9   : > { %14511 = vst [vmem:[#allocation64_spill] sm:$0xff] %v13090_v25  ;;  %v6427_v25 = vmul.bf16 %v9742_v53, %v14518_v54  ;;  %v9744_v53 = vld [vmem:[%s14138_s5 + $0x10] sm:$0xff]   ;;  %v14526_v54 = vpack.c.bf16 %v14524_v2, %v14525_v44 }
 0x4fa   : > { %v13100_v17 = vpop.f32.mrf.mxu0  ;;  %v13102_v19 = vpop.f32.mrf.mxu1  ;;  %8831 = vmatpush3.bf16.msra.mxu1 %v6428_v58  ;;  %v14522_v58 = vpack.c.bf16 %v14520_v35, %v14521_v63  ;;  %v14528_v35 = vld [vmem:[#allocation74_spill] sm:$0xff]  ;;  %v14529_v63 = vld [vmem:[#allocation69_spill] sm:$0xff]  ;;  %v14532_v2 = vld [vmem:[#allocation59_spill] sm:$0xff] }
 0x4fb   : > { %14515 = vst [vmem:[#allocation18_spill] sm:$0xff] %v13100_v17  ;;  %8832 = vmatprep.subr.bf16.mxu1 %v6435_v10  ;;  %v14533_v44 = vld [vmem:[#allocation47_spill] sm:$0xff] }
 0x4fc   : > { %v13110_v28 = vpop.f32.mrf.mxu0  ;;  %v13112_v27 = vpop.f32.mrf.mxu1  ;;  %v6434_v6 = vmul.bf16 %v9743_v15, %v14522_v58  ;;  %v9745_v15 = vld [vmem:[%s14138_s5 + $0x48] sm:$0xff]   ;;  %v14530_v58 = vpack.c.bf16 %v14528_v35, %v14529_v63  ;;  %v14537_v63 = vld [vmem:[#allocation68_spill] sm:$0xff] }
 0x4fd   : > { %14519 = vst [vmem:[#allocation17_spill] sm:$0xff] %v13110_v28  ;;  %v6426_v28 = vmul.bf16 %v9744_v53, %v14526_v54  ;;  %v9746_v53 = vld [vmem:[%s14138_s5 + $0x8] sm:$0xff]   ;;  %v14534_v54 = vpack.c.bf16 %v14532_v2, %v14533_v44  ;;  %v14539_v2 = vld [vmem:[#allocation56_spill] sm:$0xff] }
 0x4fe   : > { %v13120_v10 = vpop.f32.mrf.mxu0  ;;  %v13122_v17 = vpop.f32.mrf.mxu1  ;;  %8833 = vmatpush3.bf16.msra.mxu1 %v6427_v25  ;;  %v6433_v25 = vmul.bf16 %v9745_v15, %v14530_v58  ;;  %v9747_v15 = vld [vmem:[%s14138_s5 + $0x40] sm:$0xff]  }
 0x4ff   : > { %14523 = vst [vmem:[#allocation62_spill] sm:$0xff] %v13120_v10  ;;  %8834 = vmatprep.subr.bf16.mxu1 %v6434_v6  ;;  %v6425_v20 = vmul.bf16 %v9746_v53, %v14534_v54  ;;  %v14536_v35 = vld [vmem:[#allocation73_spill] sm:$0xff] }
 0x500   : > { %v13130_v52 = vpop.f32.mrf.mxu0  ;;  %v9174_v49 = vpop.f32.mrf.mxu1  ;;  %v14538_v58 = vpack.c.bf16 %v14536_v35, %v14537_v63  ;;  %v9748_v53 = vld [vmem:[%s14138_s5] sm:$0xff]  }
 0x501   : > { %14527 = vst [vmem:[#allocation63_spill] sm:$0xff] %v13130_v52  ;;  %v14540_v44 = vld [vmem:[#allocation45_spill] sm:$0xff] }
 0x502   : > { %v13138_v6 = vpop.f32.mrf.mxu0  ;;  %v13140_v32 = vpop.f32.mrf.mxu1  ;;  %8835 = vmatpush3.bf16.msra.mxu1 %v6426_v28  ;;  %v6432_v28 = vmul.bf16 %v9747_v15, %v14538_v58  ;;  %v14541_v54 = vpack.c.bf16 %v14539_v2, %v14540_v44  ;;  %v14542_v15 = vpack.c.bf16 %v12548_v14, %v12535_v9  ;;  %v6278_v58 = vpack.c.bf16 %v12564_v42, %v12540_v24  ;;  %v14544_v2 = vld [vmem:[#allocation27_spill] sm:$0xff]  ;;  %v14548_v24 = vld [vmem:[#allocation22_spill] sm:$0xff] }
 0x503   : > { %14531 = vst [vmem:[#allocation58_spill] sm:$0xff] %v13138_v6  ;;  %8836 = vmatprep.subr.bf16.mxu1 %v6433_v25 }
 0x504   : > { %v13148_v52 = vpop.f32.mrf.mxu0  ;;  %v9177_v12 = vpop.f32.mrf.mxu1 }
 0x505   : > { %14535 = vst [vmem:[#allocation19_spill] sm:$0xff] %v13148_v52  ;;  %v6424_v52 = vmul.bf16 %v9748_v53, %v14541_v54  ;;  %v14543_v53 = vld [vmem:[#allocation24_spill] sm:$0xff] }
 0x506   : > { %v13156_v25 = vpop.f32.mrf.mxu0  ;;  %v4840_v48 = vpop.f32.mrf.mxu1  ;;  %8837 = vmatpush3.bf16.msra.mxu1 %v6425_v20  ;;  %v6471_v20 = vmul.bf16 %v12221_v7, %v14542_v15  ;;  %v6532_v44 = vpack.c.bf16 %v14544_v2, %v14543_v53  ;;  %v14545_v7 = vld [vmem:[#allocation130_spill] sm:$0xff] }
 0x507   : > { %8838 = vmatprep.subr.bf16.mxu1 %v6432_v28  ;;  %v14550_v53 = vld [vmem:[#allocation30_spill] sm:$0xff] }
 0x508   : > { %v13166_v6 = vpop.f32.mrf.mxu0  ;;  %v9178_v35 = vpop.f32.mrf.mxu1 }
 0x509   : > { %v6231_v63 = vpack.c.bf16 %v9178_v35, %v9177_v12  ;;  %v14546_v12 = vld [vmem:[#allocation14_spill] sm:$0xff]  ;;  %v6222_v35 = vpack.c.bf16 %v13017_v55, %v12994_v59  ;;  %v14552_v59 = vld [vmem:[#allocation131_spill] sm:$0xff]  ;;  %v14553_v55 = vld [vmem:[#allocation12_spill] sm:$0xff] }
 0x50a   : > { %v13174_v28 = vpop.f32.mrf.mxu0  ;;  %v4843_v10 = vpop.f32.mrf.mxu1  ;;  %8839 = vmatpush3.bf16.msra.mxu1 %v6424_v52  ;;  %v14547_v29 = vpack.c.bf16 %v14545_v7, %v14546_v12  ;;  %v13191_v52 = vld [vmem:[%s14138_s5 + $0x2b8] sm:$0xff]  }
 0x50b   : > { %v6423_v9 = vmul.bf16 %v13181_v31, %v6231_v63  ;;  %v6230_v14 = vpack.c.bf16 %v4843_v10, %v4840_v48  ;;  %8868 = vmatprep.subr.bf16.mxu1 %v6471_v20  ;;  %v6415_v54 = vmul.bf16 %v13191_v52, %v6223_v46  ;;  %v6229_v48 = vpack.c.bf16 %v9174_v49, %v13112_v27  ;;  %v13202_v10 = vld [vmem:[%s14138_s5 + $0x2f0] sm:$0xff]   ;;  %v14551_v46 = vld [vmem:[#allocation13_spill] sm:$0xff] }
 0x50c   : > { %v6463_v42 = vmul.bf16 %v14548_v24, %v14547_v29  ;;  %v13196_v15 = vpop.f32.mrf.mxu0  ;;  %v14549_v63 = vld [vmem:[#allocation26_spill] sm:$0xff]  ;;  %v6470_v7 = vmul.bf16 %v14551_v46, %v6278_v58  ;;  %v14554_v49 = vpack.c.bf16 %v14552_v59, %v14553_v55  ;;  %v14563_v55 = vld [vmem:[#allocation125_spill] sm:$0xff] }
 0x50d   : > { %v6422_v20 = vmul.bf16 %v13202_v10, %v6230_v14  ;;  %8802 = vmatprep.subr.bf16.mxu0 %v6423_v9  ;;  %6823 = vmatmul.mubr.bf16.vlgmr.msra.gmra.mxu1 %v6532_v44  ;;  %v6537_v2 = vpack.c.bf16 %v14550_v53, %v14549_v63  ;;  %v14555_v27 = vld [vmem:[#allocation102_spill] sm:$0xff]  ;;  %v6221_v9 = vpack.c.bf16 %v12955_v8, %v12928_v43  ;;  %v14560_v53 = vld [vmem:[#allocation141_spill] sm:$0xff] }
 0x50e   : > { %v13208_v12 = vpop.f32.mrf.mxu0  ;;  %8803 = vmatpush3.bf16.msra.mxu0 %v6415_v54  ;;  %8869 = vmatpush3.bf16.msra.mxu1 %v6463_v42  ;;  %v6462_v29 = vmul.bf16 %v14555_v27, %v14554_v49  ;;  %v13219_v44 = vld [vmem:[%s14138_s5 + $0x2b0] sm:$0xff]   ;;  %v14557_v42 = vld [vmem:[#allocation140_spill] sm:$0xff]  ;;  %v13233_v8 = vld [vmem:[%s14138_s5 + $0x2e8] sm:$0xff]  }
 0x50f   : > { %6904 = vmatprep.mubr.bf16.mxu1 %v6537_v2  ;;  %8804 = vmatprep.subr.bf16.mxu0 %v6422_v20  ;;  %v6414_v58 = vmul.bf16 %v13219_v44, %v6222_v35  ;;  %v14556_v24 = vld [vmem:[#allocation142_spill] sm:$0xff]  ;;  %v14559_v20 = vld [vmem:[#allocation104_spill] sm:$0xff]  ;;  %v6421_v43 = vmul.bf16 %v13233_v8, %v6229_v48  ;;  %v6228_v35 = vpack.c.bf16 %v13140_v32, %v13122_v17 }
 0x510   : > { %v13222_v14 = vpop.f32.mrf.mxu0  ;;  %8870 = vmatprep.subr.bf16.mxu1 %v6470_v7  ;;  %v14558_v54 = vpack.c.bf16 %v14556_v24, %v14557_v42  ;;  %v14561_v2 = vld [vmem:[#allocation144_spill] sm:$0xff]  ;;  %v14565_v27 = vld [vmem:[#allocation106_spill] sm:$0xff]  ;;  %v6220_v32 = vpack.c.bf16 %v12967_v62, %v12942_v57  ;;  %v14567_v62 = vld [vmem:[#allocation129_spill] sm:$0xff] }
 0x511   : > { %v6276_v46 = vpack.c.bf16 %v14561_v2, %v14560_v53  ;;  %v14562_v7 = vld [vmem:[#allocation128_spill] sm:$0xff]  ;;  %v13247_v42 = vld [vmem:[%s14138_s5 + $0x2a8] sm:$0xff]   ;;  %v14568_v57 = vld [vmem:[#allocation127_spill] sm:$0xff] }
 0x512   : > { %v6469_v63 = vmul.bf16 %v14559_v20, %v14558_v54  ;;  %v13238_v59 = vpop.f32.mrf.mxu0  ;;  %8805 = vmatpush3.bf16.msra.mxu0 %v6414_v58  ;;  %8871 = vmatpush3.bf16.msra.mxu1 %v6462_v29  ;;  %v14564_v49 = vpack.c.bf16 %v14562_v7, %v14563_v55  ;;  %v6413_v48 = vmul.bf16 %v13247_v42, %v6221_v9  ;;  %v14566_v29 = vld [vmem:[#allocation108_spill] sm:$0xff]  ;;  %v14570_v2 = vld [vmem:[#allocation110_spill] sm:$0xff] }
 0x513   : > { %8806 = vmatprep.subr.bf16.mxu0 %v6421_v43  ;;  %v6468_v58 = vmul.bf16 %v14566_v29, %v6276_v46  ;;  %v6227_v54 = vpack.c.bf16 %v13092_v23, %v13072_v50  ;;  %v13260_v20 = vld [vmem:[%s14138_s5 + $0x2e0] sm:$0xff]   ;;  %v14569_v9 = vpack.c.bf16 %v14567_v62, %v14568_v57  ;;  %v6226_v29 = vpack.c.bf16 %v13102_v19, %v13082_v4 }
 0x514   : > { %8872 = vmatprep.subr.bf16.mxu1 %v6469_v63  ;;  %v6461_v24 = vmul.bf16 %v14565_v27, %v14564_v49  ;;  %v13252_v17 = vpop.f32.mrf.mxu0  ;;  %v6420_v63 = vmul.bf16 %v13260_v20, %v6228_v35  ;;  %v13272_v50 = vld [vmem:[%s14138_s5 + $0x2a0] sm:$0xff]   ;;  %v14572_v35 = vld [vmem:[#allocation138_spill] sm:$0xff]  ;;  %v14580_v19 = vpack.c.bf16 %v12897_v60, %v12873_v0 }
 0x515   : > { %v6460_v46 = vmul.bf16 %v14570_v2, %v14569_v9  ;;  %v6412_v23 = vmul.bf16 %v13272_v50, %v6220_v32  ;;  %v14573_v7 = vld [vmem:[#allocation136_spill] sm:$0xff]  ;;  %v14577_v62 = vld [vmem:[#allocation117_spill] sm:$0xff]  ;;  %v14579_v9 = vld [vmem:[#allocation114_spill] sm:$0xff] }
 0x516   : > { %v13263_v53 = vpop.f32.mrf.mxu0  ;;  %8807 = vmatpush3.bf16.msra.mxu0 %v6413_v48  ;;  %8873 = vmatpush3.bf16.msra.mxu1 %v6461_v24  ;;  %v14574_v55 = vpack.c.bf16 %v14572_v35, %v14573_v7  ;;  %v14575_v49 = vld [vmem:[#allocation112_spill] sm:$0xff]  ;;  %v14583_v35 = vld [vmem:[#allocation137_spill] sm:$0xff] }
 0x517   : > { %8808 = vmatprep.subr.bf16.mxu0 %v6420_v63  ;;  %8874 = vmatprep.subr.bf16.mxu1 %v6468_v58  ;;  %v13284_v24 = vld [vmem:[%s14138_s5 + $0x2d8] sm:$0xff]   ;;  %v14576_v63 = vld [vmem:[#allocation121_spill] sm:$0xff] }
 0x518   : > { %v13275_v43 = vpop.f32.mrf.mxu0  ;;  %v6467_v27 = vmul.bf16 %v14575_v49, %v14574_v55  ;;  %v6419_v48 = vmul.bf16 %v13284_v24, %v6227_v54  ;;  %v14578_v57 = vpack.c.bf16 %v14576_v63, %v14577_v62  ;;  %v13300_v54 = vld [vmem:[%s14138_s5 + $0x298] sm:$0xff]  }
 0x519   : > { %14571 = vst [vmem:[#allocation57_spill] sm:$0xff] %v13275_v43  ;;  %v6411_v4 = vmul.bf16 %v13300_v54, %v14580_v19  ;;  %v14585_v55 = vld [vmem:[#allocation116_spill] sm:$0xff]  ;;  %v14586_v62 = vld [vmem:[#allocation123_spill] sm:$0xff] }
 0x51a   : > { %v13289_v58 = vpop.f32.mrf.mxu0  ;;  %8809 = vmatpush3.bf16.msra.mxu0 %v6412_v23  ;;  %8875 = vmatpush3.bf16.msra.mxu1 %v6460_v46  ;;  %v6459_v2 = vmul.bf16 %v14579_v9, %v14578_v57  ;;  %v14582_v23 = vld [vmem:[#allocation139_spill] sm:$0xff]  ;;  %v14615_v32 = vld [vmem:[#allocation52_spill] sm:$0xff] }
 0x51b   : > { %8810 = vmatprep.subr.bf16.mxu0 %v6419_v48  ;;  %8876 = vmatprep.subr.bf16.mxu1 %v6467_v27  ;;  %v14584_v7 = vpack.c.bf16 %v14582_v23, %v14583_v35  ;;  %v6225_v27 = vpack.c.bf16 %v13052_v22, %v13029_v1  ;;  %v13317_v48 = vld [vmem:[%s14138_s5 + $0x2d0] sm:$0xff]  }
 0x51c   : > { %v13306_v46 = vpop.f32.mrf.mxu0  ;;  %v6418_v63 = vmul.bf16 %v13317_v48, %v6226_v29  ;;  %v14587_v57 = vld [vmem:[#allocation119_spill] sm:$0xff]  ;;  %v14589_v1 = vld [vmem:[#allocation118_spill] sm:$0xff]  ;;  %v14590_v29 = vpack.c.bf16 %v12911_v26, %v12887_v41 }
 0x51d   : > { %14581 = vst [vmem:[#allocation20_spill] sm:$0xff] %v13306_v46  ;;  %v6466_v49 = vmul.bf16 %v14585_v55, %v14584_v7  ;;  %v14588_v9 = vpack.c.bf16 %v14586_v62, %v14587_v57  ;;  %v13331_v19 = vld [vmem:[%s14138_s5 + $0x290] sm:$0xff]   ;;  %v14594_v55 = vld [vmem:[#allocation120_spill] sm:$0xff]  ;;  %v6224_v57 = vpack.c.bf16 %v13062_v16, %v13039_v39  ;;  %v14599_v39 = vpack.c.bf16 %v12845_v47, %v12821_v51 }
 0x51e   : > { %v13322_v0 = vpop.f32.mrf.mxu0  ;;  %8811 = vmatpush3.bf16.msra.mxu0 %v6411_v4  ;;  %8877 = vmatpush3.bf16.msra.mxu1 %v6459_v2  ;;  %v6410_v23 = vmul.bf16 %v13331_v19, %v14590_v29  ;;  %v14591_v2 = vld [vmem:[#allocation134_spill] sm:$0xff]  ;;  %v14592_v4 = vld [vmem:[#allocation132_spill] sm:$0xff] }
 0x51f   : > { %8812 = vmatprep.subr.bf16.mxu0 %v6418_v63  ;;  %8878 = vmatprep.subr.bf16.mxu1 %v6466_v49  ;;  %v6458_v22 = vmul.bf16 %v14589_v1, %v14588_v9  ;;  %v14593_v7 = vpack.c.bf16 %v14591_v2, %v14592_v4  ;;  %v13346_v63 = vld [vmem:[%s14138_s5 + $0x2c8] sm:$0xff]   ;;  %v14616_v51 = vld [vmem:[#allocation32_spill] sm:$0xff] }
 0x520   : > { %v13337_v35 = vpop.f32.mrf.mxu0  ;;  %v6417_v62 = vmul.bf16 %v13346_v63, %v6225_v27  ;;  %v14595_v9 = vld [vmem:[#allocation113_spill] sm:$0xff]  ;;  %v14598_v2 = vld [vmem:[#allocation122_spill] sm:$0xff]  ;;  %v6530_v26 = vpack.c.bf16 %v14616_v51, %v14615_v32  ;;  %v6302_v32 = vpack.c.bf16 %v13070_v38, %v13050_v30  ;;  %v14627_v38 = vld [vmem:[#allocation92_spill] sm:$0xff] }
 0x521   : > { %v6465_v49 = vmul.bf16 %v14594_v55, %v14593_v7  ;;  %v14596_v1 = vld [vmem:[#allocation109_spill] sm:$0xff]  ;;  %v14622_v51 = vld [vmem:[#allocation42_spill] sm:$0xff] }
 0x522   : > { %v13351_v41 = vpop.f32.mrf.mxu0  ;;  %8813 = vmatpush3.bf16.msra.mxu0 %v6410_v23  ;;  %8879 = vmatpush3.bf16.msra.mxu1 %v6458_v22  ;;  %v14597_v29 = vpack.c.bf16 %v14595_v9, %v14596_v1  ;;  %v13362_v27 = vld [vmem:[%s14138_s5 + $0x288] sm:$0xff]   ;;  %v14600_v23 = vld [vmem:[#allocation135_spill] sm:$0xff]  ;;  %v13377_v9 = vld [vmem:[%s14138_s5 + $0x2c0] sm:$0xff]  }
 0x523   : > { %8814 = vmatprep.subr.bf16.mxu0 %v6417_v62  ;;  %8880 = vmatprep.subr.bf16.mxu1 %v6465_v49  ;;  %v6409_v16 = vmul.bf16 %v13362_v27, %v14599_v39  ;;  %v14601_v7 = vld [vmem:[#allocation133_spill] sm:$0xff]  ;;  %v14603_v49 = vld [vmem:[#allocation124_spill] sm:$0xff]  ;;  %v6416_v1 = vmul.bf16 %v13377_v9, %v6224_v57  ;;  %v14605_v39 = vld [vmem:[#allocation111_spill] sm:$0xff] }
 0x524   : > { %v6457_v4 = vmul.bf16 %v14598_v2, %v14597_v29  ;;  %v13368_v22 = vpop.f32.mrf.mxu0  ;;  %v14602_v55 = vpack.c.bf16 %v14600_v23, %v14601_v7  ;;  %v6311_v29 = vpack.c.bf16 %v13238_v59, %v13208_v12  ;;  %v14604_v2 = vld [vmem:[#allocation115_spill] sm:$0xff]  ;;  %v14607_v7 = vld [vmem:[#allocation126_spill] sm:$0xff]  ;;  %v13393_v57 = vld [vmem:[%s14138_s5 + $0x280] sm:$0xff]   ;;  %v14609_v12 = vpack.c.bf16 %v12857_v37, %v12833_v40 }
 0x525   : > { %v14606_v23 = vpack.c.bf16 %v14604_v2, %v14605_v39  ;;  %14608 = vst [vmem:[#allocation75_spill] sm:$0xff] %v13393_v57  ;;  %v6303_v39 = vpack.c.bf16 %v13060_v13, %v13037_v11  ;;  %v6310_v37 = vpack.c.bf16 %v13252_v17, %v13222_v14  ;;  %v9766_v11 = vld [vmem:[%s14138_s5 + $0xb8] sm:$0xff]   ;;  %v14618_v13 = vld [vmem:[#allocation89_spill] sm:$0xff]  ;;  %v9768_v30 = vld [vmem:[%s14138_s5 + $0xb0] sm:$0xff]  }
 0x526   : > { %v6464_v62 = vmul.bf16 %v14603_v49, %v14602_v55  ;;  %v13384_v47 = vpop.f32.mrf.mxu0  ;;  %8815 = vmatpush3.bf16.msra.mxu0 %v6409_v16  ;;  %8881 = vmatpush3.bf16.msra.mxu1 %v6457_v4  ;;  %v6408_v59 = vmul.bf16 %v13393_v57, %v14609_v12  ;;  %v9765_v4 = vld [vmem:[%s14138_s5 + $0xf8] sm:$0xff]   ;;  %v14610_v16 = vld [vmem:[#allocation105_spill] sm:$0xff] }
 0x527   : > { %8816 = vmatprep.subr.bf16.mxu0 %v6416_v1  ;;  %v6456_v55 = vmul.bf16 %v14607_v7, %v14606_v23  ;;  %v6503_v23 = vmul.bf16 %v12808_v56, %v6311_v29  ;;  %v14613_v7 = vld [vmem:[#allocation25_spill] sm:$0xff]  ;;  %v14617_v56 = vld [vmem:[#allocation91_spill] sm:$0xff] }
 0x528   : > { %8882 = vmatprep.subr.bf16.mxu1 %v6464_v62  ;;  %v13399_v49 = vpop.f32.mrf.mxu0  ;;  %v14611_v62 = vld [vmem:[#allocation11_spill] sm:$0xff]  ;;  %v14614_v12 = vld [vmem:[#allocation29_spill] sm:$0xff]  ;;  %v14619_v29 = vpack.c.bf16 %v14617_v56, %v14618_v13  ;;  %v6309_v56 = vpack.c.bf16 %v13174_v28, %v13156_v25 }
 0x529   : > { %v14612_v1 = vpack.c.bf16 %v14610_v16, %v14611_v62  ;;  %v6536_v60 = vpack.c.bf16 %v14614_v12, %v14613_v7  ;;  %v6495_v16 = vmul.bf16 %v12814_v3, %v6303_v39  ;;  %v14623_v62 = vld [vmem:[#allocation51_spill] sm:$0xff]  ;;  %v6502_v3 = vmul.bf16 %v12828_v33, %v6310_v37  ;;  %v9769_v33 = vld [vmem:[%s14138_s5 + $0xe8] sm:$0xff]  }
 0x52a   : > { %v13412_v40 = vpop.f32.mrf.mxu0  ;;  %8817 = vmatpush3.bf16.msra.mxu0 %v6408_v59  ;;  %8883 = vmatpush3.bf16.msra.mxu1 %v6456_v55  ;;  %v6447_v14 = vmul.bf16 %v9766_v11, %v14619_v29  ;;  %v14620_v59 = vld [vmem:[#allocation41_spill] sm:$0xff]  ;;  %v14621_v55 = vld [vmem:[#allocation50_spill] sm:$0xff]  ;;  %v14625_v7 = vld [vmem:[#allocation103_spill] sm:$0xff] }
 0x52b   : > { %v6455_v2 = vmul.bf16 %v9765_v4, %v14612_v1  ;;  %8912 = vmatprep.subr.bf16.mxu1 %v6503_v23  ;;  %v6535_v4 = vpack.c.bf16 %v14621_v55, %v14620_v59  ;;  %v6541_v1 = vpack.c.bf16 %v14623_v62, %v14622_v51  ;;  %v14624_v23 = vld [vmem:[#allocation107_spill] sm:$0xff]  ;;  %v14630_v25 = vld [vmem:[#allocation101_spill] sm:$0xff]  ;;  %v6301_v59 = vpack.c.bf16 %v13015_v18, %v12992_v45 }
 0x52c   : > { %v13424_v17 = vpop.f32.mrf.mxu0  ;;  %v14626_v12 = vpack.c.bf16 %v14624_v23, %v14625_v7  ;;  %v14631_v28 = vld [vmem:[#allocation15_spill] sm:$0xff]  ;;  %v6494_v55 = vmul.bf16 %v12840_v34, %v6302_v32  ;;  %v9770_v62 = vld [vmem:[%s14138_s5 + $0xa8] sm:$0xff]   ;;  %v9771_v34 = vld [vmem:[%s14138_s5 + $0xe0] sm:$0xff]  }
 0x52d   : > { %8846 = vmatprep.subr.bf16.mxu0 %v6455_v2  ;;  %6782 = vmatmul.mubr.bf16.vlgmr.msra.gmra.mxu0 %v6530_v26  ;;  %v9767_v2 = vld [vmem:[%s14138_s5 + $0xf0] sm:$0xff]   ;;  %v14632_v37 = vpack.c.bf16 %v14630_v25, %v14631_v28  ;;  %v6493_v7 = vmul.bf16 %v12866_v5, %v6301_v59 }
 0x52e   : > { %6905 = vmatmul.mubr.bf16.vlgmr.msra.gmra.mxu1 %v6536_v60  ;;  %v6454_v11 = vmul.bf16 %v9767_v2, %v14626_v12  ;;  %v13442_v39 = vpop.f32.mrf.mxu0  ;;  %8847 = vmatpush3.bf16.msra.mxu0 %v6447_v14  ;;  %v14628_v60 = vld [vmem:[#allocation90_spill] sm:$0xff]  ;;  %v14634_v2 = vld [vmem:[#allocation85_spill] sm:$0xff]  ;;  %v6300_v12 = vpack.c.bf16 %v13027_v21, %v13005_v36  ;;  %v9773_v21 = vld [vmem:[%s14138_s5 + $0xd8] sm:$0xff]  }
 0x52f   : > { %6863 = vmatprep.mubr.bf16.mxu0 %v6535_v4  ;;  %8913 = vmatpush3.bf16.msra.mxu1 %v6495_v16  ;;  %v14629_v26 = vpack.c.bf16 %v14627_v38, %v14628_v60  ;;  %v6453_v14 = vmul.bf16 %v9769_v33, %v14632_v37  ;;  %v6501_v4 = vmul.bf16 %v12850_v61, %v6309_v56  ;;  %v14636_v61 = vld [vmem:[#allocation23_spill] sm:$0xff]  ;;  %v14640_v56 = vld [vmem:[#allocation58_spill] sm:$0xff]  ;;  %v14646_v37 = vld [vmem:[#allocation97_spill] sm:$0xff] }
 0x530   : > { %6986 = vmatprep.mubr.bf16.mxu1 %v6541_v1  ;;  %v13450_v29 = vpop.f32.mrf.mxu0  ;;  %8848 = vmatprep.subr.bf16.mxu0 %v6454_v11  ;;  %v6308_v16 = vpack.c.bf16 %v13196_v15, %v13166_v6  ;;  %v14633_v1 = vld [vmem:[#allocation87_spill] sm:$0xff]  ;;  %v14637_v6 = vld [vmem:[#allocation16_spill] sm:$0xff]  ;;  %v14639_v11 = vld [vmem:[#allocation62_spill] sm:$0xff] }
 0x531   : > { %v6446_v13 = vmul.bf16 %v9768_v30, %v14629_v26  ;;  %8914 = vmatprep.subr.bf16.mxu1 %v6502_v3  ;;  %v14635_v23 = vpack.c.bf16 %v14633_v1, %v14634_v2  ;;  %v14638_v15 = vpack.c.bf16 %v14636_v61, %v14637_v6  ;;  %v6307_v3 = vpack.c.bf16 %v14640_v56, %v14639_v11  ;;  %v14641_v30 = vld [vmem:[#allocation188_spill] sm:$0xff]  ;;  %v14643_v33 = vld [vmem:[#allocation86_spill] sm:$0xff]  ;;  %v14645_v36 = vld [vmem:[#allocation99_spill] sm:$0xff] }
 0x532   : > { %v13464_v51 = vpop.f32.mrf.mxu0  ;;  %v6500_v38 = vmul.bf16 %v14641_v30, %v6308_v16  ;;  %v9772_v26 = vld [vmem:[%s14138_s5 + $0xa0] sm:$0xff]   ;;  %v14650_v1 = vld [vmem:[#allocation63_spill] sm:$0xff]  ;;  %v14656_v56 = vld [vmem:[#allocation98_spill] sm:$0xff] }
 0x533   : > { %8849 = vmatpush3.bf16.msra.mxu0 %v6446_v13  ;;  %8915 = vmatpush3.bf16.msra.mxu1 %v6494_v55  ;;  %v6445_v45 = vmul.bf16 %v9770_v62, %v14635_v23  ;;  %v6452_v32 = vmul.bf16 %v9771_v34, %v14638_v15  ;;  %v14642_v13 = vld [vmem:[#allocation88_spill] sm:$0xff]  ;;  %v14648_v55 = vld [vmem:[#allocation190_spill] sm:$0xff]  ;;  %v14651_v2 = vld [vmem:[#allocation19_spill] sm:$0xff] }
 0x534   : > { %8850 = vmatprep.subr.bf16.mxu0 %v6453_v14  ;;  %v13472_v18 = vpop.f32.mrf.mxu0  ;;  %8916 = vmatprep.subr.bf16.mxu1 %v6501_v4  ;;  %v14644_v5 = vpack.c.bf16 %v14642_v13, %v14643_v33  ;;  %v14647_v14 = vpack.c.bf16 %v14645_v36, %v14646_v37  ;;  %v6492_v4 = vmul.bf16 %v14648_v55, %v6300_v12  ;;  %v14649_v16 = vld [vmem:[#allocation192_spill] sm:$0xff]  ;;  %v14652_v61 = vld [vmem:[#allocation83_spill] sm:$0xff]  ;;  %v14653_v6 = vld [vmem:[#allocation81_spill] sm:$0xff] }
 0x535   : > { %v6499_v62 = vmul.bf16 %v14649_v16, %v6307_v3  ;;  %v6306_v23 = vpack.c.bf16 %v14651_v2, %v14650_v1  ;;  %v9774_v34 = vld [vmem:[%s14138_s5 + $0x98] sm:$0xff]   ;;  %v14654_v15 = vpack.c.bf16 %v14652_v61, %v14653_v6  ;;  %v9775_v12 = vld [vmem:[%s14138_s5 + $0xd0] sm:$0xff]   ;;  %v14669_v61 = vld [vmem:[#allocation93_spill] sm:$0xff] }
 0x536   : > { %v13486_v60 = vpop.f32.mrf.mxu0  ;;  %v6444_v25 = vmul.bf16 %v9772_v26, %v14644_v5  ;;  %v6451_v59 = vmul.bf16 %v9773_v21, %v14647_v14  ;;  %v14655_v11 = vld [vmem:[#allocation100_spill] sm:$0xff]  ;;  %v14659_v26 = vld [vmem:[#allocation197_spill] sm:$0xff]  ;;  %v14661_v33 = vld [vmem:[#allocation194_spill] sm:$0xff] }
 0x537   : > { %8851 = vmatpush3.bf16.msra.mxu0 %v6445_v45  ;;  %8917 = vmatpush3.bf16.msra.mxu1 %v6493_v7  ;;  %v14657_v3 = vpack.c.bf16 %v14655_v11, %v14656_v56  ;;  %v14663_v21 = vld [vmem:[#allocation18_spill] sm:$0xff]  ;;  %v14664_v37 = vld [vmem:[#allocation196_spill] sm:$0xff] }
 0x538   : > { %8852 = vmatprep.subr.bf16.mxu0 %v6452_v32  ;;  %v13494_v28 = vpop.f32.mrf.mxu0  ;;  %8918 = vmatprep.subr.bf16.mxu1 %v6500_v38  ;;  %v6443_v32 = vmul.bf16 %v9774_v34, %v14654_v15  ;;  %v14658_v38 = vld [vmem:[#allocation201_spill] sm:$0xff]  ;;  %v6498_v14 = vmul.bf16 %v14664_v37, %v6306_v23  ;;  %v9776_v55 = vld [vmem:[%s14138_s5 + $0x90] sm:$0xff]  }
 0x539   : > { %v6450_v30 = vmul.bf16 %v9775_v12, %v14657_v3  ;;  %v14660_v13 = vpack.c.bf16 %v14658_v38, %v14659_v26  ;;  %v14666_v16 = vld [vmem:[#allocation82_spill] sm:$0xff]  ;;  %v14668_v34 = vld [vmem:[#allocation95_spill] sm:$0xff]  ;;  %v14676_v26 = vld [vmem:[#allocation64_spill] sm:$0xff] }
 0x53a   : > { %v13506_v45 = vpop.f32.mrf.mxu0  ;;  %v9777_v23 = vld [vmem:[%s14138_s5 + $0xc8] sm:$0xff]   ;;  %v14670_v6 = vpack.c.bf16 %v14668_v34, %v14669_v61  ;;  %v14672_v12 = vld [vmem:[#allocation199_spill] sm:$0xff] }
 0x53b   : > { %8853 = vmatpush3.bf16.msra.mxu0 %v6444_v25  ;;  %8919 = vmatpush3.bf16.msra.mxu1 %v6492_v4  ;;  %v6491_v5 = vmul.bf16 %v14661_v33, %v14660_v13  ;;  %v14662_v25 = vld [vmem:[#allocation61_spill] sm:$0xff]  ;;  %v14665_v4 = vld [vmem:[#allocation84_spill] sm:$0xff]  ;;  %v14674_v56 = vld [vmem:[#allocation198_spill] sm:$0xff] }
 0x53c   : > { %8854 = vmatprep.subr.bf16.mxu0 %v6451_v59  ;;  %v13514_v7 = vpop.f32.mrf.mxu0  ;;  %8920 = vmatprep.subr.bf16.mxu1 %v6499_v62  ;;  %v6305_v36 = vpack.c.bf16 %v14663_v21, %v14662_v25  ;;  %v14667_v62 = vpack.c.bf16 %v14665_v4, %v14666_v16  ;;  %v6449_v15 = vmul.bf16 %v9777_v23, %v14670_v6  ;;  %v14677_v13 = vld [vmem:[#allocation17_spill] sm:$0xff]  ;;  %v14678_v25 = vld [vmem:[#allocation79_spill] sm:$0xff]  ;;  %v14681_v4 = vld [vmem:[#allocation96_spill] sm:$0xff] }
 0x53d   : > { %v6304_v33 = vpack.c.bf16 %v14677_v13, %v14676_v26  ;;  %v14679_v21 = vld [vmem:[#allocation77_spill] sm:$0xff]  ;;  %v14682_v16 = vld [vmem:[#allocation94_spill] sm:$0xff] }
 0x53e   : > { %v13529_v59 = vpop.f32.mrf.mxu0  ;;  %v6442_v1 = vmul.bf16 %v9776_v55, %v14667_v62  ;;  %v14680_v37 = vpack.c.bf16 %v14678_v25, %v14679_v21  ;;  %v14683_v62 = vpack.c.bf16 %v14681_v4, %v14682_v16  ;;  %v14684_v23 = vld [vmem:[#allocation193_spill] sm:$0xff]  ;;  %v14687_v6 = vld [vmem:[#allocation202_spill] sm:$0xff]  ;;  %v14695_v21 = vld [vmem:[#allocation143_spill] sm:$0xff] }
 0x53f   : > { %8855 = vmatpush3.bf16.msra.mxu0 %v6443_v32  ;;  %8921 = vmatpush3.bf16.msra.mxu1 %v6491_v5  ;;  %v14671_v32 = vld [vmem:[#allocation203_spill] sm:$0xff]  ;;  %v9778_v5 = vld [vmem:[%s14138_s5 + $0x88] sm:$0xff]  }
 0x540   : > { %8856 = vmatprep.subr.bf16.mxu0 %v6450_v30  ;;  %v13537_v2 = vpop.f32.mrf.mxu0  ;;  %8922 = vmatprep.subr.bf16.mxu1 %v6498_v14  ;;  %v14673_v11 = vpack.c.bf16 %v14671_v32, %v14672_v12  ;;  %v14675_v30 = vld [vmem:[#allocation200_spill] sm:$0xff]  ;;  %v6441_v14 = vmul.bf16 %v9778_v5, %v14680_v37  ;;  %v14685_v34 = vld [vmem:[#allocation189_spill] sm:$0xff]  ;;  %v14692_v13 = vld [vmem:[#allocation186_spill] sm:$0xff] }
 0x541   : > { %v6497_v38 = vmul.bf16 %v14675_v30, %v6305_v36  ;;  %v9779_v36 = vld [vmem:[%s14138_s5 + $0xc0] sm:$0xff]   ;;  %v14686_v61 = vpack.c.bf16 %v14684_v23, %v14685_v34 }
 0x542   : > { %v6490_v3 = vmul.bf16 %v14674_v56, %v14673_v11  ;;  %v13558_v55 = vpop.f32.mrf.mxu0  ;;  %v14688_v32 = vld [vmem:[#allocation204_spill] sm:$0xff]  ;;  %v14699_v4 = vld [vmem:[#allocation205_spill] sm:$0xff] }
 0x543   : > { %8857 = vmatpush3.bf16.msra.mxu0 %v6442_v1  ;;  %v6448_v1 = vmul.bf16 %v9779_v36, %v14683_v62  ;;  %v6496_v12 = vmul.bf16 %v14688_v32, %v6304_v33  ;;  %v9780_v11 = vld [vmem:[%s14138_s5 + $0x80] sm:$0xff]   ;;  %v14696_v33 = vld [vmem:[#allocation195_spill] sm:$0xff] }
 0x544   : > { %8923 = vmatpush3.bf16.msra.mxu1 %v6490_v3  ;;  %8858 = vmatprep.subr.bf16.mxu0 %v6449_v15  ;;  %v6489_v15 = vmul.bf16 %v14687_v6, %v14686_v61  ;;  %v14689_v56 = vld [vmem:[#allocation80_spill] sm:$0xff]  ;;  %v14690_v3 = vld [vmem:[#allocation78_spill] sm:$0xff]  ;;  %v13577_v26 = vpop.f32.mrf.mxu0  ;;  %v14700_v62 = vld [vmem:[#allocation39_spill] sm:$0xff] }
 0x545   : > { %8924 = vmatprep.subr.bf16.mxu1 %v6497_v38  ;;  %v14691_v30 = vpack.c.bf16 %v14689_v56, %v14690_v3  ;;  %v14693_v5 = vld [vmem:[#allocation184_spill] sm:$0xff]  ;;  %v14703_v61 = vld [vmem:[#allocation49_spill] sm:$0xff]  ;;  %v14705_v32 = vld [vmem:[#allocation167_spill] sm:$0xff] }
 0x546   : > { %v14694_v25 = vpack.c.bf16 %v14692_v13, %v14693_v5  ;;  %v14702_v34 = vld [vmem:[#allocation40_spill] sm:$0xff]  ;;  %v9367_v3 = vpop.f32.mrf.mxu0  ;;  %v14709_v13 = vld [vmem:[#allocation185_spill] sm:$0xff] }
 0x547   : > { %8859 = vmatpush3.bf16.msra.mxu0 %v6441_v14  ;;  %v6440_v38 = vmul.bf16 %v9780_v11, %v14691_v30  ;;  %v14697_v14 = vld [vmem:[#allocation191_spill] sm:$0xff]  ;;  %v6540_v6 = vpack.c.bf16 %v14703_v61, %v14702_v34  ;;  %v14707_v11 = vld [vmem:[#allocation38_spill] sm:$0xff]  ;;  %v14720_v61 = vld [vmem:[#allocation180_spill] sm:$0xff] }
 0x548   : > { %8925 = vmatpush3.bf16.msra.mxu1 %v6489_v15  ;;  %8860 = vmatprep.subr.bf16.mxu0 %v6448_v1  ;;  %v6487_v37 = vmul.bf16 %v14695_v21, %v14694_v25  ;;  %v14698_v36 = vpack.c.bf16 %v14696_v33, %v14697_v14  ;;  %v14701_v1 = vld [vmem:[#allocation44_spill] sm:$0xff]  ;;  %v14704_v15 = vld [vmem:[#allocation170_spill] sm:$0xff]  ;;  %v14708_v30 = vld [vmem:[#allocation187_spill] sm:$0xff] }
 0x549   : > { %8926 = vmatprep.subr.bf16.mxu1 %v6496_v12  ;;  %v6534_v23 = vpack.c.bf16 %v14701_v1, %v14700_v62  ;;  %v14706_v12 = vpack.c.bf16 %v14704_v15, %v14705_v32  ;;  %v14710_v5 = vpack.c.bf16 %v14708_v30, %v14709_v13  ;;  %v14711_v25 = vld [vmem:[#allocation33_spill] sm:$0xff]  ;;  %v14713_v33 = vld [vmem:[#allocation60_spill] sm:$0xff]  ;;  %v14715_v14 = vld [vmem:[#allocation171_spill] sm:$0xff]  ;;  %v6105_v1 = vpop.f32.mrf.mxu0 }
 0x54a   : > { %v6488_v16 = vmul.bf16 %v14699_v4, %v14698_v36  ;;  %v14716_v36 = vld [vmem:[#allocation168_spill] sm:$0xff]  ;;  %v14719_v34 = vld [vmem:[#allocation182_spill] sm:$0xff] }
 0x54b   : > { %8861 = vmatpush3.bf16.msra.mxu0 %v6440_v38  ;;  %v6479_v56 = vmul.bf16 %v14707_v11, %v14706_v12  ;;  %v6486_v21 = vmul.bf16 %v14711_v25, %v14710_v5  ;;  %v14712_v38 = vld [vmem:[#allocation66_spill] sm:$0xff]  ;;  %v14717_v4 = vpack.c.bf16 %v14715_v14, %v14716_v36  ;;  %v14721_v15 = vpack.c.bf16 %v14719_v34, %v14720_v61  ;;  %v14727_v13 = vld [vmem:[#allocation160_spill] sm:$0xff] }
 0x54c   : > { %8927 = vmatpush3.bf16.msra.mxu1 %v6488_v16  ;;  %8890 = vmatprep.subr.bf16.mxu0 %v6487_v37  ;;  %v14714_v37 = vpack.c.bf16 %v14712_v38, %v14713_v33  ;;  %v14718_v16 = vld [vmem:[#allocation145_spill] sm:$0xff]  ;;  %v14722_v32 = vld [vmem:[#allocation146_spill] sm:$0xff]  ;;  %v14728_v5 = vld [vmem:[#allocation164_spill] sm:$0xff] }
 0x54d   : > { %v6478_v62 = vmul.bf16 %v14718_v16, %v14717_v4  ;;  %v6485_v12 = vmul.bf16 %v14722_v32, %v14721_v15  ;;  %v6284_v25 = vpack.c.bf16 %v14728_v5, %v14727_v13  ;;  %v14729_v38 = vld [vmem:[#allocation183_spill] sm:$0xff]  ;;  %v14730_v33 = vld [vmem:[#allocation181_spill] sm:$0xff]  ;;  %v14732_v14 = vld [vmem:[#allocation150_spill] sm:$0xff] }
 0x54e   : > { %6864 = vmatmul.mubr.bf16.vlgmr.msra.gmra.mxu0 %v6534_v23  ;;  %v14723_v23 = vld [vmem:[#allocation163_spill] sm:$0xff]  ;;  %v14733_v4 = vld [vmem:[#allocation153_spill] sm:$0xff]  ;;  %v14734_v34 = vld [vmem:[#allocation178_spill] sm:$0xff] }
 0x54f   : > { %6987 = vmatmul.mubr.bf16.vlgmr.msra.gmra.mxu1 %v6540_v6  ;;  %8891 = vmatpush3.bf16.msra.mxu0 %v6479_v56  ;;  %v14724_v6 = vld [vmem:[#allocation159_spill] sm:$0xff]  ;;  %v14726_v56 = vld [vmem:[#allocation149_spill] sm:$0xff]  ;;  %v6476_v16 = vmul.bf16 %v14733_v4, %v6284_v25  ;;  %v14735_v61 = vld [vmem:[#allocation176_spill] sm:$0xff] }
 0x550   : > { %6945 = vmatprep.mubr.bf16.mxu0 %v14714_v37  ;;  %8892 = vmatprep.subr.bf16.mxu0 %v6486_v21  ;;  %v14725_v11 = vpack.c.bf16 %v14723_v23, %v14724_v6  ;;  %v9368_v21 = vpop.f32.mrf.mxu0  ;;  %v14731_v37 = vpack.c.bf16 %v14729_v38, %v14730_v33  ;;  %v14736_v15 = vpack.c.bf16 %v14734_v34, %v14735_v61  ;;  %v14737_v32 = vld [vmem:[#allocation154_spill] sm:$0xff]  ;;  %v14738_v23 = vld [vmem:[#allocation155_spill] sm:$0xff]  ;;  %v14742_v5 = vld [vmem:[#allocation152_spill] sm:$0xff] }
 0x551   : > { %v14739_v6 = vld [vmem:[#allocation151_spill] sm:$0xff]  ;;  %v14743_v38 = vld [vmem:[#allocation156_spill] sm:$0xff]  ;;  %v14748_v34 = vld [vmem:[#allocation161_spill] sm:$0xff] }
 0x552   : > { %v6477_v30 = vmul.bf16 %v14726_v56, %v14725_v11  ;;  %v6484_v36 = vmul.bf16 %v14732_v14, %v14731_v37  ;;  %v14740_v11 = vpack.c.bf16 %v14738_v23, %v14739_v6  ;;  %v14741_v56 = vld [vmem:[#allocation157_spill] sm:$0xff]  ;;  %v6282_v33 = vpack.c.bf16 %v14743_v38, %v14742_v5  ;;  %v14744_v37 = vld [vmem:[#allocation179_spill] sm:$0xff]  ;;  %v14752_v23 = vld [vmem:[#allocation162_spill] sm:$0xff] }
 0x553   : > { %8893 = vmatpush3.bf16.msra.mxu0 %v6478_v62  ;;  %v6108_v62 = vpop.f32.mrf.mxu0  ;;  %v14745_v14 = vld [vmem:[#allocation177_spill] sm:$0xff] }
 0x554   : > { %8894 = vmatprep.subr.bf16.mxu0 %v6485_v12  ;;  %v6483_v12 = vmul.bf16 %v14737_v32, %v14736_v15  ;;  %v6475_v13 = vmul.bf16 %v14741_v56, %v14740_v11  ;;  %v14746_v25 = vpack.c.bf16 %v14744_v37, %v14745_v14  ;;  %v6474_v61 = vmul.bf16 %v14748_v34, %v6282_v33  ;;  %v14749_v15 = vld [vmem:[#allocation174_spill] sm:$0xff]  ;;  %v14750_v32 = vld [vmem:[#allocation172_spill] sm:$0xff]  ;;  %v14753_v11 = vld [vmem:[#allocation147_spill] sm:$0xff] }
 0x555   : > { %v14754_v56 = vld [vmem:[#allocation31_spill] sm:$0xff]  ;;  %v14756_v38 = vld [vmem:[#allocation165_spill] sm:$0xff]  ;;  %v14758_v14 = vld [vmem:[#allocation148_spill] sm:$0xff] }
 0x556   : > { %v14755_v5 = vpack.c.bf16 %v14753_v11, %v14754_v56  ;;  %v14757_v37 = vld [vmem:[#allocation35_spill] sm:$0xff]  ;;  %v14762_v34 = vld [vmem:[#allocation166_spill] sm:$0xff] }
 0x557   : > { %8895 = vmatpush3.bf16.msra.mxu0 %v6477_v30  ;;  %v9371_v30 = vpop.f32.mrf.mxu0  ;;  %v14764_v11 = vld [vmem:[#allocation34_spill] sm:$0xff] }
 0x558   : > { %8896 = vmatprep.subr.bf16.mxu0 %v6484_v36  ;;  %v14747_v36 = vld [vmem:[#allocation158_spill] sm:$0xff]  ;;  %v6473_v57 = vmul.bf16 %v14756_v38, %v14755_v5 }
 0x559   : > { %v6482_v4 = vmul.bf16 %v14747_v36, %v14746_v25  ;;  %v6280_v25 = vpack.c.bf16 %v14758_v14, %v14757_v37  ;;  %v14759_v36 = vld [vmem:[#allocation175_spill] sm:$0xff]  ;;  %v14765_v56 = vld [vmem:[#allocation46_spill] sm:$0xff] }
 0x55a   : > { %v6538_v5 = vpack.c.bf16 %v14765_v56, %v14764_v11  ;;  %v14779_v11 = vld [vmem:[#allocation72_spill] sm:$0xff] }
 0x55b   : > { %8897 = vmatpush3.bf16.msra.mxu0 %v6476_v16  ;;  %v6121_v16 = vpop.f32.mrf.mxu0 }
 0x55c   : > { %8898 = vmatprep.subr.bf16.mxu0 %v6483_v12  ;;  %v14751_v12 = vpack.c.bf16 %v14749_v15, %v14750_v32  ;;  %v14763_v15 = vld [vmem:[#allocation169_spill] sm:$0xff]  ;;  %v6319_v32 = vpack.c.bf16 %v13464_v51, %v13442_v39  ;;  %v14766_v39 = vld [vmem:[#allocation28_spill] sm:$0xff] }
 0x55d   : > { %v14767_v51 = vld [vmem:[#allocation21_spill] sm:$0xff] }
 0x55e   : > { %v6481_v6 = vmul.bf16 %v14752_v23, %v14751_v12  ;;  %v6511_v38 = vmul.bf16 %v13191_v52, %v6319_v32  ;;  %v14768_v37 = vpack.c.bf16 %v14766_v39, %v14767_v51 }
 0x55f   : > { %8899 = vmatpush3.bf16.msra.mxu0 %v6475_v13  ;;  %v9372_v13 = vpop.f32.mrf.mxu0 }
 0x560   : > { %8900 = vmatprep.subr.bf16.mxu0 %v6482_v4  ;;  %v14760_v4 = vld [vmem:[#allocation173_spill] sm:$0xff]  ;;  %v6327_v46 = vpack.c.bf16 %v9372_v13, %v9371_v30 }
 0x561   : > { %v14761_v33 = vpack.c.bf16 %v14759_v36, %v14760_v4  ;;  %v6124_v12 = vpop.f32.mrf.mxu0 }
 0x562   : > { %v6519_v23 = vmul.bf16 %v13181_v31, %v6327_v46  ;;  %v6317_v31 = vpack.c.bf16 %v13412_v40, %v13384_v47  ;;  %v6321_v40 = vpack.c.bf16 %v13506_v45, %v13486_v60  ;;  %v14776_v60 = vld [vmem:[#allocation36_spill] sm:$0xff] }
 0x563   : > { %8901 = vmatpush3.bf16.msra.mxu0 %v6474_v61  ;;  %v6480_v43 = vmul.bf16 %v14762_v34, %v14761_v33  ;;  %v6472_v61 = vmul.bf16 %v14763_v15, %v6280_v25 }
 0x564   : > { %8902 = vmatprep.subr.bf16.mxu0 %v6481_v6  ;;  %v6326_v6 = vpack.c.bf16 %v6124_v12, %v6121_v16  ;;  %v6324_v16 = vpack.c.bf16 %v6108_v62, %v6105_v1  ;;  %v9606_v62 = vld [vmem:[%s9977_s3] sm:$0xff]  }
 0x566   : > { %v6518_v30 = vmul.bf16 %v13202_v10, %v6326_v6  ;;  %v6316_v10 = vpack.c.bf16 %v13424_v17, %v13399_v49  ;;  %v6513_v17 = vmul.bf16 %v13346_v63, %v6321_v40  ;;  %v14775_v63 = vld [vmem:[#allocation75_spill] sm:$0xff] }
 0x567   : > { %8903 = vmatpush3.bf16.msra.mxu0 %v6473_v57  ;;  %v6318_v57 = vpack.c.bf16 %v13472_v18, %v13450_v29  ;;  %v6509_v29 = vmul.bf16 %v13247_v42, %v6317_v31  ;;  %v6323_v18 = vpack.c.bf16 %v13558_v55, %v13529_v59  ;;  %v14769_v42 = vpack.c.bf16 %v13351_v41, %v13322_v0 }
 0x568   : > { %8904 = vmatprep.subr.bf16.mxu0 %v6480_v43  ;;  %v6325_v43 = vpack.c.bf16 %v9368_v21, %v9367_v3  ;;  %v6516_v3 = vmul.bf16 %v13260_v20, %v6324_v16  ;;  %v6508_v47 = vmul.bf16 %v13272_v50, %v6316_v10  ;;  %v14770_v50 = vpack.c.bf16 %v13368_v22, %v13337_v35  ;;  %v14772_v35 = vld [vmem:[#allocation20_spill] sm:$0xff]  ;;  %v9605_v21 = vld [vmem:[%s9977_s3 + $0x8] sm:$0xff]  }
 0x569   : > { %v6510_v46 = vmul.bf16 %v13219_v44, %v6318_v57  ;;  %v6515_v44 = vmul.bf16 %v13284_v24, %v6323_v18  ;;  %v6507_v49 = vmul.bf16 %v13300_v54, %v14769_v42  ;;  %v6320_v59 = vpack.c.bf16 %v13514_v7, %v13494_v28  ;;  %v14777_v28 = vld [vmem:[#allocation54_spill] sm:$0xff]  ;;  %v8708_v7 = vpop.f32.mrf.mxu1  ;;  %9373 = vmatprep.subr.bf16.mxu1 %v9605_v21 }
 0x56a   : > { %v6517_v52 = vmul.bf16 %v13233_v8, %v6325_v43  ;;  %v6322_v8 = vpack.c.bf16 %v13577_v26, %v13537_v2  ;;  %v6506_v24 = vmul.bf16 %v13331_v19, %v14770_v50  ;;  %v14771_v54 = vpack.c.bf16 %v13289_v58, %v13263_v53  ;;  %v14773_v19 = vld [vmem:[#allocation57_spill] sm:$0xff]  ;;  %v8730_v2 = vpop.f32.mrf.mxu0  ;;  %9374 = vmatpush3.bf16.msra.mxu1 %v9605_v21 }
 0x56b   : > { %8905 = vmatpush3.bf16.msra.mxu0 %v6472_v61  ;;  %v14774_v41 = vpack.c.bf16 %v14772_v35, %v14773_v19  ;;  %v6542_v45 = vpack.c.bf16 %v14777_v28, %v14776_v60  ;;  %v8709_v53 = vpop.f32.mrf.mxu1  ;;  %9375 = vmatprep.subr.bf16.mxu1 %v9606_v62 }
 0x56c   : > { %8934 = vmatprep.subr.bf16.mxu0 %v6519_v23  ;;  %v6514_v20 = vmul.bf16 %v13317_v48, %v6322_v8  ;;  %v6505_v0 = vmul.bf16 %v13362_v27, %v14771_v54  ;;  %v6512_v48 = vmul.bf16 %v13377_v9, %v6320_v59  ;;  %v8731_v55 = vpop.f32.mrf.mxu0  ;;  %v8710_v32 = vadd.f32 %v8709_v53, %v8708_v7  ;;  %v14778_v23 = vld [vmem:[#allocation65_spill] sm:$0xff] }
 0x56d   : > { %v6504_v22 = vmul.bf16 %v14775_v63, %v14774_v41  ;;  %v8711_v58 = vpop.f32.mrf.mxu1  ;;  %v8732_v15 = vadd.f32 %v8731_v55, %v8730_v2  ;;  %9629 = vrcp.f32 %v14778_v23 }
 0x56e   : > { %6946 = vmatmul.mubr.bf16.vlgmr.msra.gmra.mxu0 %v6538_v5  ;;  %v8733_v1 = vpop.f32.mrf.mxu0  ;;  %9376 = vmatpush3.bf16.msra.mxu1 %v9606_v62  ;;  %9631 = vrcp.f32 %v14779_v11 }
 0x56f   : > { %8935 = vmatpush3.bf16.msra.mxu0 %v6511_v38  ;;  %7027 = vmatprep.mubr.bf16.mxu0 %v14768_v37  ;;  %v8712_v27 = vpop.f32.mrf.mxu1  ;;  %v6620_v5 = vadd.f32 %v8732_v15, %v8710_v32 }
 0x570   : > { %8936 = vmatprep.subr.bf16.mxu0 %v6518_v30  ;;  %v8734_v25 = vpop.f32.mrf.mxu0  ;;  %v8713_v56 = vadd.f32 %v8712_v27, %v8711_v58 }
 0x571   : > { %v8752_v9 = vpop.f32.mrf.mxu1  ;;  %v8735_v12 = vadd.f32 %v8734_v25, %v8733_v1 }
 0x573   : > { %8937 = vmatpush3.bf16.msra.mxu0 %v6510_v46  ;;  %v8753_v26 = vpop.f32.mrf.mxu1  ;;  %v6623_v43 = vadd.f32 %v8735_v12, %v8713_v56 }
 0x574   : > { %8938 = vmatprep.subr.bf16.mxu0 %v6517_v52  ;;  %v8754_v57 = vadd.f32 %v8753_v26, %v8752_v9 }
 0x575   : > { %v8755_v14 = vpop.f32.mrf.mxu1 }
 0x576   : > { %v8774_v36 = vpop.f32.mrf.mxu0  ;;  %v6661_v31 = vadd.f32 %v8754_v57, %v6620_v5 }
 0x577   : > { %8939 = vmatpush3.bf16.msra.mxu0 %v6509_v29  ;;  %v8756_v13 = vpop.f32.mrf.mxu1 }
 0x578   : > { %8940 = vmatprep.subr.bf16.mxu0 %v6516_v3  ;;  %v8775_v33 = vpop.f32.mrf.mxu0  ;;  %v8757_v37 = vadd.f32 %v8756_v13, %v8755_v14  ;;  %v14780_v13 = vld [vmem:[#allocation67_spill] sm:$0xff] }
 0x579   : > { %v8776_v30 = vadd.f32 %v8775_v33, %v8774_v36  ;;  %9633 = vrcp.f32 %v14780_v13 }
 0x57a   : > { %v8777_v61 = vpop.f32.mrf.mxu0  ;;  %v6664_v10 = vadd.f32 %v8757_v37, %v6623_v43  ;;  %v9630_v50 = vpop.eup %9629 }
 0x57b   : > { %8941 = vmatpush3.bf16.msra.mxu0 %v6508_v47  ;;  %v6702_v29 = vadd.f32 %v8776_v30, %v6661_v31 }
 0x57c   : > { %8942 = vmatprep.subr.bf16.mxu0 %v6515_v44  ;;  %v8778_v38 = vpop.f32.mrf.mxu0 }
 0x57d   : > { %v8779_v46 = vadd.f32 %v8778_v38, %v8777_v61 }
 0x57f   : > { %8943 = vmatpush3.bf16.msra.mxu0 %v6507_v49  ;;  %v6705_v44 = vadd.f32 %v8779_v46, %v6664_v10 }
 0x580   : > { %8944 = vmatprep.subr.bf16.mxu0 %v6514_v20 }
 0x583   : > { %8945 = vmatpush3.bf16.msra.mxu0 %v6506_v24 }
 0x584   : > { %8946 = vmatprep.subr.bf16.mxu0 %v6513_v17  ;;  %v9632_v17 = vpop.eup %9631 }
 0x587   : > { %8947 = vmatpush3.bf16.msra.mxu0 %v6505_v0 }
 0x588   : > { %8948 = vmatprep.subr.bf16.mxu0 %v6512_v48 }
 0x58b   : > { %8949 = vmatpush3.bf16.msra.mxu0 %v6504_v22 }
 0x58e   : > { %7028 = vmatmul.mubr.bf16.vlgmr.msra.gmra.mxu0 %v6542_v45 }
 0x5ad   : > { %v8796_v4 = vpop.f32.mrf.mxu1 }
 0x5af   : > { %v8797_v34 = vpop.f32.mrf.mxu1 }
 0x5b0   : > { %v8798_v52 = vadd.f32 %v8797_v34, %v8796_v4  ;;  %v14781_v4 = vld [vmem:[#allocation55_spill] sm:$0xff] }
 0x5b1   : > { %v8799_v6 = vpop.f32.mrf.mxu1  ;;  %9635 = vrcp.f32 %v14781_v4 }
 0x5b2   : > { %v6743_v8 = vadd.f32 %v8798_v52, %v6702_v29  ;;  %v9634_v29 = vpop.eup %9633 }
 0x5b3   : > { %v8800_v39 = vpop.f32.mrf.mxu1 }
 0x5b4   : > { %v8801_v18 = vadd.f32 %v8800_v39, %v8799_v6 }
 0x5b6   : > { %v6746_v49 = vadd.f32 %v8801_v18, %v6705_v44 }
 0x5be   : > { %v9636_v18 = vpop.eup %9635 }
 0x5cd   : > { %v8840_v48 = vpop.f32.mrf.mxu1 }
 0x5cf   : > { %v8841_v35 = vpop.f32.mrf.mxu1 }
 0x5d0   : > { %v8842_v1 = vadd.f32 %v8841_v35, %v8840_v48  ;;  %v7045_v48 = vld [vmem:[#allocation2 + $0x8] sm:$0xff] }
 0x5d1   : > { %v8843_v19 = vpop.f32.mrf.mxu1 }
 0x5d3   : > { %v8844_v63 = vpop.f32.mrf.mxu1 }
 0x5d4   : > { %v8845_v14 = vadd.f32 %v8844_v63, %v8843_v19 }
 0x5ed   : > { %v8818_v51 = vpop.f32.mrf.mxu0 }
 0x5ee   : > { %v8884_v60 = vpop.f32.mrf.mxu1 }
 0x5ef   : > { %v8819_v16 = vpop.f32.mrf.mxu0 }
 0x5f0   : > { %v8820_v3 = vadd.f32 %v8819_v16, %v8818_v51  ;;  %v8885_v45 = vpop.f32.mrf.mxu1 }
 0x5f1   : > { %v8821_v47 = vpop.f32.mrf.mxu0  ;;  %v8886_v33 = vadd.f32 %v8885_v45, %v8884_v60 }
 0x5f2   : > { %v6784_v40 = vadd.f32 %v8820_v3, %v6743_v8  ;;  %v8887_v53 = vpop.f32.mrf.mxu1  ;;  %v14782_v8 = vmov 0  }
 0x5f3   : > { %v8822_v42 = vpop.f32.mrf.mxu0 }
 0x5f4   : > { %v8823_v20 = vadd.f32 %v8822_v42, %v8821_v47  ;;  %v7037_v59 = vmul.f32 %v9630_v50, %v6784_v40  ;;  %v8888_v27 = vpop.f32.mrf.mxu1  ;;  %v7046_v42 = vld [vmem:[#allocation2 + $0x10] sm:$0xff]  ;;  %v8289_v40 = vld [vmem:[%s14783_s22] ss:$0 sm:$0xff] }
 0x5f5   : > { %v8889_v32 = vadd.f32 %v8888_v27, %v8887_v53 }
 0x5f6   : > { %v6787_v24 = vadd.f32 %v8823_v20, %v6746_v49  ;;  %v7044_v20 = vld [vmem:[#allocation2] sm:$0xff] }
 0x5f8   : > { %v7039_v54 = vmul.f32 %v9632_v17, %v6787_v24  ;;  %v7047_v17 = vld [vmem:[#allocation2 + $0x18] sm:$0xff] }
 0x5fa   : > { %v7048_v0 = vpack.c.bf16 %v7039_v54, %v7037_v59 }
 0x5fc   : > { %9377 = vmatprep.mubr.msk.bf16.mxu1 %vm1039_vm1, %v7048_v0 }
 0x60e   : > { %v8862_v41 = vpop.f32.mrf.mxu0 }
 0x60f   : > { %v8928_v9 = vpop.f32.mrf.mxu1 }
 0x610   : > { %v8863_v22 = vpop.f32.mrf.mxu0 }
 0x611   : > { %v8864_v55 = vadd.f32 %v8863_v22, %v8862_v41  ;;  %v8929_v62 = vpop.f32.mrf.mxu1 }
 0x612   : > { %v8865_v28 = vpop.f32.mrf.mxu0  ;;  %v8930_v57 = vadd.f32 %v8929_v62, %v8928_v9 }
 0x613   : > { %v6866_v25 = vadd.f32 %v8864_v55, %v8842_v1  ;;  %v8931_v61 = vpop.f32.mrf.mxu1 }
 0x614   : > { %v8866_v7 = vpop.f32.mrf.mxu0 }
 0x615   : > { %v8867_v21 = vadd.f32 %v8866_v7, %v8865_v28  ;;  %v6907_v12 = vadd.f32 %v8886_v33, %v6866_v25  ;;  %v8932_v5 = vpop.f32.mrf.mxu1 }
 0x616   : > { %v8933_v51 = vadd.f32 %v8932_v5, %v8931_v61 }
 0x617   : > { %v6869_v34 = vadd.f32 %v8867_v21, %v8845_v14 }
 0x619   : > { %v6910_v56 = vadd.f32 %v8889_v32, %v6869_v34 }
 0x62e   : > { %v8906_v58 = vpop.f32.mrf.mxu0 }
 0x630   : > { %v8907_v2 = vpop.f32.mrf.mxu0 }
 0x631   : > { %v8908_v15 = vadd.f32 %v8907_v2, %v8906_v58 }
 0x632   : > { %v8909_v26 = vpop.f32.mrf.mxu0 }
 0x633   : > { %v6948_v11 = vadd.f32 %v8908_v15, %v6907_v12 }
 0x634   : > { %v8910_v36 = vpop.f32.mrf.mxu0 }
 0x635   : > { %v8911_v23 = vadd.f32 %v8910_v36, %v8909_v26  ;;  %v6989_v37 = vadd.f32 %v8930_v57, %v6948_v11  ;;  %v9612_v11 = vld [vmem:[%s10005_s28 + $0x4] ss:$8 sps:$4 sm:$0xff]  }
 0x637   : > { %v6951_v43 = vadd.f32 %v8911_v23, %v6910_v56  ;;  %v9607_v23 = vld [vmem:[%s10005_s28 + $0x10] ss:$8 sps:$4 sm:$0xff]   ;;  %v9610_v56 = vld [vmem:[%s10005_s28] ss:$8 sps:$4 sm:$0xff]  }
 0x639   : > { %v6992_v52 = vadd.f32 %v8933_v51, %v6951_v43 }
 0x64e   : > { %v8950_v6 = vpop.f32.mrf.mxu0 }
 0x650   : > { %v8951_v38 = vpop.f32.mrf.mxu0 }
 0x651   : > { %v8952_v30 = vadd.f32 %v8951_v38, %v8950_v6  ;;  %v9609_v6 = vld [vmem:[%s10005_s28 + $0x14] ss:$8 sps:$4 sm:$0xff]  }
 0x652   : > { %v8953_v39 = vpop.f32.mrf.mxu0  ;;  %7266 = vmatprep.subr.bf16.mxu1 %v9609_v6 }
 0x653   : > { %v7030_v46 = vadd.f32 %v8952_v30, %v6989_v37 }
 0x654   : > { %v8954_v31 = vpop.f32.mrf.mxu0 }
 0x655   : > { %v8955_v16 = vadd.f32 %v8954_v31, %v8953_v39  ;;  %v7041_v3 = vmul.f32 %v9634_v29, %v7030_v46 }
 0x657   : > { %v7033_v10 = vadd.f32 %v8955_v16, %v6992_v52 }
 0x659   : > { %v7043_v47 = vmul.f32 %v9636_v18, %v7033_v10  ;;  %v8290_v18 = vld [vmem:[%s800_s2] ss:$0 sm:$0xff] }
 0x65b   : > { %v7049_v44 = vpack.c.bf16 %v7043_v47, %v7041_v3 }
 0x65d   : > { %9378 = vmatmul.mubr.msk.bf16.vlgmr.msra.gmra.mxu1 %vm1039_vm1, %v7049_v44 }
 0x65e   : > { %7286 = vmatprep.mubr.bf16.mxu1 %v14782_v8  ;;  %7267 = vmatpush1.bf16.msra.mxu1 %v9607_v23 }
 0x65f   : > { %7268 = vmatprep.subr.bf16.mxu1 %v9612_v11 }
 0x662   : > { %7269 = vmatpush1.bf16.msra.mxu1 %v9610_v56 }
 0x71d   : > { %v9379_v49 = vpop.f32.mrf.mxu1 }
 0x71e   : > { %v7123_v50 = vadd.f32 %v9379_v49, %v7046_v42  ;;  %v8291_v49 = vld [vmem:[%s803_s6] ss:$0 sm:$0xff]  ;;  %s14789_s6 = sld [smem:[#allocation217_spill]] (!%p8307_p5) }
 0x71f   : > { %v7106_v24 = vpop.f32.mrf.mxu1 }
 0x720   : > { %v13716_v59 = vadd.f32 %v8289_v40, %v7123_v50  ;;  %v7121_v54 = vadd.f32 %v7106_v24, %v7044_v20 }
 0x721   : > { %v9380_v0 = vpop.f32.mrf.mxu1 }
 0x722   : > { %7479 = vst.msk [vmem:[#allocation2 + $0x10] sm:$0xff] %vm1039_vm1, %v13716_v59  ;;  %v13720_v35 = vadd.f32 %v8289_v40, %v7121_v54  ;;  %v7124_v19 = vadd.f32 %v9380_v0, %v7047_v17  ;;  %v7142_v45 = vsel %vm1039_vm1, %v13716_v59, 0.0 }
 0x723   : > { %v7109_v41 = vpop.f32.mrf.mxu1 }
 0x724   : > { %7477 = vst.msk [vmem:[#allocation2] sm:$0xff] %vm1039_vm1, %v13720_v35  ;;  %v13724_v63 = vadd.f32 %v8289_v40, %v7124_v19  ;;  %v7122_v22 = vadd.f32 %v7109_v41, %v7045_v48  ;;  %v7136_v60 = vsel %vm1039_vm1, %v13720_v35, 0.0 }
 0x725   : > { %7137 = vadd.xlane.f32.xlu0 %v7136_v60 }
 0x726   : > { %7480 = vst.msk [vmem:[#allocation2 + $0x18] sm:$0xff] %vm1039_vm1, %v13724_v63  ;;  %v13730_v28 = vadd.f32 %v8289_v40, %v7122_v22  ;;  %v7145_v53 = vsel %vm1039_vm1, %v13724_v63, 0.0 }
 0x728   : > { %7478 = vst.msk [vmem:[#allocation2 + $0x8] sm:$0xff] %vm1039_vm1, %v13730_v28  ;;  %v7139_v7 = vsel %vm1039_vm1, %v13730_v28, 0.0 }
 0x729   : > { %7143 = vadd.xlane.f32.xlu0 %v7142_v45  ;;  %7140 = vadd.xlane.f32.xlu1 %v7139_v7  ;;  %v9613_v45 = vld [vmem:[%s10017_s18 + $0x38] sm:$0xff]   ;;  %v9614_v7 = vld [vmem:[%s10017_s18 + $0x30] sm:$0xff]  }
 0x72a   : > { %9381 = vmatprep.subr.bf16.mxu0 %v9613_v45 }
 0x72b   : > { %9382 = vmatpush3.bf16.msra.mxu0 %v9613_v45 }
 0x72c   : > { %9383 = vmatprep.subr.bf16.mxu0 %v9614_v7 }
 0x72d   : > { %7146 = vadd.xlane.f32.xlu1 %v7145_v53  ;;  %v9615_v53 = vld [vmem:[%s10017_s18 + $0x28] sm:$0xff]  }
 0x72f   : > { %9384 = vmatpush3.bf16.msra.mxu0 %v9614_v7 }
 0x730   : > { %9385 = vmatprep.subr.bf16.mxu0 %v9615_v53 }
 0x733   : > { %9386 = vmatpush3.bf16.msra.mxu0 %v9615_v53 }
 0x7ae   : > { %v7138_v58 = vpop.xlane.xlu0 %7137 }
 0x7af   : > { %v7148_v27 = vmul.f32 0.03125, %v7138_v58  ;;  %v9616_v58 = vld [vmem:[%s10017_s18 + $0x20] sm:$0xff]  }
 0x7b0   : > { %9387 = vmatprep.subr.bf16.mxu0 %v9616_v58 }
 0x7b1   : > { %v7152_v2 = vsub.f32 %v13720_v35, %v7148_v27  ;;  %9388 = vmatpush3.bf16.msra.mxu0 %v9616_v58  ;;  %v9618_v27 = vld [vmem:[%s10017_s18 + $0x10] sm:$0xff]  }
 0x7b2   : > { %v7144_v9 = vpop.xlane.xlu0 %7143  ;;  %v7141_v55 = vpop.xlane.xlu1 %7140 }
 0x7b3   : > { %v7150_v26 = vmul.f32 0.03125, %v7144_v9  ;;  %v7149_v1 = vmul.f32 0.03125, %v7141_v55  ;;  %v7156_v21 = vmul.f32 %v7152_v2, %v7152_v2  ;;  %v9620_v9 = vld [vmem:[%s10017_s18] sm:$0xff]  }
 0x7b4   : > { %v7216_v55 = vld [vmem:[%s10011_s24] sm:$0x3] }
 0x7b5   : > { %v7154_v62 = vsub.f32 %v13716_v59, %v7150_v26  ;;  %v7153_v14 = vsub.f32 %v13730_v28, %v7149_v1  ;;  %v7160_v25 = vsel %vm1039_vm1, %v7156_v21, 0.0  ;;  %v14784_v26 = vld [vmem:[#allocation9_spill] sm:$0xff] }
 0x7b6   : > { %7161 = vadd.xlane.f32.xlu0 %v7160_v25  ;;  %v7147_v13 = vpop.xlane.xlu1 %7146  ;;  %v7221_v1 = vrot.slane %v7216_v55, %v14784_v26 }
 0x7b7   : > { %v7151_v36 = vmul.f32 0.03125, %v7147_v13  ;;  %v7158_v4 = vmul.f32 %v7154_v62, %v7154_v62  ;;  %v7157_v33 = vmul.f32 %v7153_v14, %v7153_v14 }
 0x7b9   : > { %v7155_v34 = vsub.f32 %v13724_v63, %v7151_v36  ;;  %v7166_v15 = vsel %vm1039_vm1, %v7158_v4, 0.0  ;;  %v7163_v61 = vsel %vm1039_vm1, %v7157_v33, 0.0 }
 0x7ba   : > { %7167 = vadd.xlane.f32.xlu0 %v7166_v15  ;;  %7164 = vadd.xlane.f32.xlu1 %v7163_v61 }
 0x7bb   : > { %v7159_v32 = vmul.f32 %v7155_v34, %v7155_v34 }
 0x7bd   : > { %v7169_v12 = vsel %vm1039_vm1, %v7159_v32, 0.0 }
 0x7be   : > { %7170 = vadd.xlane.f32.xlu1 %v7169_v12 }
 0x83f   : > { %v7162_v5 = vpop.xlane.xlu0 %7161 }
 0x840   : > { %v7172_v38 = vmul.f32 0.03125, %v7162_v5 }
 0x842   : > { %v7176_v57 = vadd.f32 1e-05, %v7172_v38 }
 0x843   : > { %v7168_v43 = vpop.xlane.xlu0 %7167  ;;  %v7165_v30 = vpop.xlane.xlu1 %7164 }
 0x844   : > { %9637 = vrsqrt.f32 %v7176_v57  ;;  %v7174_v39 = vmul.f32 0.03125, %v7168_v43  ;;  %v7173_v51 = vmul.f32 0.03125, %v7165_v30 }
 0x846   : > { %v7177_v37 = vadd.f32 1e-05, %v7173_v51  ;;  %v7178_v31 = vadd.f32 1e-05, %v7174_v39 }
 0x847   : > { %v7171_v46 = vpop.xlane.xlu1 %7170 }
 0x848   : > { %v7175_v52 = vmul.f32 0.03125, %v7171_v46  ;;  %9639 = vrsqrt.f32 %v7177_v37 }
 0x849   : > { %9641 = vrsqrt.f32 %v7178_v31 }
 0x84a   : > { %v7179_v16 = vadd.f32 1e-05, %v7175_v52 }
 0x84c   : > { %9643 = vrsqrt.f32 %v7179_v16 }
 0x851   : > { %v9638_v29 = vpop.eup %9637 }
 0x852   : > { %v7184_v10 = vmul.f32 %v9638_v29, %v7152_v2  ;;  %v9619_v2 = vld [vmem:[%s10017_s18 + $0x8] sm:$0xff]  }
 0x854   : > { %v7195_v47 = vmul.f32 %v8290_v18, %v7184_v10 }
 0x855   : > { %v9640_v3 = vpop.eup %9639 }
 0x856   : > { %v7185_v44 = vmul.f32 %v9640_v3, %v7153_v14  ;;  %v9642_v42 = vpop.eup %9641  ;;  %v7206_v17 = vadd.f32 %v8291_v49, %v7195_v47 }
 0x857   : > { %v7186_v24 = vmul.f32 %v9642_v42, %v7154_v62  ;;  %v14785_v42 = vld [vmem:[#allocation10_spill] sm:$0xff] }
 0x858   : > { %v7196_v20 = vmul.f32 %v8290_v18, %v7185_v44 }
 0x859   : > { %v9644_v40 = vpop.eup %9643  ;;  %v7197_v19 = vmul.f32 %v8290_v18, %v7186_v24 }
 0x85a   : > { %v7187_v50 = vmul.f32 %v9644_v40, %v7155_v34  ;;  %v7207_v54 = vadd.f32 %v8291_v49, %v7196_v20 }
 0x85b   : > { %v7208_v22 = vadd.f32 %v8291_v49, %v7197_v19 }
 0x85c   : > { %v7210_v0 = vpack.c.bf16 %v7207_v54, %v7206_v17  ;;  %v7198_v48 = vmul.f32 %v8290_v18, %v7187_v50 }
 0x85e   : > { %8296 = vmatmul.mubr.msk.bf16.vlgmr.msra.gmra.mxu1 %vm1039_vm1, %v7210_v0  ;;  %v7209_v41 = vadd.f32 %v8291_v49, %v7198_v48  ;;  %v7225_v49 = vrot.slane %v7216_v55, %v14785_v42 }
 0x85f   : > { %7296 = vmatprep.mubr.bf16.mxu1 %v14782_v8  ;;  %v9617_v8 = vld [vmem:[%s10017_s18 + $0x18] sm:$0xff]  }
 0x860   : > { %v7211_v60 = vpack.c.bf16 %v7209_v41, %v7208_v22  ;;  %9389 = vmatprep.subr.bf16.mxu0 %v9617_v8 }
 0x861   : > { %9390 = vmatpush3.bf16.msra.mxu0 %v9617_v8 }
 0x862   : > { %9391 = vmatprep.subr.bf16.mxu0 %v9618_v27 }
 0x865   : > { %9392 = vmatpush3.bf16.msra.mxu0 %v9618_v27 }
 0x866   : > { %8297 = vmatmul.mubr.msk.bf16.gmra.mxu1 %vm1039_vm1, %v7211_v60  ;;  %9393 = vmatprep.subr.bf16.mxu0 %v9619_v2 }
 0x869   : > { %9394 = vmatpush3.bf16.msra.mxu0 %v9619_v2 }
 0x86a   : > { %9395 = vmatprep.subr.bf16.mxu0 %v9620_v9 }
 0x86d   : > { %9396 = vmatpush3.bf16.msra.mxu0 %v9620_v9 }
 0x91e   : > { %v7288_v21 = vpop.f32.mrf.mxu1 }
 0x91f   : > { %v7289_v62 = vadd.f32 %v7288_v21, %v7221_v1 }
 0x920   : > { %v7290_v14 = vpop.f32.mrf.mxu1 }
 0x921   : > { %v7307_v25 = vmul.f32 %v7289_v62, %v7289_v62  ;;  %v7291_v17 = vadd.f32 %v7290_v14, %v7225_v49  ;;  %v9781_v14 = vld [vmem:[#allocation3 + $0x10] sm:$0xff] }
 0x922   : > { %v7292_v13 = vpop.f32.mrf.mxu1 }
 0x923   : > { %v7311_v36 = vmul.f32 %v7307_v25, %v7289_v62  ;;  %v7293_v4 = vadd.f32 %v7292_v13, %v7221_v1 }
 0x924   : > { %v7294_v33 = vpop.f32.mrf.mxu1 }
 0x925   : > { %v7315_v34 = vmul.f32 0.044715, %v7311_v36  ;;  %v7308_v15 = vmul.f32 %v7293_v4, %v7293_v4  ;;  %v7295_v54 = vadd.f32 %v7294_v33, %v7225_v49 }
 0x926   : > { %v7298_v61 = vpop.f32.mrf.mxu1 }
 0x927   : > { %v7319_v32 = vadd.f32 %v7315_v34, %v7289_v62  ;;  %v7312_v12 = vmul.f32 %v7308_v15, %v7293_v4  ;;  %v7299_v23 = vadd.f32 %v7298_v61, %v7221_v1  ;;  %v9783_v61 = vld [vmem:[#allocation3 + $0x18] sm:$0xff] }
 0x928   : > { %v7300_v6 = vpop.f32.mrf.mxu1 }
 0x929   : > { %v7323_v11 = vmul.f32 0.7978846, %v7319_v32  ;;  %v7316_v56 = vmul.f32 0.044715, %v7312_v12  ;;  %v7309_v5 = vmul.f32 %v7299_v23, %v7299_v23  ;;  %v7301_v27 = vadd.f32 %v7300_v6, %v7225_v49  ;;  %v9784_v6 = vld [vmem:[#allocation3 + $0x8] sm:$0xff] }
 0x92a   : > { %v7302_v38 = vpop.f32.mrf.mxu1 }
 0x92b   : > { %9645 = vtanh.f32 %v7323_v11  ;;  %v7320_v57 = vadd.f32 %v7316_v56, %v7293_v4  ;;  %v7313_v43 = vmul.f32 %v7309_v5, %v7299_v23  ;;  %v7303_v30 = vadd.f32 %v7302_v38, %v7221_v1 }
 0x92c   : > { %v7304_v53 = vpop.f32.mrf.mxu1 }
 0x92d   : > { %v7324_v39 = vmul.f32 0.7978846, %v7320_v57  ;;  %v7317_v51 = vmul.f32 0.044715, %v7313_v43  ;;  %v7310_v37 = vmul.f32 %v7303_v30, %v7303_v30  ;;  %v7305_v2 = vadd.f32 %v7304_v53, %v7225_v49 }
 0x92f   : > { %9647 = vtanh.f32 %v7324_v39  ;;  %v7321_v31 = vadd.f32 %v7317_v51, %v7299_v23  ;;  %v7314_v46 = vmul.f32 %v7310_v37, %v7303_v30 }
 0x931   : > { %v7325_v52 = vmul.f32 0.7978846, %v7321_v31  ;;  %v7318_v16 = vmul.f32 0.044715, %v7314_v46 }
 0x933   : > { %9649 = vtanh.f32 %v7325_v52  ;;  %v7322_v29 = vadd.f32 %v7318_v16, %v7303_v30 }
 0x935   : > { %v7326_v10 = vmul.f32 0.7978846, %v7322_v29 }
 0x937   : > { %9651 = vtanh.f32 %v7326_v10 }
 0x938   : > { %v9646_v18 = vpop.eup %9645 }
 0x939   : > { %v7331_v3 = vadd.f32 1.0, %v9646_v18 }
 0x93b   : > { %v7335_v47 = vmul.f32 0.5, %v7331_v3 }
 0x93c   : > { %v9648_v44 = vpop.eup %9647 }
 0x93d   : > { %v7332_v40 = vadd.f32 1.0, %v9648_v44  ;;  %v7339_v20 = vmul.f32 %v7335_v47, %v7289_v62  ;;  %v8306_v62 = vld [vmem:[%s820_s25] ss:$0 sm:$0xff] }
 0x93f   : > { %v7336_v50 = vmul.f32 0.5, %v7332_v40  ;;  %v7343_v19 = vmul.f32 %v7339_v20, %v7291_v17 }
 0x940   : > { %v9650_v24 = vpop.eup %9649 }
 0x941   : > { %v7340_v0 = vmul.f32 %v7336_v50, %v7293_v4  ;;  %v7333_v48 = vadd.f32 1.0, %v9650_v24  ;;  %v9782_v4 = vld [vmem:[#allocation3] sm:$0xff] }
 0x943   : > { %v7344_v41 = vmul.f32 %v7340_v0, %v7295_v54  ;;  %v7337_v22 = vmul.f32 0.5, %v7333_v48 }
 0x944   : > { %v9652_v60 = vpop.eup %9651 }
 0x945   : > { %v7334_v45 = vadd.f32 1.0, %v9652_v60  ;;  %v7347_v7 = vpack.c.bf16 %v7344_v41, %v7343_v19  ;;  %v7341_v58 = vmul.f32 %v7337_v22, %v7299_v23 }
 0x947   : > { %v7338_v8 = vmul.f32 0.5, %v7334_v45  ;;  %9397 = vmatprep.mubr.bf16.mxu0 %v7347_v7  ;;  %v7345_v55 = vmul.f32 %v7341_v58, %v7301_v27 }
 0x949   : > { %v7342_v9 = vmul.f32 %v7338_v8, %v7303_v30 }
 0x94b   : > { %v7346_v26 = vmul.f32 %v7342_v9, %v7305_v2 }
 0x94d   : > { %v7348_v1 = vpack.c.bf16 %v7346_v26, %v7345_v55 }
 0x94f   : > { %9398 = vmatmul.mubr.bf16.vlgmr.msra.gmra.mxu0 %v7348_v1 }
 0xa0f   : > { %v9399_v21 = vpop.f32.mrf.mxu0 }
 0xa10   : > { %v7464_v25 = vadd.f32 %v9781_v14, %v9399_v21 }
 0xa11   : > { %v7447_v13 = vpop.f32.mrf.mxu0 }
 0xa12   : > { %v7475_v36 = vadd.f32 %v8306_v62, %v7464_v25  ;;  %v7462_v33 = vadd.f32 %v9782_v4, %v7447_v13 }
 0xa13   : > { %v9400_v34 = vpop.f32.mrf.mxu0 }
 0xa14   : > { %7483 = vst.msk [vmem:[#allocation3 + $0x10] sm:$0xff] %vm1039_vm1, %v7475_v36  ;;  %v7473_v15 = vadd.f32 %v8306_v62, %v7462_v33  ;;  %v7465_v32 = vadd.f32 %v9783_v61, %v9400_v34 }
 0xa15   : > { %v7450_v12 = vpop.f32.mrf.mxu0 }
 0xa16   : > { %7481 = vst.msk [vmem:[#allocation3] sm:$0xff] %vm1039_vm1, %v7473_v15  ;;  %v7476_v23 = vadd.f32 %v8306_v62, %v7465_v32  ;;  %v7463_v11 = vadd.f32 %v9784_v6, %v7450_v12  ;;  %7488 = sbr.rel (%p8307_p5) target bundleno = 3315 (0xcf3), region = 108 }
 0xa18   : > { %7484 = vst.msk [vmem:[#allocation3 + $0x18] sm:$0xff] %vm1039_vm1, %v7476_v23  ;;  %v7474_v56 = vadd.f32 %v8306_v62, %v7463_v11 }
 0xa1a   : > { %7482 = vst.msk [vmem:[#allocation3 + $0x8] sm:$0xff] %vm1039_vm1, %v7474_v56 }
 0xa1b   : > { %v9785_v5 = vld [vmem:[%s13865_s14 + $0x8] sm:$0xff]   ;;  %v7489_v38 = vadd.f32 %v7473_v15, %v13720_v35  ;;  %v7490_v57 = vadd.f32 %v7474_v56, %v13730_v28  ;;  %v7491_v43 = vadd.f32 %v7475_v36, %v13716_v59  ;;  %v7492_v30 = vadd.f32 %v7476_v23, %v13724_v63  ;;  %v9786_v39 = vld [vmem:[%s13865_s14] sm:$0xff]  }
 0xa1c   : > { %9401 = vmatprep.subr.bf16.mxu0 %v9785_v5  ;;  %v8308_v63 = vld [vmem:[%s13866_s15] ss:$0 sm:$0xff]  ;;  %vm7732_vm3 = vcmask 7168  }
 0xa1d   : > { %v7493_v51 = vmul.f32 0.5, %v7489_v38  ;;  %v7494_v37 = vmul.f32 0.5, %v7490_v57  ;;  %v7495_v31 = vmul.f32 0.5, %v7491_v43  ;;  %v7496_v46 = vmul.f32 0.5, %v7492_v30  ;;  %9402 = vmatpush3.bf16.msra.mxu0 %v9785_v5  ;;  %v9787_v26 = vld [vmem:[%s14786_s30] sm:$0xff]  }
 0xa1e   : > { %9403 = vmatprep.subr.bf16.mxu0 %v9786_v39  ;;  %9409 = vmatprep.subr.bf16.mxu1 %v9787_v26  ;;  %v8313_v12 = vld [vmem:[%s14787_s16] ss:$0 sm:$0xff] }
 0xa1f   : > { %7497 = vst.msk [vmem:[#allocation5] sm:$0xff] %vm1039_vm1, %v7493_v51  ;;  %7498 = vst.msk [vmem:[#allocation5 + $0x8] sm:$0xff] %vm1039_vm1, %v7494_v37  ;;  %v7501_v35 = vpack.c.bf16 %v7494_v37, %v7493_v51  ;;  %v7502_v59 = vpack.c.bf16 %v7496_v46, %v7495_v31  ;;  %9410 = vmatpush3.bf16.msra.mxu1 %v9787_v26  ;;  %v8314_v56 = vld [vmem:[%s14788_s1] ss:$0 sm:$0xff] }
 0xa20   : > { %7499 = vst.msk [vmem:[#allocation5 + $0x10] sm:$0xff] %vm1039_vm1, %v7495_v31  ;;  %7500 = vst.msk [vmem:[#allocation5 + $0x18] sm:$0xff] %vm1039_vm1, %v7496_v46 }
 0xa21   : > { %9405 = vmatprep.mubr.msk.bf16.mxu0 %vm1039_vm1, %v7501_v35  ;;  %9404 = vmatpush3.bf16.msra.mxu0 %v9786_v39 }
 0xa24   : > { %9406 = vmatmul.mubr.msk.bf16.vlgmr.msra.gmra.mxu0 %vm1039_vm1, %v7502_v59 }
 0xae4   : > { %v9407_v28 = vpop.f32.mrf.mxu0 }
 0xae5   : > { %v7575_v52 = vadd.f32 %v9407_v28, %v8308_v63 }
 0xae6   : > { %v7566_v16 = vpop.f32.mrf.mxu0 }
 0xae7   : > { %v7567_v29 = vadd.f32 %v8308_v63, %v7566_v16  ;;  %v7587_v10 = vsel %vm3765_vm2, %v7575_v52, 0.0 }
 0xae8   : > { %7588 = vadd.xlane.f32.xlu1 %v7587_v10  ;;  %v9408_v18 = vpop.f32.mrf.mxu0 }
 0xae9   : > { %v7578_v3 = vadd.f32 %v9408_v18, %v8308_v63  ;;  %v7581_v47 = vsel %vm3765_vm2, %v7567_v29, 0.0  ;;  %v8315_v18 = vld [vmem:[#allocation4] ss:$0 sm:$0xff] }
 0xaea   : > { %v7569_v44 = vpop.f32.mrf.mxu0  ;;  %7582 = vadd.xlane.f32.xlu0 %v7581_v47 }
 0xaeb   : > { %v7570_v42 = vadd.f32 %v8308_v63, %v7569_v44  ;;  %v7590_v49 = vsel %vm3765_vm2, %v7578_v3, 0.0 }
 0xaec   : > { %7591 = vadd.xlane.f32.xlu1 %v7590_v49 }
 0xaed   : > { %v7584_v40 = vsel %vm3765_vm2, %v7570_v42, 0.0 }
 0xaee   : > { %7585 = vadd.xlane.f32.xlu0 %v7584_v40 }
 0xb71   : > { %v7589_v20 = vpop.xlane.xlu1 %7588 }
 0xb72   : > { %v7596_v50 = vmul.f32 0.0625, %v7589_v20 }
 0xb73   : > { %v7583_v24 = vpop.xlane.xlu0 %7582 }
 0xb74   : > { %v7594_v17 = vmul.f32 0.0625, %v7583_v24  ;;  %v7600_v0 = vsub.f32 %v7575_v52, %v7596_v50 }
 0xb75   : > { %v7592_v54 = vpop.xlane.xlu1 %7591 }
 0xb76   : > { %v7598_v48 = vsub.f32 %v7567_v29, %v7594_v17  ;;  %v7597_v19 = vmul.f32 0.0625, %v7592_v54  ;;  %v7604_v58 = vmul.f32 %v7600_v0, %v7600_v0 }
 0xb77   : > { %v7586_v41 = vpop.xlane.xlu0 %7585 }
 0xb78   : > { %v7595_v22 = vmul.f32 0.0625, %v7586_v41  ;;  %v7602_v60 = vmul.f32 %v7598_v48, %v7598_v48  ;;  %v7601_v45 = vsub.f32 %v7578_v3, %v7597_v19  ;;  %v7612_v27 = vsel %vm3765_vm2, %v7604_v58, 0.0 }
 0xb7a   : > { %v7599_v7 = vsub.f32 %v7570_v42, %v7595_v22  ;;  %v7606_v53 = vsel %vm3765_vm2, %v7602_v60, 0.0  ;;  %v7605_v9 = vmul.f32 %v7601_v45, %v7601_v45 }
 0xb7b   : > { %7607 = vadd.xlane.f32.xlu0 %v7606_v53 }
 0xb7c   : > { %v7603_v8 = vmul.f32 %v7599_v7, %v7599_v7  ;;  %v7615_v55 = vsel %vm3765_vm2, %v7605_v9, 0.0 }
 0xb7e   : > { %v7609_v2 = vsel %vm3765_vm2, %v7603_v8, 0.0 }
 0xb7f   : > { %7613 = vadd.xlane.f32.xlu0 %v7612_v27  ;;  %7610 = vadd.xlane.f32.xlu1 %v7609_v2 }
 0xb83   : > { %7616 = vadd.xlane.f32.xlu1 %v7615_v55 }
 0xc04   : > { %v7608_v1 = vpop.xlane.xlu0 %7607 }
 0xc05   : > { %v7618_v21 = vmul.f32 0.0625, %v7608_v1 }
 0xc07   : > { %v7622_v62 = vadd.f32 1e-05, %v7618_v21 }
 0xc08   : > { %v7611_v14 = vpop.xlane.xlu1 %7610  ;;  %v7614_v25 = vpop.xlane.xlu0 %7613 }
 0xc09   : > { %9788 = vrsqrt.f32 %v7622_v62  ;;  %v7619_v13 = vmul.f32 0.0625, %v7611_v14  ;;  %v7620_v36 = vmul.f32 0.0625, %v7614_v25 }
 0xc0b   : > { %v7623_v4 = vadd.f32 1e-05, %v7619_v13  ;;  %v7624_v33 = vadd.f32 1e-05, %v7620_v36 }
 0xc0c   : > { %v7617_v34 = vpop.xlane.xlu1 %7616 }
 0xc0d   : > { %9790 = vrsqrt.f32 %v7623_v4  ;;  %v7621_v15 = vmul.f32 0.0625, %v7617_v34 }
 0xc0e   : > { %9792 = vrsqrt.f32 %v7624_v33 }
 0xc0f   : > { %v7625_v61 = vadd.f32 1e-05, %v7621_v15 }
 0xc11   : > { %9794 = vrsqrt.f32 %v7625_v61 }
 0xc16   : > { %v9789_v32 = vpop.eup %9788 }
 0xc17   : > { %v7630_v23 = vmul.f32 %v9789_v32, %v7598_v48 }
 0xc19   : > { %v7641_v6 = vmul.f32 %v8313_v12, %v7630_v23 }
 0xc1a   : > { %v9791_v11 = vpop.eup %9790 }
 0xc1b   : > { %v9793_v5 = vpop.eup %9792  ;;  %v7631_v38 = vmul.f32 %v9791_v11, %v7599_v7  ;;  %v7652_v30 = vadd.f32 %v8314_v56, %v7641_v6 }
 0xc1c   : > { %v7632_v57 = vmul.f32 %v9793_v5, %v7600_v0 }
 0xc1d   : > { %v7642_v43 = vmul.f32 %v8313_v12, %v7631_v38  ;;  %v7656_v46 = vmax.f32 %v7652_v30, 0.0 }
 0xc1e   : > { %v9795_v39 = vpop.eup %9794  ;;  %v7643_v51 = vmul.f32 %v8313_v12, %v7632_v57 }
 0xc1f   : > { %v7653_v37 = vadd.f32 %v8314_v56, %v7642_v43  ;;  %v7633_v31 = vmul.f32 %v9795_v39, %v7601_v45 }
 0xc20   : > { %v7654_v63 = vadd.f32 %v8314_v56, %v7643_v51 }
 0xc21   : > { %v7657_v35 = vmax.f32 %v7653_v37, 0.0  ;;  %v7644_v59 = vmul.f32 %v8313_v12, %v7633_v31 }
 0xc22   : > { %v7658_v16 = vmax.f32 %v7654_v63, 0.0 }
 0xc23   : > { %v7660_v28 = vpack.c.bf16 %v7657_v35, %v7656_v46  ;;  %v7655_v52 = vadd.f32 %v8314_v56, %v7644_v59 }
 0xc25   : > { %9411 = vmatprep.mubr.msk.bf16.mxu1 %vm3765_vm2, %v7660_v28  ;;  %v7659_v29 = vmax.f32 %v7655_v52, 0.0 }
 0xc27   : > { %v7661_v10 = vpack.c.bf16 %v7659_v29, %v7658_v16 }
 0xc29   : > { %9412 = vmatmul.mubr.msk.bf16.vlgmr.msra.gmra.mxu1 %vm3765_vm2, %v7661_v10 }
 0xce9   : > { %v9413_v3 = vpop.f32.mrf.mxu1 }
 0xcea   : > { %v7726_v47 = vadd.f32 %v9413_v3, %v8315_v18 }
 0xceb   : > { %v7717_v44 = vpop.f32.mrf.mxu1 }
 0xcec   : > { %7735 = vst.msk [vmem:[%s14789_s6 + $0x10] sm:$0xff] %vm7732_vm3, %v7726_v47  ;;  %v7718_v42 = vadd.f32 %v8315_v18, %v7717_v44 }
 0xced   : > { %v9414_v49 = vpop.f32.mrf.mxu1 }
 0xcee   : > { %7733 = vst.msk [vmem:[%s14789_s6] sm:$0xff] %vm7732_vm3, %v7718_v42  ;;  %v7729_v40 = vadd.f32 %v9414_v49, %v8315_v18 }
 0xcef   : > { %v7720_v20 = vpop.f32.mrf.mxu1 }
 0xcf0   : > { %7736 = vst.msk [vmem:[%s14789_s6 + $0x18] sm:$0xff] %vm7732_vm3, %v7729_v40  ;;  %v7721_v50 = vadd.f32 %v8315_v18, %v7720_v20 }
 0xcf2   : > { %7734 = vst.msk [vmem:[%s14789_s6 + $0x8] sm:$0xff] %vm7732_vm3, %v7721_v50 }
 0xcf3 PF: > { %p9421_p6 = scmp.eq.s32.totalorder %s9955_s27, 1  ;;  %s9833_s0 = smov [#allocation5]  }
 0xcf4   : > { %s7743_s17 = sshll.u32 %s9833_s0, 4  ;;  %s7744_s17 = int_to_ptr.vmem [resolvable:$true] %s7743_s17 }
 0xcf5   : > { %s9796_s29 = scalar_lea.vmem %s7744_s17, 512  ;;  %p9803_p10 = scmp.lt.s32.totalorder %s7744_s17, %s7744_s17 }
 0xcf6   : > { %p9797_p7 = scmp.ne.s32.totalorder %s7744_s17, %s9796_s29  ;;  %p9804_p11 = scmp.lt.s32.totalorder %s9796_s29, %s9796_s29 }
 0xcf8   : > { %p9798_p8 = pnand %p9797_p7, %p9421_p6  ;;  %p9805_p12 = por %p9804_p11, %p9803_p10 }
 0xcfa   : > { %p9799_p9 = pneg %p9798_p8 }
 0xcfc   : > { %p9806_p13 = pnand %p9805_p12, %p9799_p9 }
 0xcfe   : > { %9809 = shalt.err (!%p9806_p13)
}
 0xcff   : > { %s9834_s30 = smov 128   ;;  %s9835_s4 = smov 8  }
 0xd00   : > { %s14790_s22 = sld [smem:[#allocation216_spill]] }
 0xd06   : > { %9418 = dma.vmem_to_hbm [thread:$0]  (%p9421_p6), %s7744_s17, 512, %s14790_s22, [#allocation6], %s9834_s30, %s9834_s30, %s9835_s4  }
 0xd07   : > { %9825 = dma.done.wait (%p9421_p6), [#allocation6], 512  }
 0xd08   : > { %9827 = vsyncadd (%p9421_p6), [#allocation6], 4294966784 }
 0xd09 PF: > { %s14791_s28 = sld [smem:[#allocation8_spill]] }
 0xd0f   : > { %s35_s26 = sadd.s32 1, %s14791_s28  }
 0xd10   : > { %p32_p0 = scmp.ge.s32.totalorder %s35_s26, 4  }
 0xd12   :  { %34 = sbr.rel (!%p32_p0) target bundleno = 14 (0xe), region = 176 }
 0xd17   :  { %7765 = vsyncpa [#allocation6], 1 }
 0xd18   :  { %7767 = vsyncpa [#allocation6 + $0x1], 1 }

</bundles_post_ra>
